<compile_context>
chip_gen: v7x
topology: tpu7x:2x2x1
jax: 0.10.0
libtpu: 0.0.40
codegen_flags: <defaults>
</compile_context>

<pallas_src>
import functools
import math

import jax
import jax.numpy as jnp
import numpy as np
from jax.experimental import pallas as pl
from jax.experimental.pallas import tpu as pltpu


def _fused_conv_stack_kernel(
        x_ref, w0_ref, b0_ref, w1_ref, b1_ref, w2_ref, b2_ref, w3_ref, b3_ref,
        o_ref, pad0_ref, pad1_ref,
        *, B, H, W, C0, Ch, C3, pad_dtype):
    """B batch images: four fused 3x3 convs (stride 1, pad 1), ReLU between."""
    M = B * H * W

    def zero_halo(pad_ref, c):
        # Only the 1-pixel border is zeroed; every layer fully overwrites the
        # interior.  Re-done every grid step so "parallel" megacore sharding
        # (per-core scratch) stays correct.
        zrow = jnp.zeros((B, 1, W + 2, c), pad_dtype)
        zcol = jnp.zeros((B, H, 1, c), pad_dtype)
        pad_ref[:, pl.ds(0, 1), :, :] = zrow
        pad_ref[:, pl.ds(H + 1, 1), :, :] = zrow
        pad_ref[:, pl.ds(1, H), pl.ds(0, 1), :] = zcol
        pad_ref[:, pl.ds(1, H), pl.ds(W + 1, 1), :] = zcol

    zero_halo(pad0_ref, C0)
    zero_halo(pad1_ref, Ch)

    # In-kernel padding: interior <- input plane (already in the dot dtype).
    pad0_ref[:, pl.ds(1, H), pl.ds(1, W), :] = x_ref[...]

    def conv(pad_ref, w_ref, b_ref, cin, cout, relu):
        # Nine per-tap MXU matmuls accumulated in f32 -- no im2col patch
        # matrix is ever materialized.  Taps come straight off the ref.
        acc = jnp.broadcast_to(b_ref[...], (M, cout)).astype(jnp.float32)
        for kh in range(3):
            for kw in range(3):
                t = kh * 3 + kw
                tap = pad_ref[:, pl.ds(kh, H), pl.ds(kw, W), :]   # (B,H,W,cin)
                tap = tap.reshape(M, cin)                         # minor dim kept
                acc = acc + jnp.dot(tap, w_ref[t],
                                    preferred_element_type=jnp.float32)
        if relu:
            acc = jnp.maximum(acc, 0.0)
        return acc                                                # (M, cout) f32

    y = conv(pad0_ref, w0_ref, b0_ref, C0, Ch, relu=True)
    pad1_ref[:, pl.ds(1, H), pl.ds(1, W), :] = (
        y.reshape(B, H, W, Ch).astype(pad_dtype))
    y = conv(pad1_ref, w1_ref, b1_ref, Ch, Ch, relu=True)
    pad1_ref[:, pl.ds(1, H), pl.ds(1, W), :] = (
        y.reshape(B, H, W, Ch).astype(pad_dtype))
    y = conv(pad1_ref, w2_ref, b2_ref, Ch, Ch, relu=True)
    pad1_ref[:, pl.ds(1, H), pl.ds(1, W), :] = (
        y.reshape(B, H, W, Ch).astype(pad_dtype))
    y = conv(pad1_ref, w3_ref, b3_ref, Ch, C3, relu=False)        # no final ReLU
    o_ref[...] = y.reshape(B, H, W, C3).astype(o_ref.dtype)


def temporal_entropy_model(x_nchw, params, dot_dtype=jnp.bfloat16,
                           batch_block=None):
    """Forward pass matching TemporalEntropyModel.forward (NCHW in, NCHW out).

    params: four (w, b) pairs with w of shape (3, 3, Cin, Cout).
    dot_dtype: MXU operand / intermediate-activation dtype (default bf16 for
               ~2x MXU throughput and half the VMEM store traffic; f32
               accumulation is always kept).  Pass None for the exact-f32 path.
    batch_block: images per grid step; default keeps the grid length >= 2.
    """
    N, C0, H, W = x_nchw.shape
    Ch = params[0][0].shape[3]                 # hidden width (64)
    C3 = params[3][0].shape[3]                 # 2 * channel
    assert params[0][0].shape[2] == C0
    assert params[1][0].shape[2:] == (Ch, Ch)
    assert params[2][0].shape[2:] == (Ch, Ch)
    assert params[3][0].shape[2] == Ch

    pad_dtype = jnp.float32 if dot_dtype is None else dot_dtype

    # B images per grid step; keep the grid length >= 2 when possible so both
    # v7x TensorCores get work; larger B amortizes per-step pipeline overhead.
    if batch_block is None:
        batch_block = next((b for b in (4, 2, 1) if N % b == 0 and N // b >= 2), 1)
    B = batch_block
    if N % B != 0:
        raise ValueError(f"batch_block={B} must divide N={N}")

    x = jnp.transpose(x_nchw, (0, 2, 3, 1)).astype(pad_dtype)     # NCHW -> NHWC

    # (3,3,Cin,Cout) -> (9,Cin,Cout), pre-cast to the MXU operand dtype; row
    # t = kh*3+kw matches the in-kernel tap order.  Biases stay f32.
    ws = [w.reshape(9, w.shape[2], w.shape[3]).astype(pad_dtype)
          for (w, _) in params]
    bs = [b.reshape(1, b.shape[0]).astype(jnp.float32) for (_, b) in params]

    kernel = functools.partial(_fused_conv_stack_kernel,
                               B=B, H=H, W=W, C0=C0, Ch=Ch, C3=C3,
                               pad_dtype=pad_dtype)

    def full_spec(arr):
        return pl.BlockSpec(arr.shape, lambda n, _nd=arr.ndim: (0,) * _nd)

    out = pl.pallas_call(
        kernel,
        out_shape=jax.ShapeDtypeStruct((N, H, W, C3), x_nchw.dtype),
        grid=(N // B,),
        in_specs=[pl.BlockSpec((B, H, W, C0), lambda n: (n, 0, 0, 0)),
                  full_spec(ws[0]), full_spec(bs[0]),
                  full_spec(ws[1]), full_spec(bs[1]),
                  full_spec(ws[2]), full_spec(bs[2]),
                  full_spec(ws[3]), full_spec(bs[3])],
        out_specs=pl.BlockSpec((B, H, W, C3), lambda n: (n, 0, 0, 0)),
        scratch_shapes=[
            pltpu.VMEM((B, H + 2, W + 2, C0), pad_dtype),   # padded layer-0 in
            pltpu.VMEM((B, H + 2, W + 2, Ch), pad_dtype),   # padded hidden act
        ],
        compiler_params=pltpu.CompilerParams(
            dimension_semantics=("parallel",),
            vmem_limit_bytes=32 * 1024 * 1024),
    )(x, ws[0], bs[0], ws[1], bs[1], ws[2], bs[2], ws[3], bs[3])
    # TODO(synk): for production-sized H,W add an H-tile grid axis with a
    # 2-row fused halo so the padded scratches also fit v7x's 64 MiB VMEM
    # (and v5e's smaller scoped default).

    return jnp.transpose(out, (0, 3, 1, 2))    # NHWC -> NCHW


def init_params(key, tau_2, channel):
    """Deterministic parameter init (Kaiming-uniform-like, same shapes as the
    PyTorch module). Weights stored as (3, 3, Cin, Cout)."""
    dims = [(tau_2 * channel, 64), (64, 64), (64, 64), (64, 2 * channel)]
    params = []
    for i, (cin, cout) in enumerate(dims):
        kw_, kb_ = jax.random.split(jax.random.fold_in(key, i))
        bound = 1.0 / math.sqrt(cin * 9)
        w = jax.random.uniform(kw_, (3, 3, cin, cout), jnp.float32, -bound, bound)
        b = jax.random.uniform(kb_, (cout,), jnp.float32, -bound, bound)
        params.append((w, b))
    return params


def reference(x_nchw, params):
    """Plain-JAX reference (lax conv) for validation."""
    x = x_nchw
    for i, (w, b) in enumerate(params):
        w_oihw = jnp.transpose(w, (3, 2, 0, 1))       # (Cout, Cin, 3, 3)
        x = jax.lax.conv_general_dilated(
            x, w_oihw, window_strides=(1, 1), padding=((1, 1), (1, 1)),
            dimension_numbers=('NCHW', 'OIHW', 'NCHW'))
        x = x + b[None, :, None, None]
        if i < len(params) - 1:
            x = jnp.maximum(x, 0.0)
    return x


if __name__ == "__main__":
    tau_2 = 2
    channel = 4
    N, H, W = 2, 16, 16

    key = jax.random.PRNGKey(0)
    kx, kp = jax.random.split(key)
    x = jax.random.normal(kx, (N, tau_2 * channel, H, W), jnp.float32)
    params = init_params(kp, tau_2, channel)

    expected_shape = (N, 2 * channel, H, W)
    ref = jax.block_until_ready(reference(x, params))

    # Exact-f32 MXU-operand path: strict check against the lax reference.
    fwd_f32 = jax.jit(lambda xx: temporal_entropy_model(xx, params, dot_dtype=None))
    out_f32 = jax.block_until_ready(fwd_f32(x))
    assert out_f32.shape == expected_shape, (out_f32.shape, expected_shape)
    if not np.allclose(np.asarray(out_f32), np.asarray(ref), atol=1e-4, rtol=1e-4):
        raise AssertionError("f32 fused Pallas conv stack does not match reference")

    # Default bf16-operand path (f32 accumulation): loose-tolerance check.
    fwd_bf16 = jax.jit(lambda xx: temporal_entropy_model(xx, params))
    out_bf16 = jax.block_until_ready(fwd_bf16(x))
    assert out_bf16.shape == expected_shape, (out_bf16.shape, expected_shape)
    if not np.allclose(np.asarray(out_bf16), np.asarray(ref), atol=1e-1, rtol=1e-1):
        raise AssertionError("bf16 fused Pallas conv stack drifted too far from reference")

    print("KERNEL_OK")
</pallas_src>

<mosaic_0001>
module attributes {stable_mosaic.version = 11 : i64} {
  func.func @_fused_conv_stack_kernel(%arg0: i32, %arg1: memref<1x16x16x8xf32, #tpu.memory_space<vmem>>, %arg2: memref<9x8x64xf32, #tpu.memory_space<vmem>>, %arg3: memref<1x64xf32, #tpu.memory_space<vmem>>, %arg4: memref<9x64x64xf32, #tpu.memory_space<vmem>>, %arg5: memref<1x64xf32, #tpu.memory_space<vmem>>, %arg6: memref<9x64x64xf32, #tpu.memory_space<vmem>>, %arg7: memref<1x64xf32, #tpu.memory_space<vmem>>, %arg8: memref<9x64x8xf32, #tpu.memory_space<vmem>>, %arg9: memref<1x8xf32, #tpu.memory_space<vmem>>, %arg10: memref<1x16x16x8xf32, #tpu.memory_space<vmem>>, %arg11: memref<1x18x18x8xf32, #tpu.memory_space<vmem>>, %arg12: memref<1x18x18x64xf32, #tpu.memory_space<vmem>>) attributes {dimension_semantics = [#tpu.dimension_semantics<parallel>], iteration_bounds = array<i64: 2>, scalar_prefetch = 0 : i64, scratch_operands = 2 : i64, tpu.core_type = #tpu.core_type<tc>, window_params = [{transform_indices = @transform_0, window_bounds = array<i64: 1, 16, 16, 8>}, {pipeline_mode = #tpu.pipeline_mode<synchronous>, transform_indices = @transform_1, window_bounds = array<i64: 9, 8, 64>}, {pipeline_mode = #tpu.pipeline_mode<synchronous>, transform_indices = @transform_2, window_bounds = array<i64: 1, 64>}, {pipeline_mode = #tpu.pipeline_mode<synchronous>, transform_indices = @transform_3, window_bounds = array<i64: 9, 64, 64>}, {pipeline_mode = #tpu.pipeline_mode<synchronous>, transform_indices = @transform_4, window_bounds = array<i64: 1, 64>}, {pipeline_mode = #tpu.pipeline_mode<synchronous>, transform_indices = @transform_5, window_bounds = array<i64: 9, 64, 64>}, {pipeline_mode = #tpu.pipeline_mode<synchronous>, transform_indices = @transform_6, window_bounds = array<i64: 1, 64>}, {pipeline_mode = #tpu.pipeline_mode<synchronous>, transform_indices = @transform_7, window_bounds = array<i64: 9, 64, 8>}, {pipeline_mode = #tpu.pipeline_mode<synchronous>, transform_indices = @transform_8, window_bounds = array<i64: 1, 8>}, {transform_indices = @transform_9, window_bounds = array<i64: 1, 16, 16, 8>}]} {
    %cst = arith.constant 0.000000e+00 : f32
    %0 = vector.broadcast %cst : f32 to vector<1x1x18x8xf32>
    %cst_0 = arith.constant 0.000000e+00 : f32
    %1 = vector.broadcast %cst_0 : f32 to vector<1x16x1x8xf32>
    %c0 = arith.constant 0 : index
    %c0_1 = arith.constant 0 : index
    %c0_2 = arith.constant 0 : index
    %c0_3 = arith.constant 0 : index
    %2 = vector.load %arg11[%c0, %c0_1, %c0_2, %c0_3] : memref<1x18x18x8xf32, #tpu.memory_space<vmem>>, vector<1x1x18x8xf32>
    tpu.vector_store %arg11[%c0, %c0_1, %c0_2, %c0_3], %0 {strides = array<i32>} : memref<1x18x18x8xf32, #tpu.memory_space<vmem>>, vector<1x1x18x8xf32>,
    %c0_4 = arith.constant 0 : index
    %c17 = arith.constant 17 : index
    %c0_5 = arith.constant 0 : index
    %c0_6 = arith.constant 0 : index
    %3 = vector.load %arg11[%c0_4, %c17, %c0_5, %c0_6] : memref<1x18x18x8xf32, #tpu.memory_space<vmem>>, vector<1x1x18x8xf32>
    tpu.vector_store %arg11[%c0_4, %c17, %c0_5, %c0_6], %0 {strides = array<i32>} : memref<1x18x18x8xf32, #tpu.memory_space<vmem>>, vector<1x1x18x8xf32>,
    %c0_7 = arith.constant 0 : index
    %c1 = arith.constant 1 : index
    %c0_8 = arith.constant 0 : index
    %c0_9 = arith.constant 0 : index
    %4 = vector.load %arg11[%c0_7, %c1, %c0_8, %c0_9] : memref<1x18x18x8xf32, #tpu.memory_space<vmem>>, vector<1x16x1x8xf32>
    tpu.vector_store %arg11[%c0_7, %c1, %c0_8, %c0_9], %1 {strides = array<i32>} : memref<1x18x18x8xf32, #tpu.memory_space<vmem>>, vector<1x16x1x8xf32>,
    %c0_10 = arith.constant 0 : index
    %c1_11 = arith.constant 1 : index
    %c17_12 = arith.constant 17 : index
    %c0_13 = arith.constant 0 : index
    %5 = vector.load %arg11[%c0_10, %c1_11, %c17_12, %c0_13] : memref<1x18x18x8xf32, #tpu.memory_space<vmem>>, vector<1x16x1x8xf32>
    tpu.vector_store %arg11[%c0_10, %c1_11, %c17_12, %c0_13], %1 {strides = array<i32>} : memref<1x18x18x8xf32, #tpu.memory_space<vmem>>, vector<1x16x1x8xf32>,
    %cst_14 = arith.constant 0.000000e+00 : f32
    %6 = vector.broadcast %cst_14 : f32 to vector<1x1x18x64xf32>
    %cst_15 = arith.constant 0.000000e+00 : f32
    %7 = vector.broadcast %cst_15 : f32 to vector<1x16x1x64xf32>
    %c0_16 = arith.constant 0 : index
    %c0_17 = arith.constant 0 : index
    %c0_18 = arith.constant 0 : index
    %c0_19 = arith.constant 0 : index
    %8 = vector.load %arg12[%c0_16, %c0_17, %c0_18, %c0_19] : memref<1x18x18x64xf32, #tpu.memory_space<vmem>>, vector<1x1x18x64xf32>
    tpu.vector_store %arg12[%c0_16, %c0_17, %c0_18, %c0_19], %6 {strides = array<i32>} : memref<1x18x18x64xf32, #tpu.memory_space<vmem>>, vector<1x1x18x64xf32>,
    %c0_20 = arith.constant 0 : index
    %c17_21 = arith.constant 17 : index
    %c0_22 = arith.constant 0 : index
    %c0_23 = arith.constant 0 : index
    %9 = vector.load %arg12[%c0_20, %c17_21, %c0_22, %c0_23] : memref<1x18x18x64xf32, #tpu.memory_space<vmem>>, vector<1x1x18x64xf32>
    tpu.vector_store %arg12[%c0_20, %c17_21, %c0_22, %c0_23], %6 {strides = array<i32>} : memref<1x18x18x64xf32, #tpu.memory_space<vmem>>, vector<1x1x18x64xf32>,
    %c0_24 = arith.constant 0 : index
    %c1_25 = arith.constant 1 : index
    %c0_26 = arith.constant 0 : index
    %c0_27 = arith.constant 0 : index
    %10 = vector.load %arg12[%c0_24, %c1_25, %c0_26, %c0_27] : memref<1x18x18x64xf32, #tpu.memory_space<vmem>>, vector<1x16x1x64xf32>
    tpu.vector_store %arg12[%c0_24, %c1_25, %c0_26, %c0_27], %7 {strides = array<i32>} : memref<1x18x18x64xf32, #tpu.memory_space<vmem>>, vector<1x16x1x64xf32>,
    %c0_28 = arith.constant 0 : index
    %c1_29 = arith.constant 1 : index
    %c17_30 = arith.constant 17 : index
    %c0_31 = arith.constant 0 : index
    %11 = vector.load %arg12[%c0_28, %c1_29, %c17_30, %c0_31] : memref<1x18x18x64xf32, #tpu.memory_space<vmem>>, vector<1x16x1x64xf32>
    tpu.vector_store %arg12[%c0_28, %c1_29, %c17_30, %c0_31], %7 {strides = array<i32>} : memref<1x18x18x64xf32, #tpu.memory_space<vmem>>, vector<1x16x1x64xf32>,
    %c0_32 = arith.constant 0 : index
    %c0_33 = arith.constant 0 : index
    %c0_34 = arith.constant 0 : index
    %c0_35 = arith.constant 0 : index
    %12 = vector.load %arg1[%c0_32, %c0_33, %c0_34, %c0_35] : memref<1x16x16x8xf32, #tpu.memory_space<vmem>>, vector<1x16x16x8xf32>
    %c0_36 = arith.constant 0 : index
    %c1_37 = arith.constant 1 : index
    %c1_38 = arith.constant 1 : index
    %c0_39 = arith.constant 0 : index
    %13 = vector.load %arg11[%c0_36, %c1_37, %c1_38, %c0_39] : memref<1x18x18x8xf32, #tpu.memory_space<vmem>>, vector<1x16x16x8xf32>
    tpu.vector_store %arg11[%c0_36, %c1_37, %c1_38, %c0_39], %12 {strides = array<i32>} : memref<1x18x18x8xf32, #tpu.memory_space<vmem>>, vector<1x16x16x8xf32>,
    %c0_40 = arith.constant 0 : index
    %c0_41 = arith.constant 0 : index
    %14 = vector.load %arg3[%c0_40, %c0_41] : memref<1x64xf32, #tpu.memory_space<vmem>>, vector<1x64xf32>
    %15 = vector.shape_cast %14 : vector<1x64xf32> to vector<1x64xf32>
    %16 = vector.broadcast %15 : vector<1x64xf32> to vector<256x64xf32>
    %c0_42 = arith.constant 0 : index
    %c0_43 = arith.constant 0 : index
    %c0_44 = arith.constant 0 : index
    %c0_45 = arith.constant 0 : index
    %17 = vector.load %arg11[%c0_42, %c0_43, %c0_44, %c0_45] : memref<1x18x18x8xf32, #tpu.memory_space<vmem>>, vector<1x16x16x8xf32>
    %18 = vector.shape_cast %17 : vector<1x16x16x8xf32> to vector<256x8xf32>
    %c0_46 = arith.constant 0 : index
    %c0_47 = arith.constant 0 : index
    %c0_48 = arith.constant 0 : index
    %19 = vector.load %arg2[%c0_46, %c0_47, %c0_48] : memref<9x8x64xf32, #tpu.memory_space<vmem>>, vector<1x8x64xf32>
    %20 = vector.shape_cast %19 : vector<1x8x64xf32> to vector<8x64xf32>
    %cst_49 = arith.constant dense<0.000000e+00> : vector<256x64xf32>
    %21 = tpu.matmul %18, %20, %cst_49 {dimension_numbers = #tpu.dot_dimension_numbers<[1], [0], [0], [1], [0, 0, 1, 1], [], []>} : vector<256x8xf32>, vector<8x64xf32>, vector<256x64xf32> -> vector<256x64xf32>
    %22 = arith.addf %16, %21 : vector<256x64xf32>
    %c0_50 = arith.constant 0 : index
    %c0_51 = arith.constant 0 : index
    %c1_52 = arith.constant 1 : index
    %c0_53 = arith.constant 0 : index
    %23 = vector.load %arg11[%c0_50, %c0_51, %c1_52, %c0_53] : memref<1x18x18x8xf32, #tpu.memory_space<vmem>>, vector<1x16x16x8xf32>
    %24 = vector.shape_cast %23 : vector<1x16x16x8xf32> to vector<256x8xf32>
    %c1_54 = arith.constant 1 : index
    %c0_55 = arith.constant 0 : index
    %c0_56 = arith.constant 0 : index
    %25 = vector.load %arg2[%c1_54, %c0_55, %c0_56] : memref<9x8x64xf32, #tpu.memory_space<vmem>>, vector<1x8x64xf32>
    %26 = vector.shape_cast %25 : vector<1x8x64xf32> to vector<8x64xf32>
    %cst_57 = arith.constant dense<0.000000e+00> : vector<256x64xf32>
    %27 = tpu.matmul %24, %26, %cst_57 {dimension_numbers = #tpu.dot_dimension_numbers<[1], [0], [0], [1], [0, 0, 1, 1], [], []>} : vector<256x8xf32>, vector<8x64xf32>, vector<256x64xf32> -> vector<256x64xf32>
    %28 = arith.addf %22, %27 : vector<256x64xf32>
    %c0_58 = arith.constant 0 : index
    %c0_59 = arith.constant 0 : index
    %c2 = arith.constant 2 : index
    %c0_60 = arith.constant 0 : index
    %29 = vector.load %arg11[%c0_58, %c0_59, %c2, %c0_60] : memref<1x18x18x8xf32, #tpu.memory_space<vmem>>, vector<1x16x16x8xf32>
    %30 = vector.shape_cast %29 : vector<1x16x16x8xf32> to vector<256x8xf32>
    %c2_61 = arith.constant 2 : index
    %c0_62 = arith.constant 0 : index
    %c0_63 = arith.constant 0 : index
    %31 = vector.load %arg2[%c2_61, %c0_62, %c0_63] : memref<9x8x64xf32, #tpu.memory_space<vmem>>, vector<1x8x64xf32>
    %32 = vector.shape_cast %31 : vector<1x8x64xf32> to vector<8x64xf32>
    %cst_64 = arith.constant dense<0.000000e+00> : vector<256x64xf32>
    %33 = tpu.matmul %30, %32, %cst_64 {dimension_numbers = #tpu.dot_dimension_numbers<[1], [0], [0], [1], [0, 0, 1, 1], [], []>} : vector<256x8xf32>, vector<8x64xf32>, vector<256x64xf32> -> vector<256x64xf32>
    %34 = arith.addf %28, %33 : vector<256x64xf32>
    %c0_65 = arith.constant 0 : index
    %c1_66 = arith.constant 1 : index
    %c0_67 = arith.constant 0 : index
    %c0_68 = arith.constant 0 : index
    %35 = vector.load %arg11[%c0_65, %c1_66, %c0_67, %c0_68] : memref<1x18x18x8xf32, #tpu.memory_space<vmem>>, vector<1x16x16x8xf32>
    %36 = vector.shape_cast %35 : vector<1x16x16x8xf32> to vector<256x8xf32>
    %c3 = arith.constant 3 : index
    %c0_69 = arith.constant 0 : index
    %c0_70 = arith.constant 0 : index
    %37 = vector.load %arg2[%c3, %c0_69, %c0_70] : memref<9x8x64xf32, #tpu.memory_space<vmem>>, vector<1x8x64xf32>
    %38 = vector.shape_cast %37 : vector<1x8x64xf32> to vector<8x64xf32>
    %cst_71 = arith.constant dense<0.000000e+00> : vector<256x64xf32>
    %39 = tpu.matmul %36, %38, %cst_71 {dimension_numbers = #tpu.dot_dimension_numbers<[1], [0], [0], [1], [0, 0, 1, 1], [], []>} : vector<256x8xf32>, vector<8x64xf32>, vector<256x64xf32> -> vector<256x64xf32>
    %40 = arith.addf %34, %39 : vector<256x64xf32>
    %c0_72 = arith.constant 0 : index
    %c1_73 = arith.constant 1 : index
    %c1_74 = arith.constant 1 : index
    %c0_75 = arith.constant 0 : index
    %41 = vector.load %arg11[%c0_72, %c1_73, %c1_74, %c0_75] : memref<1x18x18x8xf32, #tpu.memory_space<vmem>>, vector<1x16x16x8xf32>
    %42 = vector.shape_cast %41 : vector<1x16x16x8xf32> to vector<256x8xf32>
    %c4 = arith.constant 4 : index
    %c0_76 = arith.constant 0 : index
    %c0_77 = arith.constant 0 : index
    %43 = vector.load %arg2[%c4, %c0_76, %c0_77] : memref<9x8x64xf32, #tpu.memory_space<vmem>>, vector<1x8x64xf32>
    %44 = vector.shape_cast %43 : vector<1x8x64xf32> to vector<8x64xf32>
    %cst_78 = arith.constant dense<0.000000e+00> : vector<256x64xf32>
    %45 = tpu.matmul %42, %44, %cst_78 {dimension_numbers = #tpu.dot_dimension_numbers<[1], [0], [0], [1], [0, 0, 1, 1], [], []>} : vector<256x8xf32>, vector<8x64xf32>, vector<256x64xf32> -> vector<256x64xf32>
    %46 = arith.addf %40, %45 : vector<256x64xf32>
    %c0_79 = arith.constant 0 : index
    %c1_80 = arith.constant 1 : index
    %c2_81 = arith.constant 2 : index
    %c0_82 = arith.constant 0 : index
    %47 = vector.load %arg11[%c0_79, %c1_80, %c2_81, %c0_82] : memref<1x18x18x8xf32, #tpu.memory_space<vmem>>, vector<1x16x16x8xf32>
    %48 = vector.shape_cast %47 : vector<1x16x16x8xf32> to vector<256x8xf32>
    %c5 = arith.constant 5 : index
    %c0_83 = arith.constant 0 : index
    %c0_84 = arith.constant 0 : index
    %49 = vector.load %arg2[%c5, %c0_83, %c0_84] : memref<9x8x64xf32, #tpu.memory_space<vmem>>, vector<1x8x64xf32>
    %50 = vector.shape_cast %49 : vector<1x8x64xf32> to vector<8x64xf32>
    %cst_85 = arith.constant dense<0.000000e+00> : vector<256x64xf32>
    %51 = tpu.matmul %48, %50, %cst_85 {dimension_numbers = #tpu.dot_dimension_numbers<[1], [0], [0], [1], [0, 0, 1, 1], [], []>} : vector<256x8xf32>, vector<8x64xf32>, vector<256x64xf32> -> vector<256x64xf32>
    %52 = arith.addf %46, %51 : vector<256x64xf32>
    %c0_86 = arith.constant 0 : index
    %c2_87 = arith.constant 2 : index
    %c0_88 = arith.constant 0 : index
    %c0_89 = arith.constant 0 : index
    %53 = vector.load %arg11[%c0_86, %c2_87, %c0_88, %c0_89] : memref<1x18x18x8xf32, #tpu.memory_space<vmem>>, vector<1x16x16x8xf32>
    %54 = vector.shape_cast %53 : vector<1x16x16x8xf32> to vector<256x8xf32>
    %c6 = arith.constant 6 : index
    %c0_90 = arith.constant 0 : index
    %c0_91 = arith.constant 0 : index
    %55 = vector.load %arg2[%c6, %c0_90, %c0_91] : memref<9x8x64xf32, #tpu.memory_space<vmem>>, vector<1x8x64xf32>
    %56 = vector.shape_cast %55 : vector<1x8x64xf32> to vector<8x64xf32>
    %cst_92 = arith.constant dense<0.000000e+00> : vector<256x64xf32>
    %57 = tpu.matmul %54, %56, %cst_92 {dimension_numbers = #tpu.dot_dimension_numbers<[1], [0], [0], [1], [0, 0, 1, 1], [], []>} : vector<256x8xf32>, vector<8x64xf32>, vector<256x64xf32> -> vector<256x64xf32>
    %58 = arith.addf %52, %57 : vector<256x64xf32>
    %c0_93 = arith.constant 0 : index
    %c2_94 = arith.constant 2 : index
    %c1_95 = arith.constant 1 : index
    %c0_96 = arith.constant 0 : index
    %59 = vector.load %arg11[%c0_93, %c2_94, %c1_95, %c0_96] : memref<1x18x18x8xf32, #tpu.memory_space<vmem>>, vector<1x16x16x8xf32>
    %60 = vector.shape_cast %59 : vector<1x16x16x8xf32> to vector<256x8xf32>
    %c7 = arith.constant 7 : index
    %c0_97 = arith.constant 0 : index
    %c0_98 = arith.constant 0 : index
    %61 = vector.load %arg2[%c7, %c0_97, %c0_98] : memref<9x8x64xf32, #tpu.memory_space<vmem>>, vector<1x8x64xf32>
    %62 = vector.shape_cast %61 : vector<1x8x64xf32> to vector<8x64xf32>
    %cst_99 = arith.constant dense<0.000000e+00> : vector<256x64xf32>
    %63 = tpu.matmul %60, %62, %cst_99 {dimension_numbers = #tpu.dot_dimension_numbers<[1], [0], [0], [1], [0, 0, 1, 1], [], []>} : vector<256x8xf32>, vector<8x64xf32>, vector<256x64xf32> -> vector<256x64xf32>
    %64 = arith.addf %58, %63 : vector<256x64xf32>
    %c0_100 = arith.constant 0 : index
    %c2_101 = arith.constant 2 : index
    %c2_102 = arith.constant 2 : index
    %c0_103 = arith.constant 0 : index
    %65 = vector.load %arg11[%c0_100, %c2_101, %c2_102, %c0_103] : memref<1x18x18x8xf32, #tpu.memory_space<vmem>>, vector<1x16x16x8xf32>
    %66 = vector.shape_cast %65 : vector<1x16x16x8xf32> to vector<256x8xf32>
    %c8 = arith.constant 8 : index
    %c0_104 = arith.constant 0 : index
    %c0_105 = arith.constant 0 : index
    %67 = vector.load %arg2[%c8, %c0_104, %c0_105] : memref<9x8x64xf32, #tpu.memory_space<vmem>>, vector<1x8x64xf32>
    %68 = vector.shape_cast %67 : vector<1x8x64xf32> to vector<8x64xf32>
    %cst_106 = arith.constant dense<0.000000e+00> : vector<256x64xf32>
    %69 = tpu.matmul %66, %68, %cst_106 {dimension_numbers = #tpu.dot_dimension_numbers<[1], [0], [0], [1], [0, 0, 1, 1], [], []>} : vector<256x8xf32>, vector<8x64xf32>, vector<256x64xf32> -> vector<256x64xf32>
    %70 = arith.addf %64, %69 : vector<256x64xf32>
    %cst_107 = arith.constant 0.000000e+00 : f32
    %71 = vector.broadcast %cst_107 : f32 to vector<256x64xf32>
    %72 = arith.maximumf %70, %71 : vector<256x64xf32>
    %73 = vector.shape_cast %72 : vector<256x64xf32> to vector<1x16x16x64xf32>
    %c0_108 = arith.constant 0 : index
    %c1_109 = arith.constant 1 : index
    %c1_110 = arith.constant 1 : index
    %c0_111 = arith.constant 0 : index
    %74 = vector.load %arg12[%c0_108, %c1_109, %c1_110, %c0_111] : memref<1x18x18x64xf32, #tpu.memory_space<vmem>>, vector<1x16x16x64xf32>
    tpu.vector_store %arg12[%c0_108, %c1_109, %c1_110, %c0_111], %73 {strides = array<i32>} : memref<1x18x18x64xf32, #tpu.memory_space<vmem>>, vector<1x16x16x64xf32>,
    %c0_112 = arith.constant 0 : index
    %c0_113 = arith.constant 0 : index
    %75 = vector.load %arg5[%c0_112, %c0_113] : memref<1x64xf32, #tpu.memory_space<vmem>>, vector<1x64xf32>
    %76 = vector.shape_cast %75 : vector<1x64xf32> to vector<1x64xf32>
    %77 = vector.broadcast %76 : vector<1x64xf32> to vector<256x64xf32>
    %c0_114 = arith.constant 0 : index
    %c0_115 = arith.constant 0 : index
    %c0_116 = arith.constant 0 : index
    %c0_117 = arith.constant 0 : index
    %78 = vector.load %arg12[%c0_114, %c0_115, %c0_116, %c0_117] : memref<1x18x18x64xf32, #tpu.memory_space<vmem>>, vector<1x16x16x64xf32>
    %79 = vector.shape_cast %78 : vector<1x16x16x64xf32> to vector<256x64xf32>
    %c0_118 = arith.constant 0 : index
    %c0_119 = arith.constant 0 : index
    %c0_120 = arith.constant 0 : index
    %80 = vector.load %arg4[%c0_118, %c0_119, %c0_120] : memref<9x64x64xf32, #tpu.memory_space<vmem>>, vector<1x64x64xf32>
    %81 = vector.shape_cast %80 : vector<1x64x64xf32> to vector<64x64xf32>
    %cst_121 = arith.constant dense<0.000000e+00> : vector<256x64xf32>
    %82 = tpu.matmul %79, %81, %cst_121 {dimension_numbers = #tpu.dot_dimension_numbers<[1], [0], [0], [1], [0, 0, 1, 1], [], []>} : vector<256x64xf32>, vector<64x64xf32>, vector<256x64xf32> -> vector<256x64xf32>
    %83 = arith.addf %77, %82 : vector<256x64xf32>
    %c0_122 = arith.constant 0 : index
    %c0_123 = arith.constant 0 : index
    %c1_124 = arith.constant 1 : index
    %c0_125 = arith.constant 0 : index
    %84 = vector.load %arg12[%c0_122, %c0_123, %c1_124, %c0_125] : memref<1x18x18x64xf32, #tpu.memory_space<vmem>>, vector<1x16x16x64xf32>
    %85 = vector.shape_cast %84 : vector<1x16x16x64xf32> to vector<256x64xf32>
    %c1_126 = arith.constant 1 : index
    %c0_127 = arith.constant 0 : index
    %c0_128 = arith.constant 0 : index
    %86 = vector.load %arg4[%c1_126, %c0_127, %c0_128] : memref<9x64x64xf32, #tpu.memory_space<vmem>>, vector<1x64x64xf32>
    %87 = vector.shape_cast %86 : vector<1x64x64xf32> to vector<64x64xf32>
    %cst_129 = arith.constant dense<0.000000e+00> : vector<256x64xf32>
    %88 = tpu.matmul %85, %87, %cst_129 {dimension_numbers = #tpu.dot_dimension_numbers<[1], [0], [0], [1], [0, 0, 1, 1], [], []>} : vector<256x64xf32>, vector<64x64xf32>, vector<256x64xf32> -> vector<256x64xf32>
    %89 = arith.addf %83, %88 : vector<256x64xf32>
    %c0_130 = arith.constant 0 : index
    %c0_131 = arith.constant 0 : index
    %c2_132 = arith.constant 2 : index
    %c0_133 = arith.constant 0 : index
    %90 = vector.load %arg12[%c0_130, %c0_131, %c2_132, %c0_133] : memref<1x18x18x64xf32, #tpu.memory_space<vmem>>, vector<1x16x16x64xf32>
    %91 = vector.shape_cast %90 : vector<1x16x16x64xf32> to vector<256x64xf32>
    %c2_134 = arith.constant 2 : index
    %c0_135 = arith.constant 0 : index
    %c0_136 = arith.constant 0 : index
    %92 = vector.load %arg4[%c2_134, %c0_135, %c0_136] : memref<9x64x64xf32, #tpu.memory_space<vmem>>, vector<1x64x64xf32>
    %93 = vector.shape_cast %92 : vector<1x64x64xf32> to vector<64x64xf32>
    %cst_137 = arith.constant dense<0.000000e+00> : vector<256x64xf32>
    %94 = tpu.matmul %91, %93, %cst_137 {dimension_numbers = #tpu.dot_dimension_numbers<[1], [0], [0], [1], [0, 0, 1, 1], [], []>} : vector<256x64xf32>, vector<64x64xf32>, vector<256x64xf32> -> vector<256x64xf32>
    %95 = arith.addf %89, %94 : vector<256x64xf32>
    %c0_138 = arith.constant 0 : index
    %c1_139 = arith.constant 1 : index
    %c0_140 = arith.constant 0 : index
    %c0_141 = arith.constant 0 : index
    %96 = vector.load %arg12[%c0_138, %c1_139, %c0_140, %c0_141] : memref<1x18x18x64xf32, #tpu.memory_space<vmem>>, vector<1x16x16x64xf32>
    %97 = vector.shape_cast %96 : vector<1x16x16x64xf32> to vector<256x64xf32>
    %c3_142 = arith.constant 3 : index
    %c0_143 = arith.constant 0 : index
    %c0_144 = arith.constant 0 : index
    %98 = vector.load %arg4[%c3_142, %c0_143, %c0_144] : memref<9x64x64xf32, #tpu.memory_space<vmem>>, vector<1x64x64xf32>
    %99 = vector.shape_cast %98 : vector<1x64x64xf32> to vector<64x64xf32>
    %cst_145 = arith.constant dense<0.000000e+00> : vector<256x64xf32>
    %100 = tpu.matmul %97, %99, %cst_145 {dimension_numbers = #tpu.dot_dimension_numbers<[1], [0], [0], [1], [0, 0, 1, 1], [], []>} : vector<256x64xf32>, vector<64x64xf32>, vector<256x64xf32> -> vector<256x64xf32>
    %101 = arith.addf %95, %100 : vector<256x64xf32>
    %c0_146 = arith.constant 0 : index
    %c1_147 = arith.constant 1 : index
    %c1_148 = arith.constant 1 : index
    %c0_149 = arith.constant 0 : index
    %102 = vector.load %arg12[%c0_146, %c1_147, %c1_148, %c0_149] : memref<1x18x18x64xf32, #tpu.memory_space<vmem>>, vector<1x16x16x64xf32>
    %103 = vector.shape_cast %102 : vector<1x16x16x64xf32> to vector<256x64xf32>
    %c4_150 = arith.constant 4 : index
    %c0_151 = arith.constant 0 : index
    %c0_152 = arith.constant 0 : index
    %104 = vector.load %arg4[%c4_150, %c0_151, %c0_152] : memref<9x64x64xf32, #tpu.memory_space<vmem>>, vector<1x64x64xf32>
    %105 = vector.shape_cast %104 : vector<1x64x64xf32> to vector<64x64xf32>
    %cst_153 = arith.constant dense<0.000000e+00> : vector<256x64xf32>
    %106 = tpu.matmul %103, %105, %cst_153 {dimension_numbers = #tpu.dot_dimension_numbers<[1], [0], [0], [1], [0, 0, 1, 1], [], []>} : vector<256x64xf32>, vector<64x64xf32>, vector<256x64xf32> -> vector<256x64xf32>
    %107 = arith.addf %101, %106 : vector<256x64xf32>
    %c0_154 = arith.constant 0 : index
    %c1_155 = arith.constant 1 : index
    %c2_156 = arith.constant 2 : index
    %c0_157 = arith.constant 0 : index
    %108 = vector.load %arg12[%c0_154, %c1_155, %c2_156, %c0_157] : memref<1x18x18x64xf32, #tpu.memory_space<vmem>>, vector<1x16x16x64xf32>
    %109 = vector.shape_cast %108 : vector<1x16x16x64xf32> to vector<256x64xf32>
    %c5_158 = arith.constant 5 : index
    %c0_159 = arith.constant 0 : index
    %c0_160 = arith.constant 0 : index
    %110 = vector.load %arg4[%c5_158, %c0_159, %c0_160] : memref<9x64x64xf32, #tpu.memory_space<vmem>>, vector<1x64x64xf32>
    %111 = vector.shape_cast %110 : vector<1x64x64xf32> to vector<64x64xf32>
    %cst_161 = arith.constant dense<0.000000e+00> : vector<256x64xf32>
    %112 = tpu.matmul %109, %111, %cst_161 {dimension_numbers = #tpu.dot_dimension_numbers<[1], [0], [0], [1], [0, 0, 1, 1], [], []>} : vector<256x64xf32>, vector<64x64xf32>, vector<256x64xf32> -> vector<256x64xf32>
    %113 = arith.addf %107, %112 : vector<256x64xf32>
    %c0_162 = arith.constant 0 : index
    %c2_163 = arith.constant 2 : index
    %c0_164 = arith.constant 0 : index
    %c0_165 = arith.constant 0 : index
    %114 = vector.load %arg12[%c0_162, %c2_163, %c0_164, %c0_165] : memref<1x18x18x64xf32, #tpu.memory_space<vmem>>, vector<1x16x16x64xf32>
    %115 = vector.shape_cast %114 : vector<1x16x16x64xf32> to vector<256x64xf32>
    %c6_166 = arith.constant 6 : index
    %c0_167 = arith.constant 0 : index
    %c0_168 = arith.constant 0 : index
    %116 = vector.load %arg4[%c6_166, %c0_167, %c0_168] : memref<9x64x64xf32, #tpu.memory_space<vmem>>, vector<1x64x64xf32>
    %117 = vector.shape_cast %116 : vector<1x64x64xf32> to vector<64x64xf32>
    %cst_169 = arith.constant dense<0.000000e+00> : vector<256x64xf32>
    %118 = tpu.matmul %115, %117, %cst_169 {dimension_numbers = #tpu.dot_dimension_numbers<[1], [0], [0], [1], [0, 0, 1, 1], [], []>} : vector<256x64xf32>, vector<64x64xf32>, vector<256x64xf32> -> vector<256x64xf32>
    %119 = arith.addf %113, %118 : vector<256x64xf32>
    %c0_170 = arith.constant 0 : index
    %c2_171 = arith.constant 2 : index
    %c1_172 = arith.constant 1 : index
    %c0_173 = arith.constant 0 : index
    %120 = vector.load %arg12[%c0_170, %c2_171, %c1_172, %c0_173] : memref<1x18x18x64xf32, #tpu.memory_space<vmem>>, vector<1x16x16x64xf32>
    %121 = vector.shape_cast %120 : vector<1x16x16x64xf32> to vector<256x64xf32>
    %c7_174 = arith.constant 7 : index
    %c0_175 = arith.constant 0 : index
    %c0_176 = arith.constant 0 : index
    %122 = vector.load %arg4[%c7_174, %c0_175, %c0_176] : memref<9x64x64xf32, #tpu.memory_space<vmem>>, vector<1x64x64xf32>
    %123 = vector.shape_cast %122 : vector<1x64x64xf32> to vector<64x64xf32>
    %cst_177 = arith.constant dense<0.000000e+00> : vector<256x64xf32>
    %124 = tpu.matmul %121, %123, %cst_177 {dimension_numbers = #tpu.dot_dimension_numbers<[1], [0], [0], [1], [0, 0, 1, 1], [], []>} : vector<256x64xf32>, vector<64x64xf32>, vector<256x64xf32> -> vector<256x64xf32>
    %125 = arith.addf %119, %124 : vector<256x64xf32>
    %c0_178 = arith.constant 0 : index
    %c2_179 = arith.constant 2 : index
    %c2_180 = arith.constant 2 : index
    %c0_181 = arith.constant 0 : index
    %126 = vector.load %arg12[%c0_178, %c2_179, %c2_180, %c0_181] : memref<1x18x18x64xf32, #tpu.memory_space<vmem>>, vector<1x16x16x64xf32>
    %127 = vector.shape_cast %126 : vector<1x16x16x64xf32> to vector<256x64xf32>
    %c8_182 = arith.constant 8 : index
    %c0_183 = arith.constant 0 : index
    %c0_184 = arith.constant 0 : index
    %128 = vector.load %arg4[%c8_182, %c0_183, %c0_184] : memref<9x64x64xf32, #tpu.memory_space<vmem>>, vector<1x64x64xf32>
    %129 = vector.shape_cast %128 : vector<1x64x64xf32> to vector<64x64xf32>
    %cst_185 = arith.constant dense<0.000000e+00> : vector<256x64xf32>
    %130 = tpu.matmul %127, %129, %cst_185 {dimension_numbers = #tpu.dot_dimension_numbers<[1], [0], [0], [1], [0, 0, 1, 1], [], []>} : vector<256x64xf32>, vector<64x64xf32>, vector<256x64xf32> -> vector<256x64xf32>
    %131 = arith.addf %125, %130 : vector<256x64xf32>
    %cst_186 = arith.constant 0.000000e+00 : f32
    %132 = vector.broadcast %cst_186 : f32 to vector<256x64xf32>
    %133 = arith.maximumf %131, %132 : vector<256x64xf32>
    %134 = vector.shape_cast %133 : vector<256x64xf32> to vector<1x16x16x64xf32>
    %c0_187 = arith.constant 0 : index
    %c1_188 = arith.constant 1 : index
    %c1_189 = arith.constant 1 : index
    %c0_190 = arith.constant 0 : index
    %135 = vector.load %arg12[%c0_187, %c1_188, %c1_189, %c0_190] : memref<1x18x18x64xf32, #tpu.memory_space<vmem>>, vector<1x16x16x64xf32>
    tpu.vector_store %arg12[%c0_187, %c1_188, %c1_189, %c0_190], %134 {strides = array<i32>} : memref<1x18x18x64xf32, #tpu.memory_space<vmem>>, vector<1x16x16x64xf32>,
    %c0_191 = arith.constant 0 : index
    %c0_192 = arith.constant 0 : index
    %136 = vector.load %arg7[%c0_191, %c0_192] : memref<1x64xf32, #tpu.memory_space<vmem>>, vector<1x64xf32>
    %137 = vector.shape_cast %136 : vector<1x64xf32> to vector<1x64xf32>
    %138 = vector.broadcast %137 : vector<1x64xf32> to vector<256x64xf32>
    %c0_193 = arith.constant 0 : index
    %c0_194 = arith.constant 0 : index
    %c0_195 = arith.constant 0 : index
    %c0_196 = arith.constant 0 : index
    %139 = vector.load %arg12[%c0_193, %c0_194, %c0_195, %c0_196] : memref<1x18x18x64xf32, #tpu.memory_space<vmem>>, vector<1x16x16x64xf32>
    %140 = vector.shape_cast %139 : vector<1x16x16x64xf32> to vector<256x64xf32>
    %c0_197 = arith.constant 0 : index
    %c0_198 = arith.constant 0 : index
    %c0_199 = arith.constant 0 : index
    %141 = vector.load %arg6[%c0_197, %c0_198, %c0_199] : memref<9x64x64xf32, #tpu.memory_space<vmem>>, vector<1x64x64xf32>
    %142 = vector.shape_cast %141 : vector<1x64x64xf32> to vector<64x64xf32>
    %cst_200 = arith.constant dense<0.000000e+00> : vector<256x64xf32>
    %143 = tpu.matmul %140, %142, %cst_200 {dimension_numbers = #tpu.dot_dimension_numbers<[1], [0], [0], [1], [0, 0, 1, 1], [], []>} : vector<256x64xf32>, vector<64x64xf32>, vector<256x64xf32> -> vector<256x64xf32>
    %144 = arith.addf %138, %143 : vector<256x64xf32>
    %c0_201 = arith.constant 0 : index
    %c0_202 = arith.constant 0 : index
    %c1_203 = arith.constant 1 : index
    %c0_204 = arith.constant 0 : index
    %145 = vector.load %arg12[%c0_201, %c0_202, %c1_203, %c0_204] : memref<1x18x18x64xf32, #tpu.memory_space<vmem>>, vector<1x16x16x64xf32>
    %146 = vector.shape_cast %145 : vector<1x16x16x64xf32> to vector<256x64xf32>
    %c1_205 = arith.constant 1 : index
    %c0_206 = arith.constant 0 : index
    %c0_207 = arith.constant 0 : index
    %147 = vector.load %arg6[%c1_205, %c0_206, %c0_207] : memref<9x64x64xf32, #tpu.memory_space<vmem>>, vector<1x64x64xf32>
    %148 = vector.shape_cast %147 : vector<1x64x64xf32> to vector<64x64xf32>
    %cst_208 = arith.constant dense<0.000000e+00> : vector<256x64xf32>
    %149 = tpu.matmul %146, %148, %cst_208 {dimension_numbers = #tpu.dot_dimension_numbers<[1], [0], [0], [1], [0, 0, 1, 1], [], []>} : vector<256x64xf32>, vector<64x64xf32>, vector<256x64xf32> -> vector<256x64xf32>
    %150 = arith.addf %144, %149 : vector<256x64xf32>
    %c0_209 = arith.constant 0 : index
    %c0_210 = arith.constant 0 : index
    %c2_211 = arith.constant 2 : index
    %c0_212 = arith.constant 0 : index
    %151 = vector.load %arg12[%c0_209, %c0_210, %c2_211, %c0_212] : memref<1x18x18x64xf32, #tpu.memory_space<vmem>>, vector<1x16x16x64xf32>
    %152 = vector.shape_cast %151 : vector<1x16x16x64xf32> to vector<256x64xf32>
    %c2_213 = arith.constant 2 : index
    %c0_214 = arith.constant 0 : index
    %c0_215 = arith.constant 0 : index
    %153 = vector.load %arg6[%c2_213, %c0_214, %c0_215] : memref<9x64x64xf32, #tpu.memory_space<vmem>>, vector<1x64x64xf32>
    %154 = vector.shape_cast %153 : vector<1x64x64xf32> to vector<64x64xf32>
    %cst_216 = arith.constant dense<0.000000e+00> : vector<256x64xf32>
    %155 = tpu.matmul %152, %154, %cst_216 {dimension_numbers = #tpu.dot_dimension_numbers<[1], [0], [0], [1], [0, 0, 1, 1], [], []>} : vector<256x64xf32>, vector<64x64xf32>, vector<256x64xf32> -> vector<256x64xf32>
    %156 = arith.addf %150, %155 : vector<256x64xf32>
    %c0_217 = arith.constant 0 : index
    %c1_218 = arith.constant 1 : index
    %c0_219 = arith.constant 0 : index
    %c0_220 = arith.constant 0 : index
    %157 = vector.load %arg12[%c0_217, %c1_218, %c0_219, %c0_220] : memref<1x18x18x64xf32, #tpu.memory_space<vmem>>, vector<1x16x16x64xf32>
    %158 = vector.shape_cast %157 : vector<1x16x16x64xf32> to vector<256x64xf32>
    %c3_221 = arith.constant 3 : index
    %c0_222 = arith.constant 0 : index
    %c0_223 = arith.constant 0 : index
    %159 = vector.load %arg6[%c3_221, %c0_222, %c0_223] : memref<9x64x64xf32, #tpu.memory_space<vmem>>, vector<1x64x64xf32>
    %160 = vector.shape_cast %159 : vector<1x64x64xf32> to vector<64x64xf32>
    %cst_224 = arith.constant dense<0.000000e+00> : vector<256x64xf32>
    %161 = tpu.matmul %158, %160, %cst_224 {dimension_numbers = #tpu.dot_dimension_numbers<[1], [0], [0], [1], [0, 0, 1, 1], [], []>} : vector<256x64xf32>, vector<64x64xf32>, vector<256x64xf32> -> vector<256x64xf32>
    %162 = arith.addf %156, %161 : vector<256x64xf32>
    %c0_225 = arith.constant 0 : index
    %c1_226 = arith.constant 1 : index
    %c1_227 = arith.constant 1 : index
    %c0_228 = arith.constant 0 : index
    %163 = vector.load %arg12[%c0_225, %c1_226, %c1_227, %c0_228] : memref<1x18x18x64xf32, #tpu.memory_space<vmem>>, vector<1x16x16x64xf32>
    %164 = vector.shape_cast %163 : vector<1x16x16x64xf32> to vector<256x64xf32>
    %c4_229 = arith.constant 4 : index
    %c0_230 = arith.constant 0 : index
    %c0_231 = arith.constant 0 : index
    %165 = vector.load %arg6[%c4_229, %c0_230, %c0_231] : memref<9x64x64xf32, #tpu.memory_space<vmem>>, vector<1x64x64xf32>
    %166 = vector.shape_cast %165 : vector<1x64x64xf32> to vector<64x64xf32>
    %cst_232 = arith.constant dense<0.000000e+00> : vector<256x64xf32>
    %167 = tpu.matmul %164, %166, %cst_232 {dimension_numbers = #tpu.dot_dimension_numbers<[1], [0], [0], [1], [0, 0, 1, 1], [], []>} : vector<256x64xf32>, vector<64x64xf32>, vector<256x64xf32> -> vector<256x64xf32>
    %168 = arith.addf %162, %167 : vector<256x64xf32>
    %c0_233 = arith.constant 0 : index
    %c1_234 = arith.constant 1 : index
    %c2_235 = arith.constant 2 : index
    %c0_236 = arith.constant 0 : index
    %169 = vector.load %arg12[%c0_233, %c1_234, %c2_235, %c0_236] : memref<1x18x18x64xf32, #tpu.memory_space<vmem>>, vector<1x16x16x64xf32>
    %170 = vector.shape_cast %169 : vector<1x16x16x64xf32> to vector<256x64xf32>
    %c5_237 = arith.constant 5 : index
    %c0_238 = arith.constant 0 : index
    %c0_239 = arith.constant 0 : index
    %171 = vector.load %arg6[%c5_237, %c0_238, %c0_239] : memref<9x64x64xf32, #tpu.memory_space<vmem>>, vector<1x64x64xf32>
    %172 = vector.shape_cast %171 : vector<1x64x64xf32> to vector<64x64xf32>
    %cst_240 = arith.constant dense<0.000000e+00> : vector<256x64xf32>
    %173 = tpu.matmul %170, %172, %cst_240 {dimension_numbers = #tpu.dot_dimension_numbers<[1], [0], [0], [1], [0, 0, 1, 1], [], []>} : vector<256x64xf32>, vector<64x64xf32>, vector<256x64xf32> -> vector<256x64xf32>
    %174 = arith.addf %168, %173 : vector<256x64xf32>
    %c0_241 = arith.constant 0 : index
    %c2_242 = arith.constant 2 : index
    %c0_243 = arith.constant 0 : index
    %c0_244 = arith.constant 0 : index
    %175 = vector.load %arg12[%c0_241, %c2_242, %c0_243, %c0_244] : memref<1x18x18x64xf32, #tpu.memory_space<vmem>>, vector<1x16x16x64xf32>
    %176 = vector.shape_cast %175 : vector<1x16x16x64xf32> to vector<256x64xf32>
    %c6_245 = arith.constant 6 : index
    %c0_246 = arith.constant 0 : index
    %c0_247 = arith.constant 0 : index
    %177 = vector.load %arg6[%c6_245, %c0_246, %c0_247] : memref<9x64x64xf32, #tpu.memory_space<vmem>>, vector<1x64x64xf32>
    %178 = vector.shape_cast %177 : vector<1x64x64xf32> to vector<64x64xf32>
    %cst_248 = arith.constant dense<0.000000e+00> : vector<256x64xf32>
    %179 = tpu.matmul %176, %178, %cst_248 {dimension_numbers = #tpu.dot_dimension_numbers<[1], [0], [0], [1], [0, 0, 1, 1], [], []>} : vector<256x64xf32>, vector<64x64xf32>, vector<256x64xf32> -> vector<256x64xf32>
    %180 = arith.addf %174, %179 : vector<256x64xf32>
    %c0_249 = arith.constant 0 : index
    %c2_250 = arith.constant 2 : index
    %c1_251 = arith.constant 1 : index
    %c0_252 = arith.constant 0 : index
    %181 = vector.load %arg12[%c0_249, %c2_250, %c1_251, %c0_252] : memref<1x18x18x64xf32, #tpu.memory_space<vmem>>, vector<1x16x16x64xf32>
    %182 = vector.shape_cast %181 : vector<1x16x16x64xf32> to vector<256x64xf32>
    %c7_253 = arith.constant 7 : index
    %c0_254 = arith.constant 0 : index
    %c0_255 = arith.constant 0 : index
    %183 = vector.load %arg6[%c7_253, %c0_254, %c0_255] : memref<9x64x64xf32, #tpu.memory_space<vmem>>, vector<1x64x64xf32>
    %184 = vector.shape_cast %183 : vector<1x64x64xf32> to vector<64x64xf32>
    %cst_256 = arith.constant dense<0.000000e+00> : vector<256x64xf32>
    %185 = tpu.matmul %182, %184, %cst_256 {dimension_numbers = #tpu.dot_dimension_numbers<[1], [0], [0], [1], [0, 0, 1, 1], [], []>} : vector<256x64xf32>, vector<64x64xf32>, vector<256x64xf32> -> vector<256x64xf32>
    %186 = arith.addf %180, %185 : vector<256x64xf32>
    %c0_257 = arith.constant 0 : index
    %c2_258 = arith.constant 2 : index
    %c2_259 = arith.constant 2 : index
    %c0_260 = arith.constant 0 : index
    %187 = vector.load %arg12[%c0_257, %c2_258, %c2_259, %c0_260] : memref<1x18x18x64xf32, #tpu.memory_space<vmem>>, vector<1x16x16x64xf32>
    %188 = vector.shape_cast %187 : vector<1x16x16x64xf32> to vector<256x64xf32>
    %c8_261 = arith.constant 8 : index
    %c0_262 = arith.constant 0 : index
    %c0_263 = arith.constant 0 : index
    %189 = vector.load %arg6[%c8_261, %c0_262, %c0_263] : memref<9x64x64xf32, #tpu.memory_space<vmem>>, vector<1x64x64xf32>
    %190 = vector.shape_cast %189 : vector<1x64x64xf32> to vector<64x64xf32>
    %cst_264 = arith.constant dense<0.000000e+00> : vector<256x64xf32>
    %191 = tpu.matmul %188, %190, %cst_264 {dimension_numbers = #tpu.dot_dimension_numbers<[1], [0], [0], [1], [0, 0, 1, 1], [], []>} : vector<256x64xf32>, vector<64x64xf32>, vector<256x64xf32> -> vector<256x64xf32>
    %192 = arith.addf %186, %191 : vector<256x64xf32>
    %cst_265 = arith.constant 0.000000e+00 : f32
    %193 = vector.broadcast %cst_265 : f32 to vector<256x64xf32>
    %194 = arith.maximumf %192, %193 : vector<256x64xf32>
    %195 = vector.shape_cast %194 : vector<256x64xf32> to vector<1x16x16x64xf32>
    %c0_266 = arith.constant 0 : index
    %c1_267 = arith.constant 1 : index
    %c1_268 = arith.constant 1 : index
    %c0_269 = arith.constant 0 : index
    %196 = vector.load %arg12[%c0_266, %c1_267, %c1_268, %c0_269] : memref<1x18x18x64xf32, #tpu.memory_space<vmem>>, vector<1x16x16x64xf32>
    tpu.vector_store %arg12[%c0_266, %c1_267, %c1_268, %c0_269], %195 {strides = array<i32>} : memref<1x18x18x64xf32, #tpu.memory_space<vmem>>, vector<1x16x16x64xf32>,
    %c0_270 = arith.constant 0 : index
    %c0_271 = arith.constant 0 : index
    %197 = vector.load %arg9[%c0_270, %c0_271] : memref<1x8xf32, #tpu.memory_space<vmem>>, vector<1x8xf32>
    %198 = vector.shape_cast %197 : vector<1x8xf32> to vector<1x8xf32>
    %199 = vector.broadcast %198 : vector<1x8xf32> to vector<256x8xf32>
    %c0_272 = arith.constant 0 : index
    %c0_273 = arith.constant 0 : index
    %c0_274 = arith.constant 0 : index
    %c0_275 = arith.constant 0 : index
    %200 = vector.load %arg12[%c0_272, %c0_273, %c0_274, %c0_275] : memref<1x18x18x64xf32, #tpu.memory_space<vmem>>, vector<1x16x16x64xf32>
    %201 = vector.shape_cast %200 : vector<1x16x16x64xf32> to vector<256x64xf32>
    %c0_276 = arith.constant 0 : index
    %c0_277 = arith.constant 0 : index
    %c0_278 = arith.constant 0 : index
    %202 = vector.load %arg8[%c0_276, %c0_277, %c0_278] : memref<9x64x8xf32, #tpu.memory_space<vmem>>, vector<1x64x8xf32>
    %203 = vector.shape_cast %202 : vector<1x64x8xf32> to vector<64x8xf32>
    %cst_279 = arith.constant dense<0.000000e+00> : vector<256x8xf32>
    %204 = tpu.matmul %201, %203, %cst_279 {dimension_numbers = #tpu.dot_dimension_numbers<[1], [0], [0], [1], [0, 0, 1, 1], [], []>} : vector<256x64xf32>, vector<64x8xf32>, vector<256x8xf32> -> vector<256x8xf32>
    %205 = arith.addf %199, %204 : vector<256x8xf32>
    %c0_280 = arith.constant 0 : index
    %c0_281 = arith.constant 0 : index
    %c1_282 = arith.constant 1 : index
    %c0_283 = arith.constant 0 : index
    %206 = vector.load %arg12[%c0_280, %c0_281, %c1_282, %c0_283] : memref<1x18x18x64xf32, #tpu.memory_space<vmem>>, vector<1x16x16x64xf32>
    %207 = vector.shape_cast %206 : vector<1x16x16x64xf32> to vector<256x64xf32>
    %c1_284 = arith.constant 1 : index
    %c0_285 = arith.constant 0 : index
    %c0_286 = arith.constant 0 : index
    %208 = vector.load %arg8[%c1_284, %c0_285, %c0_286] : memref<9x64x8xf32, #tpu.memory_space<vmem>>, vector<1x64x8xf32>
    %209 = vector.shape_cast %208 : vector<1x64x8xf32> to vector<64x8xf32>
    %cst_287 = arith.constant dense<0.000000e+00> : vector<256x8xf32>
    %210 = tpu.matmul %207, %209, %cst_287 {dimension_numbers = #tpu.dot_dimension_numbers<[1], [0], [0], [1], [0, 0, 1, 1], [], []>} : vector<256x64xf32>, vector<64x8xf32>, vector<256x8xf32> -> vector<256x8xf32>
    %211 = arith.addf %205, %210 : vector<256x8xf32>
    %c0_288 = arith.constant 0 : index
    %c0_289 = arith.constant 0 : index
    %c2_290 = arith.constant 2 : index
    %c0_291 = arith.constant 0 : index
    %212 = vector.load %arg12[%c0_288, %c0_289, %c2_290, %c0_291] : memref<1x18x18x64xf32, #tpu.memory_space<vmem>>, vector<1x16x16x64xf32>
    %213 = vector.shape_cast %212 : vector<1x16x16x64xf32> to vector<256x64xf32>
    %c2_292 = arith.constant 2 : index
    %c0_293 = arith.constant 0 : index
    %c0_294 = arith.constant 0 : index
    %214 = vector.load %arg8[%c2_292, %c0_293, %c0_294] : memref<9x64x8xf32, #tpu.memory_space<vmem>>, vector<1x64x8xf32>
    %215 = vector.shape_cast %214 : vector<1x64x8xf32> to vector<64x8xf32>
    %cst_295 = arith.constant dense<0.000000e+00> : vector<256x8xf32>
    %216 = tpu.matmul %213, %215, %cst_295 {dimension_numbers = #tpu.dot_dimension_numbers<[1], [0], [0], [1], [0, 0, 1, 1], [], []>} : vector<256x64xf32>, vector<64x8xf32>, vector<256x8xf32> -> vector<256x8xf32>
    %217 = arith.addf %211, %216 : vector<256x8xf32>
    %c0_296 = arith.constant 0 : index
    %c1_297 = arith.constant 1 : index
    %c0_298 = arith.constant 0 : index
    %c0_299 = arith.constant 0 : index
    %218 = vector.load %arg12[%c0_296, %c1_297, %c0_298, %c0_299] : memref<1x18x18x64xf32, #tpu.memory_space<vmem>>, vector<1x16x16x64xf32>
    %219 = vector.shape_cast %218 : vector<1x16x16x64xf32> to vector<256x64xf32>
    %c3_300 = arith.constant 3 : index
    %c0_301 = arith.constant 0 : index
    %c0_302 = arith.constant 0 : index
    %220 = vector.load %arg8[%c3_300, %c0_301, %c0_302] : memref<9x64x8xf32, #tpu.memory_space<vmem>>, vector<1x64x8xf32>
    %221 = vector.shape_cast %220 : vector<1x64x8xf32> to vector<64x8xf32>
    %cst_303 = arith.constant dense<0.000000e+00> : vector<256x8xf32>
    %222 = tpu.matmul %219, %221, %cst_303 {dimension_numbers = #tpu.dot_dimension_numbers<[1], [0], [0], [1], [0, 0, 1, 1], [], []>} : vector<256x64xf32>, vector<64x8xf32>, vector<256x8xf32> -> vector<256x8xf32>
    %223 = arith.addf %217, %222 : vector<256x8xf32>
    %c0_304 = arith.constant 0 : index
    %c1_305 = arith.constant 1 : index
    %c1_306 = arith.constant 1 : index
    %c0_307 = arith.constant 0 : index
    %224 = vector.load %arg12[%c0_304, %c1_305, %c1_306, %c0_307] : memref<1x18x18x64xf32, #tpu.memory_space<vmem>>, vector<1x16x16x64xf32>
    %225 = vector.shape_cast %224 : vector<1x16x16x64xf32> to vector<256x64xf32>
    %c4_308 = arith.constant 4 : index
    %c0_309 = arith.constant 0 : index
    %c0_310 = arith.constant 0 : index
    %226 = vector.load %arg8[%c4_308, %c0_309, %c0_310] : memref<9x64x8xf32, #tpu.memory_space<vmem>>, vector<1x64x8xf32>
    %227 = vector.shape_cast %226 : vector<1x64x8xf32> to vector<64x8xf32>
    %cst_311 = arith.constant dense<0.000000e+00> : vector<256x8xf32>
    %228 = tpu.matmul %225, %227, %cst_311 {dimension_numbers = #tpu.dot_dimension_numbers<[1], [0], [0], [1], [0, 0, 1, 1], [], []>} : vector<256x64xf32>, vector<64x8xf32>, vector<256x8xf32> -> vector<256x8xf32>
    %229 = arith.addf %223, %228 : vector<256x8xf32>
    %c0_312 = arith.constant 0 : index
    %c1_313 = arith.constant 1 : index
    %c2_314 = arith.constant 2 : index
    %c0_315 = arith.constant 0 : index
    %230 = vector.load %arg12[%c0_312, %c1_313, %c2_314, %c0_315] : memref<1x18x18x64xf32, #tpu.memory_space<vmem>>, vector<1x16x16x64xf32>
    %231 = vector.shape_cast %230 : vector<1x16x16x64xf32> to vector<256x64xf32>
    %c5_316 = arith.constant 5 : index
    %c0_317 = arith.constant 0 : index
    %c0_318 = arith.constant 0 : index
    %232 = vector.load %arg8[%c5_316, %c0_317, %c0_318] : memref<9x64x8xf32, #tpu.memory_space<vmem>>, vector<1x64x8xf32>
    %233 = vector.shape_cast %232 : vector<1x64x8xf32> to vector<64x8xf32>
    %cst_319 = arith.constant dense<0.000000e+00> : vector<256x8xf32>
    %234 = tpu.matmul %231, %233, %cst_319 {dimension_numbers = #tpu.dot_dimension_numbers<[1], [0], [0], [1], [0, 0, 1, 1], [], []>} : vector<256x64xf32>, vector<64x8xf32>, vector<256x8xf32> -> vector<256x8xf32>
    %235 = arith.addf %229, %234 : vector<256x8xf32>
    %c0_320 = arith.constant 0 : index
    %c2_321 = arith.constant 2 : index
    %c0_322 = arith.constant 0 : index
    %c0_323 = arith.constant 0 : index
    %236 = vector.load %arg12[%c0_320, %c2_321, %c0_322, %c0_323] : memref<1x18x18x64xf32, #tpu.memory_space<vmem>>, vector<1x16x16x64xf32>
    %237 = vector.shape_cast %236 : vector<1x16x16x64xf32> to vector<256x64xf32>
    %c6_324 = arith.constant 6 : index
    %c0_325 = arith.constant 0 : index
    %c0_326 = arith.constant 0 : index
    %238 = vector.load %arg8[%c6_324, %c0_325, %c0_326] : memref<9x64x8xf32, #tpu.memory_space<vmem>>, vector<1x64x8xf32>
    %239 = vector.shape_cast %238 : vector<1x64x8xf32> to vector<64x8xf32>
    %cst_327 = arith.constant dense<0.000000e+00> : vector<256x8xf32>
    %240 = tpu.matmul %237, %239, %cst_327 {dimension_numbers = #tpu.dot_dimension_numbers<[1], [0], [0], [1], [0, 0, 1, 1], [], []>} : vector<256x64xf32>, vector<64x8xf32>, vector<256x8xf32> -> vector<256x8xf32>
    %241 = arith.addf %235, %240 : vector<256x8xf32>
    %c0_328 = arith.constant 0 : index
    %c2_329 = arith.constant 2 : index
    %c1_330 = arith.constant 1 : index
    %c0_331 = arith.constant 0 : index
    %242 = vector.load %arg12[%c0_328, %c2_329, %c1_330, %c0_331] : memref<1x18x18x64xf32, #tpu.memory_space<vmem>>, vector<1x16x16x64xf32>
    %243 = vector.shape_cast %242 : vector<1x16x16x64xf32> to vector<256x64xf32>
    %c7_332 = arith.constant 7 : index
    %c0_333 = arith.constant 0 : index
    %c0_334 = arith.constant 0 : index
    %244 = vector.load %arg8[%c7_332, %c0_333, %c0_334] : memref<9x64x8xf32, #tpu.memory_space<vmem>>, vector<1x64x8xf32>
    %245 = vector.shape_cast %244 : vector<1x64x8xf32> to vector<64x8xf32>
    %cst_335 = arith.constant dense<0.000000e+00> : vector<256x8xf32>
    %246 = tpu.matmul %243, %245, %cst_335 {dimension_numbers = #tpu.dot_dimension_numbers<[1], [0], [0], [1], [0, 0, 1, 1], [], []>} : vector<256x64xf32>, vector<64x8xf32>, vector<256x8xf32> -> vector<256x8xf32>
    %247 = arith.addf %241, %246 : vector<256x8xf32>
    %c0_336 = arith.constant 0 : index
    %c2_337 = arith.constant 2 : index
    %c2_338 = arith.constant 2 : index
    %c0_339 = arith.constant 0 : index
    %248 = vector.load %arg12[%c0_336, %c2_337, %c2_338, %c0_339] : memref<1x18x18x64xf32, #tpu.memory_space<vmem>>, vector<1x16x16x64xf32>
    %249 = vector.shape_cast %248 : vector<1x16x16x64xf32> to vector<256x64xf32>
    %c8_340 = arith.constant 8 : index
    %c0_341 = arith.constant 0 : index
    %c0_342 = arith.constant 0 : index
    %250 = vector.load %arg8[%c8_340, %c0_341, %c0_342] : memref<9x64x8xf32, #tpu.memory_space<vmem>>, vector<1x64x8xf32>
    %251 = vector.shape_cast %250 : vector<1x64x8xf32> to vector<64x8xf32>
    %cst_343 = arith.constant dense<0.000000e+00> : vector<256x8xf32>
    %252 = tpu.matmul %249, %251, %cst_343 {dimension_numbers = #tpu.dot_dimension_numbers<[1], [0], [0], [1], [0, 0, 1, 1], [], []>} : vector<256x64xf32>, vector<64x8xf32>, vector<256x8xf32> -> vector<256x8xf32>
    %253 = arith.addf %247, %252 : vector<256x8xf32>
    %254 = vector.shape_cast %253 : vector<256x8xf32> to vector<1x16x16x8xf32>
    %c0_344 = arith.constant 0 : index
    %c0_345 = arith.constant 0 : index
    %c0_346 = arith.constant 0 : index
    %c0_347 = arith.constant 0 : index
    %255 = vector.load %arg10[%c0_344, %c0_345, %c0_346, %c0_347] : memref<1x16x16x8xf32, #tpu.memory_space<vmem>>, vector<1x16x16x8xf32>
    tpu.vector_store %arg10[%c0_344, %c0_345, %c0_346, %c0_347], %254 {strides = array<i32>} : memref<1x16x16x8xf32, #tpu.memory_space<vmem>>, vector<1x16x16x8xf32>,
    return
  }
  func.func @transform_0(%arg0: i32) -> (i32, i32, i32, i32) {
    %c0_i32 = arith.constant 0 : i32
    %c0_i32_0 = arith.constant 0 : i32
    %c0_i32_1 = arith.constant 0 : i32
    %c0_i32_2 = arith.constant 0 : i32
    return %arg0, %c0_i32, %c0_i32_0, %c0_i32_1 : i32, i32, i32, i32
  }
  func.func @transform_1(%arg0: i32) -> (i32, i32, i32) {
    %c0_i32 = arith.constant 0 : i32
    %c0_i32_0 = arith.constant 0 : i32
    %c0_i32_1 = arith.constant 0 : i32
    %c0_i32_2 = arith.constant 0 : i32
    return %c0_i32, %c0_i32_0, %c0_i32_1 : i32, i32, i32
  }
  func.func @transform_2(%arg0: i32) -> (i32, i32) {
    %c0_i32 = arith.constant 0 : i32
    %c0_i32_0 = arith.constant 0 : i32
    %c0_i32_1 = arith.constant 0 : i32
    return %c0_i32, %c0_i32_0 : i32, i32
  }
  func.func @transform_3(%arg0: i32) -> (i32, i32, i32) {
    %c0_i32 = arith.constant 0 : i32
    %c0_i32_0 = arith.constant 0 : i32
    %c0_i32_1 = arith.constant 0 : i32
    %c0_i32_2 = arith.constant 0 : i32
    return %c0_i32, %c0_i32_0, %c0_i32_1 : i32, i32, i32
  }
  func.func @transform_4(%arg0: i32) -> (i32, i32) {
    %c0_i32 = arith.constant 0 : i32
    %c0_i32_0 = arith.constant 0 : i32
    %c0_i32_1 = arith.constant 0 : i32
    return %c0_i32, %c0_i32_0 : i32, i32
  }
  func.func @transform_5(%arg0: i32) -> (i32, i32, i32) {
    %c0_i32 = arith.constant 0 : i32
    %c0_i32_0 = arith.constant 0 : i32
    %c0_i32_1 = arith.constant 0 : i32
    %c0_i32_2 = arith.constant 0 : i32
    return %c0_i32, %c0_i32_0, %c0_i32_1 : i32, i32, i32
  }
  func.func @transform_6(%arg0: i32) -> (i32, i32) {
    %c0_i32 = arith.constant 0 : i32
    %c0_i32_0 = arith.constant 0 : i32
    %c0_i32_1 = arith.constant 0 : i32
    return %c0_i32, %c0_i32_0 : i32, i32
  }
  func.func @transform_7(%arg0: i32) -> (i32, i32, i32) {
    %c0_i32 = arith.constant 0 : i32
    %c0_i32_0 = arith.constant 0 : i32
    %c0_i32_1 = arith.constant 0 : i32
    %c0_i32_2 = arith.constant 0 : i32
    return %c0_i32, %c0_i32_0, %c0_i32_1 : i32, i32, i32
  }
  func.func @transform_8(%arg0: i32) -> (i32, i32) {
    %c0_i32 = arith.constant 0 : i32
    %c0_i32_0 = arith.constant 0 : i32
    %c0_i32_1 = arith.constant 0 : i32
    return %c0_i32, %c0_i32_0 : i32, i32
  }
  func.func @transform_9(%arg0: i32) -> (i32, i32, i32, i32) {
    %c0_i32 = arith.constant 0 : i32
    %c0_i32_0 = arith.constant 0 : i32
    %c0_i32_1 = arith.constant 0 : i32
    %c0_i32_2 = arith.constant 0 : i32
    return %arg0, %c0_i32, %c0_i32_0, %c0_i32_1 : i32, i32, i32, i32
  }
}

</mosaic_0001>

<bundles_post_ra>
// kernel: _lambda_.1
= control target key start
LH: loop header
LB: loop body
LE: loop exit
PB: predicated region body
PF: predicated region fallthrough
CT: control target
= control target key end

     0   :  { %14 = vsyncpa [#allocation5], 0  ;;  %s25381_s0 = inlined_call_operand.vmem [shape: f32[2,16,16,8], index: 0, kind: input, shape index: {}]   ;;  %s25382_s1 = inlined_call_operand.vmem [shape: f32[9,8,64], index: 1, kind: input, shape index: {}]   ;;  %s25383_s2 = inlined_call_operand.vmem [shape: f32[1,64], index: 2, kind: input, shape index: {}]   ;;  %s25384_s3 = inlined_call_operand.vmem [shape: f32[9,64,64], index: 3, kind: input, shape index: {}]   ;;  %s25385_s4 = inlined_call_operand.vmem [shape: f32[1,64], index: 4, kind: input, shape index: {}]   ;;  %s25386_s5 = inlined_call_operand.hbm [shape: f32[9,64,64], index: 5, kind: input, shape index: {}]   ;;  %s25387_s6 = inlined_call_operand.vmem [shape: f32[1,64], index: 6, kind: input, shape index: {}]   ;;  %s25388_s7 = inlined_call_operand.hbm [shape: f32[9,64,8], index: 7, kind: input, shape index: {}]   ;;  %s25389_s8 = inlined_call_operand.vmem [shape: f32[1,8], index: 8, kind: input, shape index: {}]   ;;  %s25390_s9 = inlined_call_operand.vmem [shape: f32[2,16,16,8], index: 9, kind: output, shape index: {}]  }
   0x1   :  { %15 = vsyncpa [#allocation7], 0  ;;  %s21512_s30 = smov 0  }
   0x2 LB: > { %s21518_s10 = sadd.s32 4294967295, %s21455_s30   ;;  %p14963_p0 = scmp.ge.s32.totalorder %s21455_s30, 1  ;;  %s21455_s30 = sphi %s21512_s30, %s21_s30  }
   0x3   : > { %p246_p1 = scmp.lt.s32.totalorder %s21455_s30, 3  ;;  %s21457_s11 = smov [#allocation4]  }
   0x4   : > { %s270_s12 = sshll.u32 %s21457_s11, 4  ;;  %p25391_p3 = scmp.eq.s32.totalorder %s21518_s10, 0  ;;  %s271_s12 = int_to_ptr.vmem [resolvable:$true] %s270_s12 }
   0x5   : > { %p21522_p2 = pnand %p14963_p0, %p246_p1  ;;  %s21458_s14 = smov [#allocation6]  }
   0x6   : > { %s286_s15 = sshll.u32 %s21458_s14, 4  ;;  %s21385_s19 = scalar_lea.hbm %s25386_s5, 9216  ;;  %s21535_s15 = int_to_ptr.vmem [resolvable:$true] %s286_s15 }
   0x7   : > { %s25667_s13 = scalar_select %p21522_p2, 1, 0 }
   0x8   : > { %p21361_p4 = pneg %p21522_p2  ;;  %p21386_p6 = scmp.ne.s32.totalorder %s25386_s5, %s21385_s19 }
   0x9   : > { %p21392_p10 = scmp.lt.u32.totalorder %s21385_s19, %s25386_s5 }
   0xa   : > { %p21531_p5 = pnand %p25391_p3, %p21361_p4 }
   0xc   : > { %p21387_p7 = pneg %p21531_p5 }
   0xe   : > { %p21388_p8 = pnand %p21387_p7, %p21386_p6 }
  0x10   : > { %p21389_p9 = pneg %p21388_p8 }
  0x12   : > { %p21394_p11 = pnand %p21392_p10, %p21389_p9 }
  0x14   : > { %21397 = shalt.err (!%p21394_p11)
}
  0x15   : > { %s21398_s24 = scalar_lea.vmem %s271_s12, 9216  ;;  %p21406_p1 = scmp.lt.s32.totalorder %s271_s12, %s271_s12 }
  0x16   : > { %p21399_p12 = scmp.ne.s32.totalorder %s271_s12, %s21398_s24  ;;  %p21407_p4 = scmp.lt.s32.totalorder %s21398_s24, %s21398_s24 }
  0x18   : > { %p21401_p13 = pnand %p21399_p12, %p21387_p7  ;;  %p21408_p3 = por %p21407_p4, %p21406_p1 }
  0x1a   : > { %p21402_p0 = pneg %p21401_p13 }
  0x1c   : > { %p21409_p2 = pnand %p21408_p3, %p21402_p0 }
  0x1e   : > { %21412 = shalt.err (!%p21409_p2)
}
  0x1f   : > { %s21459_s25 = smov 128   ;;  %s21460_s26 = smov 8  }
  0x20   : > { %21364 = dma.hbm_to_vmem [thread:$0]  (!%p21531_p5), %s25386_s5, 9216, %s271_s12, [#allocation5], %s21459_s25, %s21459_s25, %s21460_s26  }
  0x21   : > { %s21413_s14 = scalar_lea.hbm %s25388_s7, 9216 }
  0x22   : > { %p21414_p6 = scmp.ne.s32.totalorder %s25388_s7, %s21413_s14  ;;  %p21420_p8 = scmp.lt.u32.totalorder %s21413_s14, %s25388_s7 }
  0x24   : > { %p21416_p2 = pnand %p21414_p6, %p21387_p7 }
  0x26   : > { %p21417_p3 = pneg %p21416_p2 }
  0x28   : > { %p21422_p9 = pnand %p21420_p8, %p21417_p3 }
  0x2a   : > { %21425 = shalt.err (!%p21422_p9)
}
  0x2b   : > { %s21426_s12 = scalar_lea.vmem %s21535_s15, 9216  ;;  %p21434_p13 = scmp.lt.s32.totalorder %s21535_s15, %s21535_s15 }
  0x2c   : > { %p21427_p10 = scmp.ne.s32.totalorder %s21535_s15, %s21426_s12  ;;  %p21435_p0 = scmp.lt.s32.totalorder %s21426_s12, %s21426_s12 }
  0x2e   : > { %p21429_p11 = pnand %p21427_p10, %p21387_p7  ;;  %p21436_p1 = por %p21435_p0, %p21434_p13 }
  0x30   : > { %p21430_p12 = pneg %p21429_p11 }
  0x32   : > { %p21437_p4 = pnand %p21436_p1, %p21430_p12 }
  0x34   : > { %21440 = shalt.err (!%p21437_p4)
}
  0x35   : > { %21367 = dma.hbm_to_vmem [thread:$0]  (!%p21531_p5), %s25388_s7, 9216, %s21535_s15, [#allocation7], %s21459_s25, %s21459_s25, %s21460_s26  }
  0x36   : > { %p25669_p6 = scmp.ne.s32.totalorder %s25667_s13, 0 }
  0x38   : > { %313 = sbr.rel (%p25669_p6) target bundleno = 3085 (0xc0d), region = 56 }
  0x3f   : > { %p25670_p2 = scmp.eq.s32.totalorder %s21518_s10, 0 }
  0x41   : > { %21446 = dma.done.wait (%p25670_p2), [#allocation5], 9216   ;;  %p25671_p7 = pmov %p25670_p2 }
  0x42   : > { %p25672_p3 = pmov %p25670_p2 }
  0x43   : > { %21448 = vsyncadd (%p25671_p7), [#allocation5], 4294958080 }
  0x44   : > { %21450 = dma.done.wait (%p25672_p3), [#allocation7], 9216   ;;  %p25673_p8 = pmov %p25670_p2 }
  0x45   : > { %vm363_vm0 = vcmask 64512   ;;  %p353_p9 = scmp.lt.s32.totalorder %s21518_s10, 1  ;;  %vm373_vm1 = vcmask 57344   ;;  %v25393_v0 = vmov 0.0   ;;  %vm366_vm2 = vcmask 58368   ;;  %v552_v1 = vld [vmem:[%s25382_s1] sm:$0xff] }
  0x46   : > { %21452 = vsyncadd (%p25673_p8), [#allocation7], 4294958080  ;;  %364 = vst.msk [vmem:[#allocation2] sm:$0xff] %vm363_vm0, %v25393_v0  ;;  %v15007_v2 = vld [vmem:[%s25382_s1 + $0x8] sm:$0xff]  ;;  %17583 = vmatprep.subr.mxu0 %v552_v1  ;;  %v15040_v43 = vld [vmem:[%s25382_s1 + $0x10] sm:$0xff]  ;;  %vm406_vm3 = vcmask 523264  }
  0x47   : > { %365 = vst.msk [vmem:[#allocation2 + $0x8] sm:$0xff] %vm363_vm0, %v25393_v0  ;;  %369 = vst.msk [vmem:[#allocation2 + $0x198] sm:$0xff] %vm363_vm0, %v25393_v0  ;;  %s26043_s10 = smov (!%p353_p9, %s21518_s10), 1  ;;  %17584 = vmatpush3.msra.mxu0 %v552_v1  ;;  %vm416_vm4 = vcmask 516096   ;;  %vm409_vm5 = vcmask 517120  }
  0x48   : > { %370 = vst.msk [vmem:[#allocation2 + $0x1a0] sm:$0xff] %vm363_vm0, %v25393_v0  ;;  %s16204_s13 = sshll.u32 %s26043_s10, 8  ;;  %17633 = vmatprep.subr.mxu0 %v15007_v2 }
  0x49   : > { %374 = vst.msk [vmem:[#allocation2 + $0x18] sm:$0x1] %vm373_vm1, %v25393_v0  ;;  %375 = vst.msk [vmem:[#allocation2 + $0x30] sm:$0x1] %vm373_vm1, %v25393_v0  ;;  %s21680_s23 = scalar_lea.vmem %s25381_s0, %s16204_s13  ;;  %s25282_s19 = scalar_lea.vmem %s25390_s9, %s16204_s13 }
  0x4a   : > { %376 = vst.msk [vmem:[#allocation2 + $0x48] sm:$0x1] %vm373_vm1, %v25393_v0  ;;  %377 = vst.msk [vmem:[#allocation2 + $0x60] sm:$0x1] %vm373_vm1, %v25393_v0  ;;  %v449_v3 = vld [vmem:[%s21680_s23] sm:$0xff]  ;;  %v450_v6 = vld [vmem:[%s21680_s23 + $0x8] sm:$0xff] }
  0x4b   : > { %378 = vst.msk [vmem:[#allocation2 + $0x78] sm:$0x1] %vm373_vm1, %v25393_v0  ;;  %379 = vst.msk [vmem:[#allocation2 + $0x90] sm:$0x1] %vm373_vm1, %v25393_v0  ;;  %v451_v7 = vld [vmem:[%s21680_s23 + $0x10] sm:$0xff]  ;;  %v452_v8 = vld [vmem:[%s21680_s23 + $0x18] sm:$0xff] }
  0x4c   : > { %380 = vst.msk [vmem:[#allocation2 + $0xa8] sm:$0x1] %vm373_vm1, %v25393_v0  ;;  %381 = vst.msk [vmem:[#allocation2 + $0xc0] sm:$0x1] %vm373_vm1, %v25393_v0  ;;  %v453_v9 = vld [vmem:[%s21680_s23 + $0x20] sm:$0xff]  ;;  %v454_v10 = vld [vmem:[%s21680_s23 + $0x28] sm:$0xff] }
  0x4d   : > { %382 = vst.msk [vmem:[#allocation2 + $0xd8] sm:$0x1] %vm373_vm1, %v25393_v0  ;;  %383 = vst.msk [vmem:[#allocation2 + $0xf0] sm:$0x1] %vm373_vm1, %v25393_v0  ;;  %v520_v4 = vld [vmem:[#allocation2] sm:$0xff]  ;;  %v455_v11 = vld [vmem:[%s21680_s23 + $0x30] sm:$0xff] }
  0x4e   : > { %384 = vst.msk [vmem:[#allocation2 + $0x108] sm:$0x1] %vm373_vm1, %v25393_v0  ;;  %385 = vst.msk [vmem:[#allocation2 + $0x120] sm:$0x1] %vm373_vm1, %v25393_v0  ;;  %v521_v5 = vld [vmem:[#allocation2 + $0x8] sm:$0xff]  ;;  %17585 = vmatprep.mubr.msk.f32.mxu0 %vm363_vm0, %v520_v4  ;;  %v456_v12 = vld [vmem:[%s21680_s23 + $0x38] sm:$0xff] }
  0x4f   : > { %386 = vst.msk [vmem:[#allocation2 + $0x138] sm:$0x1] %vm373_vm1, %v25393_v0  ;;  %387 = vst.msk [vmem:[#allocation2 + $0x150] sm:$0x1] %vm373_vm1, %v25393_v0  ;;  %17586 = vmatmul.mubr.msk.f32.vlgmr.msra.gmra.mrb[0].mxu0 %vm363_vm0, %v521_v5  ;;  %v457_v13 = vld [vmem:[%s21680_s23 + $0x40] sm:$0xff]  ;;  %v458_v14 = vld [vmem:[%s21680_s23 + $0x48] sm:$0xff] }
  0x50   : > { %388 = vst.msk [vmem:[#allocation2 + $0x168] sm:$0x1] %vm373_vm1, %v25393_v0  ;;  %389 = vst.msk [vmem:[#allocation2 + $0x180] sm:$0x1] %vm373_vm1, %v25393_v0  ;;  %17634 = vmatpush3.msra.mxu0 %v15007_v2  ;;  %v459_v15 = vld [vmem:[%s21680_s23 + $0x50] sm:$0xff]  ;;  %v460_v16 = vld [vmem:[%s21680_s23 + $0x58] sm:$0xff] }
  0x51   : > { %390 = vst.msk [vmem:[#allocation2 + $0x29] sm:$0x1] %vm373_vm1, %v25393_v0  ;;  %391 = vst.msk [vmem:[#allocation2 + $0x41] sm:$0x1] %vm373_vm1, %v25393_v0  ;;  %v461_v17 = vld [vmem:[%s21680_s23 + $0x60] sm:$0xff]  ;;  %v462_v18 = vld [vmem:[%s21680_s23 + $0x68] sm:$0xff]  ;;  %17683 = vmatprep.subr.mxu0 %v15040_v43 }
  0x52   : > { %392 = vst.msk [vmem:[#allocation2 + $0x59] sm:$0x1] %vm373_vm1, %v25393_v0  ;;  %393 = vst.msk [vmem:[#allocation2 + $0x71] sm:$0x1] %vm373_vm1, %v25393_v0  ;;  %v463_v19 = vld [vmem:[%s21680_s23 + $0x70] sm:$0xff]  ;;  %v464_v20 = vld [vmem:[%s21680_s23 + $0x78] sm:$0xff] }
  0x53   : > { %394 = vst.msk [vmem:[#allocation2 + $0x89] sm:$0x1] %vm373_vm1, %v25393_v0  ;;  %395 = vst.msk [vmem:[#allocation2 + $0xa1] sm:$0x1] %vm373_vm1, %v25393_v0  ;;  %v465_v21 = vld [vmem:[%s21680_s23 + $0x80] sm:$0xff]  ;;  %v466_v22 = vld [vmem:[%s21680_s23 + $0x88] sm:$0xff] }
  0x54   : > { %396 = vst.msk [vmem:[#allocation2 + $0xb9] sm:$0x1] %vm373_vm1, %v25393_v0  ;;  %397 = vst.msk [vmem:[#allocation2 + $0xd1] sm:$0x1] %vm373_vm1, %v25393_v0  ;;  %v467_v23 = vld [vmem:[%s21680_s23 + $0x90] sm:$0xff]  ;;  %v468_v24 = vld [vmem:[%s21680_s23 + $0x98] sm:$0xff] }
  0x55   : > { %398 = vst.msk [vmem:[#allocation2 + $0xe9] sm:$0x1] %vm373_vm1, %v25393_v0  ;;  %399 = vst.msk [vmem:[#allocation2 + $0x101] sm:$0x1] %vm373_vm1, %v25393_v0  ;;  %v469_v26 = vld [vmem:[%s21680_s23 + $0xa0] sm:$0xff]  ;;  %v470_v27 = vld [vmem:[%s21680_s23 + $0xa8] sm:$0xff] }
  0x56   : > { %400 = vst.msk [vmem:[#allocation2 + $0x119] sm:$0x1] %vm373_vm1, %v25393_v0  ;;  %401 = vst.msk [vmem:[#allocation2 + $0x131] sm:$0x1] %vm373_vm1, %v25393_v0  ;;  %v471_v29 = vld [vmem:[%s21680_s23 + $0xb0] sm:$0xff]  ;;  %v472_v30 = vld [vmem:[%s21680_s23 + $0xb8] sm:$0xff] }
  0x57   : > { %402 = vst.msk [vmem:[#allocation2 + $0x149] sm:$0x1] %vm373_vm1, %v25393_v0  ;;  %403 = vst.msk [vmem:[#allocation2 + $0x161] sm:$0x1] %vm373_vm1, %v25393_v0  ;;  %v473_v36 = vld [vmem:[%s21680_s23 + $0xc0] sm:$0xff]  ;;  %v474_v37 = vld [vmem:[%s21680_s23 + $0xc8] sm:$0xff] }
  0x58   : > { %404 = vst.msk [vmem:[#allocation2 + $0x179] sm:$0x1] %vm373_vm1, %v25393_v0  ;;  %405 = vst.msk [vmem:[#allocation2 + $0x191] sm:$0x1] %vm373_vm1, %v25393_v0  ;;  %v475_v38 = vld [vmem:[%s21680_s23 + $0xd0] sm:$0xff]  ;;  %v476_v39 = vld [vmem:[%s21680_s23 + $0xd8] sm:$0xff] }
  0x59   : > { %367 = vst.msk [vmem:[#allocation2 + $0x10] sm:$0x3] %vm366_vm2, %v25393_v0  ;;  %371 = vst.msk [vmem:[#allocation2 + $0x1a8] sm:$0x3] %vm366_vm2, %v25393_v0  ;;  %v477_v40 = vld [vmem:[%s21680_s23 + $0xe0] sm:$0xff]  ;;  %v478_v42 = vld [vmem:[%s21680_s23 + $0xe8] sm:$0xff] }
  0x5a   : > { %481 = vst.msk [vmem:[#allocation2 + $0x19] sm:$0xff] %vm363_vm0, %v449_v3  ;;  %482 = vst.msk [vmem:[#allocation2 + $0x21] sm:$0xff] %vm363_vm0, %v450_v6  ;;  %v906_v3 = vld [vmem:[#allocation2 + $0x1] sm:$0xff]  ;;  %v21879_v6 = vld [vmem:[%s25382_s1 + $0x18] sm:$0xff] }
  0x5b   : > { %483 = vst.msk [vmem:[#allocation2 + $0x31] sm:$0xff] %vm363_vm0, %v451_v7  ;;  %484 = vst.msk [vmem:[#allocation2 + $0x39] sm:$0xff] %vm363_vm0, %v452_v8 }
  0x5c   : > { %485 = vst.msk [vmem:[#allocation2 + $0x49] sm:$0xff] %vm363_vm0, %v453_v9  ;;  %486 = vst.msk [vmem:[#allocation2 + $0x51] sm:$0xff] %vm363_vm0, %v454_v10 }
  0x5d   : > { %487 = vst.msk [vmem:[#allocation2 + $0x61] sm:$0xff] %vm363_vm0, %v455_v11  ;;  %488 = vst.msk [vmem:[#allocation2 + $0x69] sm:$0xff] %vm363_vm0, %v456_v12 }
  0x5e   : > { %489 = vst.msk [vmem:[#allocation2 + $0x79] sm:$0xff] %vm363_vm0, %v457_v13  ;;  %490 = vst.msk [vmem:[#allocation2 + $0x81] sm:$0xff] %vm363_vm0, %v458_v14 }
  0x5f   : > { %491 = vst.msk [vmem:[#allocation2 + $0x91] sm:$0xff] %vm363_vm0, %v459_v15  ;;  %492 = vst.msk [vmem:[#allocation2 + $0x99] sm:$0xff] %vm363_vm0, %v460_v16 }
  0x60   : > { %493 = vst.msk [vmem:[#allocation2 + $0xa9] sm:$0xff] %vm363_vm0, %v461_v17  ;;  %494 = vst.msk [vmem:[#allocation2 + $0xb1] sm:$0xff] %vm363_vm0, %v462_v18  ;;  %v907_v4 = vld [vmem:[#allocation2 + $0x9] sm:$0xff] }
  0x61   : > { %495 = vst.msk [vmem:[#allocation2 + $0xc1] sm:$0xff] %vm363_vm0, %v463_v19  ;;  %496 = vst.msk [vmem:[#allocation2 + $0xc9] sm:$0xff] %vm363_vm0, %v464_v20  ;;  %v21727_v25 = vld [vmem:[#allocation2 + $0x18] sm:$0xff]  ;;  %v21736_v28 = vld [vmem:[#allocation2 + $0x20] sm:$0xff] }
  0x62   : > { %497 = vst.msk [vmem:[#allocation2 + $0xd9] sm:$0xff] %vm363_vm0, %v465_v21  ;;  %498 = vst.msk [vmem:[#allocation2 + $0xe1] sm:$0xff] %vm363_vm0, %v466_v22  ;;  %17588 = vmatprep.mubr.msk.f32.mxu0 %vm363_vm0, %v21727_v25  ;;  %v21744_v31 = vld [vmem:[#allocation2 + $0x30] sm:$0xff]  ;;  %v21750_v32 = vld [vmem:[#allocation2 + $0x38] sm:$0xff] }
  0x63   : > { %499 = vst.msk [vmem:[#allocation2 + $0xf1] sm:$0xff] %vm363_vm0, %v467_v23  ;;  %500 = vst.msk [vmem:[#allocation2 + $0xf9] sm:$0xff] %vm363_vm0, %v468_v24  ;;  %17589 = vmatmul.mubr.msk.f32.gmra.mrb[2].mxu0 %vm363_vm0, %v21736_v28  ;;  %v21752_v33 = vld [vmem:[#allocation2 + $0x48] sm:$0xff]  ;;  %v21758_v34 = vld [vmem:[#allocation2 + $0x50] sm:$0xff] }
  0x64   : > { %501 = vst.msk [vmem:[#allocation2 + $0x109] sm:$0xff] %vm363_vm0, %v469_v26  ;;  %502 = vst.msk [vmem:[#allocation2 + $0x111] sm:$0xff] %vm363_vm0, %v470_v27  ;;  %17591 = vmatprep.mubr.msk.f32.mxu0 %vm363_vm0, %v21744_v31  ;;  %v21760_v35 = vld [vmem:[#allocation2 + $0x60] sm:$0xff]  ;;  %v21773_v41 = vld [vmem:[#allocation2 + $0x68] sm:$0xff] }
  0x65   : > { %503 = vst.msk [vmem:[#allocation2 + $0x121] sm:$0xff] %vm363_vm0, %v471_v29  ;;  %504 = vst.msk [vmem:[#allocation2 + $0x129] sm:$0xff] %vm363_vm0, %v472_v30  ;;  %v21782_v44 = vld [vmem:[#allocation2 + $0x78] sm:$0xff]  ;;  %v21789_v45 = vld [vmem:[#allocation2 + $0x80] sm:$0xff] }
  0x66   : > { %505 = vst.msk [vmem:[#allocation2 + $0x139] sm:$0xff] %vm363_vm0, %v473_v36  ;;  %506 = vst.msk [vmem:[#allocation2 + $0x141] sm:$0xff] %vm363_vm0, %v474_v37  ;;  %v21791_v46 = vld [vmem:[#allocation2 + $0x90] sm:$0xff]  ;;  %v21797_v47 = vld [vmem:[#allocation2 + $0x98] sm:$0xff] }
  0x67   : > { %17592 = vmatmul.mubr.msk.f32.gmra.mrb[4].mxu0 %vm363_vm0, %v21750_v32  ;;  %507 = vst.msk [vmem:[#allocation2 + $0x151] sm:$0xff] %vm363_vm0, %v475_v38  ;;  %508 = vst.msk [vmem:[#allocation2 + $0x159] sm:$0xff] %vm363_vm0, %v476_v39  ;;  %v21799_v48 = vld [vmem:[#allocation2 + $0xa8] sm:$0xff]  ;;  %v21805_v49 = vld [vmem:[#allocation2 + $0xb0] sm:$0xff] }
  0x68   : > { %17594 = vmatprep.mubr.msk.f32.mxu0 %vm363_vm0, %v21752_v33  ;;  %509 = vst.msk [vmem:[#allocation2 + $0x169] sm:$0xff] %vm363_vm0, %v477_v40  ;;  %510 = vst.msk [vmem:[#allocation2 + $0x171] sm:$0xff] %vm363_vm0, %v478_v42  ;;  %v21807_v50 = vld [vmem:[#allocation2 + $0xc0] sm:$0xff]  ;;  %v21813_v51 = vld [vmem:[#allocation2 + $0xc8] sm:$0xff] }
  0x69   : > { %v21815_v52 = vld [vmem:[#allocation2 + $0xd8] sm:$0xff]  ;;  %v21821_v53 = vld [vmem:[#allocation2 + $0xe0] sm:$0xff]  ;;  %v21895_v10 = vld [vmem:[#allocation2 + $0x49] sm:$0xff] }
  0x6a   : > { %v21823_v54 = vld [vmem:[#allocation2 + $0xf0] sm:$0xff]  ;;  %v21829_v55 = vld [vmem:[#allocation2 + $0xf8] sm:$0xff]  ;;  %v21884_v7 = vld [vmem:[#allocation2 + $0x21] sm:$0xff] }
  0x6b   : > { %17595 = vmatmul.mubr.msk.f32.gmra.mrb[6].mxu0 %vm363_vm0, %v21758_v34  ;;  %v21831_v56 = vld [vmem:[#allocation2 + $0x108] sm:$0xff]  ;;  %v21837_v57 = vld [vmem:[#allocation2 + $0x110] sm:$0xff]  ;;  %v21874_v5 = vld [vmem:[#allocation2 + $0x19] sm:$0xff] }
  0x6c   : > { %17597 = vmatprep.mubr.msk.f32.mxu0 %vm363_vm0, %v21760_v35  ;;  %v21839_v58 = vld [vmem:[#allocation2 + $0x120] sm:$0xff]  ;;  %v21845_v59 = vld [vmem:[#allocation2 + $0x128] sm:$0xff]  ;;  %v21886_v8 = vld [vmem:[#allocation2 + $0x31] sm:$0xff] }
  0x6d   : > { %v21847_v60 = vld [vmem:[#allocation2 + $0x138] sm:$0xff]  ;;  %v21853_v61 = vld [vmem:[#allocation2 + $0x140] sm:$0xff]  ;;  %v21909_v13 = vld [vmem:[#allocation2 + $0x69] sm:$0xff] }
  0x6e   : > { %v21855_v62 = vld [vmem:[#allocation2 + $0x150] sm:$0xff]  ;;  %v21861_v63 = vld [vmem:[#allocation2 + $0x158] sm:$0xff]  ;;  %v21903_v12 = vld [vmem:[#allocation2 + $0x61] sm:$0xff] }
  0x6f   : > { %17598 = vmatmul.mubr.msk.f32.gmra.mrb[8].mxu0 %vm363_vm0, %v21773_v41  ;;  %v21863_v1 = vld [vmem:[#allocation2 + $0x168] sm:$0xff]  ;;  %v21869_v2 = vld [vmem:[#allocation2 + $0x170] sm:$0xff]  ;;  %v21893_v9 = vld [vmem:[#allocation2 + $0x39] sm:$0xff] }
  0x70   : > { %17600 = vmatprep.mubr.msk.f32.mxu0 %vm363_vm0, %v21782_v44  ;;  %v21901_v11 = vld [vmem:[#allocation2 + $0x51] sm:$0xff]  ;;  %v21911_v14 = vld [vmem:[#allocation2 + $0x79] sm:$0xff]  ;;  %v21917_v15 = vld [vmem:[#allocation2 + $0x81] sm:$0xff] }
  0x71   : > { %v21919_v16 = vld [vmem:[#allocation2 + $0x91] sm:$0xff]  ;;  %v21925_v17 = vld [vmem:[#allocation2 + $0x99] sm:$0xff]  ;;  %v21927_v18 = vld [vmem:[#allocation2 + $0xa9] sm:$0xff] }
  0x72   : > { %v21933_v19 = vld [vmem:[#allocation2 + $0xb1] sm:$0xff]  ;;  %v21935_v20 = vld [vmem:[#allocation2 + $0xc1] sm:$0xff]  ;;  %v21941_v21 = vld [vmem:[#allocation2 + $0xc9] sm:$0xff] }
  0x73   : > { %17601 = vmatmul.mubr.msk.f32.gmra.mrb[10].mxu0 %vm363_vm0, %v21789_v45  ;;  %v21943_v22 = vld [vmem:[#allocation2 + $0xd9] sm:$0xff]  ;;  %v21949_v23 = vld [vmem:[#allocation2 + $0xe1] sm:$0xff]  ;;  %v21951_v24 = vld [vmem:[#allocation2 + $0xf1] sm:$0xff] }
  0x74   : > { %17603 = vmatprep.mubr.msk.f32.mxu0 %vm363_vm0, %v21791_v46  ;;  %v21957_v26 = vld [vmem:[#allocation2 + $0xf9] sm:$0xff]  ;;  %v21959_v27 = vld [vmem:[#allocation2 + $0x109] sm:$0xff]  ;;  %v21965_v29 = vld [vmem:[#allocation2 + $0x111] sm:$0xff] }
  0x75   : > { %v21967_v30 = vld [vmem:[#allocation2 + $0x121] sm:$0xff]  ;;  %v21973_v36 = vld [vmem:[#allocation2 + $0x129] sm:$0xff]  ;;  %v21975_v37 = vld [vmem:[#allocation2 + $0x139] sm:$0xff] }
  0x76   : > { %25674 = vst [vmem:[#allocation10_spill] sm:$0xff] %v21967_v30  ;;  %25675 = vst [vmem:[#allocation11_spill] sm:$0xff] %v21973_v36  ;;  %v21981_v38 = vld [vmem:[#allocation2 + $0x141] sm:$0xff]  ;;  %v21983_v39 = vld [vmem:[#allocation2 + $0x151] sm:$0xff] }
  0x77   : > { %17604 = vmatmul.mubr.msk.f32.gmra.mrb[12].mxu0 %vm363_vm0, %v21797_v47  ;;  %25676 = vst [vmem:[#allocation12_spill] sm:$0xff] %v21975_v37  ;;  %25677 = vst [vmem:[#allocation13_spill] sm:$0xff] %v21981_v38  ;;  %v479_v40 = vld [vmem:[%s21680_s23 + $0xf0] sm:$0xff]  ;;  %v480_v42 = vld [vmem:[%s21680_s23 + $0xf8] sm:$0xff] }
  0x78   : > { %17606 = vmatprep.mubr.msk.f32.mxu0 %vm363_vm0, %v21799_v48  ;;  %25678 = vst [vmem:[#allocation14_spill] sm:$0xff] %v21983_v39  ;;  %511 = vst.msk [vmem:[#allocation2 + $0x181] sm:$0xff] %vm363_vm0, %v479_v40  ;;  %v1293_v40 = vld [vmem:[#allocation2 + $0x2] sm:$0xff]  ;;  %v22006_v0 = vld [vmem:[#allocation2 + $0x1a] sm:$0xff] }
  0x79   : > { %512 = vst.msk [vmem:[#allocation2 + $0x189] sm:$0xff] %vm363_vm0, %v480_v42  ;;  %v1294_v42 = vld [vmem:[#allocation2 + $0xa] sm:$0xff]  ;;  %25682 = vst [vmem:[#allocation18_spill] sm:$0xff] %v22006_v0 }
  0x7b   : > { %17607 = vmatmul.mubr.msk.f32.gmra.mrb[14].mxu0 %vm363_vm0, %v21805_v49 }
  0x7c   : > { %17609 = vmatprep.mubr.msk.f32.mxu0 %vm363_vm0, %v21807_v50 }
  0x7f   : > { %17610 = vmatmul.mubr.msk.f32.gmra.mrb[16].mxu0 %vm363_vm0, %v21813_v51 }
  0x80   : > { %17612 = vmatprep.mubr.msk.f32.mxu0 %vm363_vm0, %v21815_v52 }
  0x83   : > { %17613 = vmatmul.mubr.msk.f32.gmra.mrb[18].mxu0 %vm363_vm0, %v21821_v53 }
  0x84   : > { %17615 = vmatprep.mubr.msk.f32.mxu0 %vm363_vm0, %v21823_v54 }
  0x87   : > { %17616 = vmatmul.mubr.msk.f32.gmra.mrb[20].mxu0 %vm363_vm0, %v21829_v55 }
  0x88   : > { %17618 = vmatprep.mubr.msk.f32.mxu0 %vm363_vm0, %v21831_v56 }
  0x8b   : > { %17619 = vmatmul.mubr.msk.f32.gmra.mrb[22].mxu0 %vm363_vm0, %v21837_v57 }
  0x8c   : > { %17621 = vmatprep.mubr.msk.f32.mxu0 %vm363_vm0, %v21839_v58 }
  0x8f   : > { %17622 = vmatmul.mubr.msk.f32.gmra.mrb[24].mxu0 %vm363_vm0, %v21845_v59 }
  0x90   : > { %17624 = vmatprep.mubr.msk.f32.mxu0 %vm363_vm0, %v21847_v60 }
  0x93   : > { %17625 = vmatmul.mubr.msk.f32.gmra.mrb[26].mxu0 %vm363_vm0, %v21853_v61 }
  0x94   : > { %17627 = vmatprep.mubr.msk.f32.mxu0 %vm363_vm0, %v21855_v62 }
  0x97   : > { %17628 = vmatmul.mubr.msk.f32.gmra.mrb[28].mxu0 %vm363_vm0, %v21861_v63 }
  0x98   : > { %17630 = vmatprep.mubr.msk.f32.mxu0 %vm363_vm0, %v21863_v1 }
  0x9b   : > { %17631 = vmatmul.mubr.msk.f32.gmra.mrb[30].mxu0 %vm363_vm0, %v21869_v2 }
  0x9c   : > { %17635 = vmatprep.mubr.msk.f32.mxu0 %vm363_vm0, %v906_v3  ;;  %v21995_v3 = vld [vmem:[#allocation2 + $0x169] sm:$0xff] }
  0x9d   : > { %25680 = vst [vmem:[#allocation16_spill] sm:$0xff] %v21995_v3 }
  0x9f   : > { %17636 = vmatmul.mubr.msk.f32.vlgmr.msra.gmra.mrb[0].mxu0 %vm363_vm0, %v907_v4  ;;  %v22001_v4 = vld [vmem:[#allocation2 + $0x171] sm:$0xff] }
  0xa0   : > { %17684 = vmatpush3.msra.mxu0 %v15040_v43  ;;  %17638 = vmatprep.mubr.msk.f32.mxu0 %vm363_vm0, %v21874_v5  ;;  %v21993_v43 = vld [vmem:[#allocation2 + $0x159] sm:$0xff]  ;;  %25681 = vst [vmem:[#allocation17_spill] sm:$0xff] %v22001_v4 }
  0xa1   : > { %17733 = vmatprep.subr.mxu0 %v21879_v6  ;;  %25679 = vst [vmem:[#allocation15_spill] sm:$0xff] %v21993_v43 }
  0xa3   : > { %17639 = vmatmul.mubr.msk.f32.gmra.mrb[2].mxu0 %vm363_vm0, %v21884_v7 }
  0xa4   : > { %17641 = vmatprep.mubr.msk.f32.mxu0 %vm363_vm0, %v21886_v8 }
  0xa7   : > { %17642 = vmatmul.mubr.msk.f32.gmra.mrb[4].mxu0 %vm363_vm0, %v21893_v9 }
  0xa8   : > { %17644 = vmatprep.mubr.msk.f32.mxu0 %vm363_vm0, %v21895_v10 }
  0xab   : > { %17645 = vmatmul.mubr.msk.f32.gmra.mrb[6].mxu0 %vm363_vm0, %v21901_v11 }
  0xac   : > { %17647 = vmatprep.mubr.msk.f32.mxu0 %vm363_vm0, %v21903_v12 }
  0xaf   : > { %17648 = vmatmul.mubr.msk.f32.gmra.mrb[8].mxu0 %vm363_vm0, %v21909_v13 }
  0xb0   : > { %17650 = vmatprep.mubr.msk.f32.mxu0 %vm363_vm0, %v21911_v14 }
  0xb3   : > { %17651 = vmatmul.mubr.msk.f32.gmra.mrb[10].mxu0 %vm363_vm0, %v21917_v15 }
  0xb4   : > { %17653 = vmatprep.mubr.msk.f32.mxu0 %vm363_vm0, %v21919_v16 }
  0xb7   : > { %17654 = vmatmul.mubr.msk.f32.gmra.mrb[12].mxu0 %vm363_vm0, %v21925_v17 }
  0xb8   : > { %17656 = vmatprep.mubr.msk.f32.mxu0 %vm363_vm0, %v21927_v18 }
  0xbb   : > { %17657 = vmatmul.mubr.msk.f32.gmra.mrb[14].mxu0 %vm363_vm0, %v21933_v19 }
  0xbc   : > { %17659 = vmatprep.mubr.msk.f32.mxu0 %vm363_vm0, %v21935_v20 }
  0xbf   : > { %17660 = vmatmul.mubr.msk.f32.gmra.mrb[16].mxu0 %vm363_vm0, %v21941_v21 }
  0xc0   : > { %17662 = vmatprep.mubr.msk.f32.mxu0 %vm363_vm0, %v21943_v22 }
  0xc3   : > { %17663 = vmatmul.mubr.msk.f32.gmra.mrb[18].mxu0 %vm363_vm0, %v21949_v23 }
  0xc4   : > { %17665 = vmatprep.mubr.msk.f32.mxu0 %vm363_vm0, %v21951_v24 }
  0xc7   : > { %17666 = vmatmul.mubr.msk.f32.gmra.mrb[20].mxu0 %vm363_vm0, %v21957_v26 }
  0xc8   : > { %17668 = vmatprep.mubr.msk.f32.mxu0 %vm363_vm0, %v21959_v27 }
  0xcb   : > { %17669 = vmatmul.mubr.msk.f32.gmra.mrb[22].mxu0 %vm363_vm0, %v21965_v29 }
  0xcc   : > { %17671 = vmatprep.mubr.msk.f32.mxu0 %vm363_vm0, %v21967_v30 }
  0xcf   : > { %17672 = vmatmul.mubr.msk.f32.gmra.mrb[24].mxu0 %vm363_vm0, %v21973_v36 }
  0xd0   : > { %17674 = vmatprep.mubr.msk.f32.mxu0 %vm363_vm0, %v21975_v37 }
  0xd3   : > { %17675 = vmatmul.mubr.msk.f32.gmra.mrb[26].mxu0 %vm363_vm0, %v21981_v38 }
  0xd4   : > { %17677 = vmatprep.mubr.msk.f32.mxu0 %vm363_vm0, %v21983_v39  ;;  %v22011_v39 = vld [vmem:[%s25382_s1 + $0x20] sm:$0xff] }
  0xd7   : > { %17678 = vmatmul.mubr.msk.f32.gmra.mrb[28].mxu0 %vm363_vm0, %v21993_v43 }
  0xd8   : > { %17680 = vmatprep.mubr.msk.f32.mxu0 %vm363_vm0, %v21995_v3  ;;  %v22017_v3 = vld [vmem:[#allocation2 + $0x22] sm:$0xff] }
  0xd9   : > { %25683 = vst [vmem:[#allocation19_spill] sm:$0xff] %v22017_v3 }
  0xdb   : > { %17681 = vmatmul.mubr.msk.f32.gmra.mrb[30].mxu0 %vm363_vm0, %v22001_v4  ;;  %v22019_v4 = vld [vmem:[#allocation2 + $0x32] sm:$0xff] }
  0xdc   : > { %17685 = vmatprep.mubr.msk.f32.mxu0 %vm363_vm0, %v1293_v40  ;;  %25684 = vst [vmem:[#allocation20_spill] sm:$0xff] %v22019_v4  ;;  %v22026_v40 = vld [vmem:[#allocation2 + $0x3a] sm:$0xff] }
  0xdd   : > { %25685 = vst [vmem:[#allocation21_spill] sm:$0xff] %v22026_v40 }
  0xdf   : > { %17686 = vmatmul.mubr.msk.f32.vlgmr.msra.gmra.mrb[0].mxu0 %vm363_vm0, %v1294_v42  ;;  %v22028_v42 = vld [vmem:[#allocation2 + $0x4a] sm:$0xff] }
  0xe0   : > { %17734 = vmatpush3.msra.mxu0 %v21879_v6  ;;  %17688 = vmatprep.mubr.msk.f32.mxu0 %vm363_vm0, %v22006_v0  ;;  %25686 = vst [vmem:[#allocation22_spill] sm:$0xff] %v22028_v42  ;;  %v22034_v6 = vld [vmem:[#allocation2 + $0x52] sm:$0xff]  ;;  %v22036_v0 = vld [vmem:[#allocation2 + $0x62] sm:$0xff] }
  0xe1   : > { %17783 = vmatprep.subr.mxu0 %v22011_v39  ;;  %25687 = vst [vmem:[#allocation23_spill] sm:$0xff] %v22034_v6  ;;  %25688 = vst [vmem:[#allocation24_spill] sm:$0xff] %v22036_v0 }
  0xe3   : > { %17689 = vmatmul.mubr.msk.f32.gmra.mrb[2].mxu0 %vm363_vm0, %v22017_v3  ;;  %v22044_v3 = vld [vmem:[#allocation2 + $0x7a] sm:$0xff] }
  0xe4   : > { %17691 = vmatprep.mubr.msk.f32.mxu0 %vm363_vm0, %v22019_v4  ;;  %v22042_v4 = vld [vmem:[#allocation2 + $0x6a] sm:$0xff]  ;;  %25690 = vst [vmem:[#allocation26_spill] sm:$0xff] %v22044_v3 }
  0xe5   : > { %25689 = vst [vmem:[#allocation25_spill] sm:$0xff] %v22042_v4 }
  0xe7   : > { %17692 = vmatmul.mubr.msk.f32.gmra.mrb[4].mxu0 %vm363_vm0, %v22026_v40  ;;  %v22052_v40 = vld [vmem:[#allocation2 + $0x92] sm:$0xff] }
  0xe8   : > { %17694 = vmatprep.mubr.msk.f32.mxu0 %vm363_vm0, %v22028_v42  ;;  %v22050_v42 = vld [vmem:[#allocation2 + $0x82] sm:$0xff]  ;;  %25692 = vst [vmem:[#allocation28_spill] sm:$0xff] %v22052_v40 }
  0xe9   : > { %25691 = vst [vmem:[#allocation27_spill] sm:$0xff] %v22050_v42 }
  0xeb   : > { %17695 = vmatmul.mubr.msk.f32.gmra.mrb[6].mxu0 %vm363_vm0, %v22034_v6  ;;  %v22060_v6 = vld [vmem:[#allocation2 + $0xaa] sm:$0xff] }
  0xec   : > { %17697 = vmatprep.mubr.msk.f32.mxu0 %vm363_vm0, %v22036_v0  ;;  %v22058_v0 = vld [vmem:[#allocation2 + $0x9a] sm:$0xff]  ;;  %25694 = vst [vmem:[#allocation30_spill] sm:$0xff] %v22060_v6 }
  0xed   : > { %25693 = vst [vmem:[#allocation29_spill] sm:$0xff] %v22058_v0 }
  0xef   : > { %17698 = vmatmul.mubr.msk.f32.gmra.mrb[8].mxu0 %vm363_vm0, %v22042_v4  ;;  %v22068_v4 = vld [vmem:[#allocation2 + $0xc2] sm:$0xff] }
  0xf0   : > { %17700 = vmatprep.mubr.msk.f32.mxu0 %vm363_vm0, %v22044_v3  ;;  %v22066_v3 = vld [vmem:[#allocation2 + $0xb2] sm:$0xff]  ;;  %25696 = vst [vmem:[#allocation32_spill] sm:$0xff] %v22068_v4 }
  0xf1   : > { %25695 = vst [vmem:[#allocation31_spill] sm:$0xff] %v22066_v3 }
  0xf3   : > { %17701 = vmatmul.mubr.msk.f32.gmra.mrb[10].mxu0 %vm363_vm0, %v22050_v42  ;;  %v22076_v42 = vld [vmem:[#allocation2 + $0xda] sm:$0xff] }
  0xf4   : > { %17703 = vmatprep.mubr.msk.f32.mxu0 %vm363_vm0, %v22052_v40  ;;  %v22074_v40 = vld [vmem:[#allocation2 + $0xca] sm:$0xff]  ;;  %25698 = vst [vmem:[#allocation34_spill] sm:$0xff] %v22076_v42 }
  0xf5   : > { %25697 = vst [vmem:[#allocation33_spill] sm:$0xff] %v22074_v40 }
  0xf7   : > { %17704 = vmatmul.mubr.msk.f32.gmra.mrb[12].mxu0 %vm363_vm0, %v22058_v0  ;;  %v22084_v0 = vld [vmem:[#allocation2 + $0xf2] sm:$0xff] }
  0xf8   : > { %17706 = vmatprep.mubr.msk.f32.mxu0 %vm363_vm0, %v22060_v6  ;;  %v22082_v6 = vld [vmem:[#allocation2 + $0xe2] sm:$0xff]  ;;  %25700 = vst [vmem:[#allocation36_spill] sm:$0xff] %v22084_v0 }
  0xf9   : > { %25699 = vst [vmem:[#allocation35_spill] sm:$0xff] %v22082_v6 }
  0xfb   : > { %17707 = vmatmul.mubr.msk.f32.gmra.mrb[14].mxu0 %vm363_vm0, %v22066_v3  ;;  %v22092_v3 = vld [vmem:[#allocation2 + $0x10a] sm:$0xff] }
  0xfc   : > { %17709 = vmatprep.mubr.msk.f32.mxu0 %vm363_vm0, %v22068_v4  ;;  %v22090_v4 = vld [vmem:[#allocation2 + $0xfa] sm:$0xff]  ;;  %25702 = vst [vmem:[#allocation38_spill] sm:$0xff] %v22092_v3 }
  0xfd   : > { %25701 = vst [vmem:[#allocation37_spill] sm:$0xff] %v22090_v4 }
  0xff   : > { %17710 = vmatmul.mubr.msk.f32.gmra.mrb[16].mxu0 %vm363_vm0, %v22074_v40  ;;  %v22100_v40 = vld [vmem:[#allocation2 + $0x122] sm:$0xff] }
 0x100   : > { %17712 = vmatprep.mubr.msk.f32.mxu0 %vm363_vm0, %v22076_v42  ;;  %v22098_v42 = vld [vmem:[#allocation2 + $0x112] sm:$0xff]  ;;  %25704 = vst [vmem:[#allocation40_spill] sm:$0xff] %v22100_v40 }
 0x101   : > { %25703 = vst [vmem:[#allocation39_spill] sm:$0xff] %v22098_v42 }
 0x103   : > { %17713 = vmatmul.mubr.msk.f32.gmra.mrb[18].mxu0 %vm363_vm0, %v22082_v6  ;;  %v22108_v6 = vld [vmem:[#allocation2 + $0x13a] sm:$0xff] }
 0x104   : > { %17715 = vmatprep.mubr.msk.f32.mxu0 %vm363_vm0, %v22084_v0  ;;  %v22106_v0 = vld [vmem:[#allocation2 + $0x12a] sm:$0xff]  ;;  %25705 = vst [vmem:[#allocation41_spill] sm:$0xff] %v22108_v6 }
 0x107   : > { %17716 = vmatmul.mubr.msk.f32.gmra.mrb[20].mxu0 %vm363_vm0, %v22090_v4  ;;  %v22116_v4 = vld [vmem:[#allocation2 + $0x152] sm:$0xff] }
 0x108   : > { %17718 = vmatprep.mubr.msk.f32.mxu0 %vm363_vm0, %v22092_v3  ;;  %v22114_v3 = vld [vmem:[#allocation2 + $0x142] sm:$0xff]  ;;  %25706 = vst [vmem:[#allocation42_spill] sm:$0xff] %v22116_v4 }
 0x10b   : > { %17719 = vmatmul.mubr.msk.f32.gmra.mrb[22].mxu0 %vm363_vm0, %v22098_v42  ;;  %v22124_v42 = vld [vmem:[#allocation2 + $0x16a] sm:$0xff] }
 0x10c   : > { %17721 = vmatprep.mubr.msk.f32.mxu0 %vm363_vm0, %v22100_v40  ;;  %v22122_v40 = vld [vmem:[#allocation2 + $0x15a] sm:$0xff]  ;;  %25707 = vst [vmem:[#allocation43_spill] sm:$0xff] %v22124_v42 }
 0x10f   : > { %17722 = vmatmul.mubr.msk.f32.gmra.mrb[24].mxu0 %vm363_vm0, %v22106_v0 }
 0x110   : > { %17724 = vmatprep.mubr.msk.f32.mxu0 %vm363_vm0, %v22108_v6  ;;  %v22130_v6 = vld [vmem:[#allocation2 + $0x172] sm:$0xff] }
 0x113   : > { %17725 = vmatmul.mubr.msk.f32.gmra.mrb[26].mxu0 %vm363_vm0, %v22114_v3 }
 0x114   : > { %17727 = vmatprep.mubr.msk.f32.mxu0 %vm363_vm0, %v22116_v4  ;;  %v15139_v4 = vld [vmem:[%s25382_s1 + $0x28] sm:$0xff] }
 0x117   : > { %17728 = vmatmul.mubr.msk.f32.gmra.mrb[28].mxu0 %vm363_vm0, %v22122_v40 }
 0x118   : > { %17730 = vmatprep.mubr.msk.f32.mxu0 %vm363_vm0, %v22124_v42 }
 0x11b   : > { %17731 = vmatmul.mubr.msk.f32.gmra.mrb[30].mxu0 %vm363_vm0, %v22130_v6 }
 0x11c   : > { %17735 = vmatprep.mubr.msk.f32.mxu0 %vm363_vm0, %v21727_v25  ;;  %v22196_v25 = vld [vmem:[#allocation2 + $0x180] sm:$0xff] }
 0x11f   : > { %17736 = vmatmul.mubr.msk.f32.vlgmr.msra.gmra.mrb[0].mxu0 %vm363_vm0, %v21736_v28  ;;  %v22202_v28 = vld [vmem:[#allocation2 + $0x188] sm:$0xff] }
 0x120   : > { %17784 = vmatpush3.msra.mxu0 %v22011_v39  ;;  %17738 = vmatprep.mubr.msk.f32.mxu0 %vm363_vm0, %v21744_v31  ;;  %v15172_v39 = vld [vmem:[%s25382_s1 + $0x30] sm:$0xff] }
 0x121   : > { %17833 = vmatprep.subr.mxu0 %v15139_v4 }
 0x123   : > { %17739 = vmatmul.mubr.msk.f32.gmra.mrb[2].mxu0 %vm363_vm0, %v21750_v32 }
 0x124   : > { %17741 = vmatprep.mubr.msk.f32.mxu0 %vm363_vm0, %v21752_v33 }
 0x127   : > { %17742 = vmatmul.mubr.msk.f32.gmra.mrb[4].mxu0 %vm363_vm0, %v21758_v34 }
 0x128   : > { %17744 = vmatprep.mubr.msk.f32.mxu0 %vm363_vm0, %v21760_v35 }
 0x12b   : > { %17745 = vmatmul.mubr.msk.f32.gmra.mrb[6].mxu0 %vm363_vm0, %v21773_v41 }
 0x12c   : > { %17747 = vmatprep.mubr.msk.f32.mxu0 %vm363_vm0, %v21782_v44 }
 0x12f   : > { %17748 = vmatmul.mubr.msk.f32.gmra.mrb[8].mxu0 %vm363_vm0, %v21789_v45 }
 0x130   : > { %17750 = vmatprep.mubr.msk.f32.mxu0 %vm363_vm0, %v21791_v46 }
 0x133   : > { %17751 = vmatmul.mubr.msk.f32.gmra.mrb[10].mxu0 %vm363_vm0, %v21797_v47 }
 0x134   : > { %17753 = vmatprep.mubr.msk.f32.mxu0 %vm363_vm0, %v21799_v48 }
 0x137   : > { %17754 = vmatmul.mubr.msk.f32.gmra.mrb[12].mxu0 %vm363_vm0, %v21805_v49 }
 0x138   : > { %17756 = vmatprep.mubr.msk.f32.mxu0 %vm363_vm0, %v21807_v50 }
 0x13b   : > { %17757 = vmatmul.mubr.msk.f32.gmra.mrb[14].mxu0 %vm363_vm0, %v21813_v51 }
 0x13c   : > { %17759 = vmatprep.mubr.msk.f32.mxu0 %vm363_vm0, %v21815_v52 }
 0x13f   : > { %17760 = vmatmul.mubr.msk.f32.gmra.mrb[16].mxu0 %vm363_vm0, %v21821_v53 }
 0x140   : > { %17762 = vmatprep.mubr.msk.f32.mxu0 %vm363_vm0, %v21823_v54 }
 0x143   : > { %17763 = vmatmul.mubr.msk.f32.gmra.mrb[18].mxu0 %vm363_vm0, %v21829_v55 }
 0x144   : > { %17765 = vmatprep.mubr.msk.f32.mxu0 %vm363_vm0, %v21831_v56 }
 0x147   : > { %17766 = vmatmul.mubr.msk.f32.gmra.mrb[20].mxu0 %vm363_vm0, %v21837_v57 }
 0x148   : > { %17768 = vmatprep.mubr.msk.f32.mxu0 %vm363_vm0, %v21839_v58 }
 0x14b   : > { %17769 = vmatmul.mubr.msk.f32.gmra.mrb[22].mxu0 %vm363_vm0, %v21845_v59 }
 0x14c   : > { %17771 = vmatprep.mubr.msk.f32.mxu0 %vm363_vm0, %v21847_v60 }
 0x14f   : > { %17772 = vmatmul.mubr.msk.f32.gmra.mrb[24].mxu0 %vm363_vm0, %v21853_v61 }
 0x150   : > { %17774 = vmatprep.mubr.msk.f32.mxu0 %vm363_vm0, %v21855_v62 }
 0x153   : > { %17775 = vmatmul.mubr.msk.f32.gmra.mrb[26].mxu0 %vm363_vm0, %v21861_v63 }
 0x154   : > { %17777 = vmatprep.mubr.msk.f32.mxu0 %vm363_vm0, %v21863_v1 }
 0x157   : > { %17778 = vmatmul.mubr.msk.f32.gmra.mrb[28].mxu0 %vm363_vm0, %v21869_v2 }
 0x158   : > { %17780 = vmatprep.mubr.msk.f32.mxu0 %vm363_vm0, %v22196_v25 }
 0x15b   : > { %17781 = vmatmul.mubr.msk.f32.gmra.mrb[30].mxu0 %vm363_vm0, %v22202_v28 }
 0x15c   : > { %17785 = vmatprep.mubr.msk.f32.mxu0 %vm363_vm0, %v21874_v5  ;;  %v25708_v5 = vld [vmem:[#allocation14_spill] sm:$0xff] }
 0x15f   : > { %17786 = vmatmul.mubr.msk.f32.vlgmr.msra.gmra.mrb[0].mxu0 %vm363_vm0, %v21884_v7  ;;  %v25709_v7 = vld [vmem:[#allocation16_spill] sm:$0xff] }
 0x160   : > { %17834 = vmatpush3.msra.mxu0 %v15139_v4  ;;  %17788 = vmatprep.mubr.msk.f32.mxu0 %vm363_vm0, %v21886_v8  ;;  %v22267_v4 = vld [vmem:[#allocation2 + $0x181] sm:$0xff] }
 0x161   : > { %17883 = vmatprep.subr.mxu0 %v15172_v39  ;;  %25710 = vst [vmem:[#allocation44_spill] sm:$0xff] %v22267_v4 }
 0x163   : > { %17789 = vmatmul.mubr.msk.f32.gmra.mrb[2].mxu0 %vm363_vm0, %v21893_v9 }
 0x164   : > { %17791 = vmatprep.mubr.msk.f32.mxu0 %vm363_vm0, %v21895_v10 }
 0x167   : > { %17792 = vmatmul.mubr.msk.f32.gmra.mrb[4].mxu0 %vm363_vm0, %v21901_v11 }
 0x168   : > { %17794 = vmatprep.mubr.msk.f32.mxu0 %vm363_vm0, %v21903_v12 }
 0x16b   : > { %17795 = vmatmul.mubr.msk.f32.gmra.mrb[6].mxu0 %vm363_vm0, %v21909_v13 }
 0x16c   : > { %17797 = vmatprep.mubr.msk.f32.mxu0 %vm363_vm0, %v21911_v14 }
 0x16f   : > { %17798 = vmatmul.mubr.msk.f32.gmra.mrb[8].mxu0 %vm363_vm0, %v21917_v15 }
 0x170   : > { %17800 = vmatprep.mubr.msk.f32.mxu0 %vm363_vm0, %v21919_v16 }
 0x173   : > { %17801 = vmatmul.mubr.msk.f32.gmra.mrb[10].mxu0 %vm363_vm0, %v21925_v17 }
 0x174   : > { %17803 = vmatprep.mubr.msk.f32.mxu0 %vm363_vm0, %v21927_v18 }
 0x177   : > { %17804 = vmatmul.mubr.msk.f32.gmra.mrb[12].mxu0 %vm363_vm0, %v21933_v19 }
 0x178   : > { %17806 = vmatprep.mubr.msk.f32.mxu0 %vm363_vm0, %v21935_v20 }
 0x17b   : > { %17807 = vmatmul.mubr.msk.f32.gmra.mrb[14].mxu0 %vm363_vm0, %v21941_v21 }
 0x17c   : > { %17809 = vmatprep.mubr.msk.f32.mxu0 %vm363_vm0, %v21943_v22 }
 0x17f   : > { %17810 = vmatmul.mubr.msk.f32.gmra.mrb[16].mxu0 %vm363_vm0, %v21949_v23 }
 0x180   : > { %17812 = vmatprep.mubr.msk.f32.mxu0 %vm363_vm0, %v21951_v24 }
 0x183   : > { %17813 = vmatmul.mubr.msk.f32.gmra.mrb[18].mxu0 %vm363_vm0, %v21957_v26 }
 0x184   : > { %17815 = vmatprep.mubr.msk.f32.mxu0 %vm363_vm0, %v21959_v27 }
 0x187   : > { %17816 = vmatmul.mubr.msk.f32.gmra.mrb[20].mxu0 %vm363_vm0, %v21965_v29 }
 0x188   : > { %17818 = vmatprep.mubr.msk.f32.mxu0 %vm363_vm0, %v21967_v30  ;;  %v25711_v30 = vld [vmem:[#allocation17_spill] sm:$0xff] }
 0x18b   : > { %17819 = vmatmul.mubr.msk.f32.gmra.mrb[22].mxu0 %vm363_vm0, %v21973_v36  ;;  %v25720_v36 = vld [vmem:[#allocation25_spill] sm:$0xff] }
 0x18c   : > { %17821 = vmatprep.mubr.msk.f32.mxu0 %vm363_vm0, %v21975_v37  ;;  %v22273_v37 = vld [vmem:[#allocation2 + $0x189] sm:$0xff] }
 0x18d   : > { %25712 = vst [vmem:[#allocation45_spill] sm:$0xff] %v22273_v37 }
 0x18f   : > { %17822 = vmatmul.mubr.msk.f32.gmra.mrb[24].mxu0 %vm363_vm0, %v21981_v38  ;;  %v25717_v38 = vld [vmem:[#allocation22_spill] sm:$0xff] }
 0x190   : > { %17824 = vmatprep.mubr.msk.f32.mxu0 %vm363_vm0, %v25708_v5  ;;  %v25713_v5 = vld [vmem:[#allocation18_spill] sm:$0xff] }
 0x193   : > { %17825 = vmatmul.mubr.msk.f32.gmra.mrb[26].mxu0 %vm363_vm0, %v21993_v43  ;;  %v25714_v43 = vld [vmem:[#allocation19_spill] sm:$0xff] }
 0x194   : > { %17827 = vmatprep.mubr.msk.f32.mxu0 %vm363_vm0, %v25709_v7  ;;  %v15205_v7 = vld [vmem:[%s25382_s1 + $0x38] sm:$0xff] }
 0x197   : > { %17828 = vmatmul.mubr.msk.f32.gmra.mrb[28].mxu0 %vm363_vm0, %v25711_v30  ;;  %v25715_v30 = vld [vmem:[#allocation20_spill] sm:$0xff] }
 0x198   : > { %17830 = vmatprep.mubr.msk.f32.mxu0 %vm363_vm0, %v22267_v4  ;;  %v25716_v4 = vld [vmem:[#allocation21_spill] sm:$0xff] }
 0x19b   : > { %17831 = vmatmul.mubr.msk.f32.gmra.mrb[30].mxu0 %vm363_vm0, %v22273_v37  ;;  %v25718_v37 = vld [vmem:[#allocation23_spill] sm:$0xff] }
 0x19c   : > { %17835 = vmatprep.mubr.msk.f32.mxu0 %vm363_vm0, %v25713_v5  ;;  %v25719_v5 = vld [vmem:[#allocation24_spill] sm:$0xff] }
 0x19f   : > { %17836 = vmatmul.mubr.msk.f32.vlgmr.msra.gmra.mrb[0].mxu0 %vm363_vm0, %v25714_v43  ;;  %v25721_v43 = vld [vmem:[#allocation26_spill] sm:$0xff] }
 0x1a0   : > { %17884 = vmatpush3.msra.mxu0 %v15172_v39  ;;  %17838 = vmatprep.mubr.msk.f32.mxu0 %vm363_vm0, %v25715_v30  ;;  %v25722_v39 = vld [vmem:[#allocation27_spill] sm:$0xff]  ;;  %v25723_v30 = vld [vmem:[#allocation28_spill] sm:$0xff] }
 0x1a1   : > { %17933 = vmatprep.subr.mxu0 %v15205_v7 }
 0x1a3   : > { %17839 = vmatmul.mubr.msk.f32.gmra.mrb[2].mxu0 %vm363_vm0, %v25716_v4  ;;  %v25724_v4 = vld [vmem:[#allocation29_spill] sm:$0xff] }
 0x1a4   : > { %17841 = vmatprep.mubr.msk.f32.mxu0 %vm363_vm0, %v25717_v38  ;;  %v25725_v38 = vld [vmem:[#allocation30_spill] sm:$0xff] }
 0x1a7   : > { %17842 = vmatmul.mubr.msk.f32.gmra.mrb[4].mxu0 %vm363_vm0, %v25718_v37  ;;  %v25726_v37 = vld [vmem:[#allocation31_spill] sm:$0xff] }
 0x1a8   : > { %17844 = vmatprep.mubr.msk.f32.mxu0 %vm363_vm0, %v25719_v5  ;;  %v25727_v5 = vld [vmem:[#allocation32_spill] sm:$0xff] }
 0x1ab   : > { %17845 = vmatmul.mubr.msk.f32.gmra.mrb[6].mxu0 %vm363_vm0, %v25720_v36  ;;  %v25728_v36 = vld [vmem:[#allocation33_spill] sm:$0xff] }
 0x1ac   : > { %17847 = vmatprep.mubr.msk.f32.mxu0 %vm363_vm0, %v25721_v43  ;;  %v25729_v43 = vld [vmem:[#allocation34_spill] sm:$0xff] }
 0x1af   : > { %17848 = vmatmul.mubr.msk.f32.gmra.mrb[8].mxu0 %vm363_vm0, %v25722_v39  ;;  %v25730_v39 = vld [vmem:[#allocation35_spill] sm:$0xff] }
 0x1b0   : > { %17850 = vmatprep.mubr.msk.f32.mxu0 %vm363_vm0, %v25723_v30  ;;  %v25731_v30 = vld [vmem:[#allocation36_spill] sm:$0xff] }
 0x1b3   : > { %17851 = vmatmul.mubr.msk.f32.gmra.mrb[10].mxu0 %vm363_vm0, %v25724_v4  ;;  %v25732_v4 = vld [vmem:[#allocation37_spill] sm:$0xff] }
 0x1b4   : > { %17853 = vmatprep.mubr.msk.f32.mxu0 %vm363_vm0, %v25725_v38  ;;  %v25733_v38 = vld [vmem:[#allocation38_spill] sm:$0xff] }
 0x1b7   : > { %17854 = vmatmul.mubr.msk.f32.gmra.mrb[12].mxu0 %vm363_vm0, %v25726_v37  ;;  %v25734_v37 = vld [vmem:[#allocation39_spill] sm:$0xff] }
 0x1b8   : > { %17856 = vmatprep.mubr.msk.f32.mxu0 %vm363_vm0, %v25727_v5  ;;  %v25735_v5 = vld [vmem:[#allocation40_spill] sm:$0xff] }
 0x1bb   : > { %17857 = vmatmul.mubr.msk.f32.gmra.mrb[14].mxu0 %vm363_vm0, %v25728_v36 }
 0x1bc   : > { %17859 = vmatprep.mubr.msk.f32.mxu0 %vm363_vm0, %v25729_v43  ;;  %v25736_v43 = vld [vmem:[#allocation41_spill] sm:$0xff] }
 0x1bf   : > { %17860 = vmatmul.mubr.msk.f32.gmra.mrb[16].mxu0 %vm363_vm0, %v25730_v39 }
 0x1c0   : > { %17862 = vmatprep.mubr.msk.f32.mxu0 %vm363_vm0, %v25731_v30  ;;  %v25737_v30 = vld [vmem:[#allocation42_spill] sm:$0xff] }
 0x1c3   : > { %17863 = vmatmul.mubr.msk.f32.gmra.mrb[18].mxu0 %vm363_vm0, %v25732_v4 }
 0x1c4   : > { %17865 = vmatprep.mubr.msk.f32.mxu0 %vm363_vm0, %v25733_v38 }
 0x1c7   : > { %17866 = vmatmul.mubr.msk.f32.gmra.mrb[20].mxu0 %vm363_vm0, %v25734_v37  ;;  %v22338_v37 = vld [vmem:[#allocation2 + $0x182] sm:$0xff] }
 0x1c8   : > { %17868 = vmatprep.mubr.msk.f32.mxu0 %vm363_vm0, %v25735_v5 }
 0x1cb   : > { %17869 = vmatmul.mubr.msk.f32.gmra.mrb[22].mxu0 %vm363_vm0, %v22106_v0 }
 0x1cc   : > { %17871 = vmatprep.mubr.msk.f32.mxu0 %vm363_vm0, %v25736_v43  ;;  %v22344_v43 = vld [vmem:[#allocation2 + $0x18a] sm:$0xff] }
 0x1cf   : > { %17872 = vmatmul.mubr.msk.f32.gmra.mrb[24].mxu0 %vm363_vm0, %v22114_v3 }
 0x1d0   : > { %17874 = vmatprep.mubr.msk.f32.mxu0 %vm363_vm0, %v25737_v30 }
 0x1d3   : > { %17875 = vmatmul.mubr.msk.f32.gmra.mrb[26].mxu0 %vm363_vm0, %v22122_v40 }
 0x1d4   : > { %17877 = vmatprep.mubr.msk.f32.mxu0 %vm363_vm0, %v22124_v42  ;;  %v15238_v42 = vld [vmem:[%s25382_s1 + $0x40] sm:$0xff] }
 0x1d7   : > { %17878 = vmatmul.mubr.msk.f32.gmra.mrb[28].mxu0 %vm363_vm0, %v22130_v6 }
 0x1d8   : > { %17880 = vmatprep.mubr.msk.f32.mxu0 %vm363_vm0, %v22338_v37 }
 0x1db   : > { %17881 = vmatmul.mubr.msk.f32.gmra.mrb[30].mxu0 %vm363_vm0, %v22344_v43 }
 0x1dc   : > { %17885 = vmatprep.mubr.msk.f32.mxu0 %vm363_vm0, %v21744_v31  ;;  %v2872_v31 = vld [vmem:[#allocation2 + $0x198] sm:$0xff] }
 0x1df   : > { %17886 = vmatmul.mubr.msk.f32.vlgmr.msra.gmra.mrb[0].mxu0 %vm363_vm0, %v21750_v32  ;;  %v2873_v32 = vld [vmem:[#allocation2 + $0x1a0] sm:$0xff] }
 0x1e0   : > { %17934 = vmatpush3.msra.mxu0 %v15205_v7  ;;  %17888 = vmatprep.mubr.msk.f32.mxu0 %vm363_vm0, %v21752_v33  ;;  %v4106_v33 = vld [vmem:[%s25384_s3] sm:$0xff]  ;;  %v15311_v7 = vld [vmem:[%s25384_s3 + $0x78] sm:$0xff] }
 0x1e1   : > { %17983 = vmatprep.subr.mxu0 %v15238_v42 }
 0x1e3   : > { %17889 = vmatmul.mubr.msk.f32.gmra.mrb[2].mxu0 %vm363_vm0, %v21758_v34  ;;  %v4107_v34 = vld [vmem:[%s25384_s3 + $0x8] sm:$0xff] }
 0x1e4   : > { %17891 = vmatprep.mubr.msk.f32.mxu0 %vm363_vm0, %v21760_v35  ;;  %v4108_v35 = vld [vmem:[%s25384_s3 + $0x10] sm:$0xff] }
 0x1e7   : > { %17892 = vmatmul.mubr.msk.f32.gmra.mrb[4].mxu0 %vm363_vm0, %v21773_v41  ;;  %v19761_v41 = vpack.c.bf16 %v4107_v34, %v4106_v33 }
 0x1e8   : > { %17894 = vmatprep.mubr.msk.f32.mxu0 %vm363_vm0, %v21782_v44  ;;  %v4109_v44 = vld [vmem:[%s25384_s3 + $0x18] sm:$0xff] }
 0x1e9   : > { %19762 = vmatprep.subr.bf16.mxu1 %v19761_v41 }
 0x1ea   : > { %19764 = vmatpush3.bf16.msra.mxu1 %v19761_v41 }
 0x1eb   : > { %17895 = vmatmul.mubr.msk.f32.gmra.mrb[6].mxu0 %vm363_vm0, %v21789_v45  ;;  %v25738_v45 = vmov 0.0  }
 0x1ec   : > { %17897 = vmatprep.mubr.msk.f32.mxu0 %vm363_vm0, %v21791_v46  ;;  %407 = vst.msk [vmem:[#allocation3] sm:$0xff] %vm406_vm3, %v25738_v45  ;;  %408 = vst.msk [vmem:[#allocation3 + $0x8] sm:$0xff] %vm406_vm3, %v25738_v45  ;;  %v19765_v46 = vpack.c.bf16 %v4109_v44, %v4108_v35 }
 0x1ed   : > { %412 = vst.msk [vmem:[#allocation3 + $0x198] sm:$0xff] %vm406_vm3, %v25738_v45  ;;  %413 = vst.msk [vmem:[#allocation3 + $0x1a0] sm:$0xff] %vm406_vm3, %v25738_v45 }
 0x1ee   : > { %19766 = vmatprep.subr.bf16.mxu1 %v19765_v46  ;;  %417 = vst.msk [vmem:[#allocation3 + $0x18] sm:$0x1] %vm416_vm4, %v25738_v45  ;;  %418 = vst.msk [vmem:[#allocation3 + $0x30] sm:$0x1] %vm416_vm4, %v25738_v45 }
 0x1ef   : > { %17898 = vmatmul.mubr.msk.f32.gmra.mrb[8].mxu0 %vm363_vm0, %v21797_v47  ;;  %19768 = vmatpush3.bf16.msra.mxu1 %v19765_v46  ;;  %v25739_v47 = vld [vmem:[#allocation10_spill] sm:$0xff]  ;;  %419 = vst.msk [vmem:[#allocation3 + $0x48] sm:$0x1] %vm416_vm4, %v25738_v45  ;;  %420 = vst.msk [vmem:[#allocation3 + $0x60] sm:$0x1] %vm416_vm4, %v25738_v45 }
 0x1f0   : > { %17900 = vmatprep.mubr.msk.f32.mxu0 %vm363_vm0, %v21799_v48  ;;  %v25740_v48 = vld [vmem:[#allocation11_spill] sm:$0xff]  ;;  %421 = vst.msk [vmem:[#allocation3 + $0x78] sm:$0x1] %vm416_vm4, %v25738_v45  ;;  %422 = vst.msk [vmem:[#allocation3 + $0x90] sm:$0x1] %vm416_vm4, %v25738_v45 }
 0x1f1   : > { %423 = vst.msk [vmem:[#allocation3 + $0xa8] sm:$0x1] %vm416_vm4, %v25738_v45  ;;  %424 = vst.msk [vmem:[#allocation3 + $0xc0] sm:$0x1] %vm416_vm4, %v25738_v45 }
 0x1f2   : > { %425 = vst.msk [vmem:[#allocation3 + $0xd8] sm:$0x1] %vm416_vm4, %v25738_v45  ;;  %426 = vst.msk [vmem:[#allocation3 + $0xf0] sm:$0x1] %vm416_vm4, %v25738_v45 }
 0x1f3   : > { %17901 = vmatmul.mubr.msk.f32.gmra.mrb[10].mxu0 %vm363_vm0, %v21805_v49  ;;  %v25741_v49 = vld [vmem:[#allocation12_spill] sm:$0xff]  ;;  %427 = vst.msk [vmem:[#allocation3 + $0x108] sm:$0x1] %vm416_vm4, %v25738_v45  ;;  %428 = vst.msk [vmem:[#allocation3 + $0x120] sm:$0x1] %vm416_vm4, %v25738_v45 }
 0x1f4   : > { %17903 = vmatprep.mubr.msk.f32.mxu0 %vm363_vm0, %v21807_v50  ;;  %v25742_v50 = vld [vmem:[#allocation13_spill] sm:$0xff]  ;;  %429 = vst.msk [vmem:[#allocation3 + $0x138] sm:$0x1] %vm416_vm4, %v25738_v45  ;;  %430 = vst.msk [vmem:[#allocation3 + $0x150] sm:$0x1] %vm416_vm4, %v25738_v45 }
 0x1f5   : > { %431 = vst.msk [vmem:[#allocation3 + $0x168] sm:$0x1] %vm416_vm4, %v25738_v45  ;;  %432 = vst.msk [vmem:[#allocation3 + $0x180] sm:$0x1] %vm416_vm4, %v25738_v45 }
 0x1f6   : > { %433 = vst.msk [vmem:[#allocation3 + $0x29] sm:$0x1] %vm416_vm4, %v25738_v45  ;;  %434 = vst.msk [vmem:[#allocation3 + $0x41] sm:$0x1] %vm416_vm4, %v25738_v45 }
 0x1f7   : > { %17904 = vmatmul.mubr.msk.f32.gmra.mrb[12].mxu0 %vm363_vm0, %v21813_v51  ;;  %v25743_v51 = vld [vmem:[#allocation14_spill] sm:$0xff]  ;;  %435 = vst.msk [vmem:[#allocation3 + $0x59] sm:$0x1] %vm416_vm4, %v25738_v45  ;;  %436 = vst.msk [vmem:[#allocation3 + $0x71] sm:$0x1] %vm416_vm4, %v25738_v45 }
 0x1f8   : > { %17906 = vmatprep.mubr.msk.f32.mxu0 %vm363_vm0, %v21815_v52  ;;  %v25744_v52 = vld [vmem:[#allocation15_spill] sm:$0xff]  ;;  %437 = vst.msk [vmem:[#allocation3 + $0x89] sm:$0x1] %vm416_vm4, %v25738_v45  ;;  %438 = vst.msk [vmem:[#allocation3 + $0xa1] sm:$0x1] %vm416_vm4, %v25738_v45 }
 0x1f9   : > { %439 = vst.msk [vmem:[#allocation3 + $0xb9] sm:$0x1] %vm416_vm4, %v25738_v45  ;;  %440 = vst.msk [vmem:[#allocation3 + $0xd1] sm:$0x1] %vm416_vm4, %v25738_v45 }
 0x1fa   : > { %441 = vst.msk [vmem:[#allocation3 + $0xe9] sm:$0x1] %vm416_vm4, %v25738_v45  ;;  %442 = vst.msk [vmem:[#allocation3 + $0x101] sm:$0x1] %vm416_vm4, %v25738_v45 }
 0x1fb   : > { %17907 = vmatmul.mubr.msk.f32.gmra.mrb[14].mxu0 %vm363_vm0, %v21821_v53  ;;  %v25745_v53 = vld [vmem:[#allocation16_spill] sm:$0xff]  ;;  %443 = vst.msk [vmem:[#allocation3 + $0x119] sm:$0x1] %vm416_vm4, %v25738_v45  ;;  %444 = vst.msk [vmem:[#allocation3 + $0x131] sm:$0x1] %vm416_vm4, %v25738_v45 }
 0x1fc   : > { %17909 = vmatprep.mubr.msk.f32.mxu0 %vm363_vm0, %v21823_v54  ;;  %v25746_v54 = vld [vmem:[#allocation17_spill] sm:$0xff]  ;;  %445 = vst.msk [vmem:[#allocation3 + $0x149] sm:$0x1] %vm416_vm4, %v25738_v45  ;;  %446 = vst.msk [vmem:[#allocation3 + $0x161] sm:$0x1] %vm416_vm4, %v25738_v45 }
 0x1fd   : > { %447 = vst.msk [vmem:[#allocation3 + $0x179] sm:$0x1] %vm416_vm4, %v25738_v45  ;;  %448 = vst.msk [vmem:[#allocation3 + $0x191] sm:$0x1] %vm416_vm4, %v25738_v45 }
 0x1fe   : > { %410 = vst.msk [vmem:[#allocation3 + $0x10] sm:$0x3] %vm409_vm5, %v25738_v45  ;;  %414 = vst.msk [vmem:[#allocation3 + $0x1a8] sm:$0x3] %vm409_vm5, %v25738_v45 }
 0x1ff   : > { %17910 = vmatmul.mubr.msk.f32.gmra.mrb[16].mxu0 %vm363_vm0, %v21829_v55  ;;  %v25747_v55 = vld [vmem:[#allocation44_spill] sm:$0xff] }
 0x200   : > { %17912 = vmatprep.mubr.msk.f32.mxu0 %vm363_vm0, %v21831_v56  ;;  %v3259_v56 = vld [vmem:[#allocation2 + $0x199] sm:$0xff] }
 0x203   : > { %17913 = vmatmul.mubr.msk.f32.gmra.mrb[18].mxu0 %vm363_vm0, %v21837_v57  ;;  %v25748_v57 = vld [vmem:[#allocation45_spill] sm:$0xff] }
 0x204   : > { %17915 = vmatprep.mubr.msk.f32.mxu0 %vm363_vm0, %v21839_v58  ;;  %v3260_v58 = vld [vmem:[#allocation2 + $0x1a1] sm:$0xff] }
 0x207   : > { %17916 = vmatmul.mubr.msk.f32.gmra.mrb[20].mxu0 %vm363_vm0, %v21845_v59  ;;  %v25749_v59 = vld [vmem:[#allocation20_spill] sm:$0xff] }
 0x208   : > { %17918 = vmatprep.mubr.msk.f32.mxu0 %vm363_vm0, %v21847_v60  ;;  %v25750_v60 = vld [vmem:[#allocation21_spill] sm:$0xff] }
 0x20b   : > { %17919 = vmatmul.mubr.msk.f32.gmra.mrb[22].mxu0 %vm363_vm0, %v21853_v61  ;;  %v25751_v61 = vld [vmem:[#allocation22_spill] sm:$0xff] }
 0x20c   : > { %17921 = vmatprep.mubr.msk.f32.mxu0 %vm363_vm0, %v21855_v62  ;;  %v25752_v62 = vld [vmem:[#allocation23_spill] sm:$0xff] }
 0x20f   : > { %17922 = vmatmul.mubr.msk.f32.gmra.mrb[24].mxu0 %vm363_vm0, %v21861_v63  ;;  %v25753_v63 = vld [vmem:[#allocation24_spill] sm:$0xff] }
 0x210   : > { %17924 = vmatprep.mubr.msk.f32.mxu0 %vm363_vm0, %v21863_v1  ;;  %v25754_v1 = vld [vmem:[#allocation25_spill] sm:$0xff] }
 0x213   : > { %17925 = vmatmul.mubr.msk.f32.gmra.mrb[26].mxu0 %vm363_vm0, %v21869_v2  ;;  %v25755_v2 = vld [vmem:[#allocation26_spill] sm:$0xff] }
 0x214   : > { %17927 = vmatprep.mubr.msk.f32.mxu0 %vm363_vm0, %v22196_v25 }
 0x217   : > { %17928 = vmatmul.mubr.msk.f32.gmra.mrb[28].mxu0 %vm363_vm0, %v22202_v28  ;;  %v15310_v28 = vld [vmem:[%s25384_s3 + $0x70] sm:$0xff] }
 0x218   : > { %17930 = vmatprep.mubr.msk.f32.mxu0 %vm363_vm0, %v2872_v31  ;;  %v22673_v31 = vld [vmem:[%s25383_s2] ss:$0 sm:$0xff] }
 0x21b   : > { %17931 = vmatmul.mubr.msk.f32.gmra.mrb[30].mxu0 %vm363_vm0, %v2873_v32 }
 0x21c   : > { %17935 = vmatprep.mubr.msk.f32.mxu0 %vm363_vm0, %v21886_v8  ;;  %v25756_v8 = vld [vmem:[#allocation27_spill] sm:$0xff] }
 0x21f   : > { %17936 = vmatmul.mubr.msk.f32.vlgmr.msra.gmra.mrb[0].mxu0 %vm363_vm0, %v21893_v9  ;;  %v25757_v9 = vld [vmem:[#allocation28_spill] sm:$0xff] }
 0x220   : > { %17984 = vmatpush3.msra.mxu0 %v15238_v42  ;;  %17938 = vmatprep.mubr.msk.f32.mxu0 %vm363_vm0, %v21895_v10  ;;  %v25758_v10 = vld [vmem:[#allocation29_spill] sm:$0xff]  ;;  %v15308_v42 = vld [vmem:[%s25384_s3 + $0x60] sm:$0xff] }
 0x223   : > { %17939 = vmatmul.mubr.msk.f32.gmra.mrb[2].mxu0 %vm363_vm0, %v21901_v11  ;;  %v25759_v11 = vld [vmem:[#allocation30_spill] sm:$0xff] }
 0x224   : > { %17941 = vmatprep.mubr.msk.f32.mxu0 %vm363_vm0, %v21903_v12  ;;  %v25760_v12 = vld [vmem:[#allocation31_spill] sm:$0xff] }
 0x227   : > { %17942 = vmatmul.mubr.msk.f32.gmra.mrb[4].mxu0 %vm363_vm0, %v21909_v13  ;;  %v25761_v13 = vld [vmem:[#allocation32_spill] sm:$0xff] }
 0x228   : > { %17944 = vmatprep.mubr.msk.f32.mxu0 %vm363_vm0, %v21911_v14  ;;  %v25762_v14 = vld [vmem:[#allocation34_spill] sm:$0xff] }
 0x22b   : > { %17945 = vmatmul.mubr.msk.f32.gmra.mrb[6].mxu0 %vm363_vm0, %v21917_v15  ;;  %v25763_v15 = vld [vmem:[#allocation36_spill] sm:$0xff] }
 0x22c   : > { %17947 = vmatprep.mubr.msk.f32.mxu0 %vm363_vm0, %v21919_v16  ;;  %v25764_v16 = vld [vmem:[#allocation39_spill] sm:$0xff] }
 0x22f   : > { %17948 = vmatmul.mubr.msk.f32.gmra.mrb[8].mxu0 %vm363_vm0, %v21925_v17  ;;  %v25765_v17 = vld [vmem:[#allocation41_spill] sm:$0xff] }
 0x230   : > { %17950 = vmatprep.mubr.msk.f32.mxu0 %vm363_vm0, %v21927_v18  ;;  %v25766_v18 = vld [vmem:[#allocation43_spill] sm:$0xff] }
 0x233   : > { %17951 = vmatmul.mubr.msk.f32.gmra.mrb[10].mxu0 %vm363_vm0, %v21933_v19  ;;  %v3647_v19 = vld [vmem:[#allocation2 + $0x1a2] sm:$0xff] }
 0x234   : > { %17953 = vmatprep.mubr.msk.f32.mxu0 %vm363_vm0, %v21935_v20  ;;  %v4110_v20 = vld [vmem:[%s25384_s3 + $0x20] sm:$0xff] }
 0x237   : > { %17954 = vmatmul.mubr.msk.f32.gmra.mrb[12].mxu0 %vm363_vm0, %v21941_v21  ;;  %v4111_v21 = vld [vmem:[%s25384_s3 + $0x28] sm:$0xff] }
 0x238   : > { %17956 = vmatprep.mubr.msk.f32.mxu0 %vm363_vm0, %v21943_v22  ;;  %v19769_v22 = vpack.c.bf16 %v4111_v21, %v4110_v20 }
 0x23a   : > { %19770 = vmatprep.subr.bf16.mxu1 %v19769_v22 }
 0x23b   : > { %17957 = vmatmul.mubr.msk.f32.gmra.mrb[14].mxu0 %vm363_vm0, %v21949_v23  ;;  %19772 = vmatpush3.bf16.msra.mxu1 %v19769_v22  ;;  %v4112_v23 = vld [vmem:[%s25384_s3 + $0x30] sm:$0xff] }
 0x23c   : > { %17959 = vmatprep.mubr.msk.f32.mxu0 %vm363_vm0, %v21951_v24  ;;  %v4113_v24 = vld [vmem:[%s25384_s3 + $0x38] sm:$0xff] }
 0x23f   : > { %17960 = vmatmul.mubr.msk.f32.gmra.mrb[16].mxu0 %vm363_vm0, %v21957_v26  ;;  %v19773_v26 = vpack.c.bf16 %v4113_v24, %v4112_v23 }
 0x240   : > { %17962 = vmatprep.mubr.msk.f32.mxu0 %vm363_vm0, %v21959_v27  ;;  %v4074_v27 = vld [vmem:[#allocation3] sm:$0xff] }
 0x241   : > { %19774 = vmatprep.subr.bf16.mxu1 %v19773_v26  ;;  %18049 = vmatprep.mubr.msk.f32.mxu1 %vm406_vm3, %v4074_v27 }
 0x242   : > { %19776 = vmatpush3.bf16.msra.mxu1 %v19773_v26 }
 0x243   : > { %17963 = vmatmul.mubr.msk.f32.gmra.mrb[18].mxu0 %vm363_vm0, %v21965_v29  ;;  %v4075_v29 = vld [vmem:[#allocation3 + $0x8] sm:$0xff] }
 0x244   : > { %17965 = vmatprep.mubr.msk.f32.mxu0 %vm363_vm0, %v25739_v47 }
 0x245   : > { %18050 = vmatmul.mubr.msk.f32.vlgmr.msra.gmra.mrb[0].mxu1 %vm406_vm3, %v4075_v29 }
 0x247   : > { %17966 = vmatmul.mubr.msk.f32.gmra.mrb[20].mxu0 %vm363_vm0, %v25740_v48 }
 0x248   : > { %17968 = vmatprep.mubr.msk.f32.mxu0 %vm363_vm0, %v25741_v49 }
 0x24b   : > { %17969 = vmatmul.mubr.msk.f32.gmra.mrb[22].mxu0 %vm363_vm0, %v25742_v50 }
 0x24c   : > { %17971 = vmatprep.mubr.msk.f32.mxu0 %vm363_vm0, %v25743_v51 }
 0x24f   : > { %17972 = vmatmul.mubr.msk.f32.gmra.mrb[24].mxu0 %vm363_vm0, %v25744_v52 }
 0x250   : > { %17974 = vmatprep.mubr.msk.f32.mxu0 %vm363_vm0, %v25745_v53 }
 0x253   : > { %17975 = vmatmul.mubr.msk.f32.gmra.mrb[26].mxu0 %vm363_vm0, %v25746_v54 }
 0x254   : > { %17977 = vmatprep.mubr.msk.f32.mxu0 %vm363_vm0, %v25747_v55 }
 0x257   : > { %17978 = vmatmul.mubr.msk.f32.gmra.mrb[28].mxu0 %vm363_vm0, %v25748_v57 }
 0x258   : > { %17980 = vmatprep.mubr.msk.f32.mxu0 %vm363_vm0, %v3259_v56 }
 0x25b   : > { %17981 = vmatmul.mubr.msk.f32.gmra.mrb[30].mxu0 %vm363_vm0, %v3260_v58 }
 0x25c   : > { %17985 = vmatprep.mubr.msk.f32.mxu0 %vm363_vm0, %v25749_v59 }
 0x25f   : > { %17986 = vmatmul.mubr.msk.f32.vlgmr.msra.gmra.mrb[0].mxu0 %vm363_vm0, %v25750_v60 }
 0x260   : > { %17988 = vmatprep.mubr.msk.f32.mxu0 %vm363_vm0, %v25751_v61 }
 0x263   : > { %17989 = vmatmul.mubr.msk.f32.gmra.mrb[2].mxu0 %vm363_vm0, %v25752_v62 }
 0x264   : > { %17991 = vmatprep.mubr.msk.f32.mxu0 %vm363_vm0, %v25753_v63 }
 0x267   : > { %17992 = vmatmul.mubr.msk.f32.gmra.mrb[4].mxu0 %vm363_vm0, %v25754_v1 }
 0x268   : > { %17994 = vmatprep.mubr.msk.f32.mxu0 %vm363_vm0, %v25755_v2 }
 0x26b   : > { %17995 = vmatmul.mubr.msk.f32.gmra.mrb[6].mxu0 %vm363_vm0, %v25756_v8 }
 0x26c   : > { %17997 = vmatprep.mubr.msk.f32.mxu0 %vm363_vm0, %v25757_v9 }
 0x26f   : > { %17998 = vmatmul.mubr.msk.f32.gmra.mrb[8].mxu0 %vm363_vm0, %v25758_v10 }
 0x270   : > { %18000 = vmatprep.mubr.msk.f32.mxu0 %vm363_vm0, %v25759_v11 }
 0x273   : > { %18001 = vmatmul.mubr.msk.f32.gmra.mrb[10].mxu0 %vm363_vm0, %v25760_v12 }
 0x274   : > { %18003 = vmatprep.mubr.msk.f32.mxu0 %vm363_vm0, %v25761_v13 }
 0x277   : > { %18004 = vmatmul.mubr.msk.f32.gmra.mrb[12].mxu0 %vm363_vm0, %v25728_v36  ;;  %v15305_v36 = vld [vmem:[%s25384_s3 + $0x48] sm:$0xff] }
 0x278   : > { %18006 = vmatprep.mubr.msk.f32.mxu0 %vm363_vm0, %v25762_v14 }
 0x27b   : > { %18007 = vmatmul.mubr.msk.f32.gmra.mrb[14].mxu0 %vm363_vm0, %v25730_v39 }
 0x27c   : > { %18009 = vmatprep.mubr.msk.f32.mxu0 %vm363_vm0, %v25763_v15 }
 0x27f   : > { %18010 = vmatmul.mubr.msk.f32.gmra.mrb[16].mxu0 %vm363_vm0, %v25732_v4  ;;  %v19789_v4 = vpack.c.bf16 %v15311_v7, %v15310_v28 }
 0x280   : > { %18012 = vmatprep.mubr.msk.f32.mxu0 %vm363_vm0, %v25733_v38  ;;  %v15306_v38 = vld [vmem:[%s25384_s3 + $0x50] sm:$0xff] }
 0x283   : > { %18013 = vmatmul.mubr.msk.f32.gmra.mrb[18].mxu0 %vm363_vm0, %v25764_v16 }
 0x284   : > { %18015 = vmatprep.mubr.msk.f32.mxu0 %vm363_vm0, %v25735_v5  ;;  %v15344_v5 = vld [vmem:[%s25384_s3 + $0x80] sm:$0xff] }
 0x287   : > { %18016 = vmatmul.mubr.msk.f32.gmra.mrb[20].mxu0 %vm363_vm0, %v22106_v0  ;;  %v3646_v0 = vld [vmem:[#allocation2 + $0x19a] sm:$0xff] }
 0x288   : > { %18018 = vmatprep.mubr.msk.f32.mxu0 %vm363_vm0, %v25765_v17 }
 0x28b   : > { %18019 = vmatmul.mubr.msk.f32.gmra.mrb[22].mxu0 %vm363_vm0, %v22114_v3  ;;  %v15307_v3 = vld [vmem:[%s25384_s3 + $0x58] sm:$0xff] }
 0x28c   : > { %18021 = vmatprep.mubr.msk.f32.mxu0 %vm363_vm0, %v25737_v30  ;;  %v15304_v30 = vld [vmem:[%s25384_s3 + $0x40] sm:$0xff] }
 0x28f   : > { %18022 = vmatmul.mubr.msk.f32.gmra.mrb[24].mxu0 %vm363_vm0, %v22122_v40  ;;  %v19781_v40 = vpack.c.bf16 %v15307_v3, %v15306_v38 }
 0x290   : > { %18024 = vmatprep.mubr.msk.f32.mxu0 %vm363_vm0, %v25766_v18 }
 0x293   : > { %18025 = vmatmul.mubr.msk.f32.gmra.mrb[26].mxu0 %vm363_vm0, %v22130_v6  ;;  %v15309_v6 = vld [vmem:[%s25384_s3 + $0x68] sm:$0xff] }
 0x294   : > { %18027 = vmatprep.mubr.msk.f32.mxu0 %vm363_vm0, %v22338_v37  ;;  %v19777_v37 = vpack.c.bf16 %v15305_v36, %v15304_v30  ;;  %v19785_v25 = vpack.c.bf16 %v15309_v6, %v15308_v42 }
 0x296   : > { %19778 = vmatprep.subr.bf16.mxu1 %v19777_v37 }
 0x297   : > { %18028 = vmatmul.mubr.msk.f32.gmra.mrb[28].mxu0 %vm363_vm0, %v22344_v43  ;;  %19780 = vmatpush3.bf16.msra.mxu1 %v19777_v37  ;;  %v15345_v43 = vld [vmem:[%s25384_s3 + $0x88] sm:$0xff] }
 0x298   : > { %18030 = vmatprep.mubr.msk.f32.mxu0 %vm363_vm0, %v3646_v0  ;;  %19782 = vmatprep.subr.bf16.mxu1 %v19781_v40  ;;  %v22667_v39 = vpack.c.bf16 %v15345_v43, %v15344_v5 }
 0x29b   : > { %18031 = vmatmul.mubr.msk.f32.gmra.mrb[30].mxu0 %vm363_vm0, %v3647_v19  ;;  %19784 = vmatpush3.bf16.msra.mxu1 %v19781_v40 }
 0x29c   : > { %19786 = vmatprep.subr.bf16.mxu1 %v19785_v25 }
 0x29f   : > { %19788 = vmatpush3.bf16.msra.mxu1 %v19785_v25 }
 0x2a0   : > { %19790 = vmatprep.subr.bf16.mxu1 %v19789_v4 }
 0x2a3   : > { %19792 = vmatpush3.bf16.msra.mxu1 %v19789_v4 }
 0x2a4   : > { %19794 = vmatprep.subr.bf16.mxu1 %v22667_v39 }
 0x332   : > { %v17987_v32 = vpop.f32.mrb[0].mxu0 }
 0x333   : > { %v20201_v33 = vadd.f32 %v17987_v32, %v22673_v31  ;;  %v3812_v34 = vpop.f32.mrb[1].mxu0 }
 0x334   : > { %v20202_v35 = vadd.f32 %v22673_v31, %v3812_v34 }
 0x335   : > { %v4004_v41 = vmax.f32 %v20201_v33, 0.0 }
 0x336   : > { %v4003_v44 = vmax.f32 %v20202_v35, 0.0  ;;  %v17990_v45 = vpop.f32.mrb[2].mxu0 }
 0x337   : > { %4036 = vst.msk [vmem:[#allocation3 + $0x21] sm:$0xff] %vm406_vm3, %v4004_v41  ;;  %v20203_v46 = vadd.f32 %v17990_v45, %v22673_v31  ;;  %v3822_v47 = vpop.f32.mrb[3].mxu0 }
 0x338   : > { %4035 = vst.msk [vmem:[#allocation3 + $0x19] sm:$0xff] %vm406_vm3, %v4003_v44  ;;  %v20204_v48 = vadd.f32 %v22673_v31, %v3822_v47 }
 0x339   : > { %v4006_v49 = vmax.f32 %v20203_v46, 0.0 }
 0x33a   : > { %v4005_v50 = vmax.f32 %v20204_v48, 0.0  ;;  %v17993_v51 = vpop.f32.mrb[4].mxu0 }
 0x33b   : > { %4038 = vst.msk [vmem:[#allocation3 + $0x39] sm:$0xff] %vm406_vm3, %v4006_v49  ;;  %v20205_v52 = vadd.f32 %v17993_v51, %v22673_v31  ;;  %v3832_v53 = vpop.f32.mrb[5].mxu0 }
 0x33c   : > { %4037 = vst.msk [vmem:[#allocation3 + $0x31] sm:$0xff] %vm406_vm3, %v4005_v50  ;;  %v20206_v54 = vadd.f32 %v22673_v31, %v3832_v53 }
 0x33d   : > { %v4008_v55 = vmax.f32 %v20205_v52, 0.0 }
 0x33e   : > { %v4007_v56 = vmax.f32 %v20206_v54, 0.0  ;;  %v17996_v57 = vpop.f32.mrb[6].mxu0 }
 0x33f   : > { %4040 = vst.msk [vmem:[#allocation3 + $0x51] sm:$0xff] %vm406_vm3, %v4008_v55  ;;  %v20207_v58 = vadd.f32 %v17996_v57, %v22673_v31  ;;  %v3842_v59 = vpop.f32.mrb[7].mxu0  ;;  %v22687_v60 = vld [vmem:[#allocation3 + $0x18] sm:$0xff]  ;;  %v22689_v61 = vld [vmem:[#allocation3 + $0x20] sm:$0xff] }
 0x340   : > { %4039 = vst.msk [vmem:[#allocation3 + $0x49] sm:$0xff] %vm406_vm3, %v4007_v56  ;;  %v20208_v62 = vadd.f32 %v22673_v31, %v3842_v59  ;;  %18052 = vmatprep.mubr.msk.f32.mxu1 %vm406_vm3, %v22687_v60 }
 0x341   : > { %v4010_v63 = vmax.f32 %v20207_v58, 0.0  ;;  %18053 = vmatmul.mubr.msk.f32.gmra.mrb[2].mxu1 %vm406_vm3, %v22689_v61 }
 0x342   : > { %v4009_v1 = vmax.f32 %v20208_v62, 0.0  ;;  %v17999_v2 = vpop.f32.mrb[8].mxu0 }
 0x343   : > { %4042 = vst.msk [vmem:[#allocation3 + $0x69] sm:$0xff] %vm406_vm3, %v4010_v63  ;;  %v20209_v8 = vadd.f32 %v17999_v2, %v22673_v31  ;;  %v3852_v9 = vpop.f32.mrb[9].mxu0  ;;  %v22699_v10 = vld [vmem:[#allocation3 + $0x30] sm:$0xff]  ;;  %v22701_v11 = vld [vmem:[#allocation3 + $0x38] sm:$0xff] }
 0x344   : > { %4041 = vst.msk [vmem:[#allocation3 + $0x61] sm:$0xff] %vm406_vm3, %v4009_v1  ;;  %v20210_v12 = vadd.f32 %v22673_v31, %v3852_v9  ;;  %18055 = vmatprep.mubr.msk.f32.mxu1 %vm406_vm3, %v22699_v10 }
 0x345   : > { %v4012_v13 = vmax.f32 %v20209_v8, 0.0  ;;  %18056 = vmatmul.mubr.msk.f32.gmra.mrb[4].mxu1 %vm406_vm3, %v22701_v11 }
 0x346   : > { %v4011_v14 = vmax.f32 %v20210_v12, 0.0  ;;  %v18002_v15 = vpop.f32.mrb[10].mxu0 }
 0x347   : > { %4044 = vst.msk [vmem:[#allocation3 + $0x81] sm:$0xff] %vm406_vm3, %v4012_v13  ;;  %v20211_v16 = vadd.f32 %v18002_v15, %v22673_v31  ;;  %v3862_v17 = vpop.f32.mrb[11].mxu0  ;;  %v22711_v18 = vld [vmem:[#allocation3 + $0x48] sm:$0xff]  ;;  %v22713_v0 = vld [vmem:[#allocation3 + $0x50] sm:$0xff] }
 0x348   : > { %4043 = vst.msk [vmem:[#allocation3 + $0x79] sm:$0xff] %vm406_vm3, %v4011_v14  ;;  %v20212_v19 = vadd.f32 %v22673_v31, %v3862_v17  ;;  %18058 = vmatprep.mubr.msk.f32.mxu1 %vm406_vm3, %v22711_v18 }
 0x349   : > { %v4014_v20 = vmax.f32 %v20211_v16, 0.0  ;;  %18059 = vmatmul.mubr.msk.f32.gmra.mrb[6].mxu1 %vm406_vm3, %v22713_v0 }
 0x34a   : > { %v4013_v21 = vmax.f32 %v20212_v19, 0.0  ;;  %v18005_v22 = vpop.f32.mrb[12].mxu0 }
 0x34b   : > { %4046 = vst.msk [vmem:[#allocation3 + $0x99] sm:$0xff] %vm406_vm3, %v4014_v20  ;;  %v20213_v23 = vadd.f32 %v18005_v22, %v22673_v31  ;;  %v3872_v24 = vpop.f32.mrb[13].mxu0  ;;  %v22723_v26 = vld [vmem:[#allocation3 + $0x60] sm:$0xff]  ;;  %v22725_v27 = vld [vmem:[#allocation3 + $0x68] sm:$0xff] }
 0x34c   : > { %4045 = vst.msk [vmem:[#allocation3 + $0x91] sm:$0xff] %vm406_vm3, %v4013_v21  ;;  %v20214_v29 = vadd.f32 %v22673_v31, %v3872_v24  ;;  %18061 = vmatprep.mubr.msk.f32.mxu1 %vm406_vm3, %v22723_v26 }
 0x34d   : > { %v4016_v30 = vmax.f32 %v20213_v23, 0.0  ;;  %18062 = vmatmul.mubr.msk.f32.gmra.mrb[8].mxu1 %vm406_vm3, %v22725_v27 }
 0x34e   : > { %v4015_v36 = vmax.f32 %v20214_v29, 0.0  ;;  %v18008_v37 = vpop.f32.mrb[14].mxu0 }
 0x34f   : > { %4048 = vst.msk [vmem:[#allocation3 + $0xb1] sm:$0xff] %vm406_vm3, %v4016_v30  ;;  %v20215_v38 = vadd.f32 %v18008_v37, %v22673_v31  ;;  %v3882_v3 = vpop.f32.mrb[15].mxu0  ;;  %v22735_v40 = vld [vmem:[#allocation3 + $0x78] sm:$0xff]  ;;  %v22737_v42 = vld [vmem:[#allocation3 + $0x80] sm:$0xff] }
 0x350   : > { %4047 = vst.msk [vmem:[#allocation3 + $0xa9] sm:$0xff] %vm406_vm3, %v4015_v36  ;;  %v20216_v6 = vadd.f32 %v22673_v31, %v3882_v3  ;;  %18064 = vmatprep.mubr.msk.f32.mxu1 %vm406_vm3, %v22735_v40 }
 0x351   : > { %v4018_v25 = vmax.f32 %v20215_v38, 0.0  ;;  %18065 = vmatmul.mubr.msk.f32.gmra.mrb[10].mxu1 %vm406_vm3, %v22737_v42 }
 0x352   : > { %v4017_v28 = vmax.f32 %v20216_v6, 0.0  ;;  %v18011_v7 = vpop.f32.mrb[16].mxu0 }
 0x353   : > { %4050 = vst.msk [vmem:[#allocation3 + $0xc9] sm:$0xff] %vm406_vm3, %v4018_v25  ;;  %v20217_v4 = vadd.f32 %v18011_v7, %v22673_v31  ;;  %v3892_v5 = vpop.f32.mrb[17].mxu0  ;;  %v22747_v43 = vld [vmem:[#allocation3 + $0x90] sm:$0xff]  ;;  %v22749_v32 = vld [vmem:[#allocation3 + $0x98] sm:$0xff] }
 0x354   : > { %4049 = vst.msk [vmem:[#allocation3 + $0xc1] sm:$0xff] %vm406_vm3, %v4017_v28  ;;  %v20218_v33 = vadd.f32 %v22673_v31, %v3892_v5  ;;  %18067 = vmatprep.mubr.msk.f32.mxu1 %vm406_vm3, %v22747_v43 }
 0x355   : > { %v4020_v34 = vmax.f32 %v20217_v4, 0.0  ;;  %18068 = vmatmul.mubr.msk.f32.gmra.mrb[12].mxu1 %vm406_vm3, %v22749_v32 }
 0x356   : > { %v4019_v35 = vmax.f32 %v20218_v33, 0.0  ;;  %v18014_v41 = vpop.f32.mrb[18].mxu0 }
 0x357   : > { %4052 = vst.msk [vmem:[#allocation3 + $0xe1] sm:$0xff] %vm406_vm3, %v4020_v34  ;;  %v20219_v44 = vadd.f32 %v18014_v41, %v22673_v31  ;;  %v3902_v45 = vpop.f32.mrb[19].mxu0  ;;  %v22759_v46 = vld [vmem:[#allocation3 + $0xa8] sm:$0xff]  ;;  %v22761_v47 = vld [vmem:[#allocation3 + $0xb0] sm:$0xff] }
 0x358   : > { %4051 = vst.msk [vmem:[#allocation3 + $0xd9] sm:$0xff] %vm406_vm3, %v4019_v35  ;;  %v20220_v48 = vadd.f32 %v22673_v31, %v3902_v45  ;;  %18070 = vmatprep.mubr.msk.f32.mxu1 %vm406_vm3, %v22759_v46 }
 0x359   : > { %v4022_v49 = vmax.f32 %v20219_v44, 0.0  ;;  %18071 = vmatmul.mubr.msk.f32.gmra.mrb[14].mxu1 %vm406_vm3, %v22761_v47 }
 0x35a   : > { %v4021_v50 = vmax.f32 %v20220_v48, 0.0  ;;  %v18017_v51 = vpop.f32.mrb[20].mxu0 }
 0x35b   : > { %4054 = vst.msk [vmem:[#allocation3 + $0xf9] sm:$0xff] %vm406_vm3, %v4022_v49  ;;  %v20221_v52 = vadd.f32 %v18017_v51, %v22673_v31  ;;  %v3912_v53 = vpop.f32.mrb[21].mxu0  ;;  %v22771_v54 = vld [vmem:[#allocation3 + $0xc0] sm:$0xff]  ;;  %v22773_v55 = vld [vmem:[#allocation3 + $0xc8] sm:$0xff] }
 0x35c   : > { %4053 = vst.msk [vmem:[#allocation3 + $0xf1] sm:$0xff] %vm406_vm3, %v4021_v50  ;;  %v20222_v56 = vadd.f32 %v22673_v31, %v3912_v53  ;;  %18073 = vmatprep.mubr.msk.f32.mxu1 %vm406_vm3, %v22771_v54 }
 0x35d   : > { %v4024_v57 = vmax.f32 %v20221_v52, 0.0  ;;  %18074 = vmatmul.mubr.msk.f32.gmra.mrb[16].mxu1 %vm406_vm3, %v22773_v55 }
 0x35e   : > { %v4023_v58 = vmax.f32 %v20222_v56, 0.0  ;;  %v18020_v59 = vpop.f32.mrb[22].mxu0  ;;  %v4467_v56 = vld [vmem:[#allocation3 + $0x1] sm:$0xff] }
 0x35f   : > { %4056 = vst.msk [vmem:[#allocation3 + $0x111] sm:$0xff] %vm406_vm3, %v4024_v57  ;;  %v20223_v62 = vadd.f32 %v18020_v59, %v22673_v31  ;;  %v3922_v63 = vpop.f32.mrb[23].mxu0  ;;  %v22783_v1 = vld [vmem:[#allocation3 + $0xd8] sm:$0xff]  ;;  %v22785_v2 = vld [vmem:[#allocation3 + $0xe0] sm:$0xff]  ;;  %v4468_v59 = vld [vmem:[#allocation3 + $0x9] sm:$0xff] }
 0x360   : > { %4055 = vst.msk [vmem:[#allocation3 + $0x109] sm:$0xff] %vm406_vm3, %v4023_v58  ;;  %v20224_v8 = vadd.f32 %v22673_v31, %v3922_v63  ;;  %18076 = vmatprep.mubr.msk.f32.mxu1 %vm406_vm3, %v22783_v1  ;;  %v15346_v57 = vld [vmem:[%s25384_s3 + $0x90] sm:$0xff]  ;;  %v15347_v58 = vld [vmem:[%s25384_s3 + $0x98] sm:$0xff]  ;;  %v15348_v63 = vld [vmem:[%s25384_s3 + $0xa0] sm:$0xff] }
 0x361   : > { %v4026_v9 = vmax.f32 %v20223_v62, 0.0  ;;  %18077 = vmatmul.mubr.msk.f32.gmra.mrb[18].mxu1 %vm406_vm3, %v22785_v2  ;;  %v19797_v62 = vpack.c.bf16 %v15347_v58, %v15346_v57 }
 0x362   : > { %v4025_v12 = vmax.f32 %v20224_v8, 0.0  ;;  %v18023_v13 = vpop.f32.mrb[24].mxu0  ;;  %v15349_v8 = vld [vmem:[%s25384_s3 + $0xa8] sm:$0xff] }
 0x363   : > { %4058 = vst.msk [vmem:[#allocation3 + $0x129] sm:$0xff] %vm406_vm3, %v4026_v9  ;;  %v20225_v14 = vadd.f32 %v18023_v13, %v22673_v31  ;;  %v3932_v15 = vpop.f32.mrb[25].mxu0  ;;  %v22795_v16 = vld [vmem:[#allocation3 + $0xf0] sm:$0xff]  ;;  %v22797_v17 = vld [vmem:[#allocation3 + $0xf8] sm:$0xff]  ;;  %v22878_v13 = vld [vmem:[#allocation3 + $0x21] sm:$0xff] }
 0x364   : > { %4057 = vst.msk [vmem:[#allocation3 + $0x121] sm:$0xff] %vm406_vm3, %v4025_v12  ;;  %v20226_v19 = vadd.f32 %v22673_v31, %v3932_v15  ;;  %18079 = vmatprep.mubr.msk.f32.mxu1 %vm406_vm3, %v22795_v16  ;;  %v22873_v9 = vld [vmem:[#allocation3 + $0x19] sm:$0xff]  ;;  %v19801_v12 = vpack.c.bf16 %v15349_v8, %v15348_v63  ;;  %v15351_v15 = vld [vmem:[%s25384_s3 + $0xb8] sm:$0xff] }
 0x365   : > { %v4028_v20 = vmax.f32 %v20225_v14, 0.0  ;;  %18080 = vmatmul.mubr.msk.f32.gmra.mrb[20].mxu1 %vm406_vm3, %v22797_v17  ;;  %v15350_v14 = vld [vmem:[%s25384_s3 + $0xb0] sm:$0xff] }
 0x366   : > { %v4027_v21 = vmax.f32 %v20226_v19, 0.0  ;;  %v18026_v22 = vpop.f32.mrb[26].mxu0  ;;  %v22888_v19 = vld [vmem:[#allocation3 + $0x31] sm:$0xff] }
 0x367   : > { %4060 = vst.msk [vmem:[#allocation3 + $0x141] sm:$0xff] %vm406_vm3, %v4028_v20  ;;  %v20227_v23 = vadd.f32 %v18026_v22, %v22673_v31  ;;  %v3942_v24 = vpop.f32.mrb[27].mxu0  ;;  %v22807_v29 = vld [vmem:[#allocation3 + $0x108] sm:$0xff]  ;;  %v22809_v30 = vld [vmem:[#allocation3 + $0x110] sm:$0xff]  ;;  %v22892_v20 = vld [vmem:[#allocation3 + $0x39] sm:$0xff] }
 0x368   : > { %4059 = vst.msk [vmem:[#allocation3 + $0x139] sm:$0xff] %vm406_vm3, %v4027_v21  ;;  %v20228_v36 = vadd.f32 %v22673_v31, %v3942_v24  ;;  %18082 = vmatprep.mubr.msk.f32.mxu1 %vm406_vm3, %v22807_v29  ;;  %v15384_v21 = vld [vmem:[%s25384_s3 + $0xc0] sm:$0xff]  ;;  %v15385_v22 = vld [vmem:[%s25384_s3 + $0xc8] sm:$0xff] }
 0x369   : > { %v4030_v37 = vmax.f32 %v20227_v23, 0.0  ;;  %18083 = vmatmul.mubr.msk.f32.gmra.mrb[22].mxu1 %vm406_vm3, %v22809_v30  ;;  %v22902_v23 = vld [vmem:[#allocation3 + $0x49] sm:$0xff]  ;;  %v19809_v24 = vpack.c.bf16 %v15385_v22, %v15384_v21  ;;  %v22970_v57 = vld [vmem:[#allocation3 + $0x111] sm:$0xff]  ;;  %v15386_v21 = vld [vmem:[%s25384_s3 + $0xd0] sm:$0xff] }
 0x36a   : > { %v4029_v38 = vmax.f32 %v20228_v36, 0.0  ;;  %v18029_v3 = vpop.f32.mrb[28].mxu0  ;;  %v22906_v36 = vld [vmem:[#allocation3 + $0x51] sm:$0xff]  ;;  %v15387_v22 = vld [vmem:[%s25384_s3 + $0xd8] sm:$0xff] }
 0x36b   : > { %4062 = vst.msk [vmem:[#allocation3 + $0x159] sm:$0xff] %vm406_vm3, %v4030_v37  ;;  %v20229_v6 = vadd.f32 %v18029_v3, %v22673_v31  ;;  %v3952_v25 = vpop.f32.mrb[29].mxu0  ;;  %v22819_v28 = vld [vmem:[#allocation3 + $0x120] sm:$0xff]  ;;  %v22821_v7 = vld [vmem:[#allocation3 + $0x128] sm:$0xff] }
 0x36c   : > { %4061 = vst.msk [vmem:[#allocation3 + $0x151] sm:$0xff] %vm406_vm3, %v4029_v38  ;;  %v20230_v4 = vadd.f32 %v22673_v31, %v3952_v25  ;;  %18085 = vmatprep.mubr.msk.f32.mxu1 %vm406_vm3, %v22819_v28  ;;  %v22910_v37 = vld [vmem:[#allocation3 + $0x61] sm:$0xff]  ;;  %v22914_v38 = vld [vmem:[#allocation3 + $0x69] sm:$0xff]  ;;  %v22918_v3 = vld [vmem:[#allocation3 + $0x79] sm:$0xff] }
 0x36d   : > { %v4032_v5 = vmax.f32 %v20229_v6, 0.0  ;;  %18086 = vmatmul.mubr.msk.f32.gmra.mrb[24].mxu1 %vm406_vm3, %v22821_v7  ;;  %v22922_v6 = vld [vmem:[#allocation3 + $0x81] sm:$0xff]  ;;  %v22926_v25 = vld [vmem:[#allocation3 + $0x91] sm:$0xff] }
 0x36e   : > { %v4031_v33 = vmax.f32 %v20230_v4, 0.0  ;;  %v18032_v34 = vpop.f32.mrb[30].mxu0  ;;  %v22930_v4 = vld [vmem:[#allocation3 + $0x99] sm:$0xff]  ;;  %v22974_v58 = vld [vmem:[#allocation3 + $0x121] sm:$0xff] }
 0x36f   : > { %4064 = vst.msk [vmem:[#allocation3 + $0x171] sm:$0xff] %vm406_vm3, %v4032_v5  ;;  %v20231_v35 = vadd.f32 %v18032_v34, %v22673_v31  ;;  %v3962_v41 = vpop.f32.mrb[31].mxu0  ;;  %v22831_v44 = vld [vmem:[#allocation3 + $0x138] sm:$0xff]  ;;  %v22833_v45 = vld [vmem:[#allocation3 + $0x140] sm:$0xff]  ;;  %v22934_v5 = vld [vmem:[#allocation3 + $0xa9] sm:$0xff] }
 0x370   : > { %4063 = vst.msk [vmem:[#allocation3 + $0x169] sm:$0xff] %vm406_vm3, %v4031_v33  ;;  %v20232_v48 = vadd.f32 %v22673_v31, %v3962_v41  ;;  %18088 = vmatprep.mubr.msk.f32.mxu1 %vm406_vm3, %v22831_v44  ;;  %v22938_v33 = vld [vmem:[#allocation3 + $0xb1] sm:$0xff]  ;;  %v22942_v34 = vld [vmem:[#allocation3 + $0xc1] sm:$0xff]  ;;  %v22950_v41 = vld [vmem:[#allocation3 + $0xd9] sm:$0xff] }
 0x371   : > { %v4034_v49 = vmax.f32 %v20231_v35, 0.0  ;;  %18089 = vmatmul.mubr.msk.f32.gmra.mrb[26].mxu1 %vm406_vm3, %v22833_v45  ;;  %v22946_v35 = vld [vmem:[#allocation3 + $0xc9] sm:$0xff]  ;;  %v22986_v63 = vld [vmem:[#allocation3 + $0x141] sm:$0xff] }
 0x372   : > { %v4033_v50 = vmax.f32 %v20232_v48, 0.0  ;;  %v22954_v48 = vld [vmem:[#allocation3 + $0xe1] sm:$0xff]  ;;  %25768 = vst [vmem:[#allocation19_spill] sm:$0xff] %v22986_v63 }
 0x373   : > { %4066 = vst.msk [vmem:[#allocation3 + $0x189] sm:$0xff] %vm406_vm3, %v4034_v49  ;;  %v22842_v51 = vld [vmem:[#allocation3 + $0x150] sm:$0xff]  ;;  %v22844_v52 = vld [vmem:[#allocation3 + $0x158] sm:$0xff] }
 0x374   : > { %4065 = vst.msk [vmem:[#allocation3 + $0x181] sm:$0xff] %vm406_vm3, %v4033_v50  ;;  %18091 = vmatprep.mubr.msk.f32.mxu1 %vm406_vm3, %v22842_v51  ;;  %v22958_v49 = vld [vmem:[#allocation3 + $0xf1] sm:$0xff]  ;;  %v22962_v50 = vld [vmem:[#allocation3 + $0xf9] sm:$0xff] }
 0x375   : > { %18092 = vmatmul.mubr.msk.f32.gmra.mrb[28].mxu1 %vm406_vm3, %v22844_v52  ;;  %v22990_v8 = vld [vmem:[#allocation3 + $0x151] sm:$0xff] }
 0x376   : > { %25769 = vst [vmem:[#allocation33_spill] sm:$0xff] %v22990_v8 }
 0x377   : > { %v22851_v31 = vld [vmem:[#allocation3 + $0x168] sm:$0xff]  ;;  %v22853_v53 = vld [vmem:[#allocation3 + $0x170] sm:$0xff] }
 0x378   : > { %18094 = vmatprep.mubr.msk.f32.mxu1 %vm406_vm3, %v22851_v31 }
 0x379   : > { %18095 = vmatmul.mubr.msk.f32.gmra.mrb[30].mxu1 %vm406_vm3, %v22853_v53 }
 0x37a   : > { %18113 = vmatprep.mubr.msk.f32.mxu1 %vm406_vm3, %v4467_v56  ;;  %v22966_v56 = vld [vmem:[#allocation3 + $0x109] sm:$0xff] }
 0x37d   : > { %18114 = vmatmul.mubr.msk.f32.vlgmr.msra.gmra.mrb[0].mxu1 %vm406_vm3, %v4468_v59  ;;  %v22978_v59 = vld [vmem:[#allocation3 + $0x129] sm:$0xff] }
 0x37e   : > { %19796 = vmatpush3.bf16.msra.mxu1 %v22667_v39  ;;  %18116 = vmatprep.mubr.msk.f32.mxu1 %vm406_vm3, %v22873_v9  ;;  %v19805_v39 = vpack.c.bf16 %v15351_v15, %v15350_v14  ;;  %v22998_v14 = vld [vmem:[#allocation3 + $0x169] sm:$0xff] }
 0x37f   : > { %19798 = vmatprep.subr.bf16.mxu1 %v19797_v62  ;;  %25771 = vst [vmem:[#allocation37_spill] sm:$0xff] %v22998_v14  ;;  %v4861_v15 = vld [vmem:[#allocation3 + $0x2] sm:$0xff] }
 0x381   : > { %18117 = vmatmul.mubr.msk.f32.gmra.mrb[2].mxu1 %vm406_vm3, %v22878_v13 }
 0x382   : > { %18119 = vmatprep.mubr.msk.f32.mxu1 %vm406_vm3, %v22888_v19  ;;  %19800 = vmatpush3.bf16.msra.mxu1 %v19797_v62  ;;  %v22982_v62 = vld [vmem:[#allocation3 + $0x139] sm:$0xff] }
 0x383   : > { %19802 = vmatprep.subr.bf16.mxu1 %v19801_v12  ;;  %25767 = vst [vmem:[#allocation18_spill] sm:$0xff] %v22982_v62 }
 0x385   : > { %18120 = vmatmul.mubr.msk.f32.gmra.mrb[4].mxu1 %vm406_vm3, %v22892_v20 }
 0x386   : > { %18122 = vmatprep.mubr.msk.f32.mxu1 %vm406_vm3, %v22902_v23  ;;  %19804 = vmatpush3.bf16.msra.mxu1 %v19801_v12  ;;  %v22994_v12 = vld [vmem:[#allocation3 + $0x159] sm:$0xff] }
 0x387   : > { %19806 = vmatprep.subr.bf16.mxu1 %v19805_v39  ;;  %25770 = vst [vmem:[#allocation35_spill] sm:$0xff] %v22994_v12 }
 0x389   : > { %18123 = vmatmul.mubr.msk.f32.gmra.mrb[6].mxu1 %vm406_vm3, %v22906_v36 }
 0x38a   : > { %18125 = vmatprep.mubr.msk.f32.mxu1 %vm406_vm3, %v22910_v37  ;;  %19808 = vmatpush3.bf16.msra.mxu1 %v19805_v39  ;;  %v23002_v39 = vld [vmem:[#allocation3 + $0x171] sm:$0xff] }
 0x38b   : > { %19810 = vmatprep.subr.bf16.mxu1 %v19809_v24  ;;  %25772 = vst [vmem:[#allocation38_spill] sm:$0xff] %v23002_v39 }
 0x38d   : > { %18126 = vmatmul.mubr.msk.f32.gmra.mrb[8].mxu1 %vm406_vm3, %v22914_v38 }
 0x38e   : > { %18128 = vmatprep.mubr.msk.f32.mxu1 %vm406_vm3, %v22918_v3 }
 0x391   : > { %18129 = vmatmul.mubr.msk.f32.gmra.mrb[10].mxu1 %vm406_vm3, %v22922_v6 }
 0x392   : > { %18131 = vmatprep.mubr.msk.f32.mxu1 %vm406_vm3, %v22926_v25 }
 0x395   : > { %18132 = vmatmul.mubr.msk.f32.gmra.mrb[12].mxu1 %vm406_vm3, %v22930_v4 }
 0x396   : > { %18134 = vmatprep.mubr.msk.f32.mxu1 %vm406_vm3, %v22934_v5 }
 0x399   : > { %18135 = vmatmul.mubr.msk.f32.gmra.mrb[14].mxu1 %vm406_vm3, %v22938_v33 }
 0x39a   : > { %18137 = vmatprep.mubr.msk.f32.mxu1 %vm406_vm3, %v22942_v34 }
 0x39d   : > { %18138 = vmatmul.mubr.msk.f32.gmra.mrb[16].mxu1 %vm406_vm3, %v22946_v35 }
 0x39e   : > { %18140 = vmatprep.mubr.msk.f32.mxu1 %vm406_vm3, %v22950_v41 }
 0x3a1   : > { %18141 = vmatmul.mubr.msk.f32.gmra.mrb[18].mxu1 %vm406_vm3, %v22954_v48 }
 0x3a2   : > { %18143 = vmatprep.mubr.msk.f32.mxu1 %vm406_vm3, %v22958_v49 }
 0x3a5   : > { %18144 = vmatmul.mubr.msk.f32.gmra.mrb[20].mxu1 %vm406_vm3, %v22962_v50 }
 0x3a6   : > { %18146 = vmatprep.mubr.msk.f32.mxu1 %vm406_vm3, %v22966_v56 }
 0x3a9   : > { %18147 = vmatmul.mubr.msk.f32.gmra.mrb[22].mxu1 %vm406_vm3, %v22970_v57 }
 0x3aa   : > { %18149 = vmatprep.mubr.msk.f32.mxu1 %vm406_vm3, %v22974_v58 }
 0x3ad   : > { %18150 = vmatmul.mubr.msk.f32.gmra.mrb[24].mxu1 %vm406_vm3, %v22978_v59 }
 0x3ae   : > { %18152 = vmatprep.mubr.msk.f32.mxu1 %vm406_vm3, %v22982_v62  ;;  %v23020_v62 = vld [vmem:[#allocation3 + $0x1a] sm:$0xff] }
 0x3af   : > { %25773 = vst [vmem:[#allocation40_spill] sm:$0xff] %v23020_v62 }
 0x3b1   : > { %18153 = vmatmul.mubr.msk.f32.gmra.mrb[26].mxu1 %vm406_vm3, %v22986_v63  ;;  %v15389_v63 = vld [vmem:[%s25384_s3 + $0xe8] sm:$0xff] }
 0x3b2   : > { %18155 = vmatprep.mubr.msk.f32.mxu1 %vm406_vm3, %v22990_v8  ;;  %v19813_v8 = vpack.c.bf16 %v15387_v22, %v15386_v21  ;;  %v15390_v21 = vld [vmem:[%s25384_s3 + $0xf0] sm:$0xff]  ;;  %v15391_v22 = vld [vmem:[%s25384_s3 + $0xf8] sm:$0xff] }
 0x3b5   : > { %18156 = vmatmul.mubr.msk.f32.gmra.mrb[28].mxu1 %vm406_vm3, %v22994_v12  ;;  %v4862_v12 = vld [vmem:[#allocation3 + $0xa] sm:$0xff] }
 0x3b6   : > { %18158 = vmatprep.mubr.msk.f32.mxu1 %vm406_vm3, %v22998_v14  ;;  %v15388_v14 = vld [vmem:[%s25384_s3 + $0xe0] sm:$0xff] }
 0x3b9   : > { %18159 = vmatmul.mubr.msk.f32.gmra.mrb[30].mxu1 %vm406_vm3, %v23002_v39  ;;  %v23024_v39 = vld [vmem:[#allocation3 + $0x22] sm:$0xff] }
 0x3ba   : > { %18177 = vmatprep.mubr.msk.f32.mxu1 %vm406_vm3, %v4861_v15  ;;  %v19817_v15 = vpack.c.bf16 %v15389_v63, %v15388_v14  ;;  %25774 = vst [vmem:[#allocation42_spill] sm:$0xff] %v23024_v39  ;;  %v23038_v63 = vld [vmem:[#allocation3 + $0x3a] sm:$0xff]  ;;  %v15424_v14 = vld [vmem:[%s25384_s3 + $0x100] sm:$0xff] }
 0x3bb   : > { %25775 = vst [vmem:[#allocation10_spill] sm:$0xff] %v23038_v63 }
 0x3bd   : > { %18178 = vmatmul.mubr.msk.f32.vlgmr.msra.gmra.mrb[0].mxu1 %vm406_vm3, %v4862_v12  ;;  %v23034_v12 = vld [vmem:[#allocation3 + $0x32] sm:$0xff] }
 0x3be   : > { %19812 = vmatpush3.bf16.msra.mxu1 %v19809_v24  ;;  %18180 = vmatprep.mubr.msk.f32.mxu1 %vm406_vm3, %v23020_v62  ;;  %v19821_v24 = vpack.c.bf16 %v15391_v22, %v15390_v21  ;;  %v15425_v62 = vld [vmem:[%s25384_s3 + $0x108] sm:$0xff]  ;;  %v23056_v22 = vld [vmem:[#allocation3 + $0x62] sm:$0xff] }
 0x3bf   : > { %19814 = vmatprep.subr.bf16.mxu1 %v19813_v8  ;;  %v23052_v21 = vld [vmem:[#allocation3 + $0x52] sm:$0xff]  ;;  %25776 = vst [vmem:[#allocation11_spill] sm:$0xff] %v23056_v22 }
 0x3c1   : > { %18181 = vmatmul.mubr.msk.f32.gmra.mrb[2].mxu1 %vm406_vm3, %v23024_v39  ;;  %v23048_v39 = vld [vmem:[#allocation3 + $0x4a] sm:$0xff] }
 0x3c2   : > { %18183 = vmatprep.mubr.msk.f32.mxu1 %vm406_vm3, %v23034_v12  ;;  %19816 = vmatpush3.bf16.msra.mxu1 %v19813_v8  ;;  %v19825_v8 = vpack.c.bf16 %v15425_v62, %v15424_v14  ;;  %v23068_v62 = vld [vmem:[#allocation3 + $0x82] sm:$0xff]  ;;  %v23072_v14 = vld [vmem:[#allocation3 + $0x92] sm:$0xff] }
 0x3c3   : > { %19818 = vmatprep.subr.bf16.mxu1 %v19817_v15  ;;  %25779 = vst [vmem:[#allocation14_spill] sm:$0xff] %v23068_v62  ;;  %25780 = vst [vmem:[#allocation15_spill] sm:$0xff] %v23072_v14 }
 0x3c5   : > { %18184 = vmatmul.mubr.msk.f32.gmra.mrb[4].mxu1 %vm406_vm3, %v23038_v63  ;;  %v23060_v63 = vld [vmem:[#allocation3 + $0x6a] sm:$0xff] }
 0x3c6   : > { %18186 = vmatprep.mubr.msk.f32.mxu1 %vm406_vm3, %v23048_v39  ;;  %19820 = vmatpush3.bf16.msra.mxu1 %v19817_v15  ;;  %25777 = vst [vmem:[#allocation12_spill] sm:$0xff] %v23060_v63  ;;  %v23064_v15 = vld [vmem:[#allocation3 + $0x7a] sm:$0xff] }
 0x3c7   : > { %19822 = vmatprep.subr.bf16.mxu1 %v19821_v24  ;;  %25778 = vst [vmem:[#allocation13_spill] sm:$0xff] %v23064_v15 }
 0x3c9   : > { %18187 = vmatmul.mubr.msk.f32.gmra.mrb[6].mxu1 %vm406_vm3, %v23052_v21 }
 0x3ca   : > { %18189 = vmatprep.mubr.msk.f32.mxu1 %vm406_vm3, %v23056_v22  ;;  %19824 = vmatpush3.bf16.msra.mxu1 %v19821_v24  ;;  %v23076_v24 = vld [vmem:[#allocation3 + $0x9a] sm:$0xff] }
 0x3cb   : > { %19826 = vmatprep.subr.bf16.mxu1 %v19825_v8  ;;  %25781 = vst [vmem:[#allocation16_spill] sm:$0xff] %v23076_v24  ;;  %v15429_v22 = vld [vmem:[%s25384_s3 + $0x128] sm:$0xff] }
 0x3cd   : > { %18190 = vmatmul.mubr.msk.f32.gmra.mrb[8].mxu1 %vm406_vm3, %v23060_v63  ;;  %v23080_v63 = vld [vmem:[#allocation3 + $0xaa] sm:$0xff] }
 0x3ce   : > { %18192 = vmatprep.mubr.msk.f32.mxu1 %vm406_vm3, %v23064_v15  ;;  %25782 = vst [vmem:[#allocation17_spill] sm:$0xff] %v23080_v63  ;;  %v23084_v15 = vld [vmem:[#allocation3 + $0xb2] sm:$0xff] }
 0x3cf   : > { %25783 = vst [vmem:[#allocation44_spill] sm:$0xff] %v23084_v15 }
 0x3d1   : > { %18193 = vmatmul.mubr.msk.f32.gmra.mrb[10].mxu1 %vm406_vm3, %v23068_v62  ;;  %v23088_v62 = vld [vmem:[#allocation3 + $0xc2] sm:$0xff] }
 0x3d2   : > { %18195 = vmatprep.mubr.msk.f32.mxu1 %vm406_vm3, %v23072_v14  ;;  %25784 = vst [vmem:[#allocation45_spill] sm:$0xff] %v23088_v62  ;;  %v23092_v14 = vld [vmem:[#allocation3 + $0xca] sm:$0xff] }
 0x3d3   : > { %25785 = vst [vmem:[#allocation20_spill] sm:$0xff] %v23092_v14 }
 0x3d5   : > { %18196 = vmatmul.mubr.msk.f32.gmra.mrb[12].mxu1 %vm406_vm3, %v23076_v24  ;;  %v23096_v24 = vld [vmem:[#allocation3 + $0xda] sm:$0xff] }
 0x3d6   : > { %18198 = vmatprep.mubr.msk.f32.mxu1 %vm406_vm3, %v23080_v63  ;;  %25786 = vst [vmem:[#allocation21_spill] sm:$0xff] %v23096_v24  ;;  %v23100_v63 = vld [vmem:[#allocation3 + $0xe2] sm:$0xff] }
 0x3d7   : > { %25787 = vst [vmem:[#allocation22_spill] sm:$0xff] %v23100_v63 }
 0x3d9   : > { %18199 = vmatmul.mubr.msk.f32.gmra.mrb[14].mxu1 %vm406_vm3, %v23084_v15  ;;  %v23104_v15 = vld [vmem:[#allocation3 + $0xf2] sm:$0xff] }
 0x3da   : > { %18201 = vmatprep.mubr.msk.f32.mxu1 %vm406_vm3, %v23088_v62  ;;  %25788 = vst [vmem:[#allocation23_spill] sm:$0xff] %v23104_v15  ;;  %v23108_v62 = vld [vmem:[#allocation3 + $0xfa] sm:$0xff] }
 0x3db   : > { %25789 = vst [vmem:[#allocation24_spill] sm:$0xff] %v23108_v62 }
 0x3dd   : > { %18202 = vmatmul.mubr.msk.f32.gmra.mrb[16].mxu1 %vm406_vm3, %v23092_v14  ;;  %v23112_v14 = vld [vmem:[#allocation3 + $0x10a] sm:$0xff] }
 0x3de   : > { %18204 = vmatprep.mubr.msk.f32.mxu1 %vm406_vm3, %v23096_v24  ;;  %25790 = vst [vmem:[#allocation25_spill] sm:$0xff] %v23112_v14  ;;  %v23116_v24 = vld [vmem:[#allocation3 + $0x112] sm:$0xff] }
 0x3df   : > { %25791 = vst [vmem:[#allocation26_spill] sm:$0xff] %v23116_v24 }
 0x3e1   : > { %18205 = vmatmul.mubr.msk.f32.gmra.mrb[18].mxu1 %vm406_vm3, %v23100_v63  ;;  %v23120_v63 = vld [vmem:[#allocation3 + $0x122] sm:$0xff] }
 0x3e2   : > { %18207 = vmatprep.mubr.msk.f32.mxu1 %vm406_vm3, %v23104_v15  ;;  %25792 = vst [vmem:[#allocation27_spill] sm:$0xff] %v23120_v63  ;;  %v23124_v15 = vld [vmem:[#allocation3 + $0x12a] sm:$0xff] }
 0x3e3   : > { %25793 = vst [vmem:[#allocation28_spill] sm:$0xff] %v23124_v15 }
 0x3e5   : > { %18208 = vmatmul.mubr.msk.f32.gmra.mrb[20].mxu1 %vm406_vm3, %v23108_v62  ;;  %v23128_v62 = vld [vmem:[#allocation3 + $0x13a] sm:$0xff] }
 0x3e6   : > { %18210 = vmatprep.mubr.msk.f32.mxu1 %vm406_vm3, %v23112_v14  ;;  %25794 = vst [vmem:[#allocation29_spill] sm:$0xff] %v23128_v62  ;;  %v23132_v14 = vld [vmem:[#allocation3 + $0x142] sm:$0xff] }
 0x3e7   : > { %25795 = vst [vmem:[#allocation30_spill] sm:$0xff] %v23132_v14 }
 0x3e9   : > { %18211 = vmatmul.mubr.msk.f32.gmra.mrb[22].mxu1 %vm406_vm3, %v23116_v24  ;;  %v23136_v24 = vld [vmem:[#allocation3 + $0x152] sm:$0xff] }
 0x3ea   : > { %18213 = vmatprep.mubr.msk.f32.mxu1 %vm406_vm3, %v23120_v63  ;;  %25796 = vst [vmem:[#allocation31_spill] sm:$0xff] %v23136_v24  ;;  %v23140_v63 = vld [vmem:[#allocation3 + $0x15a] sm:$0xff] }
 0x3eb   : > { %25797 = vst [vmem:[#allocation32_spill] sm:$0xff] %v23140_v63 }
 0x3ed   : > { %18214 = vmatmul.mubr.msk.f32.gmra.mrb[24].mxu1 %vm406_vm3, %v23124_v15  ;;  %v23144_v15 = vld [vmem:[#allocation3 + $0x16a] sm:$0xff] }
 0x3ee   : > { %18216 = vmatprep.mubr.msk.f32.mxu1 %vm406_vm3, %v23128_v62  ;;  %25798 = vst [vmem:[#allocation34_spill] sm:$0xff] %v23144_v15  ;;  %v23148_v62 = vld [vmem:[#allocation3 + $0x172] sm:$0xff] }
 0x3ef   : > { %25799 = vst [vmem:[#allocation36_spill] sm:$0xff] %v23148_v62 }
 0x3f1   : > { %18217 = vmatmul.mubr.msk.f32.gmra.mrb[26].mxu1 %vm406_vm3, %v23132_v14  ;;  %v15426_v14 = vld [vmem:[%s25384_s3 + $0x110] sm:$0xff] }
 0x3f2   : > { %18219 = vmatprep.mubr.msk.f32.mxu1 %vm406_vm3, %v23136_v24  ;;  %v15427_v24 = vld [vmem:[%s25384_s3 + $0x118] sm:$0xff] }
 0x3f5   : > { %18220 = vmatmul.mubr.msk.f32.gmra.mrb[28].mxu1 %vm406_vm3, %v23140_v63  ;;  %v19829_v63 = vpack.c.bf16 %v15427_v24, %v15426_v14  ;;  %v15431_v14 = vld [vmem:[%s25384_s3 + $0x138] sm:$0xff]  ;;  %v25806_v24 = vld [vmem:[#allocation40_spill] sm:$0xff] }
 0x3f6   : > { %18222 = vmatprep.mubr.msk.f32.mxu1 %vm406_vm3, %v23144_v15  ;;  %v15428_v15 = vld [vmem:[%s25384_s3 + $0x120] sm:$0xff] }
 0x3f9   : > { %18223 = vmatmul.mubr.msk.f32.gmra.mrb[30].mxu1 %vm406_vm3, %v23148_v62  ;;  %v19833_v62 = vpack.c.bf16 %v15429_v22, %v15428_v15  ;;  %v23332_v22 = vld [vmem:[#allocation3 + $0x189] sm:$0xff]  ;;  %v15506_v15 = vld [vmem:[%s25384_s3 + $0x190] sm:$0xff] }
 0x3fa   : > { %18241 = vmatprep.mubr.msk.f32.mxu1 %vm406_vm3, %v22687_v60  ;;  %v15430_v60 = vld [vmem:[%s25384_s3 + $0x130] sm:$0xff] }
 0x3fd   : > { %18242 = vmatmul.mubr.msk.f32.vlgmr.msra.gmra.mrb[0].mxu1 %vm406_vm3, %v22689_v61  ;;  %v19837_v61 = vpack.c.bf16 %v15431_v14, %v15430_v60  ;;  %v15508_v14 = vld [vmem:[%s25384_s3 + $0x1a0] sm:$0xff] }
 0x3fe   : > { %19828 = vmatpush3.bf16.msra.mxu1 %v19825_v8  ;;  %18244 = vmatprep.mubr.msk.f32.mxu1 %vm406_vm3, %v22699_v10  ;;  %v15464_v10 = vld [vmem:[%s25384_s3 + $0x140] sm:$0xff]  ;;  %v15465_v8 = vld [vmem:[%s25384_s3 + $0x148] sm:$0xff] }
 0x3ff   : > { %19830 = vmatprep.subr.bf16.mxu1 %v19829_v63 }
 0x401   : > { %18245 = vmatmul.mubr.msk.f32.gmra.mrb[2].mxu1 %vm406_vm3, %v22701_v11  ;;  %v19841_v11 = vpack.c.bf16 %v15465_v8, %v15464_v10  ;;  %v25807_v10 = vld [vmem:[#allocation42_spill] sm:$0xff] }
 0x402   : > { %18247 = vmatprep.mubr.msk.f32.mxu1 %vm406_vm3, %v22711_v18  ;;  %19832 = vmatpush3.bf16.msra.mxu1 %v19829_v63  ;;  %v23236_v18 = vld [vmem:[#allocation3 + $0x180] sm:$0xff] }
 0x403   : > { %19834 = vmatprep.subr.bf16.mxu1 %v19833_v62  ;;  %v23328_v63 = vld [vmem:[#allocation3 + $0x181] sm:$0xff] }
 0x405   : > { %18248 = vmatmul.mubr.msk.f32.gmra.mrb[4].mxu1 %vm406_vm3, %v22713_v0  ;;  %v23240_v0 = vld [vmem:[#allocation3 + $0x188] sm:$0xff] }
 0x406   : > { %18250 = vmatprep.mubr.msk.f32.mxu1 %vm406_vm3, %v22723_v26  ;;  %19836 = vmatpush3.bf16.msra.mxu1 %v19833_v62  ;;  %v15466_v26 = vld [vmem:[%s25384_s3 + $0x150] sm:$0xff]  ;;  %v15507_v62 = vld [vmem:[%s25384_s3 + $0x198] sm:$0xff] }
 0x407   : > { %19838 = vmatprep.subr.bf16.mxu1 %v19837_v61  ;;  %v19861_v60 = vpack.c.bf16 %v15507_v62, %v15506_v15  ;;  %v25815_v15 = vld [vmem:[#allocation17_spill] sm:$0xff]  ;;  %v25816_v62 = vld [vmem:[#allocation44_spill] sm:$0xff] }
 0x409   : > { %18251 = vmatmul.mubr.msk.f32.gmra.mrb[6].mxu1 %vm406_vm3, %v22725_v27  ;;  %v15467_v27 = vld [vmem:[%s25384_s3 + $0x158] sm:$0xff] }
 0x40a   : > { %18253 = vmatprep.mubr.msk.f32.mxu1 %vm406_vm3, %v22735_v40  ;;  %19840 = vmatpush3.bf16.msra.mxu1 %v19837_v61  ;;  %v19845_v40 = vpack.c.bf16 %v15467_v27, %v15466_v26  ;;  %v15509_v61 = vld [vmem:[%s25384_s3 + $0x1a8] sm:$0xff]  ;;  %v15511_v26 = vld [vmem:[%s25384_s3 + $0x1b8] sm:$0xff]  ;;  %v25808_v27 = vld [vmem:[#allocation10_spill] sm:$0xff] }
 0x40b   : > { %19842 = vmatprep.subr.bf16.mxu1 %v19841_v11  ;;  %v19865_v8 = vpack.c.bf16 %v15509_v61, %v15508_v14  ;;  %v25819_v14 = vld [vmem:[#allocation21_spill] sm:$0xff]  ;;  %v25820_v61 = vld [vmem:[#allocation22_spill] sm:$0xff] }
 0x40d   : > { %18254 = vmatmul.mubr.msk.f32.gmra.mrb[8].mxu1 %vm406_vm3, %v22737_v42  ;;  %v15468_v42 = vld [vmem:[%s25384_s3 + $0x160] sm:$0xff] }
 0x40e   : > { %18256 = vmatprep.mubr.msk.f32.mxu1 %vm406_vm3, %v22747_v43  ;;  %v15469_v43 = vld [vmem:[%s25384_s3 + $0x168] sm:$0xff] }
 0x411   : > { %18257 = vmatmul.mubr.msk.f32.gmra.mrb[10].mxu1 %vm406_vm3, %v22749_v32  ;;  %v19849_v32 = vpack.c.bf16 %v15469_v43, %v15468_v42  ;;  %v15544_v42 = vld [vmem:[%s25384_s3 + $0x1c0] sm:$0xff]  ;;  %v15545_v43 = vld [vmem:[%s25384_s3 + $0x1c8] sm:$0xff] }
 0x412   : > { %18259 = vmatprep.mubr.msk.f32.mxu1 %vm406_vm3, %v22759_v46  ;;  %v15470_v46 = vld [vmem:[%s25384_s3 + $0x170] sm:$0xff] }
 0x415   : > { %18260 = vmatmul.mubr.msk.f32.gmra.mrb[12].mxu1 %vm406_vm3, %v22761_v47  ;;  %v15471_v47 = vld [vmem:[%s25384_s3 + $0x178] sm:$0xff] }
 0x416   : > { %18262 = vmatprep.mubr.msk.f32.mxu1 %vm406_vm3, %v22771_v54  ;;  %v19853_v54 = vpack.c.bf16 %v15471_v47, %v15470_v46  ;;  %v19873_v46 = vpack.c.bf16 %v15545_v43, %v15544_v42  ;;  %v25810_v47 = vld [vmem:[#allocation12_spill] sm:$0xff]  ;;  %v25827_v43 = vld [vmem:[#allocation29_spill] sm:$0xff] }
 0x417   : > { %v25826_v42 = vld [vmem:[#allocation28_spill] sm:$0xff] }
 0x419   : > { %18263 = vmatmul.mubr.msk.f32.gmra.mrb[14].mxu1 %vm406_vm3, %v22773_v55  ;;  %v15504_v55 = vld [vmem:[%s25384_s3 + $0x180] sm:$0xff] }
 0x41a   : > { %18265 = vmatprep.mubr.msk.f32.mxu1 %vm406_vm3, %v22783_v1  ;;  %v15505_v1 = vld [vmem:[%s25384_s3 + $0x188] sm:$0xff] }
 0x41d   : > { %18266 = vmatmul.mubr.msk.f32.gmra.mrb[16].mxu1 %vm406_vm3, %v22785_v2  ;;  %v19857_v2 = vpack.c.bf16 %v15505_v1, %v15504_v55  ;;  %v25812_v55 = vld [vmem:[#allocation14_spill] sm:$0xff]  ;;  %v25813_v1 = vld [vmem:[#allocation15_spill] sm:$0xff] }
 0x41e   : > { %18268 = vmatprep.mubr.msk.f32.mxu1 %vm406_vm3, %v22795_v16  ;;  %v25800_v16 = vld [vmem:[#allocation18_spill] sm:$0xff] }
 0x421   : > { %18269 = vmatmul.mubr.msk.f32.gmra.mrb[18].mxu1 %vm406_vm3, %v22797_v17  ;;  %v25801_v17 = vld [vmem:[#allocation19_spill] sm:$0xff] }
 0x422   : > { %18271 = vmatprep.mubr.msk.f32.mxu1 %vm406_vm3, %v22807_v29  ;;  %v25802_v29 = vld [vmem:[#allocation33_spill] sm:$0xff] }
 0x425   : > { %18272 = vmatmul.mubr.msk.f32.gmra.mrb[20].mxu1 %vm406_vm3, %v22809_v30  ;;  %v25803_v30 = vld [vmem:[#allocation35_spill] sm:$0xff] }
 0x426   : > { %18274 = vmatprep.mubr.msk.f32.mxu1 %vm406_vm3, %v22819_v28 }
 0x429   : > { %18275 = vmatmul.mubr.msk.f32.gmra.mrb[22].mxu1 %vm406_vm3, %v22821_v7 }
 0x42a   : > { %18277 = vmatprep.mubr.msk.f32.mxu1 %vm406_vm3, %v22831_v44 }
 0x42d   : > { %18278 = vmatmul.mubr.msk.f32.gmra.mrb[24].mxu1 %vm406_vm3, %v22833_v45 }
 0x42e   : > { %18280 = vmatprep.mubr.msk.f32.mxu1 %vm406_vm3, %v22842_v51 }
 0x431   : > { %18281 = vmatmul.mubr.msk.f32.gmra.mrb[26].mxu1 %vm406_vm3, %v22844_v52 }
 0x432   : > { %18283 = vmatprep.mubr.msk.f32.mxu1 %vm406_vm3, %v22851_v31 }
 0x435   : > { %18284 = vmatmul.mubr.msk.f32.gmra.mrb[28].mxu1 %vm406_vm3, %v22853_v53 }
 0x436   : > { %18286 = vmatprep.mubr.msk.f32.mxu1 %vm406_vm3, %v23236_v18 }
 0x439   : > { %18287 = vmatmul.mubr.msk.f32.gmra.mrb[30].mxu1 %vm406_vm3, %v23240_v0 }
 0x43a   : > { %18305 = vmatprep.mubr.msk.f32.mxu1 %vm406_vm3, %v22873_v9  ;;  %v25804_v9 = vld [vmem:[#allocation37_spill] sm:$0xff] }
 0x43d   : > { %18306 = vmatmul.mubr.msk.f32.vlgmr.msra.gmra.mrb[0].mxu1 %vm406_vm3, %v22878_v13  ;;  %v25805_v13 = vld [vmem:[#allocation38_spill] sm:$0xff] }
 0x43e   : > { %19844 = vmatpush3.bf16.msra.mxu1 %v19841_v11  ;;  %18308 = vmatprep.mubr.msk.f32.mxu1 %vm406_vm3, %v22888_v19  ;;  %v15510_v11 = vld [vmem:[%s25384_s3 + $0x1b0] sm:$0xff] }
 0x43f   : > { %19846 = vmatprep.subr.bf16.mxu1 %v19845_v40 }
 0x441   : > { %18309 = vmatmul.mubr.msk.f32.gmra.mrb[2].mxu1 %vm406_vm3, %v22892_v20 }
 0x442   : > { %18311 = vmatprep.mubr.msk.f32.mxu1 %vm406_vm3, %v22902_v23  ;;  %19848 = vmatpush3.bf16.msra.mxu1 %v19845_v40  ;;  %v19869_v40 = vpack.c.bf16 %v15511_v26, %v15510_v11  ;;  %v25823_v11 = vld [vmem:[#allocation25_spill] sm:$0xff]  ;;  %v25824_v26 = vld [vmem:[#allocation26_spill] sm:$0xff] }
 0x443   : > { %19850 = vmatprep.subr.bf16.mxu1 %v19849_v32 }
 0x445   : > { %18312 = vmatmul.mubr.msk.f32.gmra.mrb[4].mxu1 %vm406_vm3, %v22906_v36 }
 0x446   : > { %18314 = vmatprep.mubr.msk.f32.mxu1 %vm406_vm3, %v22910_v37  ;;  %19852 = vmatpush3.bf16.msra.mxu1 %v19849_v32  ;;  %v25809_v32 = vld [vmem:[#allocation11_spill] sm:$0xff] }
 0x447   : > { %19854 = vmatprep.subr.bf16.mxu1 %v19853_v54 }
 0x449   : > { %18315 = vmatmul.mubr.msk.f32.gmra.mrb[6].mxu1 %vm406_vm3, %v22914_v38 }
 0x44a   : > { %18317 = vmatprep.mubr.msk.f32.mxu1 %vm406_vm3, %v22918_v3  ;;  %19856 = vmatpush3.bf16.msra.mxu1 %v19853_v54  ;;  %v25811_v54 = vld [vmem:[#allocation13_spill] sm:$0xff] }
 0x44b   : > { %19858 = vmatprep.subr.bf16.mxu1 %v19857_v2 }
 0x44d   : > { %18318 = vmatmul.mubr.msk.f32.gmra.mrb[8].mxu1 %vm406_vm3, %v22922_v6 }
 0x44e   : > { %18320 = vmatprep.mubr.msk.f32.mxu1 %vm406_vm3, %v22926_v25 }
 0x451   : > { %18321 = vmatmul.mubr.msk.f32.gmra.mrb[10].mxu1 %vm406_vm3, %v22930_v4 }
 0x452   : > { %18323 = vmatprep.mubr.msk.f32.mxu1 %vm406_vm3, %v22934_v5 }
 0x455   : > { %18324 = vmatmul.mubr.msk.f32.gmra.mrb[12].mxu1 %vm406_vm3, %v22938_v33 }
 0x456   : > { %18326 = vmatprep.mubr.msk.f32.mxu1 %vm406_vm3, %v22942_v34 }
 0x459   : > { %18327 = vmatmul.mubr.msk.f32.gmra.mrb[14].mxu1 %vm406_vm3, %v22946_v35 }
 0x45a   : > { %18329 = vmatprep.mubr.msk.f32.mxu1 %vm406_vm3, %v22950_v41 }
 0x45d   : > { %18330 = vmatmul.mubr.msk.f32.gmra.mrb[16].mxu1 %vm406_vm3, %v22954_v48 }
 0x45e   : > { %18332 = vmatprep.mubr.msk.f32.mxu1 %vm406_vm3, %v22958_v49 }
 0x461   : > { %18333 = vmatmul.mubr.msk.f32.gmra.mrb[18].mxu1 %vm406_vm3, %v22962_v50 }
 0x462   : > { %18335 = vmatprep.mubr.msk.f32.mxu1 %vm406_vm3, %v22966_v56 }
 0x465   : > { %18336 = vmatmul.mubr.msk.f32.gmra.mrb[20].mxu1 %vm406_vm3, %v22970_v57 }
 0x466   : > { %18338 = vmatprep.mubr.msk.f32.mxu1 %vm406_vm3, %v22974_v58 }
 0x469   : > { %18339 = vmatmul.mubr.msk.f32.gmra.mrb[22].mxu1 %vm406_vm3, %v22978_v59 }
 0x46a   : > { %18341 = vmatprep.mubr.msk.f32.mxu1 %vm406_vm3, %v25800_v16 }
 0x46d   : > { %18342 = vmatmul.mubr.msk.f32.gmra.mrb[24].mxu1 %vm406_vm3, %v25801_v17 }
 0x46e   : > { %18344 = vmatprep.mubr.msk.f32.mxu1 %vm406_vm3, %v25802_v29 }
 0x471   : > { %18345 = vmatmul.mubr.msk.f32.gmra.mrb[26].mxu1 %vm406_vm3, %v25803_v30 }
 0x472   : > { %18347 = vmatprep.mubr.msk.f32.mxu1 %vm406_vm3, %v25804_v9 }
 0x475   : > { %18348 = vmatmul.mubr.msk.f32.gmra.mrb[28].mxu1 %vm406_vm3, %v25805_v13 }
 0x476   : > { %18350 = vmatprep.mubr.msk.f32.mxu1 %vm406_vm3, %v23328_v63 }
 0x479   : > { %18351 = vmatmul.mubr.msk.f32.gmra.mrb[30].mxu1 %vm406_vm3, %v23332_v22 }
 0x47a   : > { %18369 = vmatprep.mubr.msk.f32.mxu1 %vm406_vm3, %v25806_v24  ;;  %v25817_v24 = vld [vmem:[#allocation45_spill] sm:$0xff] }
 0x47d   : > { %18370 = vmatmul.mubr.msk.f32.vlgmr.msra.gmra.mrb[0].mxu1 %vm406_vm3, %v25807_v10  ;;  %v25821_v10 = vld [vmem:[#allocation23_spill] sm:$0xff] }
 0x47e   : > { %19860 = vmatpush3.bf16.msra.mxu1 %v19857_v2  ;;  %18372 = vmatprep.mubr.msk.f32.mxu1 %vm406_vm3, %v23034_v12  ;;  %v25814_v2 = vld [vmem:[#allocation16_spill] sm:$0xff] }
 0x47f   : > { %19862 = vmatprep.subr.bf16.mxu1 %v19861_v60 }
 0x481   : > { %18373 = vmatmul.mubr.msk.f32.gmra.mrb[2].mxu1 %vm406_vm3, %v25808_v27 }
 0x482   : > { %18375 = vmatprep.mubr.msk.f32.mxu1 %vm406_vm3, %v23048_v39  ;;  %19864 = vmatpush3.bf16.msra.mxu1 %v19861_v60  ;;  %v25818_v60 = vld [vmem:[#allocation20_spill] sm:$0xff] }
 0x483   : > { %19866 = vmatprep.subr.bf16.mxu1 %v19865_v8 }
 0x485   : > { %18376 = vmatmul.mubr.msk.f32.gmra.mrb[4].mxu1 %vm406_vm3, %v23052_v21 }
 0x486   : > { %18378 = vmatprep.mubr.msk.f32.mxu1 %vm406_vm3, %v25809_v32  ;;  %19868 = vmatpush3.bf16.msra.mxu1 %v19865_v8  ;;  %v25822_v8 = vld [vmem:[#allocation24_spill] sm:$0xff] }
 0x487   : > { %19870 = vmatprep.subr.bf16.mxu1 %v19869_v40 }
 0x489   : > { %18379 = vmatmul.mubr.msk.f32.gmra.mrb[6].mxu1 %vm406_vm3, %v25810_v47 }
 0x48a   : > { %18381 = vmatprep.mubr.msk.f32.mxu1 %vm406_vm3, %v25811_v54  ;;  %19872 = vmatpush3.bf16.msra.mxu1 %v19869_v40  ;;  %v25825_v40 = vld [vmem:[#allocation27_spill] sm:$0xff] }
 0x48b   : > { %19874 = vmatprep.subr.bf16.mxu1 %v19873_v46 }
 0x48d   : > { %18382 = vmatmul.mubr.msk.f32.gmra.mrb[8].mxu1 %vm406_vm3, %v25812_v55 }
 0x48e   : > { %18384 = vmatprep.mubr.msk.f32.mxu1 %vm406_vm3, %v25813_v1 }
 0x491   : > { %18385 = vmatmul.mubr.msk.f32.gmra.mrb[10].mxu1 %vm406_vm3, %v25814_v2 }
 0x492   : > { %18387 = vmatprep.mubr.msk.f32.mxu1 %vm406_vm3, %v25815_v15 }
 0x495   : > { %18388 = vmatmul.mubr.msk.f32.gmra.mrb[12].mxu1 %vm406_vm3, %v25816_v62 }
 0x496   : > { %18390 = vmatprep.mubr.msk.f32.mxu1 %vm406_vm3, %v25817_v24 }
 0x499   : > { %18391 = vmatmul.mubr.msk.f32.gmra.mrb[14].mxu1 %vm406_vm3, %v25818_v60  ;;  %v6441_v60 = vld [vmem:[#allocation3 + $0x50] sm:$0xff] }
 0x49a   : > { %18393 = vmatprep.mubr.msk.f32.mxu1 %vm406_vm3, %v25819_v14  ;;  %v6440_v14 = vld [vmem:[#allocation3 + $0x48] sm:$0xff] }
 0x49d   : > { %18394 = vmatmul.mubr.msk.f32.gmra.mrb[16].mxu1 %vm406_vm3, %v25820_v61  ;;  %v25828_v61 = vld [vmem:[#allocation30_spill] sm:$0xff] }
 0x49e   : > { %18396 = vmatprep.mubr.msk.f32.mxu1 %vm406_vm3, %v25821_v10  ;;  %v25829_v10 = vld [vmem:[#allocation31_spill] sm:$0xff] }
 0x4a1   : > { %18397 = vmatmul.mubr.msk.f32.gmra.mrb[18].mxu1 %vm406_vm3, %v25822_v8  ;;  %v25830_v8 = vld [vmem:[#allocation32_spill] sm:$0xff] }
 0x4a2   : > { %18399 = vmatprep.mubr.msk.f32.mxu1 %vm406_vm3, %v25823_v11  ;;  %v25831_v11 = vld [vmem:[#allocation34_spill] sm:$0xff] }
 0x4a5   : > { %18400 = vmatmul.mubr.msk.f32.gmra.mrb[20].mxu1 %vm406_vm3, %v25824_v26  ;;  %v25832_v26 = vld [vmem:[#allocation36_spill] sm:$0xff] }
 0x4a6   : > { %18402 = vmatprep.mubr.msk.f32.mxu1 %vm406_vm3, %v25825_v40  ;;  %v23420_v40 = vld [vmem:[#allocation3 + $0x182] sm:$0xff] }
 0x4a7   : > { %25833 = vst [vmem:[#allocation39_spill] sm:$0xff] %v23420_v40 }
 0x4a9   : > { %18403 = vmatmul.mubr.msk.f32.gmra.mrb[22].mxu1 %vm406_vm3, %v25826_v42  ;;  %v15549_v42 = vld [vmem:[%s25384_s3 + $0x1e8] sm:$0xff] }
 0x4aa   : > { %18405 = vmatprep.mubr.msk.f32.mxu1 %vm406_vm3, %v25827_v43  ;;  %v23424_v43 = vld [vmem:[#allocation3 + $0x18a] sm:$0xff] }
 0x4ab   : > { %25834 = vst [vmem:[#allocation41_spill] sm:$0xff] %v23424_v43 }
 0x4ad   : > { %18406 = vmatmul.mubr.msk.f32.gmra.mrb[24].mxu1 %vm406_vm3, %v25828_v61  ;;  %v6439_v61 = vld [vmem:[#allocation3 + $0x38] sm:$0xff] }
 0x4ae   : > { %18408 = vmatprep.mubr.msk.f32.mxu1 %vm406_vm3, %v25829_v10  ;;  %v15546_v10 = vld [vmem:[%s25384_s3 + $0x1d0] sm:$0xff] }
 0x4b1   : > { %18409 = vmatmul.mubr.msk.f32.gmra.mrb[26].mxu1 %vm406_vm3, %v25830_v8  ;;  %v15547_v8 = vld [vmem:[%s25384_s3 + $0x1d8] sm:$0xff] }
 0x4b2   : > { %18411 = vmatprep.mubr.msk.f32.mxu1 %vm406_vm3, %v25831_v11  ;;  %v6438_v11 = vld [vmem:[#allocation3 + $0x30] sm:$0xff] }
 0x4b5   : > { %18412 = vmatmul.mubr.msk.f32.gmra.mrb[28].mxu1 %vm406_vm3, %v25832_v26  ;;  %v19877_v26 = vpack.c.bf16 %v15547_v8, %v15546_v10  ;;  %v15550_v10 = vld [vmem:[%s25384_s3 + $0x1f0] sm:$0xff]  ;;  %v15551_v8 = vld [vmem:[%s25384_s3 + $0x1f8] sm:$0xff] }
 0x4b6   : > { %18414 = vmatprep.mubr.msk.f32.mxu1 %vm406_vm3, %v23420_v40  ;;  %v15548_v40 = vld [vmem:[%s25384_s3 + $0x1e0] sm:$0xff] }
 0x4b9   : > { %18415 = vmatmul.mubr.msk.f32.gmra.mrb[30].mxu1 %vm406_vm3, %v23424_v43  ;;  %v19881_v43 = vpack.c.bf16 %v15549_v42, %v15548_v40  ;;  %v15585_v40 = vld [vmem:[%s25384_s3 + $0x208] sm:$0xff] }
 0x4ba   : > { %18433 = vmatprep.mubr.msk.f32.mxu1 %vm406_vm3, %v6438_v11  ;;  %v6442_v11 = vld [vmem:[#allocation3 + $0x60] sm:$0xff]  ;;  %v6444_v42 = vld [vmem:[#allocation3 + $0x78] sm:$0xff] }
 0x4bd   : > { %18434 = vmatmul.mubr.msk.f32.vlgmr.msra.gmra.mrb[0].mxu1 %vm406_vm3, %v6439_v61  ;;  %v15584_v61 = vld [vmem:[%s25384_s3 + $0x200] sm:$0xff] }
 0x4be   : > { %19876 = vmatpush3.bf16.msra.mxu1 %v19873_v46  ;;  %18436 = vmatprep.mubr.msk.f32.mxu1 %vm406_vm3, %v6440_v14  ;;  %v19885_v46 = vpack.c.bf16 %v15551_v8, %v15550_v10  ;;  %v6443_v14 = vld [vmem:[#allocation3 + $0x68] sm:$0xff]  ;;  %v6446_v10 = vld [vmem:[#allocation3 + $0x90] sm:$0xff]  ;;  %v6447_v8 = vld [vmem:[#allocation3 + $0x98] sm:$0xff] }
 0x4bf   : > { %19878 = vmatprep.subr.bf16.mxu1 %v19877_v26 }
 0x4c1   : > { %18437 = vmatmul.mubr.msk.f32.gmra.mrb[2].mxu1 %vm406_vm3, %v6441_v60  ;;  %v19889_v60 = vpack.c.bf16 %v15585_v40, %v15584_v61  ;;  %v6451_v61 = vld [vmem:[#allocation3 + $0xc8] sm:$0xff]  ;;  %v6452_v40 = vld [vmem:[#allocation3 + $0xd8] sm:$0xff] }
 0x4c2   : > { %18439 = vmatprep.mubr.msk.f32.mxu1 %vm406_vm3, %v6442_v11  ;;  %19880 = vmatpush3.bf16.msra.mxu1 %v19877_v26  ;;  %v6445_v26 = vld [vmem:[#allocation3 + $0x80] sm:$0xff]  ;;  %v6448_v11 = vld [vmem:[#allocation3 + $0xa8] sm:$0xff] }
 0x4c3   : > { %19882 = vmatprep.subr.bf16.mxu1 %v19881_v43 }
 0x4c5   : > { %18440 = vmatmul.mubr.msk.f32.gmra.mrb[4].mxu1 %vm406_vm3, %v6443_v14  ;;  %v6449_v14 = vld [vmem:[#allocation3 + $0xb0] sm:$0xff] }
 0x4c6   : > { %18442 = vmatprep.mubr.msk.f32.mxu1 %vm406_vm3, %v6444_v42  ;;  %19884 = vmatpush3.bf16.msra.mxu1 %v19881_v43  ;;  %v6450_v43 = vld [vmem:[#allocation3 + $0xc0] sm:$0xff]  ;;  %v6454_v42 = vld [vmem:[#allocation3 + $0xf0] sm:$0xff] }
 0x4c7   : > { %19886 = vmatprep.subr.bf16.mxu1 %v19885_v46 }
 0x4c9   : > { %18443 = vmatmul.mubr.msk.f32.gmra.mrb[6].mxu1 %vm406_vm3, %v6445_v26  ;;  %v6455_v26 = vld [vmem:[#allocation3 + $0xf8] sm:$0xff] }
 0x4ca   : > { %18445 = vmatprep.mubr.msk.f32.mxu1 %vm406_vm3, %v6446_v10  ;;  %19888 = vmatpush3.bf16.msra.mxu1 %v19885_v46  ;;  %v6453_v46 = vld [vmem:[#allocation3 + $0xe0] sm:$0xff]  ;;  %v6456_v10 = vld [vmem:[#allocation3 + $0x108] sm:$0xff] }
 0x4cb   : > { %19890 = vmatprep.subr.bf16.mxu1 %v19889_v60 }
 0x4cd   : > { %18446 = vmatmul.mubr.msk.f32.gmra.mrb[8].mxu1 %vm406_vm3, %v6447_v8  ;;  %v6457_v8 = vld [vmem:[#allocation3 + $0x110] sm:$0xff] }
 0x4ce   : > { %18448 = vmatprep.mubr.msk.f32.mxu1 %vm406_vm3, %v6448_v11  ;;  %v15588_v11 = vld [vmem:[%s25384_s3 + $0x220] sm:$0xff] }
 0x4d1   : > { %18449 = vmatmul.mubr.msk.f32.gmra.mrb[10].mxu1 %vm406_vm3, %v6449_v14 }
 0x4d2   : > { %18451 = vmatprep.mubr.msk.f32.mxu1 %vm406_vm3, %v6450_v43  ;;  %v15589_v43 = vld [vmem:[%s25384_s3 + $0x228] sm:$0xff] }
 0x4d5   : > { %18452 = vmatmul.mubr.msk.f32.gmra.mrb[12].mxu1 %vm406_vm3, %v6451_v61  ;;  %v7727_v61 = vld [vmem:[#allocation4 + $0x20] sm:$0xff] }
 0x4d6   : > { %18454 = vmatprep.mubr.msk.f32.mxu1 %vm406_vm3, %v6452_v40  ;;  %v7728_v40 = vld [vmem:[#allocation4 + $0x28] sm:$0xff] }
 0x4d9   : > { %18455 = vmatmul.mubr.msk.f32.gmra.mrb[14].mxu1 %vm406_vm3, %v6453_v46  ;;  %v15590_v46 = vld [vmem:[%s25384_s3 + $0x230] sm:$0xff] }
 0x4da   : > { %18457 = vmatprep.mubr.msk.f32.mxu1 %vm406_vm3, %v6454_v42  ;;  %v19913_v42 = vpack.c.bf16 %v7728_v40, %v7727_v61 }
 0x4dd   : > { %18458 = vmatmul.mubr.msk.f32.gmra.mrb[16].mxu1 %vm406_vm3, %v6455_v26  ;;  %v15591_v26 = vld [vmem:[%s25384_s3 + $0x238] sm:$0xff] }
 0x4de   : > { %18460 = vmatprep.mubr.msk.f32.mxu1 %vm406_vm3, %v6456_v10  ;;  %v7729_v10 = vld [vmem:[#allocation4 + $0x30] sm:$0xff] }
 0x4e1   : > { %18461 = vmatmul.mubr.msk.f32.gmra.mrb[18].mxu1 %vm406_vm3, %v6457_v8  ;;  %v7730_v8 = vld [vmem:[#allocation4 + $0x38] sm:$0xff] }
 0x4e2   : > { %18463 = vmatprep.mubr.msk.f32.mxu1 %vm406_vm3, %v22819_v28  ;;  %v6468_v28 = vld [vmem:[#allocation3 + $0x198] sm:$0xff] }
 0x4e5   : > { %18464 = vmatmul.mubr.msk.f32.gmra.mrb[20].mxu1 %vm406_vm3, %v22821_v7  ;;  %v6469_v7 = vld [vmem:[#allocation3 + $0x1a0] sm:$0xff] }
 0x4e6   : > { %18466 = vmatprep.mubr.msk.f32.mxu1 %vm406_vm3, %v22831_v44  ;;  %v15586_v44 = vld [vmem:[%s25384_s3 + $0x210] sm:$0xff] }
 0x4e9   : > { %18467 = vmatmul.mubr.msk.f32.gmra.mrb[22].mxu1 %vm406_vm3, %v22833_v45  ;;  %v15587_v45 = vld [vmem:[%s25384_s3 + $0x218] sm:$0xff] }
 0x4ea   : > { %18469 = vmatprep.mubr.msk.f32.mxu1 %vm406_vm3, %v22842_v51  ;;  %v7723_v51 = vld [vmem:[#allocation4] sm:$0xff] }
 0x4ed   : > { %18470 = vmatmul.mubr.msk.f32.gmra.mrb[24].mxu1 %vm406_vm3, %v22844_v52  ;;  %v7724_v52 = vld [vmem:[#allocation4 + $0x8] sm:$0xff] }
 0x4ee   : > { %18472 = vmatprep.mubr.msk.f32.mxu1 %vm406_vm3, %v22851_v31  ;;  %v7725_v31 = vld [vmem:[#allocation4 + $0x10] sm:$0xff] }
 0x4f1   : > { %18473 = vmatmul.mubr.msk.f32.gmra.mrb[26].mxu1 %vm406_vm3, %v22853_v53  ;;  %v19905_v53 = vpack.c.bf16 %v7724_v52, %v7723_v51 }
 0x4f2   : > { %18475 = vmatprep.mubr.msk.f32.mxu1 %vm406_vm3, %v23236_v18  ;;  %v7726_v18 = vld [vmem:[#allocation4 + $0x18] sm:$0xff] }
 0x4f3   : > { %v19909_v14 = vpack.c.bf16 %v7726_v18, %v7725_v31  ;;  %19906 = vmatprep.subr.bf16.mxu0 %v19905_v53 }
 0x4f4   : > { %19908 = vmatpush3.bf16.msra.mxu0 %v19905_v53 }
 0x4f5   : > { %18476 = vmatmul.mubr.msk.f32.gmra.mrb[28].mxu1 %vm406_vm3, %v23240_v0  ;;  %v19893_v0 = vpack.c.bf16 %v15587_v45, %v15586_v44  ;;  %19910 = vmatprep.subr.bf16.mxu0 %v19909_v14 }
 0x4f6   : > { %18478 = vmatprep.mubr.msk.f32.mxu1 %vm406_vm3, %v6468_v28 }
 0x4f8   : > { %19912 = vmatpush3.bf16.msra.mxu0 %v19909_v14 }
 0x4f9   : > { %18479 = vmatmul.mubr.msk.f32.gmra.mrb[30].mxu1 %vm406_vm3, %v6469_v7  ;;  %19914 = vmatprep.subr.bf16.mxu0 %v19913_v42 }
 0x4fa   : > { %18497 = vmatprep.mubr.msk.f32.mxu1 %vm406_vm3, %v22888_v19  ;;  %v19897_v19 = vpack.c.bf16 %v15589_v43, %v15588_v11 }
 0x4fc   : > { %19916 = vmatpush3.bf16.msra.mxu0 %v19913_v42 }
 0x4fd   : > { %18498 = vmatmul.mubr.msk.f32.vlgmr.msra.gmra.mrb[0].mxu1 %vm406_vm3, %v22892_v20  ;;  %v19901_v20 = vpack.c.bf16 %v15591_v26, %v15590_v46 }
 0x4fe   : > { %19892 = vmatpush3.bf16.msra.mxu1 %v19889_v60  ;;  %18500 = vmatprep.mubr.msk.f32.mxu1 %vm406_vm3, %v22902_v23  ;;  %v19917_v23 = vpack.c.bf16 %v7730_v8, %v7729_v10 }
 0x4ff   : > { %19894 = vmatprep.subr.bf16.mxu1 %v19893_v0 }
 0x500   : > { %19918 = vmatprep.subr.bf16.mxu0 %v19917_v23 }
 0x501   : > { %18501 = vmatmul.mubr.msk.f32.gmra.mrb[2].mxu1 %vm406_vm3, %v22906_v36  ;;  %19920 = vmatpush3.bf16.msra.mxu0 %v19917_v23  ;;  %v6862_v36 = vld [vmem:[#allocation3 + $0x199] sm:$0xff] }
 0x502   : > { %18503 = vmatprep.mubr.msk.f32.mxu1 %vm406_vm3, %v22910_v37  ;;  %19896 = vmatpush3.bf16.msra.mxu1 %v19893_v0  ;;  %v6863_v37 = vld [vmem:[#allocation3 + $0x1a1] sm:$0xff] }
 0x503   : > { %19898 = vmatprep.subr.bf16.mxu1 %v19897_v19 }
 0x505   : > { %18504 = vmatmul.mubr.msk.f32.gmra.mrb[4].mxu1 %vm406_vm3, %v22914_v38  ;;  %v25835_v38 = vld [vmem:[#allocation20_spill] sm:$0xff] }
 0x506   : > { %18506 = vmatprep.mubr.msk.f32.mxu1 %vm406_vm3, %v22918_v3  ;;  %19900 = vmatpush3.bf16.msra.mxu1 %v19897_v19  ;;  %v25836_v3 = vld [vmem:[#allocation21_spill] sm:$0xff] }
 0x507   : > { %19902 = vmatprep.subr.bf16.mxu1 %v19901_v20 }
 0x509   : > { %18507 = vmatmul.mubr.msk.f32.gmra.mrb[6].mxu1 %vm406_vm3, %v22922_v6  ;;  %v25837_v6 = vld [vmem:[#allocation22_spill] sm:$0xff] }
 0x50a   : > { %18509 = vmatprep.mubr.msk.f32.mxu1 %vm406_vm3, %v22926_v25  ;;  %19904 = vmatpush3.bf16.msra.mxu1 %v19901_v20  ;;  %v25838_v25 = vld [vmem:[#allocation23_spill] sm:$0xff] }
 0x50d   : > { %18510 = vmatmul.mubr.msk.f32.gmra.mrb[8].mxu1 %vm406_vm3, %v22930_v4  ;;  %v25839_v4 = vld [vmem:[#allocation24_spill] sm:$0xff] }
 0x50e   : > { %18512 = vmatprep.mubr.msk.f32.mxu1 %vm406_vm3, %v22934_v5  ;;  %v25840_v5 = vld [vmem:[#allocation25_spill] sm:$0xff] }
 0x511   : > { %18513 = vmatmul.mubr.msk.f32.gmra.mrb[10].mxu1 %vm406_vm3, %v22938_v33  ;;  %v25841_v33 = vld [vmem:[#allocation26_spill] sm:$0xff] }
 0x512   : > { %18515 = vmatprep.mubr.msk.f32.mxu1 %vm406_vm3, %v22942_v34  ;;  %v25842_v34 = vld [vmem:[#allocation27_spill] sm:$0xff] }
 0x515   : > { %18516 = vmatmul.mubr.msk.f32.gmra.mrb[12].mxu1 %vm406_vm3, %v22946_v35  ;;  %v25843_v35 = vld [vmem:[#allocation28_spill] sm:$0xff] }
 0x516   : > { %18518 = vmatprep.mubr.msk.f32.mxu1 %vm406_vm3, %v22950_v41  ;;  %v25844_v41 = vld [vmem:[#allocation29_spill] sm:$0xff] }
 0x519   : > { %18519 = vmatmul.mubr.msk.f32.gmra.mrb[14].mxu1 %vm406_vm3, %v22954_v48  ;;  %v25845_v48 = vld [vmem:[#allocation30_spill] sm:$0xff] }
 0x51a   : > { %18521 = vmatprep.mubr.msk.f32.mxu1 %vm406_vm3, %v22958_v49  ;;  %v25846_v49 = vld [vmem:[#allocation31_spill] sm:$0xff] }
 0x51d   : > { %18522 = vmatmul.mubr.msk.f32.gmra.mrb[16].mxu1 %vm406_vm3, %v22962_v50  ;;  %v25847_v50 = vld [vmem:[#allocation32_spill] sm:$0xff] }
 0x51e   : > { %18524 = vmatprep.mubr.msk.f32.mxu1 %vm406_vm3, %v22966_v56  ;;  %v25848_v56 = vld [vmem:[#allocation34_spill] sm:$0xff] }
 0x521   : > { %18525 = vmatmul.mubr.msk.f32.gmra.mrb[18].mxu1 %vm406_vm3, %v22970_v57  ;;  %v25849_v57 = vld [vmem:[#allocation36_spill] sm:$0xff] }
 0x522   : > { %18527 = vmatprep.mubr.msk.f32.mxu1 %vm406_vm3, %v22974_v58  ;;  %v25850_v58 = vld [vmem:[#allocation39_spill] sm:$0xff] }
 0x525   : > { %18528 = vmatmul.mubr.msk.f32.gmra.mrb[20].mxu1 %vm406_vm3, %v22978_v59  ;;  %v7256_v59 = vld [vmem:[#allocation3 + $0x19a] sm:$0xff] }
 0x526   : > { %18530 = vmatprep.mubr.msk.f32.mxu1 %vm406_vm3, %v25800_v16  ;;  %v7692_v16 = vld [vmem:[#allocation3 + $0x8] sm:$0xff] }
 0x529   : > { %18531 = vmatmul.mubr.msk.f32.gmra.mrb[22].mxu1 %vm406_vm3, %v25801_v17  ;;  %v8117_v17 = vld [vmem:[#allocation4 + $0x40] sm:$0xff] }
 0x52a   : > { %18533 = vmatprep.mubr.msk.f32.mxu1 %vm406_vm3, %v25802_v29  ;;  %v8118_v29 = vld [vmem:[#allocation4 + $0x48] sm:$0xff] }
 0x52d   : > { %18534 = vmatmul.mubr.msk.f32.gmra.mrb[24].mxu1 %vm406_vm3, %v25803_v30  ;;  %v19921_v30 = vpack.c.bf16 %v8118_v29, %v8117_v17 }
 0x52e   : > { %18536 = vmatprep.mubr.msk.f32.mxu1 %vm406_vm3, %v25804_v9  ;;  %v8119_v9 = vld [vmem:[#allocation4 + $0x50] sm:$0xff] }
 0x52f   : > { %19922 = vmatprep.subr.bf16.mxu0 %v19921_v30 }
 0x531   : > { %18537 = vmatmul.mubr.msk.f32.gmra.mrb[26].mxu1 %vm406_vm3, %v25805_v13  ;;  %v8120_v13 = vld [vmem:[#allocation4 + $0x58] sm:$0xff] }
 0x532   : > { %18539 = vmatprep.mubr.msk.f32.mxu1 %vm406_vm3, %v23328_v63  ;;  %v19925_v63 = vpack.c.bf16 %v8120_v13, %v8119_v9 }
 0x535   : > { %18540 = vmatmul.mubr.msk.f32.gmra.mrb[28].mxu1 %vm406_vm3, %v23332_v22  ;;  %v8121_v22 = vld [vmem:[#allocation4 + $0x60] sm:$0xff] }
 0x536   : > { %18542 = vmatprep.mubr.msk.f32.mxu1 %vm406_vm3, %v6862_v36 }
 0x539   : > { %18543 = vmatmul.mubr.msk.f32.gmra.mrb[30].mxu1 %vm406_vm3, %v6863_v37 }
 0x53a   : > { %18561 = vmatprep.mubr.msk.f32.mxu1 %vm406_vm3, %v23034_v12  ;;  %v7257_v12 = vld [vmem:[#allocation3 + $0x1a2] sm:$0xff] }
 0x53d   : > { %18562 = vmatmul.mubr.msk.f32.vlgmr.msra.gmra.mrb[0].mxu1 %vm406_vm3, %v25808_v27  ;;  %v8122_v27 = vld [vmem:[#allocation4 + $0x68] sm:$0xff] }
 0x53e   : > { %18564 = vmatprep.mubr.msk.f32.mxu1 %vm406_vm3, %v23048_v39  ;;  %v25851_v39 = vld [vmem:[#allocation41_spill] sm:$0xff] }
 0x541   : > { %18565 = vmatmul.mubr.msk.f32.gmra.mrb[2].mxu1 %vm406_vm3, %v23052_v21  ;;  %v7691_v21 = vld [vmem:[#allocation3] sm:$0xff] }
 0x542   : > { %18567 = vmatprep.mubr.msk.f32.mxu1 %vm406_vm3, %v25809_v32  ;;  %18625 = vmatprep.mubr.msk.f32.mxu0 %vm406_vm3, %v7691_v21  ;;  %v19929_v32 = vpack.c.bf16 %v8122_v27, %v8121_v22 }
 0x543   : > { %18626 = vmatmul.mubr.msk.f32.vlgmr.msra.gmra.mrb[32].mxu0 %vm406_vm3, %v7692_v16 }
 0x544   : > { %19924 = vmatpush3.bf16.msra.mxu0 %v19921_v30 }
 0x545   : > { %18568 = vmatmul.mubr.msk.f32.gmra.mrb[4].mxu1 %vm406_vm3, %v25810_v47  ;;  %19926 = vmatprep.subr.bf16.mxu0 %v19925_v63  ;;  %v8123_v47 = vld [vmem:[#allocation4 + $0x70] sm:$0xff] }
 0x546   : > { %18570 = vmatprep.mubr.msk.f32.mxu1 %vm406_vm3, %v25811_v54  ;;  %v8124_v54 = vld [vmem:[#allocation4 + $0x78] sm:$0xff] }
 0x548   : > { %19928 = vmatpush3.bf16.msra.mxu0 %v19925_v63 }
 0x549   : > { %18571 = vmatmul.mubr.msk.f32.gmra.mrb[6].mxu1 %vm406_vm3, %v25812_v55  ;;  %19930 = vmatprep.subr.bf16.mxu0 %v19929_v32  ;;  %v19933_v55 = vpack.c.bf16 %v8124_v54, %v8123_v47 }
 0x54a   : > { %18573 = vmatprep.mubr.msk.f32.mxu1 %vm406_vm3, %v25813_v1  ;;  %v8511_v1 = vld [vmem:[#allocation4 + $0x80] sm:$0xff] }
 0x54c   : > { %19932 = vmatpush3.bf16.msra.mxu0 %v19929_v32 }
 0x54d   : > { %18574 = vmatmul.mubr.msk.f32.gmra.mrb[8].mxu1 %vm406_vm3, %v25814_v2  ;;  %19934 = vmatprep.subr.bf16.mxu0 %v19933_v55  ;;  %v8512_v2 = vld [vmem:[#allocation4 + $0x88] sm:$0xff] }
 0x54e   : > { %18576 = vmatprep.mubr.msk.f32.mxu1 %vm406_vm3, %v25815_v15  ;;  %v23638_v15 = vpack.c.bf16 %v8512_v2, %v8511_v1 }
 0x550   : > { %19936 = vmatpush3.bf16.msra.mxu0 %v19933_v55 }
 0x551   : > { %18577 = vmatmul.mubr.msk.f32.gmra.mrb[10].mxu1 %vm406_vm3, %v25816_v62  ;;  %19938 = vmatprep.subr.bf16.mxu0 %v23638_v15  ;;  %v23644_v62 = vld [vmem:[%s25385_s4] ss:$0 sm:$0xff] }
 0x552   : > { %18579 = vmatprep.mubr.msk.f32.mxu1 %vm406_vm3, %v25817_v24 }
 0x555   : > { %18580 = vmatmul.mubr.msk.f32.gmra.mrb[12].mxu1 %vm406_vm3, %v25835_v38 }
 0x556   : > { %18582 = vmatprep.mubr.msk.f32.mxu1 %vm406_vm3, %v25836_v3 }
 0x559   : > { %18583 = vmatmul.mubr.msk.f32.gmra.mrb[14].mxu1 %vm406_vm3, %v25837_v6 }
 0x55a   : > { %18585 = vmatprep.mubr.msk.f32.mxu1 %vm406_vm3, %v25838_v25 }
 0x55d   : > { %18586 = vmatmul.mubr.msk.f32.gmra.mrb[16].mxu1 %vm406_vm3, %v25839_v4 }
 0x55e   : > { %18588 = vmatprep.mubr.msk.f32.mxu1 %vm406_vm3, %v25840_v5 }
 0x561   : > { %18589 = vmatmul.mubr.msk.f32.gmra.mrb[18].mxu1 %vm406_vm3, %v25841_v33 }
 0x562   : > { %18591 = vmatprep.mubr.msk.f32.mxu1 %vm406_vm3, %v25842_v34 }
 0x565   : > { %18592 = vmatmul.mubr.msk.f32.gmra.mrb[20].mxu1 %vm406_vm3, %v25843_v35 }
 0x566   : > { %18594 = vmatprep.mubr.msk.f32.mxu1 %vm406_vm3, %v25844_v41 }
 0x569   : > { %18595 = vmatmul.mubr.msk.f32.gmra.mrb[22].mxu1 %vm406_vm3, %v25845_v48 }
 0x56a   : > { %18597 = vmatprep.mubr.msk.f32.mxu1 %vm406_vm3, %v25846_v49 }
 0x56d   : > { %18598 = vmatmul.mubr.msk.f32.gmra.mrb[24].mxu1 %vm406_vm3, %v25847_v50 }
 0x56e   : > { %18600 = vmatprep.mubr.msk.f32.mxu1 %vm406_vm3, %v25848_v56 }
 0x571   : > { %18601 = vmatmul.mubr.msk.f32.gmra.mrb[26].mxu1 %vm406_vm3, %v25849_v57 }
 0x572   : > { %18603 = vmatprep.mubr.msk.f32.mxu1 %vm406_vm3, %v25850_v58 }
 0x575   : > { %18604 = vmatmul.mubr.msk.f32.gmra.mrb[28].mxu1 %vm406_vm3, %v25851_v39 }
 0x576   : > { %18606 = vmatprep.mubr.msk.f32.mxu1 %vm406_vm3, %v7256_v59 }
 0x579   : > { %18607 = vmatmul.mubr.msk.f32.gmra.mrb[30].mxu1 %vm406_vm3, %v7257_v12 }
 0x610   : > { %v18563_v24 = vpop.f32.mrb[0].mxu1 }
 0x611   : > { %v20233_v60 = vadd.f32 %v18563_v24, %v23644_v62  ;;  %v7429_v28 = vpop.f32.mrb[1].mxu1 }
 0x612   : > { %v20234_v7 = vadd.f32 %v23644_v62, %v7429_v28 }
 0x613   : > { %v7621_v44 = vmax.f32 %v20233_v60, 0.0 }
 0x614   : > { %v7620_v45 = vmax.f32 %v20234_v7, 0.0  ;;  %v18566_v51 = vpop.f32.mrb[2].mxu1 }
 0x615   : > { %7653 = vst.msk [vmem:[#allocation3 + $0x21] sm:$0xff] %vm406_vm3, %v7621_v44  ;;  %v20235_v52 = vadd.f32 %v18566_v51, %v23644_v62  ;;  %v7439_v31 = vpop.f32.mrb[3].mxu1 }
 0x616   : > { %7652 = vst.msk [vmem:[#allocation3 + $0x19] sm:$0xff] %vm406_vm3, %v7620_v45  ;;  %v20236_v53 = vadd.f32 %v23644_v62, %v7439_v31 }
 0x617   : > { %v7623_v18 = vmax.f32 %v20235_v52, 0.0 }
 0x618   : > { %v7622_v0 = vmax.f32 %v20236_v53, 0.0  ;;  %v18569_v11 = vpop.f32.mrb[4].mxu1 }
 0x619   : > { %7655 = vst.msk [vmem:[#allocation3 + $0x39] sm:$0xff] %vm406_vm3, %v7623_v18  ;;  %v20237_v14 = vadd.f32 %v18569_v11, %v23644_v62  ;;  %v7449_v43 = vpop.f32.mrb[5].mxu1 }
 0x61a   : > { %7654 = vst.msk [vmem:[#allocation3 + $0x31] sm:$0xff] %vm406_vm3, %v7622_v0  ;;  %v20238_v61 = vadd.f32 %v23644_v62, %v7449_v43 }
 0x61b   : > { %v7625_v40 = vmax.f32 %v20237_v14, 0.0 }
 0x61c   : > { %v7624_v19 = vmax.f32 %v20238_v61, 0.0  ;;  %v18572_v46 = vpop.f32.mrb[6].mxu1 }
 0x61d   : > { %7657 = vst.msk [vmem:[#allocation3 + $0x51] sm:$0xff] %vm406_vm3, %v7625_v40  ;;  %v20239_v42 = vadd.f32 %v18572_v46, %v23644_v62  ;;  %v7459_v26 = vpop.f32.mrb[7].mxu1  ;;  %v23658_v10 = vld [vmem:[#allocation3 + $0x18] sm:$0xff]  ;;  %v23660_v8 = vld [vmem:[#allocation3 + $0x20] sm:$0xff] }
 0x61e   : > { %7656 = vst.msk [vmem:[#allocation3 + $0x49] sm:$0xff] %vm406_vm3, %v7624_v19  ;;  %v20240_v20 = vadd.f32 %v23644_v62, %v7459_v26  ;;  %18628 = vmatprep.mubr.msk.f32.mxu0 %vm406_vm3, %v23658_v10 }
 0x61f   : > { %v7627_v23 = vmax.f32 %v20239_v42, 0.0  ;;  %18629 = vmatmul.mubr.msk.f32.gmra.mrb[34].mxu0 %vm406_vm3, %v23660_v8 }
 0x620   : > { %v7626_v36 = vmax.f32 %v20240_v20, 0.0  ;;  %v18575_v37 = vpop.f32.mrb[8].mxu1 }
 0x621   : > { %7659 = vst.msk [vmem:[#allocation3 + $0x69] sm:$0xff] %vm406_vm3, %v7627_v23  ;;  %v20241_v38 = vadd.f32 %v18575_v37, %v23644_v62  ;;  %v7469_v3 = vpop.f32.mrb[9].mxu1  ;;  %v23670_v6 = vld [vmem:[#allocation3 + $0x30] sm:$0xff]  ;;  %v23672_v25 = vld [vmem:[#allocation3 + $0x38] sm:$0xff] }
 0x622   : > { %7658 = vst.msk [vmem:[#allocation3 + $0x61] sm:$0xff] %vm406_vm3, %v7626_v36  ;;  %v20242_v4 = vadd.f32 %v23644_v62, %v7469_v3  ;;  %18631 = vmatprep.mubr.msk.f32.mxu0 %vm406_vm3, %v23670_v6 }
 0x623   : > { %v7629_v5 = vmax.f32 %v20241_v38, 0.0  ;;  %18632 = vmatmul.mubr.msk.f32.gmra.mrb[36].mxu0 %vm406_vm3, %v23672_v25 }
 0x624   : > { %v7628_v33 = vmax.f32 %v20242_v4, 0.0  ;;  %v18578_v34 = vpop.f32.mrb[10].mxu1 }
 0x625   : > { %7661 = vst.msk [vmem:[#allocation3 + $0x81] sm:$0xff] %vm406_vm3, %v7629_v5  ;;  %v20243_v35 = vadd.f32 %v18578_v34, %v23644_v62  ;;  %v7479_v41 = vpop.f32.mrb[11].mxu1  ;;  %v23682_v48 = vld [vmem:[#allocation3 + $0x48] sm:$0xff]  ;;  %v23684_v49 = vld [vmem:[#allocation3 + $0x50] sm:$0xff] }
 0x626   : > { %7660 = vst.msk [vmem:[#allocation3 + $0x79] sm:$0xff] %vm406_vm3, %v7628_v33  ;;  %v20244_v50 = vadd.f32 %v23644_v62, %v7479_v41  ;;  %18634 = vmatprep.mubr.msk.f32.mxu0 %vm406_vm3, %v23682_v48 }
 0x627   : > { %v7631_v56 = vmax.f32 %v20243_v35, 0.0  ;;  %18635 = vmatmul.mubr.msk.f32.gmra.mrb[38].mxu0 %vm406_vm3, %v23684_v49 }
 0x628   : > { %v7630_v57 = vmax.f32 %v20244_v50, 0.0  ;;  %v18581_v58 = vpop.f32.mrb[12].mxu1 }
 0x629   : > { %7663 = vst.msk [vmem:[#allocation3 + $0x99] sm:$0xff] %vm406_vm3, %v7631_v56  ;;  %v20245_v59 = vadd.f32 %v18581_v58, %v23644_v62  ;;  %v7489_v39 = vpop.f32.mrb[13].mxu1  ;;  %v23694_v12 = vld [vmem:[#allocation3 + $0x60] sm:$0xff]  ;;  %v23696_v21 = vld [vmem:[#allocation3 + $0x68] sm:$0xff] }
 0x62a   : > { %7662 = vst.msk [vmem:[#allocation3 + $0x91] sm:$0xff] %vm406_vm3, %v7630_v57  ;;  %v20246_v16 = vadd.f32 %v23644_v62, %v7489_v39  ;;  %18637 = vmatprep.mubr.msk.f32.mxu0 %vm406_vm3, %v23694_v12 }
 0x62b   : > { %v7633_v17 = vmax.f32 %v20245_v59, 0.0  ;;  %18638 = vmatmul.mubr.msk.f32.gmra.mrb[40].mxu0 %vm406_vm3, %v23696_v21 }
 0x62c   : > { %v7632_v29 = vmax.f32 %v20246_v16, 0.0  ;;  %v18584_v30 = vpop.f32.mrb[14].mxu1 }
 0x62d   : > { %7665 = vst.msk [vmem:[#allocation3 + $0xb1] sm:$0xff] %vm406_vm3, %v7633_v17  ;;  %v20247_v9 = vadd.f32 %v18584_v30, %v23644_v62  ;;  %v7499_v13 = vpop.f32.mrb[15].mxu1  ;;  %v23706_v63 = vld [vmem:[#allocation3 + $0x78] sm:$0xff]  ;;  %v23708_v22 = vld [vmem:[#allocation3 + $0x80] sm:$0xff] }
 0x62e   : > { %7664 = vst.msk [vmem:[#allocation3 + $0xa9] sm:$0xff] %vm406_vm3, %v7632_v29  ;;  %v20248_v27 = vadd.f32 %v23644_v62, %v7499_v13  ;;  %18640 = vmatprep.mubr.msk.f32.mxu0 %vm406_vm3, %v23706_v63 }
 0x62f   : > { %v7635_v32 = vmax.f32 %v20247_v9, 0.0  ;;  %18641 = vmatmul.mubr.msk.f32.gmra.mrb[42].mxu0 %vm406_vm3, %v23708_v22 }
 0x630   : > { %v7634_v47 = vmax.f32 %v20248_v27, 0.0  ;;  %v18587_v54 = vpop.f32.mrb[16].mxu1 }
 0x631   : > { %7667 = vst.msk [vmem:[#allocation3 + $0xc9] sm:$0xff] %vm406_vm3, %v7635_v32  ;;  %v20249_v55 = vadd.f32 %v18587_v54, %v23644_v62  ;;  %v7509_v1 = vpop.f32.mrb[17].mxu1  ;;  %v23718_v2 = vld [vmem:[#allocation3 + $0x90] sm:$0xff]  ;;  %v23720_v24 = vld [vmem:[#allocation3 + $0x98] sm:$0xff] }
 0x632   : > { %7666 = vst.msk [vmem:[#allocation3 + $0xc1] sm:$0xff] %vm406_vm3, %v7634_v47  ;;  %v20250_v60 = vadd.f32 %v23644_v62, %v7509_v1  ;;  %18643 = vmatprep.mubr.msk.f32.mxu0 %vm406_vm3, %v23718_v2 }
 0x633   : > { %v7637_v28 = vmax.f32 %v20249_v55, 0.0  ;;  %18644 = vmatmul.mubr.msk.f32.gmra.mrb[44].mxu0 %vm406_vm3, %v23720_v24 }
 0x634   : > { %v7636_v7 = vmax.f32 %v20250_v60, 0.0  ;;  %v18590_v44 = vpop.f32.mrb[18].mxu1 }
 0x635   : > { %7669 = vst.msk [vmem:[#allocation3 + $0xe1] sm:$0xff] %vm406_vm3, %v7637_v28  ;;  %v20251_v45 = vadd.f32 %v18590_v44, %v23644_v62  ;;  %v7519_v51 = vpop.f32.mrb[19].mxu1  ;;  %v23730_v52 = vld [vmem:[#allocation3 + $0xa8] sm:$0xff]  ;;  %v23732_v31 = vld [vmem:[#allocation3 + $0xb0] sm:$0xff] }
 0x636   : > { %7668 = vst.msk [vmem:[#allocation3 + $0xd9] sm:$0xff] %vm406_vm3, %v7636_v7  ;;  %v20252_v53 = vadd.f32 %v23644_v62, %v7519_v51  ;;  %18646 = vmatprep.mubr.msk.f32.mxu0 %vm406_vm3, %v23730_v52 }
 0x637   : > { %v7639_v18 = vmax.f32 %v20251_v45, 0.0  ;;  %18647 = vmatmul.mubr.msk.f32.gmra.mrb[46].mxu0 %vm406_vm3, %v23732_v31 }
 0x638   : > { %v7638_v0 = vmax.f32 %v20252_v53, 0.0  ;;  %v18593_v11 = vpop.f32.mrb[20].mxu1 }
 0x639   : > { %7671 = vst.msk [vmem:[#allocation3 + $0xf9] sm:$0xff] %vm406_vm3, %v7639_v18  ;;  %v20253_v14 = vadd.f32 %v18593_v11, %v23644_v62  ;;  %v7529_v43 = vpop.f32.mrb[21].mxu1  ;;  %v23742_v61 = vld [vmem:[#allocation3 + $0xc0] sm:$0xff]  ;;  %v23744_v40 = vld [vmem:[#allocation3 + $0xc8] sm:$0xff] }
 0x63a   : > { %7670 = vst.msk [vmem:[#allocation3 + $0xf1] sm:$0xff] %vm406_vm3, %v7638_v0  ;;  %v20254_v19 = vadd.f32 %v23644_v62, %v7529_v43  ;;  %18649 = vmatprep.mubr.msk.f32.mxu0 %vm406_vm3, %v23742_v61 }
 0x63b   : > { %v7641_v46 = vmax.f32 %v20253_v14, 0.0  ;;  %18650 = vmatmul.mubr.msk.f32.gmra.mrb[48].mxu0 %vm406_vm3, %v23744_v40 }
 0x63c   : > { %v7640_v42 = vmax.f32 %v20254_v19, 0.0  ;;  %v18596_v26 = vpop.f32.mrb[22].mxu1  ;;  %v8084_v19 = vld [vmem:[#allocation3 + $0x1] sm:$0xff] }
 0x63d   : > { %7673 = vst.msk [vmem:[#allocation3 + $0x111] sm:$0xff] %vm406_vm3, %v7641_v46  ;;  %v20255_v20 = vadd.f32 %v18596_v26, %v23644_v62  ;;  %v7539_v23 = vpop.f32.mrb[23].mxu1  ;;  %v23754_v36 = vld [vmem:[#allocation3 + $0xd8] sm:$0xff]  ;;  %v23756_v37 = vld [vmem:[#allocation3 + $0xe0] sm:$0xff]  ;;  %v8085_v26 = vld [vmem:[#allocation3 + $0x9] sm:$0xff] }
 0x63e   : > { %7672 = vst.msk [vmem:[#allocation3 + $0x109] sm:$0xff] %vm406_vm3, %v7640_v42  ;;  %v20256_v38 = vadd.f32 %v23644_v62, %v7539_v23  ;;  %18652 = vmatprep.mubr.msk.f32.mxu0 %vm406_vm3, %v23754_v36  ;;  %v8513_v46 = vld [vmem:[#allocation4 + $0x90] sm:$0xff]  ;;  %v8514_v42 = vld [vmem:[#allocation4 + $0x98] sm:$0xff]  ;;  %v8515_v23 = vld [vmem:[#allocation4 + $0xa0] sm:$0xff] }
 0x63f   : > { %v7643_v3 = vmax.f32 %v20255_v20, 0.0  ;;  %18653 = vmatmul.mubr.msk.f32.gmra.mrb[50].mxu0 %vm406_vm3, %v23756_v37  ;;  %v19941_v20 = vpack.c.bf16 %v8514_v42, %v8513_v46 }
 0x640   : > { %v7642_v4 = vmax.f32 %v20256_v38, 0.0  ;;  %v18599_v5 = vpop.f32.mrb[24].mxu1  ;;  %v8516_v38 = vld [vmem:[#allocation4 + $0xa8] sm:$0xff] }
 0x641   : > { %7675 = vst.msk [vmem:[#allocation3 + $0x129] sm:$0xff] %vm406_vm3, %v7643_v3  ;;  %v20257_v33 = vadd.f32 %v18599_v5, %v23644_v62  ;;  %v7549_v34 = vpop.f32.mrb[25].mxu1  ;;  %v23766_v35 = vld [vmem:[#allocation3 + $0xf0] sm:$0xff]  ;;  %v23768_v41 = vld [vmem:[#allocation3 + $0xf8] sm:$0xff]  ;;  %v23837_v5 = vld [vmem:[#allocation3 + $0x21] sm:$0xff] }
 0x642   : > { %7674 = vst.msk [vmem:[#allocation3 + $0x121] sm:$0xff] %vm406_vm3, %v7642_v4  ;;  %v20258_v50 = vadd.f32 %v23644_v62, %v7549_v34  ;;  %18655 = vmatprep.mubr.msk.f32.mxu0 %vm406_vm3, %v23766_v35  ;;  %v23832_v3 = vld [vmem:[#allocation3 + $0x19] sm:$0xff]  ;;  %v19945_v4 = vpack.c.bf16 %v8516_v38, %v8515_v23  ;;  %v8518_v34 = vld [vmem:[#allocation4 + $0xb8] sm:$0xff] }
 0x643   : > { %v7645_v56 = vmax.f32 %v20257_v33, 0.0  ;;  %18656 = vmatmul.mubr.msk.f32.gmra.mrb[52].mxu0 %vm406_vm3, %v23768_v41  ;;  %v8517_v33 = vld [vmem:[#allocation4 + $0xb0] sm:$0xff] }
 0x644   : > { %v7644_v57 = vmax.f32 %v20258_v50, 0.0  ;;  %v18602_v58 = vpop.f32.mrb[26].mxu1  ;;  %v23841_v50 = vld [vmem:[#allocation3 + $0x31] sm:$0xff] }
 0x645   : > { %7677 = vst.msk [vmem:[#allocation3 + $0x141] sm:$0xff] %vm406_vm3, %v7645_v56  ;;  %v20259_v59 = vadd.f32 %v18602_v58, %v23644_v62  ;;  %v7559_v39 = vpop.f32.mrb[27].mxu1  ;;  %v23778_v16 = vld [vmem:[#allocation3 + $0x108] sm:$0xff]  ;;  %v23780_v17 = vld [vmem:[#allocation3 + $0x110] sm:$0xff]  ;;  %v23845_v56 = vld [vmem:[#allocation3 + $0x39] sm:$0xff] }
 0x646   : > { %7676 = vst.msk [vmem:[#allocation3 + $0x139] sm:$0xff] %vm406_vm3, %v7644_v57  ;;  %v20260_v29 = vadd.f32 %v23644_v62, %v7559_v39  ;;  %18658 = vmatprep.mubr.msk.f32.mxu0 %vm406_vm3, %v23778_v16  ;;  %v8905_v57 = vld [vmem:[#allocation4 + $0xc0] sm:$0xff]  ;;  %v8906_v58 = vld [vmem:[#allocation4 + $0xc8] sm:$0xff] }
 0x647   : > { %v7647_v30 = vmax.f32 %v20259_v59, 0.0  ;;  %18659 = vmatmul.mubr.msk.f32.gmra.mrb[54].mxu0 %vm406_vm3, %v23780_v17  ;;  %v23849_v59 = vld [vmem:[#allocation3 + $0x49] sm:$0xff]  ;;  %v19953_v39 = vpack.c.bf16 %v8906_v58, %v8905_v57  ;;  %v23917_v46 = vld [vmem:[#allocation3 + $0x111] sm:$0xff]  ;;  %v8907_v57 = vld [vmem:[#allocation4 + $0xd0] sm:$0xff] }
 0x648   : > { %v7646_v9 = vmax.f32 %v20260_v29, 0.0  ;;  %v18605_v13 = vpop.f32.mrb[28].mxu1  ;;  %v23853_v29 = vld [vmem:[#allocation3 + $0x51] sm:$0xff]  ;;  %25852 = vst [vmem:[#allocation43_spill] sm:$0xff] %v23917_v46  ;;  %v8908_v58 = vld [vmem:[#allocation4 + $0xd8] sm:$0xff] }
 0x649   : > { %7679 = vst.msk [vmem:[#allocation3 + $0x159] sm:$0xff] %vm406_vm3, %v7647_v30  ;;  %v20261_v27 = vadd.f32 %v18605_v13, %v23644_v62  ;;  %v7569_v32 = vpop.f32.mrb[29].mxu1  ;;  %v23790_v47 = vld [vmem:[#allocation3 + $0x120] sm:$0xff]  ;;  %v23792_v54 = vld [vmem:[#allocation3 + $0x128] sm:$0xff] }
 0x64a   : > { %7678 = vst.msk [vmem:[#allocation3 + $0x151] sm:$0xff] %vm406_vm3, %v7646_v9  ;;  %v20262_v55 = vadd.f32 %v23644_v62, %v7569_v32  ;;  %18661 = vmatprep.mubr.msk.f32.mxu0 %vm406_vm3, %v23790_v47  ;;  %v23857_v30 = vld [vmem:[#allocation3 + $0x61] sm:$0xff]  ;;  %v23861_v9 = vld [vmem:[#allocation3 + $0x69] sm:$0xff]  ;;  %v23865_v13 = vld [vmem:[#allocation3 + $0x79] sm:$0xff] }
 0x64b   : > { %v7649_v1 = vmax.f32 %v20261_v27, 0.0  ;;  %18662 = vmatmul.mubr.msk.f32.gmra.mrb[56].mxu0 %vm406_vm3, %v23792_v54  ;;  %v23869_v27 = vld [vmem:[#allocation3 + $0x81] sm:$0xff]  ;;  %v23873_v32 = vld [vmem:[#allocation3 + $0x91] sm:$0xff] }
 0x64c   : > { %v7648_v60 = vmax.f32 %v20262_v55, 0.0  ;;  %v18608_v28 = vpop.f32.mrb[30].mxu1  ;;  %v23877_v55 = vld [vmem:[#allocation3 + $0x99] sm:$0xff]  ;;  %v23921_v42 = vld [vmem:[#allocation3 + $0x121] sm:$0xff] }
 0x64d   : > { %7681 = vst.msk [vmem:[#allocation3 + $0x171] sm:$0xff] %vm406_vm3, %v7649_v1  ;;  %v20263_v7 = vadd.f32 %v18608_v28, %v23644_v62  ;;  %v7579_v44 = vpop.f32.mrb[31].mxu1  ;;  %v23802_v45 = vld [vmem:[#allocation3 + $0x138] sm:$0xff]  ;;  %v23804_v51 = vld [vmem:[#allocation3 + $0x140] sm:$0xff]  ;;  %v23881_v1 = vld [vmem:[#allocation3 + $0xa9] sm:$0xff] }
 0x64e   : > { %7680 = vst.msk [vmem:[#allocation3 + $0x169] sm:$0xff] %vm406_vm3, %v7648_v60  ;;  %v20264_v53 = vadd.f32 %v23644_v62, %v7579_v44  ;;  %18664 = vmatprep.mubr.msk.f32.mxu0 %vm406_vm3, %v23802_v45  ;;  %v23885_v60 = vld [vmem:[#allocation3 + $0xb1] sm:$0xff]  ;;  %v23889_v28 = vld [vmem:[#allocation3 + $0xc1] sm:$0xff]  ;;  %v23897_v44 = vld [vmem:[#allocation3 + $0xd9] sm:$0xff] }
 0x64f   : > { %v7651_v18 = vmax.f32 %v20263_v7, 0.0  ;;  %18665 = vmatmul.mubr.msk.f32.gmra.mrb[58].mxu0 %vm406_vm3, %v23804_v51  ;;  %v23893_v7 = vld [vmem:[#allocation3 + $0xc9] sm:$0xff]  ;;  %25853 = vst [vmem:[#allocation18_spill] sm:$0xff] %v23921_v42  ;;  %v23933_v23 = vld [vmem:[#allocation3 + $0x141] sm:$0xff] }
 0x650   : > { %v7650_v0 = vmax.f32 %v20264_v53, 0.0  ;;  %v23901_v53 = vld [vmem:[#allocation3 + $0xe1] sm:$0xff]  ;;  %25856 = vst [vmem:[#allocation35_spill] sm:$0xff] %v23933_v23 }
 0x651   : > { %7683 = vst.msk [vmem:[#allocation3 + $0x189] sm:$0xff] %vm406_vm3, %v7651_v18  ;;  %v23813_v11 = vld [vmem:[#allocation3 + $0x150] sm:$0xff]  ;;  %v23815_v14 = vld [vmem:[#allocation3 + $0x158] sm:$0xff] }
 0x652   : > { %7682 = vst.msk [vmem:[#allocation3 + $0x181] sm:$0xff] %vm406_vm3, %v7650_v0  ;;  %18667 = vmatprep.mubr.msk.f32.mxu0 %vm406_vm3, %v23813_v11  ;;  %v23905_v18 = vld [vmem:[#allocation3 + $0xf1] sm:$0xff]  ;;  %v23909_v0 = vld [vmem:[#allocation3 + $0xf9] sm:$0xff] }
 0x653   : > { %18668 = vmatmul.mubr.msk.f32.gmra.mrb[60].mxu0 %vm406_vm3, %v23815_v14  ;;  %v23937_v38 = vld [vmem:[#allocation3 + $0x151] sm:$0xff] }
 0x654   : > { %25857 = vst [vmem:[#allocation37_spill] sm:$0xff] %v23937_v38 }
 0x655   : > { %v23822_v62 = vld [vmem:[#allocation3 + $0x168] sm:$0xff]  ;;  %v23824_v43 = vld [vmem:[#allocation3 + $0x170] sm:$0xff] }
 0x656   : > { %18670 = vmatprep.mubr.msk.f32.mxu0 %vm406_vm3, %v23822_v62 }
 0x657   : > { %18671 = vmatmul.mubr.msk.f32.gmra.mrb[62].mxu0 %vm406_vm3, %v23824_v43 }
 0x658   : > { %18689 = vmatprep.mubr.msk.f32.mxu0 %vm406_vm3, %v8084_v19  ;;  %v23913_v19 = vld [vmem:[#allocation3 + $0x109] sm:$0xff] }
 0x65b   : > { %18690 = vmatmul.mubr.msk.f32.vlgmr.msra.gmra.mrb[32].mxu0 %vm406_vm3, %v8085_v26  ;;  %v23925_v26 = vld [vmem:[#allocation3 + $0x129] sm:$0xff] }
 0x65c   : > { %19940 = vmatpush3.bf16.msra.mxu0 %v23638_v15  ;;  %18692 = vmatprep.mubr.msk.f32.mxu0 %vm406_vm3, %v23832_v3  ;;  %v19949_v15 = vpack.c.bf16 %v8518_v34, %v8517_v33  ;;  %25854 = vst [vmem:[#allocation19_spill] sm:$0xff] %v23925_v26  ;;  %v23945_v33 = vld [vmem:[#allocation3 + $0x169] sm:$0xff] }
 0x65d   : > { %19942 = vmatprep.subr.bf16.mxu0 %v19941_v20  ;;  %25859 = vst [vmem:[#allocation40_spill] sm:$0xff] %v23945_v33  ;;  %v8478_v34 = vld [vmem:[#allocation3 + $0x2] sm:$0xff] }
 0x65f   : > { %18693 = vmatmul.mubr.msk.f32.gmra.mrb[34].mxu0 %vm406_vm3, %v23837_v5 }
 0x660   : > { %18695 = vmatprep.mubr.msk.f32.mxu0 %vm406_vm3, %v23841_v50  ;;  %19944 = vmatpush3.bf16.msra.mxu0 %v19941_v20  ;;  %v23929_v20 = vld [vmem:[#allocation3 + $0x139] sm:$0xff] }
 0x661   : > { %19946 = vmatprep.subr.bf16.mxu0 %v19945_v4  ;;  %25855 = vst [vmem:[#allocation33_spill] sm:$0xff] %v23929_v20 }
 0x663   : > { %18696 = vmatmul.mubr.msk.f32.gmra.mrb[36].mxu0 %vm406_vm3, %v23845_v56 }
 0x664   : > { %18698 = vmatprep.mubr.msk.f32.mxu0 %vm406_vm3, %v23849_v59  ;;  %19948 = vmatpush3.bf16.msra.mxu0 %v19945_v4  ;;  %v23941_v4 = vld [vmem:[#allocation3 + $0x159] sm:$0xff] }
 0x665   : > { %19950 = vmatprep.subr.bf16.mxu0 %v19949_v15  ;;  %25858 = vst [vmem:[#allocation38_spill] sm:$0xff] %v23941_v4 }
 0x667   : > { %18699 = vmatmul.mubr.msk.f32.gmra.mrb[38].mxu0 %vm406_vm3, %v23853_v29 }
 0x668   : > { %18701 = vmatprep.mubr.msk.f32.mxu0 %vm406_vm3, %v23857_v30  ;;  %19952 = vmatpush3.bf16.msra.mxu0 %v19949_v15  ;;  %v23949_v15 = vld [vmem:[#allocation3 + $0x171] sm:$0xff] }
 0x669   : > { %19954 = vmatprep.subr.bf16.mxu0 %v19953_v39  ;;  %25860 = vst [vmem:[#allocation42_spill] sm:$0xff] %v23949_v15 }
 0x66b   : > { %18702 = vmatmul.mubr.msk.f32.gmra.mrb[40].mxu0 %vm406_vm3, %v23861_v9 }
 0x66c   : > { %18704 = vmatprep.mubr.msk.f32.mxu0 %vm406_vm3, %v23865_v13 }
 0x66f   : > { %18705 = vmatmul.mubr.msk.f32.gmra.mrb[42].mxu0 %vm406_vm3, %v23869_v27 }
 0x670   : > { %18707 = vmatprep.mubr.msk.f32.mxu0 %vm406_vm3, %v23873_v32 }
 0x673   : > { %18708 = vmatmul.mubr.msk.f32.gmra.mrb[44].mxu0 %vm406_vm3, %v23877_v55 }
 0x674   : > { %18710 = vmatprep.mubr.msk.f32.mxu0 %vm406_vm3, %v23881_v1 }
 0x677   : > { %18711 = vmatmul.mubr.msk.f32.gmra.mrb[46].mxu0 %vm406_vm3, %v23885_v60 }
 0x678   : > { %18713 = vmatprep.mubr.msk.f32.mxu0 %vm406_vm3, %v23889_v28 }
 0x67b   : > { %18714 = vmatmul.mubr.msk.f32.gmra.mrb[48].mxu0 %vm406_vm3, %v23893_v7 }
 0x67c   : > { %18716 = vmatprep.mubr.msk.f32.mxu0 %vm406_vm3, %v23897_v44 }
 0x67f   : > { %18717 = vmatmul.mubr.msk.f32.gmra.mrb[50].mxu0 %vm406_vm3, %v23901_v53 }
 0x680   : > { %18719 = vmatprep.mubr.msk.f32.mxu0 %vm406_vm3, %v23905_v18 }
 0x683   : > { %18720 = vmatmul.mubr.msk.f32.gmra.mrb[52].mxu0 %vm406_vm3, %v23909_v0 }
 0x684   : > { %18722 = vmatprep.mubr.msk.f32.mxu0 %vm406_vm3, %v23913_v19 }
 0x687   : > { %18723 = vmatmul.mubr.msk.f32.gmra.mrb[54].mxu0 %vm406_vm3, %v23917_v46  ;;  %v8911_v46 = vld [vmem:[#allocation4 + $0xf0] sm:$0xff] }
 0x688   : > { %18725 = vmatprep.mubr.msk.f32.mxu0 %vm406_vm3, %v23921_v42  ;;  %v23959_v42 = vld [vmem:[#allocation3 + $0x22] sm:$0xff] }
 0x689   : > { %25861 = vst [vmem:[#allocation10_spill] sm:$0xff] %v23959_v42 }
 0x68b   : > { %18726 = vmatmul.mubr.msk.f32.gmra.mrb[56].mxu0 %vm406_vm3, %v23925_v26  ;;  %v8910_v26 = vld [vmem:[#allocation4 + $0xe8] sm:$0xff] }
 0x68c   : > { %18728 = vmatprep.mubr.msk.f32.mxu0 %vm406_vm3, %v23929_v20  ;;  %v8909_v20 = vld [vmem:[#allocation4 + $0xe0] sm:$0xff] }
 0x68f   : > { %18729 = vmatmul.mubr.msk.f32.gmra.mrb[58].mxu0 %vm406_vm3, %v23933_v23  ;;  %v19957_v23 = vpack.c.bf16 %v8908_v58, %v8907_v57  ;;  %v9299_v57 = vld [vmem:[#allocation4 + $0x100] sm:$0xff]  ;;  %v9300_v58 = vld [vmem:[#allocation4 + $0x108] sm:$0xff] }
 0x690   : > { %18731 = vmatprep.mubr.msk.f32.mxu0 %vm406_vm3, %v23937_v38  ;;  %v8479_v38 = vld [vmem:[#allocation3 + $0xa] sm:$0xff] }
 0x693   : > { %18732 = vmatmul.mubr.msk.f32.gmra.mrb[60].mxu0 %vm406_vm3, %v23941_v4  ;;  %v23955_v4 = vld [vmem:[#allocation3 + $0x1a] sm:$0xff] }
 0x694   : > { %18734 = vmatprep.mubr.msk.f32.mxu0 %vm406_vm3, %v23945_v33  ;;  %v19961_v33 = vpack.c.bf16 %v8910_v26, %v8909_v20  ;;  %v23971_v26 = vld [vmem:[#allocation3 + $0x4a] sm:$0xff]  ;;  %v19969_v20 = vpack.c.bf16 %v9300_v58, %v9299_v57  ;;  %v23995_v57 = vld [vmem:[#allocation3 + $0x92] sm:$0xff] }
 0x695   : > { %25862 = vst [vmem:[#allocation11_spill] sm:$0xff] %v23971_v26  ;;  %25868 = vst [vmem:[#allocation17_spill] sm:$0xff] %v23995_v57  ;;  %v24003_v58 = vld [vmem:[#allocation3 + $0xaa] sm:$0xff] }
 0x696   : > { %25870 = vst [vmem:[#allocation45_spill] sm:$0xff] %v24003_v58 }
 0x697   : > { %18735 = vmatmul.mubr.msk.f32.gmra.mrb[62].mxu0 %vm406_vm3, %v23949_v15  ;;  %v8912_v15 = vld [vmem:[#allocation4 + $0xf8] sm:$0xff] }
 0x698   : > { %18753 = vmatprep.mubr.msk.f32.mxu0 %vm406_vm3, %v8478_v34  ;;  %v23963_v34 = vld [vmem:[#allocation3 + $0x32] sm:$0xff] }
 0x69b   : > { %18754 = vmatmul.mubr.msk.f32.vlgmr.msra.gmra.mrb[32].mxu0 %vm406_vm3, %v8479_v38  ;;  %v23967_v38 = vld [vmem:[#allocation3 + $0x3a] sm:$0xff] }
 0x69c   : > { %19956 = vmatpush3.bf16.msra.mxu0 %v19953_v39  ;;  %18756 = vmatprep.mubr.msk.f32.mxu0 %vm406_vm3, %v23955_v4  ;;  %v19965_v39 = vpack.c.bf16 %v8912_v15, %v8911_v46  ;;  %v23979_v46 = vld [vmem:[#allocation3 + $0x62] sm:$0xff] }
 0x69d   : > { %19958 = vmatprep.subr.bf16.mxu0 %v19957_v23  ;;  %25864 = vst [vmem:[#allocation13_spill] sm:$0xff] %v23979_v46  ;;  %v23991_v15 = vld [vmem:[#allocation3 + $0x82] sm:$0xff] }
 0x69e   : > { %25867 = vst [vmem:[#allocation16_spill] sm:$0xff] %v23991_v15 }
 0x69f   : > { %18757 = vmatmul.mubr.msk.f32.gmra.mrb[34].mxu0 %vm406_vm3, %v23959_v42  ;;  %v23975_v42 = vld [vmem:[#allocation3 + $0x52] sm:$0xff] }
 0x6a0   : > { %18759 = vmatprep.mubr.msk.f32.mxu0 %vm406_vm3, %v23963_v34  ;;  %19960 = vmatpush3.bf16.msra.mxu0 %v19957_v23  ;;  %25863 = vst [vmem:[#allocation12_spill] sm:$0xff] %v23975_v42  ;;  %v23983_v23 = vld [vmem:[#allocation3 + $0x6a] sm:$0xff] }
 0x6a1   : > { %19962 = vmatprep.subr.bf16.mxu0 %v19961_v33  ;;  %25865 = vst [vmem:[#allocation14_spill] sm:$0xff] %v23983_v23 }
 0x6a3   : > { %18760 = vmatmul.mubr.msk.f32.gmra.mrb[36].mxu0 %vm406_vm3, %v23967_v38 }
 0x6a4   : > { %18762 = vmatprep.mubr.msk.f32.mxu0 %vm406_vm3, %v23971_v26  ;;  %19964 = vmatpush3.bf16.msra.mxu0 %v19961_v33  ;;  %v23987_v33 = vld [vmem:[#allocation3 + $0x7a] sm:$0xff]  ;;  %v9306_v26 = vld [vmem:[#allocation4 + $0x138] sm:$0xff] }
 0x6a5   : > { %19966 = vmatprep.subr.bf16.mxu0 %v19965_v39  ;;  %25866 = vst [vmem:[#allocation15_spill] sm:$0xff] %v23987_v33 }
 0x6a7   : > { %18763 = vmatmul.mubr.msk.f32.gmra.mrb[38].mxu0 %vm406_vm3, %v23975_v42  ;;  %v9304_v42 = vld [vmem:[#allocation4 + $0x128] sm:$0xff] }
 0x6a8   : > { %18765 = vmatprep.mubr.msk.f32.mxu0 %vm406_vm3, %v23979_v46  ;;  %19968 = vmatpush3.bf16.msra.mxu0 %v19965_v39  ;;  %v23999_v39 = vld [vmem:[#allocation3 + $0x9a] sm:$0xff]  ;;  %v9302_v46 = vld [vmem:[#allocation4 + $0x118] sm:$0xff] }
 0x6a9   : > { %19970 = vmatprep.subr.bf16.mxu0 %v19969_v20  ;;  %25869 = vst [vmem:[#allocation44_spill] sm:$0xff] %v23999_v39 }
 0x6ab   : > { %18766 = vmatmul.mubr.msk.f32.gmra.mrb[40].mxu0 %vm406_vm3, %v23983_v23  ;;  %v9301_v23 = vld [vmem:[#allocation4 + $0x110] sm:$0xff] }
 0x6ac   : > { %18768 = vmatprep.mubr.msk.f32.mxu0 %vm406_vm3, %v23987_v33  ;;  %v24007_v33 = vld [vmem:[#allocation3 + $0xb2] sm:$0xff] }
 0x6ad   : > { %25871 = vst [vmem:[#allocation20_spill] sm:$0xff] %v24007_v33 }
 0x6af   : > { %18769 = vmatmul.mubr.msk.f32.gmra.mrb[42].mxu0 %vm406_vm3, %v23991_v15  ;;  %v24011_v15 = vld [vmem:[#allocation3 + $0xc2] sm:$0xff] }
 0x6b0   : > { %18771 = vmatprep.mubr.msk.f32.mxu0 %vm406_vm3, %v23995_v57  ;;  %25872 = vst [vmem:[#allocation21_spill] sm:$0xff] %v24011_v15  ;;  %v24015_v57 = vld [vmem:[#allocation3 + $0xca] sm:$0xff] }
 0x6b1   : > { %25873 = vst [vmem:[#allocation22_spill] sm:$0xff] %v24015_v57 }
 0x6b3   : > { %18772 = vmatmul.mubr.msk.f32.gmra.mrb[44].mxu0 %vm406_vm3, %v23999_v39  ;;  %v24019_v39 = vld [vmem:[#allocation3 + $0xda] sm:$0xff] }
 0x6b4   : > { %18774 = vmatprep.mubr.msk.f32.mxu0 %vm406_vm3, %v24003_v58  ;;  %25874 = vst [vmem:[#allocation23_spill] sm:$0xff] %v24019_v39  ;;  %v24023_v58 = vld [vmem:[#allocation3 + $0xe2] sm:$0xff] }
 0x6b5   : > { %25875 = vst [vmem:[#allocation24_spill] sm:$0xff] %v24023_v58 }
 0x6b7   : > { %18775 = vmatmul.mubr.msk.f32.gmra.mrb[46].mxu0 %vm406_vm3, %v24007_v33  ;;  %v24027_v33 = vld [vmem:[#allocation3 + $0xf2] sm:$0xff] }
 0x6b8   : > { %18777 = vmatprep.mubr.msk.f32.mxu0 %vm406_vm3, %v24011_v15  ;;  %25876 = vst [vmem:[#allocation25_spill] sm:$0xff] %v24027_v33  ;;  %v24031_v15 = vld [vmem:[#allocation3 + $0xfa] sm:$0xff] }
 0x6b9   : > { %25877 = vst [vmem:[#allocation26_spill] sm:$0xff] %v24031_v15 }
 0x6bb   : > { %18778 = vmatmul.mubr.msk.f32.gmra.mrb[48].mxu0 %vm406_vm3, %v24015_v57  ;;  %v24035_v57 = vld [vmem:[#allocation3 + $0x10a] sm:$0xff] }
 0x6bc   : > { %18780 = vmatprep.mubr.msk.f32.mxu0 %vm406_vm3, %v24019_v39  ;;  %25878 = vst [vmem:[#allocation27_spill] sm:$0xff] %v24035_v57  ;;  %v24039_v39 = vld [vmem:[#allocation3 + $0x112] sm:$0xff] }
 0x6bd   : > { %25879 = vst [vmem:[#allocation28_spill] sm:$0xff] %v24039_v39 }
 0x6bf   : > { %18781 = vmatmul.mubr.msk.f32.gmra.mrb[50].mxu0 %vm406_vm3, %v24023_v58  ;;  %v24043_v58 = vld [vmem:[#allocation3 + $0x122] sm:$0xff] }
 0x6c0   : > { %18783 = vmatprep.mubr.msk.f32.mxu0 %vm406_vm3, %v24027_v33  ;;  %25880 = vst [vmem:[#allocation29_spill] sm:$0xff] %v24043_v58  ;;  %v24047_v33 = vld [vmem:[#allocation3 + $0x12a] sm:$0xff] }
 0x6c1   : > { %25881 = vst [vmem:[#allocation30_spill] sm:$0xff] %v24047_v33 }
 0x6c3   : > { %18784 = vmatmul.mubr.msk.f32.gmra.mrb[52].mxu0 %vm406_vm3, %v24031_v15  ;;  %v24051_v15 = vld [vmem:[#allocation3 + $0x13a] sm:$0xff] }
 0x6c4   : > { %18786 = vmatprep.mubr.msk.f32.mxu0 %vm406_vm3, %v24035_v57  ;;  %25882 = vst [vmem:[#allocation31_spill] sm:$0xff] %v24051_v15  ;;  %v24055_v57 = vld [vmem:[#allocation3 + $0x142] sm:$0xff] }
 0x6c5   : > { %25883 = vst [vmem:[#allocation32_spill] sm:$0xff] %v24055_v57 }
 0x6c7   : > { %18787 = vmatmul.mubr.msk.f32.gmra.mrb[54].mxu0 %vm406_vm3, %v24039_v39  ;;  %v24059_v39 = vld [vmem:[#allocation3 + $0x152] sm:$0xff] }
 0x6c8   : > { %18789 = vmatprep.mubr.msk.f32.mxu0 %vm406_vm3, %v24043_v58  ;;  %25884 = vst [vmem:[#allocation34_spill] sm:$0xff] %v24059_v39  ;;  %v24063_v58 = vld [vmem:[#allocation3 + $0x15a] sm:$0xff] }
 0x6c9   : > { %25885 = vst [vmem:[#allocation36_spill] sm:$0xff] %v24063_v58 }
 0x6cb   : > { %18790 = vmatmul.mubr.msk.f32.gmra.mrb[56].mxu0 %vm406_vm3, %v24047_v33  ;;  %v24067_v33 = vld [vmem:[#allocation3 + $0x16a] sm:$0xff] }
 0x6cc   : > { %18792 = vmatprep.mubr.msk.f32.mxu0 %vm406_vm3, %v24051_v15  ;;  %25886 = vst [vmem:[#allocation39_spill] sm:$0xff] %v24067_v33  ;;  %v24071_v15 = vld [vmem:[#allocation3 + $0x172] sm:$0xff] }
 0x6cd   : > { %25887 = vst [vmem:[#allocation41_spill] sm:$0xff] %v24071_v15 }
 0x6cf   : > { %18793 = vmatmul.mubr.msk.f32.gmra.mrb[58].mxu0 %vm406_vm3, %v24055_v57  ;;  %v9303_v57 = vld [vmem:[#allocation4 + $0x120] sm:$0xff] }
 0x6d0   : > { %18795 = vmatprep.mubr.msk.f32.mxu0 %vm406_vm3, %v24059_v39  ;;  %v19973_v39 = vpack.c.bf16 %v9302_v46, %v9301_v23  ;;  %v9693_v46 = vld [vmem:[#allocation4 + $0x140] sm:$0xff]  ;;  %v9694_v23 = vld [vmem:[#allocation4 + $0x148] sm:$0xff] }
 0x6d3   : > { %18796 = vmatmul.mubr.msk.f32.gmra.mrb[60].mxu0 %vm406_vm3, %v24063_v58  ;;  %v9305_v58 = vld [vmem:[#allocation4 + $0x130] sm:$0xff] }
 0x6d4   : > { %18798 = vmatprep.mubr.msk.f32.mxu0 %vm406_vm3, %v24067_v33  ;;  %v19977_v33 = vpack.c.bf16 %v9304_v42, %v9303_v57  ;;  %v25894_v42 = vld [vmem:[#allocation38_spill] sm:$0xff] }
 0x6d5   : > { %v24207_v57 = vld [vmem:[#allocation3 + $0x189] sm:$0xff] }
 0x6d7   : > { %18799 = vmatmul.mubr.msk.f32.gmra.mrb[62].mxu0 %vm406_vm3, %v24071_v15 }
 0x6d8   : > { %18817 = vmatprep.mubr.msk.f32.mxu0 %vm406_vm3, %v23658_v10  ;;  %v19981_v10 = vpack.c.bf16 %v9306_v26, %v9305_v58  ;;  %v25895_v26 = vld [vmem:[#allocation40_spill] sm:$0xff]  ;;  %v10090_v58 = vld [vmem:[#allocation4 + $0x198] sm:$0xff] }
 0x6db   : > { %18818 = vmatmul.mubr.msk.f32.vlgmr.msra.gmra.mrb[32].mxu0 %vm406_vm3, %v23660_v8  ;;  %v19985_v8 = vpack.c.bf16 %v9694_v23, %v9693_v46  ;;  %v10091_v46 = vld [vmem:[#allocation4 + $0x1a0] sm:$0xff]  ;;  %v10092_v23 = vld [vmem:[#allocation4 + $0x1a8] sm:$0xff] }
 0x6dc   : > { %19972 = vmatpush3.bf16.msra.mxu0 %v19969_v20  ;;  %18820 = vmatprep.mubr.msk.f32.mxu0 %vm406_vm3, %v23670_v6  ;;  %v24135_v6 = vld [vmem:[#allocation3 + $0x180] sm:$0xff]  ;;  %v25896_v20 = vld [vmem:[#allocation42_spill] sm:$0xff] }
 0x6dd   : > { %19974 = vmatprep.subr.bf16.mxu0 %v19973_v39 }
 0x6df   : > { %18821 = vmatmul.mubr.msk.f32.gmra.mrb[34].mxu0 %vm406_vm3, %v23672_v25  ;;  %v24139_v25 = vld [vmem:[#allocation3 + $0x188] sm:$0xff] }
 0x6e0   : > { %18823 = vmatprep.mubr.msk.f32.mxu0 %vm406_vm3, %v23682_v48  ;;  %19976 = vmatpush3.bf16.msra.mxu0 %v19973_v39  ;;  %v9695_v48 = vld [vmem:[#allocation4 + $0x150] sm:$0xff] }
 0x6e1   : > { %19978 = vmatprep.subr.bf16.mxu0 %v19977_v33  ;;  %v10089_v39 = vld [vmem:[#allocation4 + $0x190] sm:$0xff] }
 0x6e3   : > { %18824 = vmatmul.mubr.msk.f32.gmra.mrb[36].mxu0 %vm406_vm3, %v23684_v49  ;;  %v9696_v49 = vld [vmem:[#allocation4 + $0x158] sm:$0xff] }
 0x6e4   : > { %18826 = vmatprep.mubr.msk.f32.mxu0 %vm406_vm3, %v23694_v12  ;;  %19980 = vmatpush3.bf16.msra.mxu0 %v19977_v33  ;;  %v19989_v12 = vpack.c.bf16 %v9696_v49, %v9695_v48  ;;  %v24203_v33 = vld [vmem:[#allocation3 + $0x181] sm:$0xff]  ;;  %v20009_v48 = vpack.c.bf16 %v10092_v23, %v10091_v46 }
 0x6e5   : > { %19982 = vmatprep.subr.bf16.mxu0 %v19981_v10  ;;  %v10093_v49 = vld [vmem:[#allocation4 + $0x1b0] sm:$0xff]  ;;  %v25908_v23 = vld [vmem:[#allocation21_spill] sm:$0xff] }
 0x6e6   : > { %v25907_v46 = vld [vmem:[#allocation20_spill] sm:$0xff] }
 0x6e7   : > { %18827 = vmatmul.mubr.msk.f32.gmra.mrb[38].mxu0 %vm406_vm3, %v23696_v21  ;;  %v9697_v21 = vld [vmem:[#allocation4 + $0x160] sm:$0xff] }
 0x6e8   : > { %18829 = vmatprep.mubr.msk.f32.mxu0 %vm406_vm3, %v23706_v63  ;;  %19984 = vmatpush3.bf16.msra.mxu0 %v19981_v10  ;;  %v9698_v63 = vld [vmem:[#allocation4 + $0x168] sm:$0xff]  ;;  %v20005_v10 = vpack.c.bf16 %v10090_v58, %v10089_v39  ;;  %v25904_v39 = vld [vmem:[#allocation17_spill] sm:$0xff]  ;;  %v25905_v58 = vld [vmem:[#allocation44_spill] sm:$0xff] }
 0x6e9   : > { %19986 = vmatprep.subr.bf16.mxu0 %v19985_v8 }
 0x6eb   : > { %18830 = vmatmul.mubr.msk.f32.gmra.mrb[40].mxu0 %vm406_vm3, %v23708_v22  ;;  %v19993_v22 = vpack.c.bf16 %v9698_v63, %v9697_v21  ;;  %v25898_v21 = vld [vmem:[#allocation11_spill] sm:$0xff]  ;;  %v10481_v63 = vld [vmem:[#allocation4 + $0x1c0] sm:$0xff] }
 0x6ec   : > { %18832 = vmatprep.mubr.msk.f32.mxu0 %vm406_vm3, %v23718_v2  ;;  %v9699_v2 = vld [vmem:[#allocation4 + $0x170] sm:$0xff] }
 0x6ef   : > { %18833 = vmatmul.mubr.msk.f32.gmra.mrb[42].mxu0 %vm406_vm3, %v23720_v24  ;;  %v9700_v24 = vld [vmem:[#allocation4 + $0x178] sm:$0xff] }
 0x6f0   : > { %18835 = vmatprep.mubr.msk.f32.mxu0 %vm406_vm3, %v23730_v52  ;;  %v19997_v52 = vpack.c.bf16 %v9700_v24, %v9699_v2  ;;  %v25899_v2 = vld [vmem:[#allocation12_spill] sm:$0xff]  ;;  %v25900_v24 = vld [vmem:[#allocation13_spill] sm:$0xff] }
 0x6f3   : > { %18836 = vmatmul.mubr.msk.f32.gmra.mrb[44].mxu0 %vm406_vm3, %v23732_v31  ;;  %v10087_v31 = vld [vmem:[#allocation4 + $0x180] sm:$0xff] }
 0x6f4   : > { %18838 = vmatprep.mubr.msk.f32.mxu0 %vm406_vm3, %v23742_v61  ;;  %v10088_v61 = vld [vmem:[#allocation4 + $0x188] sm:$0xff] }
 0x6f7   : > { %18839 = vmatmul.mubr.msk.f32.gmra.mrb[46].mxu0 %vm406_vm3, %v23744_v40  ;;  %v20001_v40 = vpack.c.bf16 %v10088_v61, %v10087_v31  ;;  %v25901_v31 = vld [vmem:[#allocation14_spill] sm:$0xff]  ;;  %v25902_v61 = vld [vmem:[#allocation15_spill] sm:$0xff] }
 0x6f8   : > { %18841 = vmatprep.mubr.msk.f32.mxu0 %vm406_vm3, %v23754_v36  ;;  %v25888_v36 = vld [vmem:[#allocation43_spill] sm:$0xff] }
 0x6fb   : > { %18842 = vmatmul.mubr.msk.f32.gmra.mrb[48].mxu0 %vm406_vm3, %v23756_v37  ;;  %v25889_v37 = vld [vmem:[#allocation18_spill] sm:$0xff] }
 0x6fc   : > { %18844 = vmatprep.mubr.msk.f32.mxu0 %vm406_vm3, %v23766_v35  ;;  %v25890_v35 = vld [vmem:[#allocation19_spill] sm:$0xff] }
 0x6ff   : > { %18845 = vmatmul.mubr.msk.f32.gmra.mrb[50].mxu0 %vm406_vm3, %v23768_v41  ;;  %v25891_v41 = vld [vmem:[#allocation33_spill] sm:$0xff] }
 0x700   : > { %18847 = vmatprep.mubr.msk.f32.mxu0 %vm406_vm3, %v23778_v16 }
 0x703   : > { %18848 = vmatmul.mubr.msk.f32.gmra.mrb[52].mxu0 %vm406_vm3, %v23780_v17 }
 0x704   : > { %18850 = vmatprep.mubr.msk.f32.mxu0 %vm406_vm3, %v23790_v47 }
 0x707   : > { %18851 = vmatmul.mubr.msk.f32.gmra.mrb[54].mxu0 %vm406_vm3, %v23792_v54 }
 0x708   : > { %18853 = vmatprep.mubr.msk.f32.mxu0 %vm406_vm3, %v23802_v45 }
 0x70b   : > { %18854 = vmatmul.mubr.msk.f32.gmra.mrb[56].mxu0 %vm406_vm3, %v23804_v51 }
 0x70c   : > { %18856 = vmatprep.mubr.msk.f32.mxu0 %vm406_vm3, %v23813_v11 }
 0x70f   : > { %18857 = vmatmul.mubr.msk.f32.gmra.mrb[58].mxu0 %vm406_vm3, %v23815_v14 }
 0x710   : > { %18859 = vmatprep.mubr.msk.f32.mxu0 %vm406_vm3, %v23822_v62 }
 0x713   : > { %18860 = vmatmul.mubr.msk.f32.gmra.mrb[60].mxu0 %vm406_vm3, %v23824_v43 }
 0x714   : > { %18862 = vmatprep.mubr.msk.f32.mxu0 %vm406_vm3, %v24135_v6 }
 0x717   : > { %18863 = vmatmul.mubr.msk.f32.gmra.mrb[62].mxu0 %vm406_vm3, %v24139_v25 }
 0x718   : > { %18881 = vmatprep.mubr.msk.f32.mxu0 %vm406_vm3, %v23832_v3  ;;  %v25892_v3 = vld [vmem:[#allocation35_spill] sm:$0xff] }
 0x71b   : > { %18882 = vmatmul.mubr.msk.f32.vlgmr.msra.gmra.mrb[32].mxu0 %vm406_vm3, %v23837_v5  ;;  %v25893_v5 = vld [vmem:[#allocation37_spill] sm:$0xff] }
 0x71c   : > { %19988 = vmatpush3.bf16.msra.mxu0 %v19985_v8  ;;  %18884 = vmatprep.mubr.msk.f32.mxu0 %vm406_vm3, %v23841_v50  ;;  %v25897_v8 = vld [vmem:[#allocation10_spill] sm:$0xff] }
 0x71d   : > { %19990 = vmatprep.subr.bf16.mxu0 %v19989_v12 }
 0x71f   : > { %18885 = vmatmul.mubr.msk.f32.gmra.mrb[34].mxu0 %vm406_vm3, %v23845_v56 }
 0x720   : > { %18887 = vmatprep.mubr.msk.f32.mxu0 %vm406_vm3, %v23849_v59  ;;  %19992 = vmatpush3.bf16.msra.mxu0 %v19989_v12  ;;  %v10094_v12 = vld [vmem:[#allocation4 + $0x1b8] sm:$0xff] }
 0x721   : > { %19994 = vmatprep.subr.bf16.mxu0 %v19993_v22 }
 0x723   : > { %18888 = vmatmul.mubr.msk.f32.gmra.mrb[36].mxu0 %vm406_vm3, %v23853_v29 }
 0x724   : > { %18890 = vmatprep.mubr.msk.f32.mxu0 %vm406_vm3, %v23857_v30  ;;  %19996 = vmatpush3.bf16.msra.mxu0 %v19993_v22  ;;  %v10482_v22 = vld [vmem:[#allocation4 + $0x1c8] sm:$0xff] }
 0x725   : > { %19998 = vmatprep.subr.bf16.mxu0 %v19997_v52 }
 0x727   : > { %18891 = vmatmul.mubr.msk.f32.gmra.mrb[38].mxu0 %vm406_vm3, %v23861_v9 }
 0x728   : > { %18893 = vmatprep.mubr.msk.f32.mxu0 %vm406_vm3, %v23865_v13  ;;  %20000 = vmatpush3.bf16.msra.mxu0 %v19997_v52  ;;  %v20017_v52 = vpack.c.bf16 %v10482_v22, %v10481_v63  ;;  %v25914_v63 = vld [vmem:[#allocation27_spill] sm:$0xff]  ;;  %v25915_v22 = vld [vmem:[#allocation28_spill] sm:$0xff] }
 0x729   : > { %20002 = vmatprep.subr.bf16.mxu0 %v20001_v40 }
 0x72b   : > { %18894 = vmatmul.mubr.msk.f32.gmra.mrb[40].mxu0 %vm406_vm3, %v23869_v27 }
 0x72c   : > { %18896 = vmatprep.mubr.msk.f32.mxu0 %vm406_vm3, %v23873_v32 }
 0x72f   : > { %18897 = vmatmul.mubr.msk.f32.gmra.mrb[42].mxu0 %vm406_vm3, %v23877_v55 }
 0x730   : > { %18899 = vmatprep.mubr.msk.f32.mxu0 %vm406_vm3, %v23881_v1 }
 0x733   : > { %18900 = vmatmul.mubr.msk.f32.gmra.mrb[44].mxu0 %vm406_vm3, %v23885_v60 }
 0x734   : > { %18902 = vmatprep.mubr.msk.f32.mxu0 %vm406_vm3, %v23889_v28 }
 0x737   : > { %18903 = vmatmul.mubr.msk.f32.gmra.mrb[46].mxu0 %vm406_vm3, %v23893_v7 }
 0x738   : > { %18905 = vmatprep.mubr.msk.f32.mxu0 %vm406_vm3, %v23897_v44 }
 0x73b   : > { %18906 = vmatmul.mubr.msk.f32.gmra.mrb[48].mxu0 %vm406_vm3, %v23901_v53 }
 0x73c   : > { %18908 = vmatprep.mubr.msk.f32.mxu0 %vm406_vm3, %v23905_v18 }
 0x73f   : > { %18909 = vmatmul.mubr.msk.f32.gmra.mrb[50].mxu0 %vm406_vm3, %v23909_v0 }
 0x740   : > { %18911 = vmatprep.mubr.msk.f32.mxu0 %vm406_vm3, %v23913_v19 }
 0x743   : > { %18912 = vmatmul.mubr.msk.f32.gmra.mrb[52].mxu0 %vm406_vm3, %v25888_v36 }
 0x744   : > { %18914 = vmatprep.mubr.msk.f32.mxu0 %vm406_vm3, %v25889_v37 }
 0x747   : > { %18915 = vmatmul.mubr.msk.f32.gmra.mrb[54].mxu0 %vm406_vm3, %v25890_v35 }
 0x748   : > { %18917 = vmatprep.mubr.msk.f32.mxu0 %vm406_vm3, %v25891_v41 }
 0x74b   : > { %18918 = vmatmul.mubr.msk.f32.gmra.mrb[56].mxu0 %vm406_vm3, %v25892_v3 }
 0x74c   : > { %18920 = vmatprep.mubr.msk.f32.mxu0 %vm406_vm3, %v25893_v5 }
 0x74f   : > { %18921 = vmatmul.mubr.msk.f32.gmra.mrb[58].mxu0 %vm406_vm3, %v25894_v42 }
 0x750   : > { %18923 = vmatprep.mubr.msk.f32.mxu0 %vm406_vm3, %v25895_v26 }
 0x753   : > { %18924 = vmatmul.mubr.msk.f32.gmra.mrb[60].mxu0 %vm406_vm3, %v25896_v20 }
 0x754   : > { %18926 = vmatprep.mubr.msk.f32.mxu0 %vm406_vm3, %v24203_v33 }
 0x757   : > { %18927 = vmatmul.mubr.msk.f32.gmra.mrb[62].mxu0 %vm406_vm3, %v24207_v57 }
 0x758   : > { %18945 = vmatprep.mubr.msk.f32.mxu0 %vm406_vm3, %v23955_v4  ;;  %v20013_v4 = vpack.c.bf16 %v10094_v12, %v10093_v49  ;;  %v25911_v49 = vld [vmem:[#allocation24_spill] sm:$0xff]  ;;  %v25912_v12 = vld [vmem:[#allocation25_spill] sm:$0xff] }
 0x75b   : > { %18946 = vmatmul.mubr.msk.f32.vlgmr.msra.gmra.mrb[32].mxu0 %vm406_vm3, %v25897_v8  ;;  %v25909_v8 = vld [vmem:[#allocation22_spill] sm:$0xff] }
 0x75c   : > { %20004 = vmatpush3.bf16.msra.mxu0 %v20001_v40  ;;  %18948 = vmatprep.mubr.msk.f32.mxu0 %vm406_vm3, %v23963_v34  ;;  %v25903_v40 = vld [vmem:[#allocation16_spill] sm:$0xff] }
 0x75d   : > { %20006 = vmatprep.subr.bf16.mxu0 %v20005_v10 }
 0x75f   : > { %18949 = vmatmul.mubr.msk.f32.gmra.mrb[34].mxu0 %vm406_vm3, %v23967_v38 }
 0x760   : > { %18951 = vmatprep.mubr.msk.f32.mxu0 %vm406_vm3, %v25898_v21  ;;  %20008 = vmatpush3.bf16.msra.mxu0 %v20005_v10  ;;  %v25906_v10 = vld [vmem:[#allocation45_spill] sm:$0xff] }
 0x761   : > { %20010 = vmatprep.subr.bf16.mxu0 %v20009_v48 }
 0x763   : > { %18952 = vmatmul.mubr.msk.f32.gmra.mrb[36].mxu0 %vm406_vm3, %v25899_v2 }
 0x764   : > { %18954 = vmatprep.mubr.msk.f32.mxu0 %vm406_vm3, %v25900_v24  ;;  %20012 = vmatpush3.bf16.msra.mxu0 %v20009_v48  ;;  %v25910_v48 = vld [vmem:[#allocation23_spill] sm:$0xff] }
 0x765   : > { %20014 = vmatprep.subr.bf16.mxu0 %v20013_v4 }
 0x767   : > { %18955 = vmatmul.mubr.msk.f32.gmra.mrb[38].mxu0 %vm406_vm3, %v25901_v31 }
 0x768   : > { %18957 = vmatprep.mubr.msk.f32.mxu0 %vm406_vm3, %v25902_v61  ;;  %20016 = vmatpush3.bf16.msra.mxu0 %v20013_v4  ;;  %v25913_v4 = vld [vmem:[#allocation26_spill] sm:$0xff] }
 0x769   : > { %20018 = vmatprep.subr.bf16.mxu0 %v20017_v52 }
 0x76b   : > { %18958 = vmatmul.mubr.msk.f32.gmra.mrb[40].mxu0 %vm406_vm3, %v25903_v40 }
 0x76c   : > { %18960 = vmatprep.mubr.msk.f32.mxu0 %vm406_vm3, %v25904_v39  ;;  %v10488_v39 = vld [vmem:[#allocation4 + $0x1f8] sm:$0xff] }
 0x76f   : > { %18961 = vmatmul.mubr.msk.f32.gmra.mrb[42].mxu0 %vm406_vm3, %v25905_v58  ;;  %v10487_v58 = vld [vmem:[#allocation4 + $0x1f0] sm:$0xff] }
 0x770   : > { %18963 = vmatprep.mubr.msk.f32.mxu0 %vm406_vm3, %v25906_v10  ;;  %v10057_v10 = vld [vmem:[#allocation3 + $0x50] sm:$0xff] }
 0x773   : > { %18964 = vmatmul.mubr.msk.f32.gmra.mrb[44].mxu0 %vm406_vm3, %v25907_v46  ;;  %v10486_v46 = vld [vmem:[#allocation4 + $0x1e8] sm:$0xff] }
 0x774   : > { %18966 = vmatprep.mubr.msk.f32.mxu0 %vm406_vm3, %v25908_v23  ;;  %v25916_v23 = vld [vmem:[#allocation29_spill] sm:$0xff] }
 0x777   : > { %18967 = vmatmul.mubr.msk.f32.gmra.mrb[46].mxu0 %vm406_vm3, %v25909_v8  ;;  %v25917_v8 = vld [vmem:[#allocation30_spill] sm:$0xff] }
 0x778   : > { %18969 = vmatprep.mubr.msk.f32.mxu0 %vm406_vm3, %v25910_v48  ;;  %v25918_v48 = vld [vmem:[#allocation31_spill] sm:$0xff] }
 0x77b   : > { %18970 = vmatmul.mubr.msk.f32.gmra.mrb[48].mxu0 %vm406_vm3, %v25911_v49  ;;  %v25919_v49 = vld [vmem:[#allocation32_spill] sm:$0xff] }
 0x77c   : > { %18972 = vmatprep.mubr.msk.f32.mxu0 %vm406_vm3, %v25912_v12  ;;  %v25920_v12 = vld [vmem:[#allocation34_spill] sm:$0xff] }
 0x77f   : > { %18973 = vmatmul.mubr.msk.f32.gmra.mrb[50].mxu0 %vm406_vm3, %v25913_v4  ;;  %v25921_v4 = vld [vmem:[#allocation36_spill] sm:$0xff] }
 0x780   : > { %18975 = vmatprep.mubr.msk.f32.mxu0 %vm406_vm3, %v25914_v63  ;;  %v25922_v63 = vld [vmem:[#allocation39_spill] sm:$0xff] }
 0x783   : > { %18976 = vmatmul.mubr.msk.f32.gmra.mrb[52].mxu0 %vm406_vm3, %v25915_v22  ;;  %v10485_v22 = vld [vmem:[#allocation4 + $0x1e0] sm:$0xff] }
 0x784   : > { %18978 = vmatprep.mubr.msk.f32.mxu0 %vm406_vm3, %v25916_v23  ;;  %v24271_v23 = vld [vmem:[#allocation3 + $0x182] sm:$0xff] }
 0x785   : > { %25923 = vst [vmem:[#allocation43_spill] sm:$0xff] %v24271_v23 }
 0x787   : > { %18979 = vmatmul.mubr.msk.f32.gmra.mrb[54].mxu0 %vm406_vm3, %v25917_v8  ;;  %v10484_v8 = vld [vmem:[#allocation4 + $0x1d8] sm:$0xff] }
 0x788   : > { %18981 = vmatprep.mubr.msk.f32.mxu0 %vm406_vm3, %v25918_v48  ;;  %v24275_v48 = vld [vmem:[#allocation3 + $0x18a] sm:$0xff] }
 0x789   : > { %25924 = vst [vmem:[#allocation18_spill] sm:$0xff] %v24275_v48 }
 0x78b   : > { %18982 = vmatmul.mubr.msk.f32.gmra.mrb[56].mxu0 %vm406_vm3, %v25919_v49  ;;  %v10483_v49 = vld [vmem:[#allocation4 + $0x1d0] sm:$0xff] }
 0x78c   : > { %18984 = vmatprep.mubr.msk.f32.mxu0 %vm406_vm3, %v25920_v12  ;;  %v10054_v12 = vld [vmem:[#allocation3 + $0x30] sm:$0xff] }
 0x78f   : > { %18985 = vmatmul.mubr.msk.f32.gmra.mrb[58].mxu0 %vm406_vm3, %v25921_v4  ;;  %v20021_v4 = vpack.c.bf16 %v10484_v8, %v10483_v49  ;;  %v20029_v8 = vpack.c.bf16 %v10488_v39, %v10487_v58  ;;  %v10059_v49 = vld [vmem:[#allocation3 + $0x68] sm:$0xff]  ;;  %v10063_v39 = vld [vmem:[#allocation3 + $0x98] sm:$0xff] }
 0x790   : > { %18987 = vmatprep.mubr.msk.f32.mxu0 %vm406_vm3, %v25922_v63  ;;  %v10055_v63 = vld [vmem:[#allocation3 + $0x38] sm:$0xff]  ;;  %v10064_v58 = vld [vmem:[#allocation3 + $0xa8] sm:$0xff] }
 0x793   : > { %18988 = vmatmul.mubr.msk.f32.gmra.mrb[60].mxu0 %vm406_vm3, %v24071_v15  ;;  %v10056_v15 = vld [vmem:[#allocation3 + $0x48] sm:$0xff] }
 0x794   : > { %18990 = vmatprep.mubr.msk.f32.mxu0 %vm406_vm3, %v24271_v23  ;;  %v20025_v23 = vpack.c.bf16 %v10486_v46, %v10485_v22  ;;  %v10061_v46 = vld [vmem:[#allocation3 + $0x80] sm:$0xff]  ;;  %v10068_v22 = vld [vmem:[#allocation3 + $0xd8] sm:$0xff] }
 0x797   : > { %18991 = vmatmul.mubr.msk.f32.gmra.mrb[62].mxu0 %vm406_vm3, %v24275_v48  ;;  %v10058_v48 = vld [vmem:[#allocation3 + $0x60] sm:$0xff] }
 0x798   : > { %19009 = vmatprep.mubr.msk.f32.mxu0 %vm406_vm3, %v10054_v12  ;;  %v10875_v12 = vld [vmem:[#allocation4 + $0x200] sm:$0xff] }
 0x79b   : > { %19010 = vmatmul.mubr.msk.f32.vlgmr.msra.gmra.mrb[32].mxu0 %vm406_vm3, %v10055_v63  ;;  %v10876_v63 = vld [vmem:[#allocation4 + $0x208] sm:$0xff] }
 0x79c   : > { %20020 = vmatpush3.bf16.msra.mxu0 %v20017_v52  ;;  %19012 = vmatprep.mubr.msk.f32.mxu0 %vm406_vm3, %v10056_v15  ;;  %v10060_v52 = vld [vmem:[#allocation3 + $0x78] sm:$0xff]  ;;  %v20033_v15 = vpack.c.bf16 %v10876_v63, %v10875_v12 }
 0x79d   : > { %20022 = vmatprep.subr.bf16.mxu0 %v20021_v4  ;;  %v10071_v12 = vld [vmem:[#allocation3 + $0xf8] sm:$0xff] }
 0x79f   : > { %19013 = vmatmul.mubr.msk.f32.gmra.mrb[34].mxu0 %vm406_vm3, %v10057_v10  ;;  %v10062_v10 = vld [vmem:[#allocation3 + $0x90] sm:$0xff] }
 0x7a0   : > { %19015 = vmatprep.mubr.msk.f32.mxu0 %vm406_vm3, %v10058_v48  ;;  %20024 = vmatpush3.bf16.msra.mxu0 %v20021_v4  ;;  %v10065_v48 = vld [vmem:[#allocation3 + $0xb0] sm:$0xff]  ;;  %v10067_v4 = vld [vmem:[#allocation3 + $0xc8] sm:$0xff] }
 0x7a1   : > { %20026 = vmatprep.subr.bf16.mxu0 %v20025_v23 }
 0x7a3   : > { %19016 = vmatmul.mubr.msk.f32.gmra.mrb[36].mxu0 %vm406_vm3, %v10059_v49  ;;  %v10070_v49 = vld [vmem:[#allocation3 + $0xf0] sm:$0xff] }
 0x7a4   : > { %19018 = vmatprep.mubr.msk.f32.mxu0 %vm406_vm3, %v10060_v52  ;;  %20028 = vmatpush3.bf16.msra.mxu0 %v20025_v23  ;;  %v10066_v23 = vld [vmem:[#allocation3 + $0xc0] sm:$0xff]  ;;  %v11343_v52 = vld [vmem:[#allocation6 + $0x20] sm:$0xff] }
 0x7a5   : > { %20030 = vmatprep.subr.bf16.mxu0 %v20029_v8 }
 0x7a7   : > { %19019 = vmatmul.mubr.msk.f32.gmra.mrb[38].mxu0 %vm406_vm3, %v10061_v46  ;;  %v11344_v46 = vld [vmem:[#allocation6 + $0x28] sm:$0xff] }
 0x7a8   : > { %19021 = vmatprep.mubr.msk.f32.mxu0 %vm406_vm3, %v10062_v10  ;;  %20032 = vmatpush3.bf16.msra.mxu0 %v20029_v8  ;;  %v10069_v8 = vld [vmem:[#allocation3 + $0xe0] sm:$0xff] }
 0x7a9   : > { %20034 = vmatprep.subr.bf16.mxu0 %v20033_v15  ;;  %v10881_v10 = vld [vmem:[#allocation4 + $0x230] sm:$0xff] }
 0x7ab   : > { %19022 = vmatmul.mubr.msk.f32.gmra.mrb[40].mxu0 %vm406_vm3, %v10063_v39  ;;  %v20057_v39 = vpack.c.bf16 %v11344_v46, %v11343_v52 }
 0x7ac   : > { %19024 = vmatprep.mubr.msk.f32.mxu0 %vm406_vm3, %v10064_v58  ;;  %v10882_v58 = vld [vmem:[#allocation4 + $0x238] sm:$0xff] }
 0x7af   : > { %19025 = vmatmul.mubr.msk.f32.gmra.mrb[42].mxu0 %vm406_vm3, %v10065_v48  ;;  %v11345_v48 = vld [vmem:[#allocation6 + $0x30] sm:$0xff] }
 0x7b0   : > { %19027 = vmatprep.mubr.msk.f32.mxu0 %vm406_vm3, %v10066_v23  ;;  %v11346_v23 = vld [vmem:[#allocation6 + $0x38] sm:$0xff] }
 0x7b3   : > { %19028 = vmatmul.mubr.msk.f32.gmra.mrb[44].mxu0 %vm406_vm3, %v10067_v4 }
 0x7b4   : > { %19030 = vmatprep.mubr.msk.f32.mxu0 %vm406_vm3, %v10068_v22 }
 0x7b7   : > { %19031 = vmatmul.mubr.msk.f32.gmra.mrb[46].mxu0 %vm406_vm3, %v10069_v8 }
 0x7b8   : > { %19033 = vmatprep.mubr.msk.f32.mxu0 %vm406_vm3, %v10070_v49 }
 0x7bb   : > { %19034 = vmatmul.mubr.msk.f32.gmra.mrb[48].mxu0 %vm406_vm3, %v10071_v12 }
 0x7bc   : > { %19036 = vmatprep.mubr.msk.f32.mxu0 %vm406_vm3, %v23778_v16  ;;  %v10084_v16 = vld [vmem:[#allocation3 + $0x198] sm:$0xff] }
 0x7bf   : > { %19037 = vmatmul.mubr.msk.f32.gmra.mrb[50].mxu0 %vm406_vm3, %v23780_v17  ;;  %v10085_v17 = vld [vmem:[#allocation3 + $0x1a0] sm:$0xff] }
 0x7c0   : > { %19039 = vmatprep.mubr.msk.f32.mxu0 %vm406_vm3, %v23790_v47  ;;  %v10877_v47 = vld [vmem:[#allocation4 + $0x210] sm:$0xff] }
 0x7c3   : > { %19040 = vmatmul.mubr.msk.f32.gmra.mrb[52].mxu0 %vm406_vm3, %v23792_v54  ;;  %v10878_v54 = vld [vmem:[#allocation4 + $0x218] sm:$0xff] }
 0x7c4   : > { %19042 = vmatprep.mubr.msk.f32.mxu0 %vm406_vm3, %v23802_v45  ;;  %v11339_v45 = vld [vmem:[#allocation6] sm:$0xff] }
 0x7c7   : > { %19043 = vmatmul.mubr.msk.f32.gmra.mrb[54].mxu0 %vm406_vm3, %v23804_v51  ;;  %v11340_v51 = vld [vmem:[#allocation6 + $0x8] sm:$0xff] }
 0x7c8   : > { %19045 = vmatprep.mubr.msk.f32.mxu0 %vm406_vm3, %v23813_v11  ;;  %v11341_v11 = vld [vmem:[#allocation6 + $0x10] sm:$0xff] }
 0x7cb   : > { %19046 = vmatmul.mubr.msk.f32.gmra.mrb[56].mxu0 %vm406_vm3, %v23815_v14  ;;  %v24325_v14 = vpack.c.bf16 %v11340_v51, %v11339_v45  ;;  %v11735_v51 = vld [vmem:[#allocation6 + $0x50] sm:$0xff] }
 0x7cc   : > { %19048 = vmatprep.mubr.msk.f32.mxu0 %vm406_vm3, %v23822_v62  ;;  %v11342_v62 = vld [vmem:[#allocation6 + $0x18] sm:$0xff] }
 0x7cd   : > { %v24327_v63 = vpack.c.bf16 %v11342_v62, %v11341_v11  ;;  %20193 = vmatprep.subr.bf16.mxu1 %v24325_v14  ;;  %v11736_v11 = vld [vmem:[#allocation6 + $0x58] sm:$0xff] }
 0x7ce   : > { %20197 = vmatpush3.bf16.msra.mxu1 %v24325_v14  ;;  %v20069_v46 = vpack.c.bf16 %v11736_v11, %v11735_v51 }
 0x7cf   : > { %19049 = vmatmul.mubr.msk.f32.gmra.mrb[58].mxu0 %vm406_vm3, %v23824_v43  ;;  %v20037_v43 = vpack.c.bf16 %v10878_v54, %v10877_v47  ;;  %20194 = vmatprep.subr.bf16.mxu1 %v24327_v63 }
 0x7d0   : > { %19051 = vmatprep.mubr.msk.f32.mxu0 %vm406_vm3, %v24135_v6  ;;  %v10879_v6 = vld [vmem:[#allocation4 + $0x220] sm:$0xff] }
 0x7d2   : > { %20198 = vmatpush3.bf16.msra.mxu1 %v24327_v63 }
 0x7d3   : > { %19052 = vmatmul.mubr.msk.f32.gmra.mrb[60].mxu0 %vm406_vm3, %v24139_v25  ;;  %v10880_v25 = vld [vmem:[#allocation4 + $0x228] sm:$0xff]  ;;  %20195 = vmatprep.subr.bf16.mxu1 %v20057_v39 }
 0x7d4   : > { %19054 = vmatprep.mubr.msk.f32.mxu0 %vm406_vm3, %v10084_v16 }
 0x7d6   : > { %20199 = vmatpush3.bf16.msra.mxu1 %v20057_v39 }
 0x7d7   : > { %19055 = vmatmul.mubr.msk.f32.gmra.mrb[62].mxu0 %vm406_vm3, %v10085_v17 }
 0x7d8   : > { %19073 = vmatprep.mubr.msk.f32.mxu0 %vm406_vm3, %v23841_v50  ;;  %v20041_v50 = vpack.c.bf16 %v10880_v25, %v10879_v6 }
 0x7db   : > { %19074 = vmatmul.mubr.msk.f32.vlgmr.msra.gmra.mrb[32].mxu0 %vm406_vm3, %v23845_v56  ;;  %v20045_v56 = vpack.c.bf16 %v10882_v58, %v10881_v10  ;;  %v11737_v10 = vld [vmem:[#allocation6 + $0x60] sm:$0xff] }
 0x7dc   : > { %20036 = vmatpush3.bf16.msra.mxu0 %v20033_v15  ;;  %19076 = vmatprep.mubr.msk.f32.mxu0 %vm406_vm3, %v23849_v59  ;;  %v20061_v59 = vpack.c.bf16 %v11346_v23, %v11345_v48 }
 0x7dd   : > { %20038 = vmatprep.subr.bf16.mxu0 %v20037_v43 }
 0x7de   : > { %20196 = vmatprep.subr.bf16.mxu1 %v20061_v59 }
 0x7df   : > { %19077 = vmatmul.mubr.msk.f32.gmra.mrb[34].mxu0 %vm406_vm3, %v23853_v29  ;;  %20200 = vmatpush3.bf16.msra.mxu1 %v20061_v59  ;;  %v10478_v29 = vld [vmem:[#allocation3 + $0x199] sm:$0xff] }
 0x7e0   : > { %19079 = vmatprep.mubr.msk.f32.mxu0 %vm406_vm3, %v23857_v30  ;;  %20040 = vmatpush3.bf16.msra.mxu0 %v20037_v43  ;;  %v10479_v30 = vld [vmem:[#allocation3 + $0x1a1] sm:$0xff] }
 0x7e1   : > { %20042 = vmatprep.subr.bf16.mxu0 %v20041_v50 }
 0x7e3   : > { %19080 = vmatmul.mubr.msk.f32.gmra.mrb[36].mxu0 %vm406_vm3, %v23861_v9  ;;  %v25925_v9 = vld [vmem:[#allocation17_spill] sm:$0xff] }
 0x7e4   : > { %19082 = vmatprep.mubr.msk.f32.mxu0 %vm406_vm3, %v23865_v13  ;;  %20044 = vmatpush3.bf16.msra.mxu0 %v20041_v50  ;;  %v25926_v13 = vld [vmem:[#allocation44_spill] sm:$0xff] }
 0x7e5   : > { %20046 = vmatprep.subr.bf16.mxu0 %v20045_v56 }
 0x7e7   : > { %19083 = vmatmul.mubr.msk.f32.gmra.mrb[38].mxu0 %vm406_vm3, %v23869_v27  ;;  %v25927_v27 = vld [vmem:[#allocation45_spill] sm:$0xff] }
 0x7e8   : > { %19085 = vmatprep.mubr.msk.f32.mxu0 %vm406_vm3, %v23873_v32  ;;  %20048 = vmatpush3.bf16.msra.mxu0 %v20045_v56  ;;  %v25928_v32 = vld [vmem:[#allocation20_spill] sm:$0xff] }
 0x7e9   : > { %20050 = vmatprep.subr.bf16.mxu0 %v24325_v14 }
 0x7eb   : > { %19086 = vmatmul.mubr.msk.f32.gmra.mrb[40].mxu0 %vm406_vm3, %v23877_v55  ;;  %v25929_v55 = vld [vmem:[#allocation21_spill] sm:$0xff] }
 0x7ec   : > { %19088 = vmatprep.mubr.msk.f32.mxu0 %vm406_vm3, %v23881_v1  ;;  %v25930_v1 = vld [vmem:[#allocation22_spill] sm:$0xff] }
 0x7ef   : > { %19089 = vmatmul.mubr.msk.f32.gmra.mrb[42].mxu0 %vm406_vm3, %v23885_v60  ;;  %v25931_v60 = vld [vmem:[#allocation23_spill] sm:$0xff] }
 0x7f0   : > { %19091 = vmatprep.mubr.msk.f32.mxu0 %vm406_vm3, %v23889_v28  ;;  %v25932_v28 = vld [vmem:[#allocation24_spill] sm:$0xff] }
 0x7f3   : > { %19092 = vmatmul.mubr.msk.f32.gmra.mrb[44].mxu0 %vm406_vm3, %v23893_v7  ;;  %v25933_v7 = vld [vmem:[#allocation25_spill] sm:$0xff] }
 0x7f4   : > { %19094 = vmatprep.mubr.msk.f32.mxu0 %vm406_vm3, %v23897_v44  ;;  %v25934_v44 = vld [vmem:[#allocation26_spill] sm:$0xff] }
 0x7f7   : > { %19095 = vmatmul.mubr.msk.f32.gmra.mrb[46].mxu0 %vm406_vm3, %v23901_v53  ;;  %v25935_v53 = vld [vmem:[#allocation27_spill] sm:$0xff] }
 0x7f8   : > { %19097 = vmatprep.mubr.msk.f32.mxu0 %vm406_vm3, %v23905_v18  ;;  %v25936_v18 = vld [vmem:[#allocation28_spill] sm:$0xff] }
 0x7fb   : > { %19098 = vmatmul.mubr.msk.f32.gmra.mrb[48].mxu0 %vm406_vm3, %v23909_v0  ;;  %v25937_v0 = vld [vmem:[#allocation29_spill] sm:$0xff] }
 0x7fc   : > { %19100 = vmatprep.mubr.msk.f32.mxu0 %vm406_vm3, %v23913_v19  ;;  %v25938_v19 = vld [vmem:[#allocation30_spill] sm:$0xff] }
 0x7ff   : > { %19101 = vmatmul.mubr.msk.f32.gmra.mrb[50].mxu0 %vm406_vm3, %v25888_v36  ;;  %v25941_v36 = vld [vmem:[#allocation34_spill] sm:$0xff] }
 0x800   : > { %19103 = vmatprep.mubr.msk.f32.mxu0 %vm406_vm3, %v25889_v37  ;;  %v25942_v37 = vld [vmem:[#allocation36_spill] sm:$0xff] }
 0x803   : > { %19104 = vmatmul.mubr.msk.f32.gmra.mrb[52].mxu0 %vm406_vm3, %v25890_v35  ;;  %v25943_v35 = vld [vmem:[#allocation39_spill] sm:$0xff] }
 0x804   : > { %19106 = vmatprep.mubr.msk.f32.mxu0 %vm406_vm3, %v25891_v41  ;;  %v25944_v41 = vld [vmem:[#allocation41_spill] sm:$0xff] }
 0x807   : > { %19107 = vmatmul.mubr.msk.f32.gmra.mrb[54].mxu0 %vm406_vm3, %v25892_v3  ;;  %v25945_v3 = vld [vmem:[#allocation43_spill] sm:$0xff] }
 0x808   : > { %19109 = vmatprep.mubr.msk.f32.mxu0 %vm406_vm3, %v25893_v5  ;;  %v10872_v5 = vld [vmem:[#allocation3 + $0x19a] sm:$0xff] }
 0x80b   : > { %19110 = vmatmul.mubr.msk.f32.gmra.mrb[56].mxu0 %vm406_vm3, %v25894_v42  ;;  %v25946_v42 = vld [vmem:[#allocation18_spill] sm:$0xff] }
 0x80c   : > { %19112 = vmatprep.mubr.msk.f32.mxu0 %vm406_vm3, %v25895_v26  ;;  %v10873_v26 = vld [vmem:[#allocation3 + $0x1a2] sm:$0xff] }
 0x80f   : > { %19113 = vmatmul.mubr.msk.f32.gmra.mrb[58].mxu0 %vm406_vm3, %v25896_v20  ;;  %v11733_v20 = vld [vmem:[#allocation6 + $0x40] sm:$0xff] }
 0x810   : > { %19115 = vmatprep.mubr.msk.f32.mxu0 %vm406_vm3, %v24203_v33  ;;  %v11734_v33 = vld [vmem:[#allocation6 + $0x48] sm:$0xff] }
 0x813   : > { %19116 = vmatmul.mubr.msk.f32.gmra.mrb[60].mxu0 %vm406_vm3, %v24207_v57  ;;  %v20065_v57 = vpack.c.bf16 %v11734_v33, %v11733_v20 }
 0x814   : > { %19118 = vmatprep.mubr.msk.f32.mxu0 %vm406_vm3, %v10478_v29 }
 0x815   : > { %20066 = vmatprep.subr.bf16.mxu1 %v20065_v57 }
 0x817   : > { %19119 = vmatmul.mubr.msk.f32.gmra.mrb[62].mxu0 %vm406_vm3, %v10479_v30 }
 0x818   : > { %19137 = vmatprep.mubr.msk.f32.mxu0 %vm406_vm3, %v23963_v34  ;;  %v25939_v34 = vld [vmem:[#allocation31_spill] sm:$0xff] }
 0x81b   : > { %19138 = vmatmul.mubr.msk.f32.vlgmr.msra.gmra.mrb[32].mxu0 %vm406_vm3, %v23967_v38  ;;  %v25940_v38 = vld [vmem:[#allocation32_spill] sm:$0xff] }
 0x81c   : > { %19140 = vmatprep.mubr.msk.f32.mxu0 %vm406_vm3, %v25898_v21  ;;  %20052 = vmatpush3.bf16.msra.mxu0 %v24325_v14  ;;  %v24462_v21 = vld [vmem:[%s25387_s6] ss:$0 sm:$0xff] }
 0x81d   : > { %20054 = vmatprep.subr.bf16.mxu0 %v24327_v63 }
 0x81f   : > { %19141 = vmatmul.mubr.msk.f32.gmra.mrb[34].mxu0 %vm406_vm3, %v25899_v2 }
 0x820   : > { %19143 = vmatprep.mubr.msk.f32.mxu0 %vm406_vm3, %v25900_v24  ;;  %20056 = vmatpush3.bf16.msra.mxu0 %v24327_v63 }
 0x821   : > { %20058 = vmatprep.subr.bf16.mxu0 %v20057_v39 }
 0x823   : > { %19144 = vmatmul.mubr.msk.f32.gmra.mrb[36].mxu0 %vm406_vm3, %v25901_v31 }
 0x824   : > { %19146 = vmatprep.mubr.msk.f32.mxu0 %vm406_vm3, %v25902_v61  ;;  %20060 = vmatpush3.bf16.msra.mxu0 %v20057_v39  ;;  %v11738_v39 = vld [vmem:[#allocation6 + $0x68] sm:$0xff] }
 0x825   : > { %20062 = vmatprep.subr.bf16.mxu0 %v20061_v59 }
 0x827   : > { %19147 = vmatmul.mubr.msk.f32.gmra.mrb[38].mxu0 %vm406_vm3, %v25903_v40 }
 0x828   : > { %19149 = vmatprep.mubr.msk.f32.mxu0 %vm406_vm3, %v25925_v9  ;;  %20064 = vmatpush3.bf16.msra.mxu0 %v20061_v59  ;;  %v20073_v9 = vpack.c.bf16 %v11738_v39, %v11737_v10 }
 0x82b   : > { %19150 = vmatmul.mubr.msk.f32.gmra.mrb[40].mxu0 %vm406_vm3, %v25926_v13 }
 0x82c   : > { %19152 = vmatprep.mubr.msk.f32.mxu0 %vm406_vm3, %v25927_v27  ;;  %v11739_v27 = vld [vmem:[#allocation6 + $0x70] sm:$0xff] }
 0x82f   : > { %19153 = vmatmul.mubr.msk.f32.gmra.mrb[42].mxu0 %vm406_vm3, %v25928_v32  ;;  %v11740_v32 = vld [vmem:[#allocation6 + $0x78] sm:$0xff] }
 0x830   : > { %19155 = vmatprep.mubr.msk.f32.mxu0 %vm406_vm3, %v25929_v55 }
 0x833   : > { %19156 = vmatmul.mubr.msk.f32.gmra.mrb[44].mxu0 %vm406_vm3, %v25930_v1 }
 0x834   : > { %19158 = vmatprep.mubr.msk.f32.mxu0 %vm406_vm3, %v25931_v60 }
 0x837   : > { %19159 = vmatmul.mubr.msk.f32.gmra.mrb[46].mxu0 %vm406_vm3, %v25932_v28 }
 0x838   : > { %19161 = vmatprep.mubr.msk.f32.mxu0 %vm406_vm3, %v25933_v7 }
 0x83b   : > { %19162 = vmatmul.mubr.msk.f32.gmra.mrb[48].mxu0 %vm406_vm3, %v25934_v44 }
 0x83c   : > { %19164 = vmatprep.mubr.msk.f32.mxu0 %vm406_vm3, %v25935_v53 }
 0x83f   : > { %19165 = vmatmul.mubr.msk.f32.gmra.mrb[50].mxu0 %vm406_vm3, %v25936_v18  ;;  %v20077_v18 = vpack.c.bf16 %v11740_v32, %v11739_v27 }
 0x840   : > { %19167 = vmatprep.mubr.msk.f32.mxu0 %vm406_vm3, %v25937_v0 }
 0x843   : > { %19168 = vmatmul.mubr.msk.f32.gmra.mrb[52].mxu0 %vm406_vm3, %v25938_v19  ;;  %v12127_v19 = vld [vmem:[#allocation6 + $0x80] sm:$0xff] }
 0x844   : > { %19170 = vmatprep.mubr.msk.f32.mxu0 %vm406_vm3, %v25939_v34  ;;  %v12128_v34 = vld [vmem:[#allocation6 + $0x88] sm:$0xff] }
 0x847   : > { %19171 = vmatmul.mubr.msk.f32.gmra.mrb[54].mxu0 %vm406_vm3, %v25940_v38 }
 0x848   : > { %19173 = vmatprep.mubr.msk.f32.mxu0 %vm406_vm3, %v25941_v36 }
 0x84b   : > { %19174 = vmatmul.mubr.msk.f32.gmra.mrb[56].mxu0 %vm406_vm3, %v25942_v37 }
 0x84c   : > { %19176 = vmatprep.mubr.msk.f32.mxu0 %vm406_vm3, %v25943_v35 }
 0x84f   : > { %19177 = vmatmul.mubr.msk.f32.gmra.mrb[58].mxu0 %vm406_vm3, %v25944_v41 }
 0x850   : > { %19179 = vmatprep.mubr.msk.f32.mxu0 %vm406_vm3, %v25945_v3 }
 0x853   : > { %19180 = vmatmul.mubr.msk.f32.gmra.mrb[60].mxu0 %vm406_vm3, %v25946_v42  ;;  %v24516_v42 = vpack.c.bf16 %v12128_v34, %v12127_v19 }
 0x854   : > { %19182 = vmatprep.mubr.msk.f32.mxu0 %vm406_vm3, %v10872_v5 }
 0x857   : > { %19183 = vmatmul.mubr.msk.f32.gmra.mrb[62].mxu0 %vm406_vm3, %v10873_v26 }
 0x8ee   : > { %v19139_v2 = vpop.f32.mrb[32].mxu0 }
 0x8ef   : > { %v20265_v24 = vadd.f32 %v19139_v2, %v24462_v21  ;;  %v11045_v31 = vpop.f32.mrb[33].mxu0 }
 0x8f0   : > { %v20266_v61 = vadd.f32 %v24462_v21, %v11045_v31 }
 0x8f1   : > { %v11237_v40 = vmax.f32 %v20265_v24, 0.0 }
 0x8f2   : > { %v11236_v15 = vmax.f32 %v20266_v61, 0.0  ;;  %v19142_v4 = vpop.f32.mrb[34].mxu0 }
 0x8f3   : > { %11269 = vst.msk [vmem:[#allocation3 + $0x21] sm:$0xff] %vm406_vm3, %v11237_v40  ;;  %v20267_v22 = vadd.f32 %v19142_v4, %v24462_v21  ;;  %v11055_v8 = vpop.f32.mrb[35].mxu0 }
 0x8f4   : > { %11268 = vst.msk [vmem:[#allocation3 + $0x19] sm:$0xff] %vm406_vm3, %v11236_v15  ;;  %v20268_v49 = vadd.f32 %v24462_v21, %v11055_v8 }
 0x8f5   : > { %v11239_v12 = vmax.f32 %v20267_v22, 0.0 }
 0x8f6   : > { %v11238_v16 = vmax.f32 %v20268_v49, 0.0  ;;  %v19145_v17 = vpop.f32.mrb[36].mxu0 }
 0x8f7   : > { %11271 = vst.msk [vmem:[#allocation3 + $0x39] sm:$0xff] %vm406_vm3, %v11239_v12  ;;  %v20269_v47 = vadd.f32 %v19145_v17, %v24462_v21  ;;  %v11065_v54 = vpop.f32.mrb[37].mxu0 }
 0x8f8   : > { %11270 = vst.msk [vmem:[#allocation3 + $0x31] sm:$0xff] %vm406_vm3, %v11238_v16  ;;  %v20270_v45 = vadd.f32 %v24462_v21, %v11065_v54 }
 0x8f9   : > { %v11241_v14 = vmax.f32 %v20269_v47, 0.0 }
 0x8fa   : > { %v11240_v62 = vmax.f32 %v20270_v45, 0.0  ;;  %v19148_v43 = vpop.f32.mrb[38].mxu0 }
 0x8fb   : > { %11273 = vst.msk [vmem:[#allocation3 + $0x51] sm:$0xff] %vm406_vm3, %v11241_v14  ;;  %v20271_v6 = vadd.f32 %v19148_v43, %v24462_v21  ;;  %v11075_v63 = vpop.f32.mrb[39].mxu0  ;;  %v24476_v25 = vld [vmem:[#allocation3 + $0x18] sm:$0xff]  ;;  %v24478_v52 = vld [vmem:[#allocation3 + $0x20] sm:$0xff] }
 0x8fc   : > { %11272 = vst.msk [vmem:[#allocation3 + $0x49] sm:$0xff] %vm406_vm3, %v11240_v62  ;;  %v20272_v50 = vadd.f32 %v24462_v21, %v11075_v63  ;;  %19204 = vmatprep.mubr.msk.f32.mxu1 %vm406_vm3, %v24476_v25 }
 0x8fd   : > { %v11243_v58 = vmax.f32 %v20271_v6, 0.0  ;;  %19205 = vmatmul.mubr.msk.f32.vlgmr.msra.gmra.mrb[32].mxu1 %vm406_vm3, %v24478_v52 }
 0x8fe   : > { %v11242_v48 = vmax.f32 %v20272_v50, 0.0  ;;  %20068 = vmatpush3.bf16.msra.mxu1 %v20065_v57  ;;  %v19151_v23 = vpop.f32.mrb[40].mxu0 }
 0x8ff   : > { %11275 = vst.msk [vmem:[#allocation3 + $0x69] sm:$0xff] %vm406_vm3, %v11243_v58  ;;  %v20273_v56 = vadd.f32 %v19151_v23, %v24462_v21  ;;  %v11085_v59 = vpop.f32.mrb[41].mxu0  ;;  %v24488_v29 = vld [vmem:[#allocation3 + $0x30] sm:$0xff]  ;;  %v24490_v30 = vld [vmem:[#allocation3 + $0x38] sm:$0xff]  ;;  %20070 = vmatprep.subr.bf16.mxu1 %v20069_v46 }
 0x900   : > { %11274 = vst.msk [vmem:[#allocation3 + $0x61] sm:$0xff] %vm406_vm3, %v11242_v48  ;;  %v20274_v13 = vadd.f32 %v24462_v21, %v11085_v59  ;;  %19207 = vmatprep.mubr.msk.f32.mxu1 %vm406_vm3, %v24488_v29 }
 0x901   : > { %v11245_v55 = vmax.f32 %v20273_v56, 0.0  ;;  %19208 = vmatmul.mubr.msk.f32.gmra.mrb[34].mxu1 %vm406_vm3, %v24490_v30 }
 0x902   : > { %v11244_v1 = vmax.f32 %v20274_v13, 0.0  ;;  %v19154_v60 = vpop.f32.mrb[42].mxu0  ;;  %20072 = vmatpush3.bf16.msra.mxu1 %v20069_v46 }
 0x903   : > { %11277 = vst.msk [vmem:[#allocation3 + $0x81] sm:$0xff] %vm406_vm3, %v11245_v55  ;;  %v20275_v28 = vadd.f32 %v19154_v60, %v24462_v21  ;;  %v11095_v7 = vpop.f32.mrb[43].mxu0  ;;  %v24500_v44 = vld [vmem:[#allocation3 + $0x48] sm:$0xff]  ;;  %v24502_v53 = vld [vmem:[#allocation3 + $0x50] sm:$0xff]  ;;  %20074 = vmatprep.subr.bf16.mxu1 %v20073_v9 }
 0x904   : > { %11276 = vst.msk [vmem:[#allocation3 + $0x79] sm:$0xff] %vm406_vm3, %v11244_v1  ;;  %v20276_v0 = vadd.f32 %v24462_v21, %v11095_v7  ;;  %19210 = vmatprep.mubr.msk.f32.mxu1 %vm406_vm3, %v24500_v44 }
 0x905   : > { %v11247_v38 = vmax.f32 %v20275_v28, 0.0  ;;  %19211 = vmatmul.mubr.msk.f32.gmra.mrb[36].mxu1 %vm406_vm3, %v24502_v53 }
 0x906   : > { %v11246_v36 = vmax.f32 %v20276_v0, 0.0  ;;  %v19157_v37 = vpop.f32.mrb[44].mxu0  ;;  %20076 = vmatpush3.bf16.msra.mxu1 %v20073_v9 }
 0x907   : > { %11279 = vst.msk [vmem:[#allocation3 + $0x99] sm:$0xff] %vm406_vm3, %v11247_v38  ;;  %v20277_v35 = vadd.f32 %v19157_v37, %v24462_v21  ;;  %v11105_v41 = vpop.f32.mrb[45].mxu0  ;;  %v24512_v3 = vld [vmem:[#allocation3 + $0x60] sm:$0xff]  ;;  %v24514_v5 = vld [vmem:[#allocation3 + $0x68] sm:$0xff]  ;;  %20078 = vmatprep.subr.bf16.mxu1 %v20077_v18 }
 0x908   : > { %11278 = vst.msk [vmem:[#allocation3 + $0x91] sm:$0xff] %vm406_vm3, %v11246_v36  ;;  %v20278_v26 = vadd.f32 %v24462_v21, %v11105_v41  ;;  %19213 = vmatprep.mubr.msk.f32.mxu1 %vm406_vm3, %v24512_v3 }
 0x909   : > { %v11249_v20 = vmax.f32 %v20277_v35, 0.0  ;;  %19214 = vmatmul.mubr.msk.f32.gmra.mrb[38].mxu1 %vm406_vm3, %v24514_v5 }
 0x90a   : > { %v11248_v33 = vmax.f32 %v20278_v26, 0.0  ;;  %v19160_v57 = vpop.f32.mrb[46].mxu0  ;;  %20080 = vmatpush3.bf16.msra.mxu1 %v20077_v18 }
 0x90b   : > { %11281 = vst.msk [vmem:[#allocation3 + $0xb1] sm:$0xff] %vm406_vm3, %v11249_v20  ;;  %v20279_v2 = vadd.f32 %v19160_v57, %v24462_v21  ;;  %v11115_v24 = vpop.f32.mrb[47].mxu0  ;;  %v24526_v31 = vld [vmem:[#allocation3 + $0x78] sm:$0xff]  ;;  %v24528_v61 = vld [vmem:[#allocation3 + $0x80] sm:$0xff]  ;;  %20082 = vmatprep.subr.bf16.mxu1 %v24516_v42 }
 0x90c   : > { %11280 = vst.msk [vmem:[#allocation3 + $0xa9] sm:$0xff] %vm406_vm3, %v11248_v33  ;;  %v20280_v40 = vadd.f32 %v24462_v21, %v11115_v24  ;;  %19216 = vmatprep.mubr.msk.f32.mxu1 %vm406_vm3, %v24526_v31 }
 0x90d   : > { %v11251_v15 = vmax.f32 %v20279_v2, 0.0  ;;  %19217 = vmatmul.mubr.msk.f32.gmra.mrb[40].mxu1 %vm406_vm3, %v24528_v61 }
 0x90e   : > { %v11250_v4 = vmax.f32 %v20280_v40, 0.0  ;;  %v19163_v22 = vpop.f32.mrb[48].mxu0 }
 0x90f   : > { %11283 = vst.msk [vmem:[#allocation3 + $0xc9] sm:$0xff] %vm406_vm3, %v11251_v15  ;;  %v20281_v8 = vadd.f32 %v19163_v22, %v24462_v21  ;;  %v11125_v49 = vpop.f32.mrb[49].mxu0  ;;  %v24539_v12 = vld [vmem:[#allocation3 + $0x90] sm:$0xff]  ;;  %v24541_v16 = vld [vmem:[#allocation3 + $0x98] sm:$0xff] }
 0x910   : > { %11282 = vst.msk [vmem:[#allocation3 + $0xc1] sm:$0xff] %vm406_vm3, %v11250_v4  ;;  %v20282_v17 = vadd.f32 %v24462_v21, %v11125_v49  ;;  %19219 = vmatprep.mubr.msk.f32.mxu1 %vm406_vm3, %v24539_v12 }
 0x911   : > { %v11253_v47 = vmax.f32 %v20281_v8, 0.0  ;;  %19220 = vmatmul.mubr.msk.f32.gmra.mrb[42].mxu1 %vm406_vm3, %v24541_v16 }
 0x912   : > { %v11252_v54 = vmax.f32 %v20282_v17, 0.0  ;;  %v19166_v45 = vpop.f32.mrb[50].mxu0 }
 0x913   : > { %11285 = vst.msk [vmem:[#allocation3 + $0xe1] sm:$0xff] %vm406_vm3, %v11253_v47  ;;  %v20283_v51 = vadd.f32 %v19166_v45, %v24462_v21  ;;  %v11135_v11 = vpop.f32.mrb[51].mxu0  ;;  %v24551_v14 = vld [vmem:[#allocation3 + $0xa8] sm:$0xff]  ;;  %v24553_v62 = vld [vmem:[#allocation3 + $0xb0] sm:$0xff] }
 0x914   : > { %11284 = vst.msk [vmem:[#allocation3 + $0xd9] sm:$0xff] %vm406_vm3, %v11252_v54  ;;  %v20284_v43 = vadd.f32 %v24462_v21, %v11135_v11  ;;  %19222 = vmatprep.mubr.msk.f32.mxu1 %vm406_vm3, %v24551_v14 }
 0x915   : > { %v11255_v6 = vmax.f32 %v20283_v51, 0.0  ;;  %19223 = vmatmul.mubr.msk.f32.gmra.mrb[44].mxu1 %vm406_vm3, %v24553_v62 }
 0x916   : > { %v11254_v63 = vmax.f32 %v20284_v43, 0.0  ;;  %v19169_v46 = vpop.f32.mrb[52].mxu0 }
 0x917   : > { %11287 = vst.msk [vmem:[#allocation3 + $0xf9] sm:$0xff] %vm406_vm3, %v11255_v6  ;;  %v20285_v50 = vadd.f32 %v19169_v46, %v24462_v21  ;;  %v11145_v10 = vpop.f32.mrb[53].mxu0  ;;  %v24563_v39 = vld [vmem:[#allocation3 + $0xc0] sm:$0xff]  ;;  %v24565_v58 = vld [vmem:[#allocation3 + $0xc8] sm:$0xff] }
 0x918   : > { %11286 = vst.msk [vmem:[#allocation3 + $0xf1] sm:$0xff] %vm406_vm3, %v11254_v63  ;;  %v20286_v48 = vadd.f32 %v24462_v21, %v11145_v10  ;;  %19225 = vmatprep.mubr.msk.f32.mxu1 %vm406_vm3, %v24563_v39 }
 0x919   : > { %v11257_v23 = vmax.f32 %v20285_v50, 0.0  ;;  %19226 = vmatmul.mubr.msk.f32.gmra.mrb[46].mxu1 %vm406_vm3, %v24565_v58 }
 0x91a   : > { %v11256_v56 = vmax.f32 %v20286_v48, 0.0  ;;  %v19172_v59 = vpop.f32.mrb[54].mxu0  ;;  %v11700_v48 = vld [vmem:[#allocation3 + $0x1] sm:$0xff] }
 0x91b   : > { %11289 = vst.msk [vmem:[#allocation3 + $0x111] sm:$0xff] %vm406_vm3, %v11257_v23  ;;  %v20287_v9 = vadd.f32 %v19172_v59, %v24462_v21  ;;  %v11155_v13 = vpop.f32.mrb[55].mxu0  ;;  %v24575_v27 = vld [vmem:[#allocation3 + $0xd8] sm:$0xff]  ;;  %v24577_v32 = vld [vmem:[#allocation3 + $0xe0] sm:$0xff]  ;;  %v11701_v59 = vld [vmem:[#allocation3 + $0x9] sm:$0xff] }
 0x91c   : > { %11288 = vst.msk [vmem:[#allocation3 + $0x109] sm:$0xff] %vm406_vm3, %v11256_v56  ;;  %v20288_v55 = vadd.f32 %v24462_v21, %v11155_v13  ;;  %19228 = vmatprep.mubr.msk.f32.mxu1 %vm406_vm3, %v24575_v27  ;;  %v12129_v23 = vld [vmem:[#allocation6 + $0x90] sm:$0xff]  ;;  %v12130_v56 = vld [vmem:[#allocation6 + $0x98] sm:$0xff]  ;;  %v12131_v13 = vld [vmem:[#allocation6 + $0xa0] sm:$0xff] }
 0x91d   : > { %v11259_v1 = vmax.f32 %v20287_v9, 0.0  ;;  %19229 = vmatmul.mubr.msk.f32.gmra.mrb[48].mxu1 %vm406_vm3, %v24577_v32  ;;  %v20085_v9 = vpack.c.bf16 %v12130_v56, %v12129_v23 }
 0x91e   : > { %v11258_v60 = vmax.f32 %v20288_v55, 0.0  ;;  %v19175_v28 = vpop.f32.mrb[56].mxu0  ;;  %v12132_v55 = vld [vmem:[#allocation6 + $0xa8] sm:$0xff] }
 0x91f   : > { %11291 = vst.msk [vmem:[#allocation3 + $0x129] sm:$0xff] %vm406_vm3, %v11259_v1  ;;  %v20289_v7 = vadd.f32 %v19175_v28, %v24462_v21  ;;  %v11165_v18 = vpop.f32.mrb[57].mxu0  ;;  %v24587_v0 = vld [vmem:[#allocation3 + $0xf0] sm:$0xff]  ;;  %v24589_v19 = vld [vmem:[#allocation3 + $0xf8] sm:$0xff]  ;;  %v24658_v28 = vld [vmem:[#allocation3 + $0x21] sm:$0xff] }
 0x920   : > { %11290 = vst.msk [vmem:[#allocation3 + $0x121] sm:$0xff] %vm406_vm3, %v11258_v60  ;;  %v20290_v34 = vadd.f32 %v24462_v21, %v11165_v18  ;;  %19231 = vmatprep.mubr.msk.f32.mxu1 %vm406_vm3, %v24587_v0  ;;  %v24653_v1 = vld [vmem:[#allocation3 + $0x19] sm:$0xff]  ;;  %v20089_v60 = vpack.c.bf16 %v12132_v55, %v12131_v13  ;;  %v12134_v18 = vld [vmem:[#allocation6 + $0xb8] sm:$0xff] }
 0x921   : > { %v11261_v38 = vmax.f32 %v20289_v7, 0.0  ;;  %19232 = vmatmul.mubr.msk.f32.gmra.mrb[50].mxu1 %vm406_vm3, %v24589_v19  ;;  %v12133_v7 = vld [vmem:[#allocation6 + $0xb0] sm:$0xff] }
 0x922   : > { %v11260_v36 = vmax.f32 %v20290_v34, 0.0  ;;  %v19178_v37 = vpop.f32.mrb[58].mxu0  ;;  %v24662_v34 = vld [vmem:[#allocation3 + $0x31] sm:$0xff] }
 0x923   : > { %11293 = vst.msk [vmem:[#allocation3 + $0x141] sm:$0xff] %vm406_vm3, %v11261_v38  ;;  %v20291_v35 = vadd.f32 %v19178_v37, %v24462_v21  ;;  %v11175_v41 = vpop.f32.mrb[59].mxu0  ;;  %v24599_v26 = vld [vmem:[#allocation3 + $0x108] sm:$0xff]  ;;  %v24601_v20 = vld [vmem:[#allocation3 + $0x110] sm:$0xff]  ;;  %v24666_v38 = vld [vmem:[#allocation3 + $0x39] sm:$0xff] }
 0x924   : > { %11292 = vst.msk [vmem:[#allocation3 + $0x139] sm:$0xff] %vm406_vm3, %v11260_v36  ;;  %v20292_v33 = vadd.f32 %v24462_v21, %v11175_v41  ;;  %19234 = vmatprep.mubr.msk.f32.mxu1 %vm406_vm3, %v24599_v26  ;;  %v12521_v36 = vld [vmem:[#allocation6 + $0xc0] sm:$0xff]  ;;  %v12522_v37 = vld [vmem:[#allocation6 + $0xc8] sm:$0xff] }
 0x925   : > { %v11263_v57 = vmax.f32 %v20291_v35, 0.0  ;;  %19235 = vmatmul.mubr.msk.f32.gmra.mrb[52].mxu1 %vm406_vm3, %v24601_v20  ;;  %v24670_v35 = vld [vmem:[#allocation3 + $0x49] sm:$0xff]  ;;  %v20097_v41 = vpack.c.bf16 %v12522_v37, %v12521_v36  ;;  %v24738_v23 = vld [vmem:[#allocation3 + $0x111] sm:$0xff]  ;;  %v12523_v36 = vld [vmem:[#allocation6 + $0xd0] sm:$0xff] }
 0x926   : > { %v11262_v2 = vmax.f32 %v20292_v33, 0.0  ;;  %v19181_v24 = vpop.f32.mrb[60].mxu0  ;;  %v24674_v33 = vld [vmem:[#allocation3 + $0x51] sm:$0xff]  ;;  %25947 = vst [vmem:[#allocation19_spill] sm:$0xff] %v24738_v23  ;;  %v12524_v37 = vld [vmem:[#allocation6 + $0xd8] sm:$0xff] }
 0x927   : > { %11295 = vst.msk [vmem:[#allocation3 + $0x159] sm:$0xff] %vm406_vm3, %v11263_v57  ;;  %v20293_v40 = vadd.f32 %v19181_v24, %v24462_v21  ;;  %v11185_v15 = vpop.f32.mrb[61].mxu0  ;;  %v24611_v4 = vld [vmem:[#allocation3 + $0x120] sm:$0xff]  ;;  %v24613_v22 = vld [vmem:[#allocation3 + $0x128] sm:$0xff] }
 0x928   : > { %11294 = vst.msk [vmem:[#allocation3 + $0x151] sm:$0xff] %vm406_vm3, %v11262_v2  ;;  %v20294_v8 = vadd.f32 %v24462_v21, %v11185_v15  ;;  %19237 = vmatprep.mubr.msk.f32.mxu1 %vm406_vm3, %v24611_v4  ;;  %v24678_v57 = vld [vmem:[#allocation3 + $0x61] sm:$0xff]  ;;  %v24682_v2 = vld [vmem:[#allocation3 + $0x69] sm:$0xff]  ;;  %v24686_v24 = vld [vmem:[#allocation3 + $0x79] sm:$0xff] }
 0x929   : > { %v11265_v49 = vmax.f32 %v20293_v40, 0.0  ;;  %19238 = vmatmul.mubr.msk.f32.gmra.mrb[54].mxu1 %vm406_vm3, %v24613_v22  ;;  %v24690_v40 = vld [vmem:[#allocation3 + $0x81] sm:$0xff]  ;;  %v24694_v15 = vld [vmem:[#allocation3 + $0x91] sm:$0xff] }
 0x92a   : > { %v11264_v17 = vmax.f32 %v20294_v8, 0.0  ;;  %v19184_v47 = vpop.f32.mrb[62].mxu0  ;;  %v24698_v8 = vld [vmem:[#allocation3 + $0x99] sm:$0xff]  ;;  %v24742_v56 = vld [vmem:[#allocation3 + $0x121] sm:$0xff] }
 0x92b   : > { %11297 = vst.msk [vmem:[#allocation3 + $0x171] sm:$0xff] %vm406_vm3, %v11265_v49  ;;  %v20295_v54 = vadd.f32 %v19184_v47, %v24462_v21  ;;  %v11195_v45 = vpop.f32.mrb[63].mxu0  ;;  %v24623_v51 = vld [vmem:[#allocation3 + $0x138] sm:$0xff]  ;;  %v24625_v11 = vld [vmem:[#allocation3 + $0x140] sm:$0xff]  ;;  %v24702_v49 = vld [vmem:[#allocation3 + $0xa9] sm:$0xff] }
 0x92c   : > { %11296 = vst.msk [vmem:[#allocation3 + $0x169] sm:$0xff] %vm406_vm3, %v11264_v17  ;;  %v20296_v43 = vadd.f32 %v24462_v21, %v11195_v45  ;;  %19240 = vmatprep.mubr.msk.f32.mxu1 %vm406_vm3, %v24623_v51  ;;  %v24706_v17 = vld [vmem:[#allocation3 + $0xb1] sm:$0xff]  ;;  %v24710_v47 = vld [vmem:[#allocation3 + $0xc1] sm:$0xff]  ;;  %v24718_v45 = vld [vmem:[#allocation3 + $0xd9] sm:$0xff] }
 0x92d   : > { %v11267_v6 = vmax.f32 %v20295_v54, 0.0  ;;  %19241 = vmatmul.mubr.msk.f32.gmra.mrb[56].mxu1 %vm406_vm3, %v24625_v11  ;;  %v24714_v54 = vld [vmem:[#allocation3 + $0xc9] sm:$0xff]  ;;  %25948 = vst [vmem:[#allocation33_spill] sm:$0xff] %v24742_v56  ;;  %v24754_v13 = vld [vmem:[#allocation3 + $0x141] sm:$0xff] }
 0x92e   : > { %v11266_v63 = vmax.f32 %v20296_v43, 0.0  ;;  %v24722_v43 = vld [vmem:[#allocation3 + $0xe1] sm:$0xff]  ;;  %25951 = vst [vmem:[#allocation38_spill] sm:$0xff] %v24754_v13 }
 0x92f   : > { %11299 = vst.msk [vmem:[#allocation3 + $0x189] sm:$0xff] %vm406_vm3, %v11267_v6  ;;  %v24634_v46 = vld [vmem:[#allocation3 + $0x150] sm:$0xff]  ;;  %v24636_v50 = vld [vmem:[#allocation3 + $0x158] sm:$0xff] }
 0x930   : > { %11298 = vst.msk [vmem:[#allocation3 + $0x181] sm:$0xff] %vm406_vm3, %v11266_v63  ;;  %19243 = vmatprep.mubr.msk.f32.mxu1 %vm406_vm3, %v24634_v46  ;;  %v24726_v6 = vld [vmem:[#allocation3 + $0xf1] sm:$0xff]  ;;  %v24730_v63 = vld [vmem:[#allocation3 + $0xf9] sm:$0xff] }
 0x931   : > { %19244 = vmatmul.mubr.msk.f32.gmra.mrb[58].mxu1 %vm406_vm3, %v24636_v50  ;;  %v24758_v55 = vld [vmem:[#allocation3 + $0x151] sm:$0xff] }
 0x932   : > { %25952 = vst [vmem:[#allocation40_spill] sm:$0xff] %v24758_v55 }
 0x933   : > { %v24643_v21 = vld [vmem:[#allocation3 + $0x168] sm:$0xff]  ;;  %v24645_v10 = vld [vmem:[#allocation3 + $0x170] sm:$0xff] }
 0x934   : > { %19246 = vmatprep.mubr.msk.f32.mxu1 %vm406_vm3, %v24643_v21 }
 0x935   : > { %19247 = vmatmul.mubr.msk.f32.gmra.mrb[60].mxu1 %vm406_vm3, %v24645_v10 }
 0x936   : > { %19265 = vmatprep.mubr.msk.f32.mxu1 %vm406_vm3, %v11700_v48  ;;  %v24734_v48 = vld [vmem:[#allocation3 + $0x109] sm:$0xff] }
 0x939   : > { %19266 = vmatmul.mubr.msk.f32.vlgmr.msra.gmra.mrb[62].mxu1 %vm406_vm3, %v11701_v59  ;;  %v24746_v59 = vld [vmem:[#allocation3 + $0x129] sm:$0xff] }
 0x93a   : > { %20084 = vmatpush3.bf16.msra.mxu1 %v24516_v42  ;;  %19268 = vmatprep.mubr.msk.f32.mxu1 %vm406_vm3, %v24653_v1  ;;  %v20093_v42 = vpack.c.bf16 %v12134_v18, %v12133_v7  ;;  %25949 = vst [vmem:[#allocation35_spill] sm:$0xff] %v24746_v59  ;;  %v24766_v7 = vld [vmem:[#allocation3 + $0x169] sm:$0xff] }
 0x93b   : > { %20086 = vmatprep.subr.bf16.mxu1 %v20085_v9  ;;  %25954 = vst [vmem:[#allocation10_spill] sm:$0xff] %v24766_v7  ;;  %v12094_v18 = vld [vmem:[#allocation3 + $0x2] sm:$0xff] }
 0x93d   : > { %19269 = vmatmul.mubr.msk.f32.gmra.mrb[32].mxu1 %vm406_vm3, %v24658_v28 }
 0x93e   : > { %19271 = vmatprep.mubr.msk.f32.mxu1 %vm406_vm3, %v24662_v34  ;;  %20088 = vmatpush3.bf16.msra.mxu1 %v20085_v9  ;;  %v24750_v9 = vld [vmem:[#allocation3 + $0x139] sm:$0xff] }
 0x93f   : > { %20090 = vmatprep.subr.bf16.mxu1 %v20089_v60  ;;  %25950 = vst [vmem:[#allocation37_spill] sm:$0xff] %v24750_v9 }
 0x941   : > { %19272 = vmatmul.mubr.msk.f32.gmra.mrb[34].mxu1 %vm406_vm3, %v24666_v38 }
 0x942   : > { %19274 = vmatprep.mubr.msk.f32.mxu1 %vm406_vm3, %v24670_v35  ;;  %20092 = vmatpush3.bf16.msra.mxu1 %v20089_v60  ;;  %v24762_v60 = vld [vmem:[#allocation3 + $0x159] sm:$0xff] }
 0x943   : > { %20094 = vmatprep.subr.bf16.mxu1 %v20093_v42  ;;  %25953 = vst [vmem:[#allocation42_spill] sm:$0xff] %v24762_v60 }
 0x945   : > { %19275 = vmatmul.mubr.msk.f32.gmra.mrb[36].mxu1 %vm406_vm3, %v24674_v33 }
 0x946   : > { %19277 = vmatprep.mubr.msk.f32.mxu1 %vm406_vm3, %v24678_v57  ;;  %20096 = vmatpush3.bf16.msra.mxu1 %v20093_v42  ;;  %v24770_v42 = vld [vmem:[#allocation3 + $0x171] sm:$0xff] }
 0x947   : > { %20098 = vmatprep.subr.bf16.mxu1 %v20097_v41  ;;  %25955 = vst [vmem:[#allocation11_spill] sm:$0xff] %v24770_v42 }
 0x949   : > { %19278 = vmatmul.mubr.msk.f32.gmra.mrb[38].mxu1 %vm406_vm3, %v24682_v2 }
 0x94a   : > { %19280 = vmatprep.mubr.msk.f32.mxu1 %vm406_vm3, %v24686_v24 }
 0x94d   : > { %19281 = vmatmul.mubr.msk.f32.gmra.mrb[40].mxu1 %vm406_vm3, %v24690_v40 }
 0x94e   : > { %19283 = vmatprep.mubr.msk.f32.mxu1 %vm406_vm3, %v24694_v15 }
 0x951   : > { %19284 = vmatmul.mubr.msk.f32.gmra.mrb[42].mxu1 %vm406_vm3, %v24698_v8 }
 0x952   : > { %19286 = vmatprep.mubr.msk.f32.mxu1 %vm406_vm3, %v24702_v49 }
 0x955   : > { %19287 = vmatmul.mubr.msk.f32.gmra.mrb[44].mxu1 %vm406_vm3, %v24706_v17 }
 0x956   : > { %19289 = vmatprep.mubr.msk.f32.mxu1 %vm406_vm3, %v24710_v47 }
 0x959   : > { %19290 = vmatmul.mubr.msk.f32.gmra.mrb[46].mxu1 %vm406_vm3, %v24714_v54 }
 0x95a   : > { %19292 = vmatprep.mubr.msk.f32.mxu1 %vm406_vm3, %v24718_v45 }
 0x95d   : > { %19293 = vmatmul.mubr.msk.f32.gmra.mrb[48].mxu1 %vm406_vm3, %v24722_v43 }
 0x95e   : > { %19295 = vmatprep.mubr.msk.f32.mxu1 %vm406_vm3, %v24726_v6 }
 0x961   : > { %19296 = vmatmul.mubr.msk.f32.gmra.mrb[50].mxu1 %vm406_vm3, %v24730_v63 }
 0x962   : > { %19298 = vmatprep.mubr.msk.f32.mxu1 %vm406_vm3, %v24734_v48 }
 0x965   : > { %19299 = vmatmul.mubr.msk.f32.gmra.mrb[52].mxu1 %vm406_vm3, %v24738_v23  ;;  %v12527_v23 = vld [vmem:[#allocation6 + $0xf0] sm:$0xff] }
 0x966   : > { %19301 = vmatprep.mubr.msk.f32.mxu1 %vm406_vm3, %v24742_v56  ;;  %v24780_v56 = vld [vmem:[#allocation3 + $0x22] sm:$0xff] }
 0x967   : > { %25956 = vst [vmem:[#allocation12_spill] sm:$0xff] %v24780_v56 }
 0x969   : > { %19302 = vmatmul.mubr.msk.f32.gmra.mrb[54].mxu1 %vm406_vm3, %v24746_v59  ;;  %v12526_v59 = vld [vmem:[#allocation6 + $0xe8] sm:$0xff] }
 0x96a   : > { %19304 = vmatprep.mubr.msk.f32.mxu1 %vm406_vm3, %v24750_v9  ;;  %v12525_v9 = vld [vmem:[#allocation6 + $0xe0] sm:$0xff] }
 0x96d   : > { %19305 = vmatmul.mubr.msk.f32.gmra.mrb[56].mxu1 %vm406_vm3, %v24754_v13  ;;  %v20101_v13 = vpack.c.bf16 %v12524_v37, %v12523_v36  ;;  %v12915_v36 = vld [vmem:[#allocation6 + $0x100] sm:$0xff]  ;;  %v12916_v37 = vld [vmem:[#allocation6 + $0x108] sm:$0xff] }
 0x96e   : > { %19307 = vmatprep.mubr.msk.f32.mxu1 %vm406_vm3, %v24758_v55  ;;  %v12095_v55 = vld [vmem:[#allocation3 + $0xa] sm:$0xff] }
 0x971   : > { %19308 = vmatmul.mubr.msk.f32.gmra.mrb[58].mxu1 %vm406_vm3, %v24762_v60  ;;  %v24776_v60 = vld [vmem:[#allocation3 + $0x1a] sm:$0xff] }
 0x972   : > { %19310 = vmatprep.mubr.msk.f32.mxu1 %vm406_vm3, %v24766_v7  ;;  %v20105_v7 = vpack.c.bf16 %v12526_v59, %v12525_v9  ;;  %v24792_v59 = vld [vmem:[#allocation3 + $0x4a] sm:$0xff]  ;;  %v20113_v9 = vpack.c.bf16 %v12916_v37, %v12915_v36  ;;  %v24816_v36 = vld [vmem:[#allocation3 + $0x92] sm:$0xff] }
 0x973   : > { %25957 = vst [vmem:[#allocation13_spill] sm:$0xff] %v24792_v59  ;;  %25963 = vst [vmem:[#allocation45_spill] sm:$0xff] %v24816_v36  ;;  %v24824_v37 = vld [vmem:[#allocation3 + $0xaa] sm:$0xff] }
 0x974   : > { %25965 = vst [vmem:[#allocation21_spill] sm:$0xff] %v24824_v37 }
 0x975   : > { %19311 = vmatmul.mubr.msk.f32.gmra.mrb[60].mxu1 %vm406_vm3, %v24770_v42  ;;  %v12528_v42 = vld [vmem:[#allocation6 + $0xf8] sm:$0xff] }
 0x976   : > { %19329 = vmatprep.mubr.msk.f32.mxu1 %vm406_vm3, %v12094_v18  ;;  %v24784_v18 = vld [vmem:[#allocation3 + $0x32] sm:$0xff] }
 0x979   : > { %19330 = vmatmul.mubr.msk.f32.vlgmr.msra.gmra.mrb[62].mxu1 %vm406_vm3, %v12095_v55  ;;  %v24788_v55 = vld [vmem:[#allocation3 + $0x3a] sm:$0xff] }
 0x97a   : > { %20100 = vmatpush3.bf16.msra.mxu1 %v20097_v41  ;;  %19332 = vmatprep.mubr.msk.f32.mxu1 %vm406_vm3, %v24776_v60  ;;  %v20109_v41 = vpack.c.bf16 %v12528_v42, %v12527_v23  ;;  %v24800_v23 = vld [vmem:[#allocation3 + $0x62] sm:$0xff] }
 0x97b   : > { %20102 = vmatprep.subr.bf16.mxu1 %v20101_v13  ;;  %25959 = vst [vmem:[#allocation15_spill] sm:$0xff] %v24800_v23  ;;  %v24812_v42 = vld [vmem:[#allocation3 + $0x82] sm:$0xff] }
 0x97c   : > { %25962 = vst [vmem:[#allocation44_spill] sm:$0xff] %v24812_v42 }
 0x97d   : > { %19333 = vmatmul.mubr.msk.f32.gmra.mrb[32].mxu1 %vm406_vm3, %v24780_v56  ;;  %v24796_v56 = vld [vmem:[#allocation3 + $0x52] sm:$0xff] }
 0x97e   : > { %19335 = vmatprep.mubr.msk.f32.mxu1 %vm406_vm3, %v24784_v18  ;;  %20104 = vmatpush3.bf16.msra.mxu1 %v20101_v13  ;;  %25958 = vst [vmem:[#allocation14_spill] sm:$0xff] %v24796_v56  ;;  %v24804_v13 = vld [vmem:[#allocation3 + $0x6a] sm:$0xff] }
 0x97f   : > { %20106 = vmatprep.subr.bf16.mxu1 %v20105_v7  ;;  %25960 = vst [vmem:[#allocation16_spill] sm:$0xff] %v24804_v13 }
 0x981   : > { %19336 = vmatmul.mubr.msk.f32.gmra.mrb[34].mxu1 %vm406_vm3, %v24788_v55 }
 0x982   : > { %19338 = vmatprep.mubr.msk.f32.mxu1 %vm406_vm3, %v24792_v59  ;;  %20108 = vmatpush3.bf16.msra.mxu1 %v20105_v7  ;;  %v24808_v7 = vld [vmem:[#allocation3 + $0x7a] sm:$0xff]  ;;  %v12922_v59 = vld [vmem:[#allocation6 + $0x138] sm:$0xff] }
 0x983   : > { %20110 = vmatprep.subr.bf16.mxu1 %v20109_v41  ;;  %25961 = vst [vmem:[#allocation17_spill] sm:$0xff] %v24808_v7 }
 0x985   : > { %19339 = vmatmul.mubr.msk.f32.gmra.mrb[36].mxu1 %vm406_vm3, %v24796_v56  ;;  %v12920_v56 = vld [vmem:[#allocation6 + $0x128] sm:$0xff] }
 0x986   : > { %19341 = vmatprep.mubr.msk.f32.mxu1 %vm406_vm3, %v24800_v23  ;;  %20112 = vmatpush3.bf16.msra.mxu1 %v20109_v41  ;;  %v24820_v41 = vld [vmem:[#allocation3 + $0x9a] sm:$0xff]  ;;  %v12918_v23 = vld [vmem:[#allocation6 + $0x118] sm:$0xff] }
 0x987   : > { %20114 = vmatprep.subr.bf16.mxu1 %v20113_v9  ;;  %25964 = vst [vmem:[#allocation20_spill] sm:$0xff] %v24820_v41 }
 0x989   : > { %19342 = vmatmul.mubr.msk.f32.gmra.mrb[38].mxu1 %vm406_vm3, %v24804_v13  ;;  %v12917_v13 = vld [vmem:[#allocation6 + $0x110] sm:$0xff] }
 0x98a   : > { %19344 = vmatprep.mubr.msk.f32.mxu1 %vm406_vm3, %v24808_v7  ;;  %v24828_v7 = vld [vmem:[#allocation3 + $0xb2] sm:$0xff] }
 0x98b   : > { %25966 = vst [vmem:[#allocation22_spill] sm:$0xff] %v24828_v7 }
 0x98d   : > { %19345 = vmatmul.mubr.msk.f32.gmra.mrb[40].mxu1 %vm406_vm3, %v24812_v42  ;;  %v24832_v42 = vld [vmem:[#allocation3 + $0xc2] sm:$0xff] }
 0x98e   : > { %19347 = vmatprep.mubr.msk.f32.mxu1 %vm406_vm3, %v24816_v36  ;;  %25967 = vst [vmem:[#allocation23_spill] sm:$0xff] %v24832_v42  ;;  %v24836_v36 = vld [vmem:[#allocation3 + $0xca] sm:$0xff] }
 0x98f   : > { %25968 = vst [vmem:[#allocation24_spill] sm:$0xff] %v24836_v36 }
 0x991   : > { %19348 = vmatmul.mubr.msk.f32.gmra.mrb[42].mxu1 %vm406_vm3, %v24820_v41  ;;  %v24840_v41 = vld [vmem:[#allocation3 + $0xda] sm:$0xff] }
 0x992   : > { %19350 = vmatprep.mubr.msk.f32.mxu1 %vm406_vm3, %v24824_v37  ;;  %25969 = vst [vmem:[#allocation25_spill] sm:$0xff] %v24840_v41  ;;  %v24844_v37 = vld [vmem:[#allocation3 + $0xe2] sm:$0xff] }
 0x993   : > { %25970 = vst [vmem:[#allocation26_spill] sm:$0xff] %v24844_v37 }
 0x995   : > { %19351 = vmatmul.mubr.msk.f32.gmra.mrb[44].mxu1 %vm406_vm3, %v24828_v7  ;;  %v24848_v7 = vld [vmem:[#allocation3 + $0xf2] sm:$0xff] }
 0x996   : > { %19353 = vmatprep.mubr.msk.f32.mxu1 %vm406_vm3, %v24832_v42  ;;  %25971 = vst [vmem:[#allocation27_spill] sm:$0xff] %v24848_v7  ;;  %v24852_v42 = vld [vmem:[#allocation3 + $0xfa] sm:$0xff] }
 0x997   : > { %25972 = vst [vmem:[#allocation28_spill] sm:$0xff] %v24852_v42 }
 0x999   : > { %19354 = vmatmul.mubr.msk.f32.gmra.mrb[46].mxu1 %vm406_vm3, %v24836_v36  ;;  %v24856_v36 = vld [vmem:[#allocation3 + $0x10a] sm:$0xff] }
 0x99a   : > { %19356 = vmatprep.mubr.msk.f32.mxu1 %vm406_vm3, %v24840_v41  ;;  %25973 = vst [vmem:[#allocation29_spill] sm:$0xff] %v24856_v36  ;;  %v24860_v41 = vld [vmem:[#allocation3 + $0x112] sm:$0xff] }
 0x99b   : > { %25974 = vst [vmem:[#allocation30_spill] sm:$0xff] %v24860_v41 }
 0x99d   : > { %19357 = vmatmul.mubr.msk.f32.gmra.mrb[48].mxu1 %vm406_vm3, %v24844_v37  ;;  %v24864_v37 = vld [vmem:[#allocation3 + $0x122] sm:$0xff] }
 0x99e   : > { %19359 = vmatprep.mubr.msk.f32.mxu1 %vm406_vm3, %v24848_v7  ;;  %25975 = vst [vmem:[#allocation31_spill] sm:$0xff] %v24864_v37  ;;  %v24868_v7 = vld [vmem:[#allocation3 + $0x12a] sm:$0xff] }
 0x99f   : > { %25976 = vst [vmem:[#allocation32_spill] sm:$0xff] %v24868_v7 }
 0x9a1   : > { %19360 = vmatmul.mubr.msk.f32.gmra.mrb[50].mxu1 %vm406_vm3, %v24852_v42  ;;  %v24872_v42 = vld [vmem:[#allocation3 + $0x13a] sm:$0xff] }
 0x9a2   : > { %19362 = vmatprep.mubr.msk.f32.mxu1 %vm406_vm3, %v24856_v36  ;;  %25977 = vst [vmem:[#allocation34_spill] sm:$0xff] %v24872_v42  ;;  %v24876_v36 = vld [vmem:[#allocation3 + $0x142] sm:$0xff] }
 0x9a3   : > { %25978 = vst [vmem:[#allocation36_spill] sm:$0xff] %v24876_v36 }
 0x9a5   : > { %19363 = vmatmul.mubr.msk.f32.gmra.mrb[52].mxu1 %vm406_vm3, %v24860_v41  ;;  %v24880_v41 = vld [vmem:[#allocation3 + $0x152] sm:$0xff] }
 0x9a6   : > { %19365 = vmatprep.mubr.msk.f32.mxu1 %vm406_vm3, %v24864_v37  ;;  %25979 = vst [vmem:[#allocation39_spill] sm:$0xff] %v24880_v41  ;;  %v24884_v37 = vld [vmem:[#allocation3 + $0x15a] sm:$0xff] }
 0x9a7   : > { %25980 = vst [vmem:[#allocation41_spill] sm:$0xff] %v24884_v37 }
 0x9a9   : > { %19366 = vmatmul.mubr.msk.f32.gmra.mrb[54].mxu1 %vm406_vm3, %v24868_v7  ;;  %v24888_v7 = vld [vmem:[#allocation3 + $0x16a] sm:$0xff] }
 0x9aa   : > { %19368 = vmatprep.mubr.msk.f32.mxu1 %vm406_vm3, %v24872_v42  ;;  %25981 = vst [vmem:[#allocation43_spill] sm:$0xff] %v24888_v7  ;;  %v24892_v42 = vld [vmem:[#allocation3 + $0x172] sm:$0xff] }
 0x9ab   : > { %25982 = vst [vmem:[#allocation18_spill] sm:$0xff] %v24892_v42 }
 0x9ad   : > { %19369 = vmatmul.mubr.msk.f32.gmra.mrb[56].mxu1 %vm406_vm3, %v24876_v36  ;;  %v12919_v36 = vld [vmem:[#allocation6 + $0x120] sm:$0xff] }
 0x9ae   : > { %19371 = vmatprep.mubr.msk.f32.mxu1 %vm406_vm3, %v24880_v41  ;;  %v20117_v41 = vpack.c.bf16 %v12918_v23, %v12917_v13  ;;  %v13309_v23 = vld [vmem:[#allocation6 + $0x140] sm:$0xff]  ;;  %v13310_v13 = vld [vmem:[#allocation6 + $0x148] sm:$0xff] }
 0x9b1   : > { %19372 = vmatmul.mubr.msk.f32.gmra.mrb[58].mxu1 %vm406_vm3, %v24884_v37  ;;  %v12921_v37 = vld [vmem:[#allocation6 + $0x130] sm:$0xff] }
 0x9b2   : > { %19374 = vmatprep.mubr.msk.f32.mxu1 %vm406_vm3, %v24888_v7  ;;  %v20121_v7 = vpack.c.bf16 %v12920_v56, %v12919_v36  ;;  %v25989_v56 = vld [vmem:[#allocation42_spill] sm:$0xff] }
 0x9b3   : > { %v25028_v36 = vld [vmem:[#allocation3 + $0x189] sm:$0xff] }
 0x9b5   : > { %19375 = vmatmul.mubr.msk.f32.gmra.mrb[60].mxu1 %vm406_vm3, %v24892_v42 }
 0x9b6   : > { %19393 = vmatprep.mubr.msk.f32.mxu1 %vm406_vm3, %v24476_v25  ;;  %v20125_v25 = vpack.c.bf16 %v12922_v59, %v12921_v37  ;;  %v25990_v59 = vld [vmem:[#allocation10_spill] sm:$0xff]  ;;  %v13706_v37 = vld [vmem:[#allocation6 + $0x198] sm:$0xff] }
 0x9b9   : > { %19394 = vmatmul.mubr.msk.f32.vlgmr.msra.gmra.mrb[62].mxu1 %vm406_vm3, %v24478_v52  ;;  %v20129_v52 = vpack.c.bf16 %v13310_v13, %v13309_v23  ;;  %v13707_v23 = vld [vmem:[#allocation6 + $0x1a0] sm:$0xff]  ;;  %v13708_v13 = vld [vmem:[#allocation6 + $0x1a8] sm:$0xff] }
 0x9ba   : > { %20116 = vmatpush3.bf16.msra.mxu1 %v20113_v9  ;;  %19396 = vmatprep.mubr.msk.f32.mxu1 %vm406_vm3, %v24488_v29  ;;  %v24956_v29 = vld [vmem:[#allocation3 + $0x180] sm:$0xff]  ;;  %v25991_v9 = vld [vmem:[#allocation11_spill] sm:$0xff] }
 0x9bb   : > { %20118 = vmatprep.subr.bf16.mxu1 %v20117_v41 }
 0x9bd   : > { %19397 = vmatmul.mubr.msk.f32.gmra.mrb[32].mxu1 %vm406_vm3, %v24490_v30  ;;  %v24960_v30 = vld [vmem:[#allocation3 + $0x188] sm:$0xff] }
 0x9be   : > { %19399 = vmatprep.mubr.msk.f32.mxu1 %vm406_vm3, %v24500_v44  ;;  %20120 = vmatpush3.bf16.msra.mxu1 %v20117_v41  ;;  %v13311_v44 = vld [vmem:[#allocation6 + $0x150] sm:$0xff] }
 0x9bf   : > { %20122 = vmatprep.subr.bf16.mxu1 %v20121_v7  ;;  %v13705_v41 = vld [vmem:[#allocation6 + $0x190] sm:$0xff] }
 0x9c1   : > { %19400 = vmatmul.mubr.msk.f32.gmra.mrb[34].mxu1 %vm406_vm3, %v24502_v53  ;;  %v13312_v53 = vld [vmem:[#allocation6 + $0x158] sm:$0xff] }
 0x9c2   : > { %19402 = vmatprep.mubr.msk.f32.mxu1 %vm406_vm3, %v24512_v3  ;;  %20124 = vmatpush3.bf16.msra.mxu1 %v20121_v7  ;;  %v20133_v3 = vpack.c.bf16 %v13312_v53, %v13311_v44  ;;  %v25024_v7 = vld [vmem:[#allocation3 + $0x181] sm:$0xff]  ;;  %v20153_v44 = vpack.c.bf16 %v13708_v13, %v13707_v23  ;;  %v26002_v23 = vld [vmem:[#allocation22_spill] sm:$0xff]  ;;  %v26003_v13 = vld [vmem:[#allocation23_spill] sm:$0xff] }
 0x9c3   : > { %20126 = vmatprep.subr.bf16.mxu1 %v20125_v25  ;;  %v13709_v53 = vld [vmem:[#allocation6 + $0x1b0] sm:$0xff] }
 0x9c5   : > { %19403 = vmatmul.mubr.msk.f32.gmra.mrb[36].mxu1 %vm406_vm3, %v24514_v5  ;;  %v13313_v5 = vld [vmem:[#allocation6 + $0x160] sm:$0xff] }
 0x9c6   : > { %19405 = vmatprep.mubr.msk.f32.mxu1 %vm406_vm3, %v24526_v31  ;;  %20128 = vmatpush3.bf16.msra.mxu1 %v20125_v25  ;;  %v13314_v31 = vld [vmem:[#allocation6 + $0x168] sm:$0xff]  ;;  %v20149_v25 = vpack.c.bf16 %v13706_v37, %v13705_v41  ;;  %v25999_v41 = vld [vmem:[#allocation45_spill] sm:$0xff]  ;;  %v26000_v37 = vld [vmem:[#allocation20_spill] sm:$0xff] }
 0x9c7   : > { %20130 = vmatprep.subr.bf16.mxu1 %v20129_v52 }
 0x9c9   : > { %19406 = vmatmul.mubr.msk.f32.gmra.mrb[38].mxu1 %vm406_vm3, %v24528_v61  ;;  %v20137_v61 = vpack.c.bf16 %v13314_v31, %v13313_v5  ;;  %v25993_v5 = vld [vmem:[#allocation13_spill] sm:$0xff]  ;;  %v14097_v31 = vld [vmem:[#allocation6 + $0x1c0] sm:$0xff] }
 0x9ca   : > { %19408 = vmatprep.mubr.msk.f32.mxu1 %vm406_vm3, %v24539_v12  ;;  %v13315_v12 = vld [vmem:[#allocation6 + $0x170] sm:$0xff] }
 0x9cd   : > { %19409 = vmatmul.mubr.msk.f32.gmra.mrb[40].mxu1 %vm406_vm3, %v24541_v16  ;;  %v13316_v16 = vld [vmem:[#allocation6 + $0x178] sm:$0xff] }
 0x9ce   : > { %19411 = vmatprep.mubr.msk.f32.mxu1 %vm406_vm3, %v24551_v14  ;;  %v20141_v14 = vpack.c.bf16 %v13316_v16, %v13315_v12  ;;  %v25994_v12 = vld [vmem:[#allocation14_spill] sm:$0xff]  ;;  %v25995_v16 = vld [vmem:[#allocation15_spill] sm:$0xff] }
 0x9d1   : > { %19412 = vmatmul.mubr.msk.f32.gmra.mrb[42].mxu1 %vm406_vm3, %v24553_v62  ;;  %v13703_v62 = vld [vmem:[#allocation6 + $0x180] sm:$0xff] }
 0x9d2   : > { %19414 = vmatprep.mubr.msk.f32.mxu1 %vm406_vm3, %v24563_v39  ;;  %v13704_v39 = vld [vmem:[#allocation6 + $0x188] sm:$0xff] }
 0x9d5   : > { %19415 = vmatmul.mubr.msk.f32.gmra.mrb[44].mxu1 %vm406_vm3, %v24565_v58  ;;  %v20145_v58 = vpack.c.bf16 %v13704_v39, %v13703_v62  ;;  %v25996_v62 = vld [vmem:[#allocation16_spill] sm:$0xff]  ;;  %v25997_v39 = vld [vmem:[#allocation17_spill] sm:$0xff] }
 0x9d6   : > { %19417 = vmatprep.mubr.msk.f32.mxu1 %vm406_vm3, %v24575_v27  ;;  %v25983_v27 = vld [vmem:[#allocation19_spill] sm:$0xff] }
 0x9d9   : > { %19418 = vmatmul.mubr.msk.f32.gmra.mrb[46].mxu1 %vm406_vm3, %v24577_v32  ;;  %v25984_v32 = vld [vmem:[#allocation33_spill] sm:$0xff] }
 0x9da   : > { %19420 = vmatprep.mubr.msk.f32.mxu1 %vm406_vm3, %v24587_v0  ;;  %v25985_v0 = vld [vmem:[#allocation35_spill] sm:$0xff] }
 0x9dd   : > { %19421 = vmatmul.mubr.msk.f32.gmra.mrb[48].mxu1 %vm406_vm3, %v24589_v19  ;;  %v25986_v19 = vld [vmem:[#allocation37_spill] sm:$0xff] }
 0x9de   : > { %19423 = vmatprep.mubr.msk.f32.mxu1 %vm406_vm3, %v24599_v26 }
 0x9e1   : > { %19424 = vmatmul.mubr.msk.f32.gmra.mrb[50].mxu1 %vm406_vm3, %v24601_v20 }
 0x9e2   : > { %19426 = vmatprep.mubr.msk.f32.mxu1 %vm406_vm3, %v24611_v4 }
 0x9e5   : > { %19427 = vmatmul.mubr.msk.f32.gmra.mrb[52].mxu1 %vm406_vm3, %v24613_v22 }
 0x9e6   : > { %19429 = vmatprep.mubr.msk.f32.mxu1 %vm406_vm3, %v24623_v51 }
 0x9e9   : > { %19430 = vmatmul.mubr.msk.f32.gmra.mrb[54].mxu1 %vm406_vm3, %v24625_v11 }
 0x9ea   : > { %19432 = vmatprep.mubr.msk.f32.mxu1 %vm406_vm3, %v24634_v46 }
 0x9ed   : > { %19433 = vmatmul.mubr.msk.f32.gmra.mrb[56].mxu1 %vm406_vm3, %v24636_v50 }
 0x9ee   : > { %19435 = vmatprep.mubr.msk.f32.mxu1 %vm406_vm3, %v24643_v21 }
 0x9f1   : > { %19436 = vmatmul.mubr.msk.f32.gmra.mrb[58].mxu1 %vm406_vm3, %v24645_v10 }
 0x9f2   : > { %19438 = vmatprep.mubr.msk.f32.mxu1 %vm406_vm3, %v24956_v29 }
 0x9f5   : > { %19439 = vmatmul.mubr.msk.f32.gmra.mrb[60].mxu1 %vm406_vm3, %v24960_v30 }
 0x9f6   : > { %19457 = vmatprep.mubr.msk.f32.mxu1 %vm406_vm3, %v24653_v1  ;;  %v25987_v1 = vld [vmem:[#allocation38_spill] sm:$0xff] }
 0x9f9   : > { %19458 = vmatmul.mubr.msk.f32.vlgmr.msra.gmra.mrb[62].mxu1 %vm406_vm3, %v24658_v28  ;;  %v25988_v28 = vld [vmem:[#allocation40_spill] sm:$0xff] }
 0x9fa   : > { %20132 = vmatpush3.bf16.msra.mxu1 %v20129_v52  ;;  %19460 = vmatprep.mubr.msk.f32.mxu1 %vm406_vm3, %v24662_v34  ;;  %v25992_v52 = vld [vmem:[#allocation12_spill] sm:$0xff] }
 0x9fb   : > { %20134 = vmatprep.subr.bf16.mxu1 %v20133_v3 }
 0x9fd   : > { %19461 = vmatmul.mubr.msk.f32.gmra.mrb[32].mxu1 %vm406_vm3, %v24666_v38 }
 0x9fe   : > { %19463 = vmatprep.mubr.msk.f32.mxu1 %vm406_vm3, %v24670_v35  ;;  %20136 = vmatpush3.bf16.msra.mxu1 %v20133_v3  ;;  %v13710_v3 = vld [vmem:[#allocation6 + $0x1b8] sm:$0xff] }
 0x9ff   : > { %20138 = vmatprep.subr.bf16.mxu1 %v20137_v61 }
 0xa01   : > { %19464 = vmatmul.mubr.msk.f32.gmra.mrb[34].mxu1 %vm406_vm3, %v24674_v33 }
 0xa02   : > { %19466 = vmatprep.mubr.msk.f32.mxu1 %vm406_vm3, %v24678_v57  ;;  %20140 = vmatpush3.bf16.msra.mxu1 %v20137_v61  ;;  %v14098_v61 = vld [vmem:[#allocation6 + $0x1c8] sm:$0xff] }
 0xa03   : > { %20142 = vmatprep.subr.bf16.mxu1 %v20141_v14 }
 0xa05   : > { %19467 = vmatmul.mubr.msk.f32.gmra.mrb[36].mxu1 %vm406_vm3, %v24682_v2 }
 0xa06   : > { %19469 = vmatprep.mubr.msk.f32.mxu1 %vm406_vm3, %v24686_v24  ;;  %20144 = vmatpush3.bf16.msra.mxu1 %v20141_v14  ;;  %v20161_v14 = vpack.c.bf16 %v14098_v61, %v14097_v31  ;;  %v26009_v31 = vld [vmem:[#allocation29_spill] sm:$0xff]  ;;  %v26010_v61 = vld [vmem:[#allocation30_spill] sm:$0xff] }
 0xa07   : > { %20146 = vmatprep.subr.bf16.mxu1 %v20145_v58 }
 0xa09   : > { %19470 = vmatmul.mubr.msk.f32.gmra.mrb[38].mxu1 %vm406_vm3, %v24690_v40 }
 0xa0a   : > { %19472 = vmatprep.mubr.msk.f32.mxu1 %vm406_vm3, %v24694_v15 }
 0xa0d   : > { %19473 = vmatmul.mubr.msk.f32.gmra.mrb[40].mxu1 %vm406_vm3, %v24698_v8 }
 0xa0e   : > { %19475 = vmatprep.mubr.msk.f32.mxu1 %vm406_vm3, %v24702_v49 }
 0xa11   : > { %19476 = vmatmul.mubr.msk.f32.gmra.mrb[42].mxu1 %vm406_vm3, %v24706_v17 }
 0xa12   : > { %19478 = vmatprep.mubr.msk.f32.mxu1 %vm406_vm3, %v24710_v47 }
 0xa15   : > { %19479 = vmatmul.mubr.msk.f32.gmra.mrb[44].mxu1 %vm406_vm3, %v24714_v54 }
 0xa16   : > { %19481 = vmatprep.mubr.msk.f32.mxu1 %vm406_vm3, %v24718_v45 }
 0xa19   : > { %19482 = vmatmul.mubr.msk.f32.gmra.mrb[46].mxu1 %vm406_vm3, %v24722_v43 }
 0xa1a   : > { %19484 = vmatprep.mubr.msk.f32.mxu1 %vm406_vm3, %v24726_v6 }
 0xa1d   : > { %19485 = vmatmul.mubr.msk.f32.gmra.mrb[48].mxu1 %vm406_vm3, %v24730_v63 }
 0xa1e   : > { %19487 = vmatprep.mubr.msk.f32.mxu1 %vm406_vm3, %v24734_v48 }
 0xa21   : > { %19488 = vmatmul.mubr.msk.f32.gmra.mrb[50].mxu1 %vm406_vm3, %v25983_v27 }
 0xa22   : > { %19490 = vmatprep.mubr.msk.f32.mxu1 %vm406_vm3, %v25984_v32 }
 0xa25   : > { %19491 = vmatmul.mubr.msk.f32.gmra.mrb[52].mxu1 %vm406_vm3, %v25985_v0 }
 0xa26   : > { %19493 = vmatprep.mubr.msk.f32.mxu1 %vm406_vm3, %v25986_v19 }
 0xa29   : > { %19494 = vmatmul.mubr.msk.f32.gmra.mrb[54].mxu1 %vm406_vm3, %v25987_v1 }
 0xa2a   : > { %19496 = vmatprep.mubr.msk.f32.mxu1 %vm406_vm3, %v25988_v28 }
 0xa2d   : > { %19497 = vmatmul.mubr.msk.f32.gmra.mrb[56].mxu1 %vm406_vm3, %v25989_v56 }
 0xa2e   : > { %19499 = vmatprep.mubr.msk.f32.mxu1 %vm406_vm3, %v25990_v59 }
 0xa31   : > { %19500 = vmatmul.mubr.msk.f32.gmra.mrb[58].mxu1 %vm406_vm3, %v25991_v9 }
 0xa32   : > { %19502 = vmatprep.mubr.msk.f32.mxu1 %vm406_vm3, %v25024_v7 }
 0xa35   : > { %19503 = vmatmul.mubr.msk.f32.gmra.mrb[60].mxu1 %vm406_vm3, %v25028_v36 }
 0xa36   : > { %19521 = vmatprep.mubr.msk.f32.mxu1 %vm406_vm3, %v24776_v60  ;;  %v20157_v60 = vpack.c.bf16 %v13710_v3, %v13709_v53  ;;  %v26006_v53 = vld [vmem:[#allocation26_spill] sm:$0xff]  ;;  %v26007_v3 = vld [vmem:[#allocation27_spill] sm:$0xff] }
 0xa39   : > { %19522 = vmatmul.mubr.msk.f32.vlgmr.msra.gmra.mrb[62].mxu1 %vm406_vm3, %v25992_v52  ;;  %v26004_v52 = vld [vmem:[#allocation24_spill] sm:$0xff] }
 0xa3a   : > { %20148 = vmatpush3.bf16.msra.mxu1 %v20145_v58  ;;  %19524 = vmatprep.mubr.msk.f32.mxu1 %vm406_vm3, %v24784_v18  ;;  %v25998_v58 = vld [vmem:[#allocation44_spill] sm:$0xff] }
 0xa3b   : > { %20150 = vmatprep.subr.bf16.mxu1 %v20149_v25 }
 0xa3d   : > { %19525 = vmatmul.mubr.msk.f32.gmra.mrb[32].mxu1 %vm406_vm3, %v24788_v55 }
 0xa3e   : > { %19527 = vmatprep.mubr.msk.f32.mxu1 %vm406_vm3, %v25993_v5  ;;  %20152 = vmatpush3.bf16.msra.mxu1 %v20149_v25  ;;  %v26001_v25 = vld [vmem:[#allocation21_spill] sm:$0xff] }
 0xa3f   : > { %20154 = vmatprep.subr.bf16.mxu1 %v20153_v44 }
 0xa41   : > { %19528 = vmatmul.mubr.msk.f32.gmra.mrb[34].mxu1 %vm406_vm3, %v25994_v12 }
 0xa42   : > { %19530 = vmatprep.mubr.msk.f32.mxu1 %vm406_vm3, %v25995_v16  ;;  %20156 = vmatpush3.bf16.msra.mxu1 %v20153_v44  ;;  %v26005_v44 = vld [vmem:[#allocation25_spill] sm:$0xff] }
 0xa43   : > { %20158 = vmatprep.subr.bf16.mxu1 %v20157_v60 }
 0xa45   : > { %19531 = vmatmul.mubr.msk.f32.gmra.mrb[36].mxu1 %vm406_vm3, %v25996_v62 }
 0xa46   : > { %19533 = vmatprep.mubr.msk.f32.mxu1 %vm406_vm3, %v25997_v39  ;;  %20160 = vmatpush3.bf16.msra.mxu1 %v20157_v60  ;;  %v26008_v60 = vld [vmem:[#allocation28_spill] sm:$0xff] }
 0xa47   : > { %20162 = vmatprep.subr.bf16.mxu1 %v20161_v14 }
 0xa49   : > { %19534 = vmatmul.mubr.msk.f32.gmra.mrb[38].mxu1 %vm406_vm3, %v25998_v58 }
 0xa4a   : > { %19536 = vmatprep.mubr.msk.f32.mxu1 %vm406_vm3, %v25999_v41  ;;  %v14103_v41 = vld [vmem:[#allocation6 + $0x1f0] sm:$0xff] }
 0xa4d   : > { %19537 = vmatmul.mubr.msk.f32.gmra.mrb[40].mxu1 %vm406_vm3, %v26000_v37  ;;  %v13673_v37 = vld [vmem:[#allocation3 + $0x50] sm:$0xff] }
 0xa4e   : > { %19539 = vmatprep.mubr.msk.f32.mxu1 %vm406_vm3, %v26001_v25  ;;  %v13672_v25 = vld [vmem:[#allocation3 + $0x48] sm:$0xff] }
 0xa51   : > { %19540 = vmatmul.mubr.msk.f32.gmra.mrb[42].mxu1 %vm406_vm3, %v26002_v23  ;;  %v14101_v23 = vld [vmem:[#allocation6 + $0x1e0] sm:$0xff] }
 0xa52   : > { %19542 = vmatprep.mubr.msk.f32.mxu1 %vm406_vm3, %v26003_v13  ;;  %v26011_v13 = vld [vmem:[#allocation31_spill] sm:$0xff] }
 0xa55   : > { %19543 = vmatmul.mubr.msk.f32.gmra.mrb[44].mxu1 %vm406_vm3, %v26004_v52  ;;  %v26012_v52 = vld [vmem:[#allocation32_spill] sm:$0xff] }
 0xa56   : > { %19545 = vmatprep.mubr.msk.f32.mxu1 %vm406_vm3, %v26005_v44  ;;  %v26013_v44 = vld [vmem:[#allocation34_spill] sm:$0xff] }
 0xa59   : > { %19546 = vmatmul.mubr.msk.f32.gmra.mrb[46].mxu1 %vm406_vm3, %v26006_v53  ;;  %v26014_v53 = vld [vmem:[#allocation36_spill] sm:$0xff] }
 0xa5a   : > { %19548 = vmatprep.mubr.msk.f32.mxu1 %vm406_vm3, %v26007_v3  ;;  %v26015_v3 = vld [vmem:[#allocation39_spill] sm:$0xff] }
 0xa5d   : > { %19549 = vmatmul.mubr.msk.f32.gmra.mrb[48].mxu1 %vm406_vm3, %v26008_v60  ;;  %v26016_v60 = vld [vmem:[#allocation41_spill] sm:$0xff] }
 0xa5e   : > { %19551 = vmatprep.mubr.msk.f32.mxu1 %vm406_vm3, %v26009_v31  ;;  %v26017_v31 = vld [vmem:[#allocation43_spill] sm:$0xff] }
 0xa61   : > { %19552 = vmatmul.mubr.msk.f32.gmra.mrb[50].mxu1 %vm406_vm3, %v26010_v61  ;;  %v13671_v61 = vld [vmem:[#allocation3 + $0x38] sm:$0xff] }
 0xa62   : > { %19554 = vmatprep.mubr.msk.f32.mxu1 %vm406_vm3, %v26011_v13  ;;  %v25092_v13 = vld [vmem:[#allocation3 + $0x182] sm:$0xff] }
 0xa63   : > { %26018 = vst [vmem:[#allocation19_spill] sm:$0xff] %v25092_v13 }
 0xa65   : > { %19555 = vmatmul.mubr.msk.f32.gmra.mrb[52].mxu1 %vm406_vm3, %v26012_v52  ;;  %v14100_v52 = vld [vmem:[#allocation6 + $0x1d8] sm:$0xff] }
 0xa66   : > { %19557 = vmatprep.mubr.msk.f32.mxu1 %vm406_vm3, %v26013_v44  ;;  %v25096_v44 = vld [vmem:[#allocation3 + $0x18a] sm:$0xff] }
 0xa67   : > { %26019 = vst [vmem:[#allocation33_spill] sm:$0xff] %v25096_v44 }
 0xa69   : > { %19558 = vmatmul.mubr.msk.f32.gmra.mrb[54].mxu1 %vm406_vm3, %v26014_v53  ;;  %v14099_v53 = vld [vmem:[#allocation6 + $0x1d0] sm:$0xff] }
 0xa6a   : > { %19560 = vmatprep.mubr.msk.f32.mxu1 %vm406_vm3, %v26015_v3  ;;  %v13670_v3 = vld [vmem:[#allocation3 + $0x30] sm:$0xff] }
 0xa6d   : > { %19561 = vmatmul.mubr.msk.f32.gmra.mrb[56].mxu1 %vm406_vm3, %v26016_v60  ;;  %v11307_v60 = vld [vmem:[#allocation3] sm:$0xff] }
 0xa6e   : > { %19563 = vmatprep.mubr.msk.f32.mxu1 %vm406_vm3, %v26017_v31  ;;  %19201 = vmatprep.mubr.msk.f32.mxu0 %vm406_vm3, %v11307_v60  ;;  %v11308_v31 = vld [vmem:[#allocation3 + $0x8] sm:$0xff]  ;;  %v13674_v60 = vld [vmem:[#allocation3 + $0x60] sm:$0xff] }
 0xa6f   : > { %19202 = vmatmul.mubr.msk.f32.vlgmr.msra.gmra.mrb[64].mxu0 %vm406_vm3, %v11308_v31  ;;  %v14491_v31 = vld [vmem:[#allocation6 + $0x200] sm:$0xff] }
 0xa71   : > { %19564 = vmatmul.mubr.msk.f32.gmra.mrb[58].mxu1 %vm406_vm3, %v24892_v42  ;;  %v20165_v42 = vpack.c.bf16 %v14100_v52, %v14099_v53  ;;  %v13675_v53 = vld [vmem:[#allocation3 + $0x68] sm:$0xff] }
 0xa72   : > { %19566 = vmatprep.mubr.msk.f32.mxu1 %vm406_vm3, %v25092_v13  ;;  %v14102_v13 = vld [vmem:[#allocation6 + $0x1e8] sm:$0xff] }
 0xa75   : > { %19567 = vmatmul.mubr.msk.f32.gmra.mrb[60].mxu1 %vm406_vm3, %v25096_v44  ;;  %v20169_v44 = vpack.c.bf16 %v14102_v13, %v14101_v23  ;;  %v13677_v23 = vld [vmem:[#allocation3 + $0x80] sm:$0xff]  ;;  %v13681_v13 = vld [vmem:[#allocation3 + $0xb0] sm:$0xff] }
 0xa76   : > { %19585 = vmatprep.mubr.msk.f32.mxu1 %vm406_vm3, %v13670_v3  ;;  %v14104_v3 = vld [vmem:[#allocation6 + $0x1f8] sm:$0xff] }
 0xa77   : > { %v20173_v52 = vpack.c.bf16 %v14104_v3, %v14103_v41  ;;  %v13680_v41 = vld [vmem:[#allocation3 + $0xa8] sm:$0xff] }
 0xa78   : > { %v13683_v3 = vld [vmem:[#allocation3 + $0xc8] sm:$0xff] }
 0xa79   : > { %19586 = vmatmul.mubr.msk.f32.vlgmr.msra.gmra.mrb[62].mxu1 %vm406_vm3, %v13671_v61  ;;  %v14492_v61 = vld [vmem:[#allocation6 + $0x208] sm:$0xff] }
 0xa7a   : > { %20164 = vmatpush3.bf16.msra.mxu1 %v20161_v14  ;;  %19588 = vmatprep.mubr.msk.f32.mxu1 %vm406_vm3, %v13672_v25  ;;  %v13676_v14 = vld [vmem:[#allocation3 + $0x78] sm:$0xff]  ;;  %v20177_v25 = vpack.c.bf16 %v14492_v61, %v14491_v31 }
 0xa7b   : > { %20166 = vmatprep.subr.bf16.mxu1 %v20165_v42  ;;  %v13687_v31 = vld [vmem:[#allocation3 + $0xf8] sm:$0xff] }
 0xa7d   : > { %19589 = vmatmul.mubr.msk.f32.gmra.mrb[32].mxu1 %vm406_vm3, %v13673_v37  ;;  %v13678_v37 = vld [vmem:[#allocation3 + $0x90] sm:$0xff] }
 0xa7e   : > { %19591 = vmatprep.mubr.msk.f32.mxu1 %vm406_vm3, %v13674_v60  ;;  %20168 = vmatpush3.bf16.msra.mxu1 %v20165_v42  ;;  %v13679_v42 = vld [vmem:[#allocation3 + $0x98] sm:$0xff] }
 0xa7f   : > { %20170 = vmatprep.subr.bf16.mxu1 %v20169_v44  ;;  %v13684_v60 = vld [vmem:[#allocation3 + $0xd8] sm:$0xff] }
 0xa81   : > { %19592 = vmatmul.mubr.msk.f32.gmra.mrb[34].mxu1 %vm406_vm3, %v13675_v53  ;;  %v13686_v53 = vld [vmem:[#allocation3 + $0xf0] sm:$0xff] }
 0xa82   : > { %19594 = vmatprep.mubr.msk.f32.mxu1 %vm406_vm3, %v13676_v14  ;;  %20172 = vmatpush3.bf16.msra.mxu1 %v20169_v44  ;;  %v13682_v44 = vld [vmem:[#allocation3 + $0xc0] sm:$0xff] }
 0xa83   : > { %20174 = vmatprep.subr.bf16.mxu1 %v20173_v52 }
 0xa85   : > { %19595 = vmatmul.mubr.msk.f32.gmra.mrb[36].mxu1 %vm406_vm3, %v13677_v23 }
 0xa86   : > { %19597 = vmatprep.mubr.msk.f32.mxu1 %vm406_vm3, %v13678_v37  ;;  %20176 = vmatpush3.bf16.msra.mxu1 %v20173_v52  ;;  %v13685_v52 = vld [vmem:[#allocation3 + $0xe0] sm:$0xff] }
 0xa87   : > { %20178 = vmatprep.subr.bf16.mxu1 %v20177_v25 }
 0xa89   : > { %19598 = vmatmul.mubr.msk.f32.gmra.mrb[38].mxu1 %vm406_vm3, %v13679_v42 }
 0xa8a   : > { %19600 = vmatprep.mubr.msk.f32.mxu1 %vm406_vm3, %v13680_v41 }
 0xa8d   : > { %19601 = vmatmul.mubr.msk.f32.gmra.mrb[40].mxu1 %vm406_vm3, %v13681_v13 }
 0xa8e   : > { %19603 = vmatprep.mubr.msk.f32.mxu1 %vm406_vm3, %v13682_v44 }
 0xa91   : > { %19604 = vmatmul.mubr.msk.f32.gmra.mrb[42].mxu1 %vm406_vm3, %v13683_v3 }
 0xa92   : > { %19606 = vmatprep.mubr.msk.f32.mxu1 %vm406_vm3, %v13684_v60 }
 0xa95   : > { %19607 = vmatmul.mubr.msk.f32.gmra.mrb[44].mxu1 %vm406_vm3, %v13685_v52 }
 0xa96   : > { %19609 = vmatprep.mubr.msk.f32.mxu1 %vm406_vm3, %v13686_v53 }
 0xa99   : > { %19610 = vmatmul.mubr.msk.f32.gmra.mrb[46].mxu1 %vm406_vm3, %v13687_v31 }
 0xa9a   : > { %19612 = vmatprep.mubr.msk.f32.mxu1 %vm406_vm3, %v24599_v26  ;;  %v13700_v26 = vld [vmem:[#allocation3 + $0x198] sm:$0xff] }
 0xa9d   : > { %19613 = vmatmul.mubr.msk.f32.gmra.mrb[48].mxu1 %vm406_vm3, %v24601_v20  ;;  %v13701_v20 = vld [vmem:[#allocation3 + $0x1a0] sm:$0xff] }
 0xa9e   : > { %19615 = vmatprep.mubr.msk.f32.mxu1 %vm406_vm3, %v24611_v4  ;;  %v14493_v4 = vld [vmem:[#allocation6 + $0x210] sm:$0xff] }
 0xaa1   : > { %19616 = vmatmul.mubr.msk.f32.gmra.mrb[50].mxu1 %vm406_vm3, %v24613_v22  ;;  %v14494_v22 = vld [vmem:[#allocation6 + $0x218] sm:$0xff] }
 0xaa2   : > { %19618 = vmatprep.mubr.msk.f32.mxu1 %vm406_vm3, %v24623_v51  ;;  %v20181_v51 = vpack.c.bf16 %v14494_v22, %v14493_v4 }
 0xaa5   : > { %19619 = vmatmul.mubr.msk.f32.gmra.mrb[52].mxu1 %vm406_vm3, %v24625_v11  ;;  %v14495_v11 = vld [vmem:[#allocation6 + $0x220] sm:$0xff] }
 0xaa6   : > { %19621 = vmatprep.mubr.msk.f32.mxu1 %vm406_vm3, %v24634_v46  ;;  %v14496_v46 = vld [vmem:[#allocation6 + $0x228] sm:$0xff] }
 0xaa9   : > { %19622 = vmatmul.mubr.msk.f32.gmra.mrb[54].mxu1 %vm406_vm3, %v24636_v50  ;;  %v20185_v50 = vpack.c.bf16 %v14496_v46, %v14495_v11 }
 0xaaa   : > { %19624 = vmatprep.mubr.msk.f32.mxu1 %vm406_vm3, %v24643_v21  ;;  %v14497_v21 = vld [vmem:[#allocation6 + $0x230] sm:$0xff] }
 0xaad   : > { %19625 = vmatmul.mubr.msk.f32.gmra.mrb[56].mxu1 %vm406_vm3, %v24645_v10  ;;  %v14498_v10 = vld [vmem:[#allocation6 + $0x238] sm:$0xff] }
 0xaae   : > { %19627 = vmatprep.mubr.msk.f32.mxu1 %vm406_vm3, %v24956_v29  ;;  %v26038_v29 = vld [vmem:[#allocation43_spill] sm:$0xff] }
 0xab1   : > { %19628 = vmatmul.mubr.msk.f32.gmra.mrb[58].mxu1 %vm406_vm3, %v24960_v30  ;;  %v26039_v30 = vld [vmem:[#allocation18_spill] sm:$0xff] }
 0xab2   : > { %19630 = vmatprep.mubr.msk.f32.mxu1 %vm406_vm3, %v13700_v26 }
 0xab5   : > { %19631 = vmatmul.mubr.msk.f32.gmra.mrb[60].mxu1 %vm406_vm3, %v13701_v20 }
 0xab6   : > { %19649 = vmatprep.mubr.msk.f32.mxu1 %vm406_vm3, %v24662_v34  ;;  %v20189_v34 = vpack.c.bf16 %v14498_v10, %v14497_v21 }
 0xab9   : > { %19650 = vmatmul.mubr.msk.f32.vlgmr.msra.gmra.mrb[62].mxu1 %vm406_vm3, %v24666_v38  ;;  %v14094_v38 = vld [vmem:[#allocation3 + $0x199] sm:$0xff] }
 0xaba   : > { %20180 = vmatpush3.bf16.msra.mxu1 %v20177_v25  ;;  %19652 = vmatprep.mubr.msk.f32.mxu1 %vm406_vm3, %v24670_v35  ;;  %v14095_v35 = vld [vmem:[#allocation3 + $0x1a1] sm:$0xff] }
 0xabb   : > { %20182 = vmatprep.subr.bf16.mxu1 %v20181_v51 }
 0xabd   : > { %19653 = vmatmul.mubr.msk.f32.gmra.mrb[32].mxu1 %vm406_vm3, %v24674_v33  ;;  %v26020_v33 = vld [vmem:[#allocation45_spill] sm:$0xff] }
 0xabe   : > { %19655 = vmatprep.mubr.msk.f32.mxu1 %vm406_vm3, %v24678_v57  ;;  %20184 = vmatpush3.bf16.msra.mxu1 %v20181_v51  ;;  %v26021_v57 = vld [vmem:[#allocation20_spill] sm:$0xff] }
 0xabf   : > { %20186 = vmatprep.subr.bf16.mxu1 %v20185_v50 }
 0xac1   : > { %19656 = vmatmul.mubr.msk.f32.gmra.mrb[34].mxu1 %vm406_vm3, %v24682_v2  ;;  %v26022_v2 = vld [vmem:[#allocation21_spill] sm:$0xff] }
 0xac2   : > { %19658 = vmatprep.mubr.msk.f32.mxu1 %vm406_vm3, %v24686_v24  ;;  %20188 = vmatpush3.bf16.msra.mxu1 %v20185_v50  ;;  %v26023_v24 = vld [vmem:[#allocation22_spill] sm:$0xff] }
 0xac3   : > { %20190 = vmatprep.subr.bf16.mxu1 %v20189_v34 }
 0xac5   : > { %19659 = vmatmul.mubr.msk.f32.gmra.mrb[36].mxu1 %vm406_vm3, %v24690_v40  ;;  %v26024_v40 = vld [vmem:[#allocation23_spill] sm:$0xff] }
 0xac6   : > { %19661 = vmatprep.mubr.msk.f32.mxu1 %vm406_vm3, %v24694_v15  ;;  %20192 = vmatpush3.bf16.msra.mxu1 %v20189_v34  ;;  %v26025_v15 = vld [vmem:[#allocation24_spill] sm:$0xff] }
 0xac9   : > { %19662 = vmatmul.mubr.msk.f32.gmra.mrb[38].mxu1 %vm406_vm3, %v24698_v8  ;;  %v26026_v8 = vld [vmem:[#allocation25_spill] sm:$0xff] }
 0xaca   : > { %19664 = vmatprep.mubr.msk.f32.mxu1 %vm406_vm3, %v24702_v49  ;;  %v26027_v49 = vld [vmem:[#allocation26_spill] sm:$0xff] }
 0xacd   : > { %19665 = vmatmul.mubr.msk.f32.gmra.mrb[40].mxu1 %vm406_vm3, %v24706_v17  ;;  %v26028_v17 = vld [vmem:[#allocation27_spill] sm:$0xff] }
 0xace   : > { %19667 = vmatprep.mubr.msk.f32.mxu1 %vm406_vm3, %v24710_v47  ;;  %v26029_v47 = vld [vmem:[#allocation28_spill] sm:$0xff] }
 0xad1   : > { %19668 = vmatmul.mubr.msk.f32.gmra.mrb[42].mxu1 %vm406_vm3, %v24714_v54  ;;  %v26030_v54 = vld [vmem:[#allocation29_spill] sm:$0xff] }
 0xad2   : > { %19670 = vmatprep.mubr.msk.f32.mxu1 %vm406_vm3, %v24718_v45  ;;  %v26031_v45 = vld [vmem:[#allocation30_spill] sm:$0xff] }
 0xad5   : > { %19671 = vmatmul.mubr.msk.f32.gmra.mrb[44].mxu1 %vm406_vm3, %v24722_v43  ;;  %v26032_v43 = vld [vmem:[#allocation31_spill] sm:$0xff] }
 0xad6   : > { %19673 = vmatprep.mubr.msk.f32.mxu1 %vm406_vm3, %v24726_v6  ;;  %v26033_v6 = vld [vmem:[#allocation32_spill] sm:$0xff] }
 0xad9   : > { %19674 = vmatmul.mubr.msk.f32.gmra.mrb[46].mxu1 %vm406_vm3, %v24730_v63  ;;  %v26034_v63 = vld [vmem:[#allocation34_spill] sm:$0xff] }
 0xada   : > { %19676 = vmatprep.mubr.msk.f32.mxu1 %vm406_vm3, %v24734_v48  ;;  %v26035_v48 = vld [vmem:[#allocation36_spill] sm:$0xff] }
 0xadd   : > { %19677 = vmatmul.mubr.msk.f32.gmra.mrb[48].mxu1 %vm406_vm3, %v25983_v27  ;;  %v26040_v27 = vld [vmem:[#allocation19_spill] sm:$0xff] }
 0xade   : > { %19679 = vmatprep.mubr.msk.f32.mxu1 %vm406_vm3, %v25984_v32  ;;  %v14488_v32 = vld [vmem:[#allocation3 + $0x19a] sm:$0xff] }
 0xae1   : > { %19680 = vmatmul.mubr.msk.f32.gmra.mrb[50].mxu1 %vm406_vm3, %v25985_v0  ;;  %v26041_v0 = vld [vmem:[#allocation33_spill] sm:$0xff] }
 0xae2   : > { %19682 = vmatprep.mubr.msk.f32.mxu1 %vm406_vm3, %v25986_v19  ;;  %v14489_v19 = vld [vmem:[#allocation3 + $0x1a2] sm:$0xff] }
 0xae5   : > { %19683 = vmatmul.mubr.msk.f32.gmra.mrb[52].mxu1 %vm406_vm3, %v25987_v1 }
 0xae6   : > { %19685 = vmatprep.mubr.msk.f32.mxu1 %vm406_vm3, %v25988_v28 }
 0xae9   : > { %19686 = vmatmul.mubr.msk.f32.gmra.mrb[54].mxu1 %vm406_vm3, %v25989_v56  ;;  %v25273_v56 = vld [vmem:[%s25389_s8] ss:$0 sm:$0xff] }
 0xaea   : > { %19688 = vmatprep.mubr.msk.f32.mxu1 %vm406_vm3, %v25990_v59 }
 0xaed   : > { %19689 = vmatmul.mubr.msk.f32.gmra.mrb[56].mxu1 %vm406_vm3, %v25991_v9 }
 0xaee   : > { %19691 = vmatprep.mubr.msk.f32.mxu1 %vm406_vm3, %v25024_v7 }
 0xaf1   : > { %19692 = vmatmul.mubr.msk.f32.gmra.mrb[58].mxu1 %vm406_vm3, %v25028_v36 }
 0xaf2   : > { %19694 = vmatprep.mubr.msk.f32.mxu1 %vm406_vm3, %v14094_v38 }
 0xaf5   : > { %19695 = vmatmul.mubr.msk.f32.gmra.mrb[60].mxu1 %vm406_vm3, %v14095_v35 }
 0xaf6   : > { %19713 = vmatprep.mubr.msk.f32.mxu1 %vm406_vm3, %v24784_v18  ;;  %v26036_v18 = vld [vmem:[#allocation39_spill] sm:$0xff] }
 0xaf9   : > { %19714 = vmatmul.mubr.msk.f32.vlgmr.msra.gmra.mrb[62].mxu1 %vm406_vm3, %v24788_v55  ;;  %v26037_v55 = vld [vmem:[#allocation41_spill] sm:$0xff] }
 0xafa   : > { %19716 = vmatprep.mubr.msk.f32.mxu1 %vm406_vm3, %v25993_v5 }
 0xafd   : > { %19717 = vmatmul.mubr.msk.f32.gmra.mrb[32].mxu1 %vm406_vm3, %v25994_v12 }
 0xafe   : > { %19719 = vmatprep.mubr.msk.f32.mxu1 %vm406_vm3, %v25995_v16 }
 0xb01   : > { %19720 = vmatmul.mubr.msk.f32.gmra.mrb[34].mxu1 %vm406_vm3, %v25996_v62 }
 0xb02   : > { %19722 = vmatprep.mubr.msk.f32.mxu1 %vm406_vm3, %v25997_v39 }
 0xb05   : > { %19723 = vmatmul.mubr.msk.f32.gmra.mrb[36].mxu1 %vm406_vm3, %v25998_v58 }
 0xb06   : > { %19725 = vmatprep.mubr.msk.f32.mxu1 %vm406_vm3, %v26020_v33 }
 0xb09   : > { %19726 = vmatmul.mubr.msk.f32.gmra.mrb[38].mxu1 %vm406_vm3, %v26021_v57 }
 0xb0a   : > { %19728 = vmatprep.mubr.msk.f32.mxu1 %vm406_vm3, %v26022_v2 }
 0xb0d   : > { %19729 = vmatmul.mubr.msk.f32.gmra.mrb[40].mxu1 %vm406_vm3, %v26023_v24 }
 0xb0e   : > { %19731 = vmatprep.mubr.msk.f32.mxu1 %vm406_vm3, %v26024_v40 }
 0xb11   : > { %19732 = vmatmul.mubr.msk.f32.gmra.mrb[42].mxu1 %vm406_vm3, %v26025_v15 }
 0xb12   : > { %19734 = vmatprep.mubr.msk.f32.mxu1 %vm406_vm3, %v26026_v8 }
 0xb15   : > { %19735 = vmatmul.mubr.msk.f32.gmra.mrb[44].mxu1 %vm406_vm3, %v26027_v49 }
 0xb16   : > { %19737 = vmatprep.mubr.msk.f32.mxu1 %vm406_vm3, %v26028_v17 }
 0xb19   : > { %19738 = vmatmul.mubr.msk.f32.gmra.mrb[46].mxu1 %vm406_vm3, %v26029_v47 }
 0xb1a   : > { %19740 = vmatprep.mubr.msk.f32.mxu1 %vm406_vm3, %v26030_v54 }
 0xb1d   : > { %19741 = vmatmul.mubr.msk.f32.gmra.mrb[48].mxu1 %vm406_vm3, %v26031_v45 }
 0xb1e   : > { %19743 = vmatprep.mubr.msk.f32.mxu1 %vm406_vm3, %v26032_v43 }
 0xb21   : > { %19744 = vmatmul.mubr.msk.f32.gmra.mrb[50].mxu1 %vm406_vm3, %v26033_v6 }
 0xb22   : > { %19746 = vmatprep.mubr.msk.f32.mxu1 %vm406_vm3, %v26034_v63 }
 0xb25   : > { %19747 = vmatmul.mubr.msk.f32.gmra.mrb[52].mxu1 %vm406_vm3, %v26035_v48 }
 0xb26   : > { %19749 = vmatprep.mubr.msk.f32.mxu1 %vm406_vm3, %v26036_v18 }
 0xb29   : > { %19750 = vmatmul.mubr.msk.f32.gmra.mrb[54].mxu1 %vm406_vm3, %v26037_v55 }
 0xb2a   : > { %19752 = vmatprep.mubr.msk.f32.mxu1 %vm406_vm3, %v26038_v29 }
 0xb2d   : > { %19753 = vmatmul.mubr.msk.f32.gmra.mrb[56].mxu1 %vm406_vm3, %v26039_v30 }
 0xb2e   : > { %19755 = vmatprep.mubr.msk.f32.mxu1 %vm406_vm3, %v26040_v27 }
 0xb31   : > { %19756 = vmatmul.mubr.msk.f32.gmra.mrb[58].mxu1 %vm406_vm3, %v26041_v0 }
 0xb32   : > { %19758 = vmatprep.mubr.msk.f32.mxu1 %vm406_vm3, %v14488_v32 }
 0xb35   : > { %19759 = vmatmul.mubr.msk.f32.gmra.mrb[60].mxu1 %vm406_vm3, %v14489_v19 }
 0xb42   : > { %v19203_v1 = vpop.f32.mrb[64].mxu0 }
 0xb43   : > { %v11509_v28 = vpop.f32.mrb[65].mxu0  ;;  %v11669_v59 = vadd.f32 %v19203_v1, %v25273_v56 }
 0xb44   : > { %v11668_v9 = vadd.f32 %v25273_v56, %v11509_v28 }
 0xbcc   : > { %v19715_v7 = vpop.f32.mrb[62].mxu1 }
 0xbcd   : > { %v20298_v36 = vadd.f32 %v19715_v7, %v11669_v59  ;;  %v14661_v5 = vpop.f32.mrb[63].mxu1 }
 0xbce   : > { %v20300_v12 = vadd.f32 %v14661_v5, %v11668_v9 }
 0xbcf   : > { %14853 = vst.msk [vmem:[%s25282_s19 + $0x8] sm:$0xff] %vm363_vm0, %v20298_v36 }
 0xbd0   : > { %14852 = vst.msk [vmem:[%s25282_s19] sm:$0xff] %vm363_vm0, %v20300_v12  ;;  %v19718_v16 = vpop.f32.mrb[32].mxu1 }
 0xbd1   : > { %v20301_v62 = vadd.f32 %v19718_v16, %v25273_v56  ;;  %v14671_v39 = vpop.f32.mrb[33].mxu1 }
 0xbd2   : > { %v20302_v58 = vadd.f32 %v25273_v56, %v14671_v39 }
 0xbd3   : > { %14855 = vst.msk [vmem:[%s25282_s19 + $0x18] sm:$0xff] %vm363_vm0, %v20301_v62 }
 0xbd4   : > { %14854 = vst.msk [vmem:[%s25282_s19 + $0x10] sm:$0xff] %vm363_vm0, %v20302_v58  ;;  %v19721_v61 = vpop.f32.mrb[34].mxu1 }
 0xbd5   : > { %v20303_v14 = vadd.f32 %v19721_v61, %v25273_v56  ;;  %v14681_v25 = vpop.f32.mrb[35].mxu1 }
 0xbd6   : > { %v20304_v23 = vadd.f32 %v25273_v56, %v14681_v25 }
 0xbd7   : > { %14857 = vst.msk [vmem:[%s25282_s19 + $0x28] sm:$0xff] %vm363_vm0, %v20303_v14 }
 0xbd8   : > { %14856 = vst.msk [vmem:[%s25282_s19 + $0x20] sm:$0xff] %vm363_vm0, %v20304_v23  ;;  %v19724_v37 = vpop.f32.mrb[36].mxu1 }
 0xbd9   : > { %v20305_v42 = vadd.f32 %v19724_v37, %v25273_v56  ;;  %v14691_v41 = vpop.f32.mrb[37].mxu1 }
 0xbda   : > { %v20306_v13 = vadd.f32 %v25273_v56, %v14691_v41 }
 0xbdb   : > { %14859 = vst.msk [vmem:[%s25282_s19 + $0x38] sm:$0xff] %vm363_vm0, %v20305_v42 }
 0xbdc   : > { %14858 = vst.msk [vmem:[%s25282_s19 + $0x30] sm:$0xff] %vm363_vm0, %v20306_v13  ;;  %v19727_v44 = vpop.f32.mrb[38].mxu1 }
 0xbdd   : > { %v20307_v3 = vadd.f32 %v19727_v44, %v25273_v56  ;;  %v14701_v60 = vpop.f32.mrb[39].mxu1 }
 0xbde   : > { %v20308_v52 = vadd.f32 %v25273_v56, %v14701_v60 }
 0xbdf   : > { %14861 = vst.msk [vmem:[%s25282_s19 + $0x48] sm:$0xff] %vm363_vm0, %v20307_v3 }
 0xbe0   : > { %14860 = vst.msk [vmem:[%s25282_s19 + $0x40] sm:$0xff] %vm363_vm0, %v20308_v52  ;;  %v19730_v53 = vpop.f32.mrb[40].mxu1 }
 0xbe1   : > { %v20309_v31 = vadd.f32 %v19730_v53, %v25273_v56  ;;  %v14711_v26 = vpop.f32.mrb[41].mxu1 }
 0xbe2   : > { %v20310_v20 = vadd.f32 %v25273_v56, %v14711_v26 }
 0xbe3   : > { %14863 = vst.msk [vmem:[%s25282_s19 + $0x58] sm:$0xff] %vm363_vm0, %v20309_v31 }
 0xbe4   : > { %14862 = vst.msk [vmem:[%s25282_s19 + $0x50] sm:$0xff] %vm363_vm0, %v20310_v20  ;;  %v19733_v4 = vpop.f32.mrb[42].mxu1 }
 0xbe5   : > { %v20311_v22 = vadd.f32 %v19733_v4, %v25273_v56  ;;  %v14721_v51 = vpop.f32.mrb[43].mxu1 }
 0xbe6   : > { %v20312_v11 = vadd.f32 %v25273_v56, %v14721_v51 }
 0xbe7   : > { %14865 = vst.msk [vmem:[%s25282_s19 + $0x68] sm:$0xff] %vm363_vm0, %v20311_v22 }
 0xbe8   : > { %14864 = vst.msk [vmem:[%s25282_s19 + $0x60] sm:$0xff] %vm363_vm0, %v20312_v11  ;;  %v19736_v46 = vpop.f32.mrb[44].mxu1 }
 0xbe9   : > { %v20313_v50 = vadd.f32 %v19736_v46, %v25273_v56  ;;  %v14731_v21 = vpop.f32.mrb[45].mxu1 }
 0xbea   : > { %v20314_v10 = vadd.f32 %v25273_v56, %v14731_v21 }
 0xbeb   : > { %14867 = vst.msk [vmem:[%s25282_s19 + $0x78] sm:$0xff] %vm363_vm0, %v20313_v50 }
 0xbec   : > { %14866 = vst.msk [vmem:[%s25282_s19 + $0x70] sm:$0xff] %vm363_vm0, %v20314_v10  ;;  %v19739_v34 = vpop.f32.mrb[46].mxu1 }
 0xbed   : > { %v20315_v38 = vadd.f32 %v19739_v34, %v25273_v56  ;;  %v14741_v35 = vpop.f32.mrb[47].mxu1 }
 0xbee   : > { %v20316_v33 = vadd.f32 %v25273_v56, %v14741_v35 }
 0xbef   : > { %14869 = vst.msk [vmem:[%s25282_s19 + $0x88] sm:$0xff] %vm363_vm0, %v20315_v38 }
 0xbf0   : > { %14868 = vst.msk [vmem:[%s25282_s19 + $0x80] sm:$0xff] %vm363_vm0, %v20316_v33  ;;  %v19742_v57 = vpop.f32.mrb[48].mxu1 }
 0xbf1   : > { %v20317_v2 = vadd.f32 %v19742_v57, %v25273_v56  ;;  %v14751_v24 = vpop.f32.mrb[49].mxu1 }
 0xbf2   : > { %v20318_v40 = vadd.f32 %v25273_v56, %v14751_v24 }
 0xbf3   : > { %14871 = vst.msk [vmem:[%s25282_s19 + $0x98] sm:$0xff] %vm363_vm0, %v20317_v2 }
 0xbf4   : > { %14870 = vst.msk [vmem:[%s25282_s19 + $0x90] sm:$0xff] %vm363_vm0, %v20318_v40  ;;  %v19745_v15 = vpop.f32.mrb[50].mxu1 }
 0xbf5   : > { %v20319_v8 = vadd.f32 %v19745_v15, %v25273_v56  ;;  %v14761_v49 = vpop.f32.mrb[51].mxu1 }
 0xbf6   : > { %v20320_v17 = vadd.f32 %v25273_v56, %v14761_v49 }
 0xbf7   : > { %14873 = vst.msk [vmem:[%s25282_s19 + $0xa8] sm:$0xff] %vm363_vm0, %v20319_v8 }
 0xbf8   : > { %14872 = vst.msk [vmem:[%s25282_s19 + $0xa0] sm:$0xff] %vm363_vm0, %v20320_v17  ;;  %v19748_v47 = vpop.f32.mrb[52].mxu1 }
 0xbf9   : > { %v20321_v54 = vadd.f32 %v19748_v47, %v25273_v56  ;;  %v14771_v45 = vpop.f32.mrb[53].mxu1 }
 0xbfa   : > { %v20322_v43 = vadd.f32 %v25273_v56, %v14771_v45 }
 0xbfb   : > { %14875 = vst.msk [vmem:[%s25282_s19 + $0xb8] sm:$0xff] %vm363_vm0, %v20321_v54 }
 0xbfc   : > { %14874 = vst.msk [vmem:[%s25282_s19 + $0xb0] sm:$0xff] %vm363_vm0, %v20322_v43  ;;  %v19751_v6 = vpop.f32.mrb[54].mxu1 }
 0xbfd   : > { %v20323_v63 = vadd.f32 %v19751_v6, %v25273_v56  ;;  %v14781_v48 = vpop.f32.mrb[55].mxu1 }
 0xbfe   : > { %v20324_v18 = vadd.f32 %v25273_v56, %v14781_v48 }
 0xbff   : > { %14877 = vst.msk [vmem:[%s25282_s19 + $0xc8] sm:$0xff] %vm363_vm0, %v20323_v63 }
 0xc00   : > { %14876 = vst.msk [vmem:[%s25282_s19 + $0xc0] sm:$0xff] %vm363_vm0, %v20324_v18  ;;  %v19754_v55 = vpop.f32.mrb[56].mxu1 }
 0xc01   : > { %v20325_v29 = vadd.f32 %v19754_v55, %v25273_v56  ;;  %v14791_v30 = vpop.f32.mrb[57].mxu1 }
 0xc02   : > { %v20326_v27 = vadd.f32 %v25273_v56, %v14791_v30 }
 0xc03   : > { %14879 = vst.msk [vmem:[%s25282_s19 + $0xd8] sm:$0xff] %vm363_vm0, %v20325_v29 }
 0xc04   : > { %14878 = vst.msk [vmem:[%s25282_s19 + $0xd0] sm:$0xff] %vm363_vm0, %v20326_v27  ;;  %v19757_v32 = vpop.f32.mrb[58].mxu1 }
 0xc05   : > { %v20327_v0 = vadd.f32 %v19757_v32, %v25273_v56  ;;  %v14801_v19 = vpop.f32.mrb[59].mxu1 }
 0xc06   : > { %v20328_v1 = vadd.f32 %v25273_v56, %v14801_v19 }
 0xc07   : > { %14881 = vst.msk [vmem:[%s25282_s19 + $0xe8] sm:$0xff] %vm363_vm0, %v20327_v0 }
 0xc08   : > { %14880 = vst.msk [vmem:[%s25282_s19 + $0xe0] sm:$0xff] %vm363_vm0, %v20328_v1  ;;  %v19760_v28 = vpop.f32.mrb[60].mxu1 }
 0xc09   : > { %v20329_v59 = vadd.f32 %v19760_v28, %v25273_v56  ;;  %v14811_v9 = vpop.f32.mrb[61].mxu1 }
 0xc0a   : > { %v20330_v7 = vadd.f32 %v25273_v56, %v14811_v9 }
 0xc0b   : > { %14883 = vst.msk [vmem:[%s25282_s19 + $0xf8] sm:$0xff] %vm363_vm0, %v20329_v59 }
 0xc0c   : > { %14882 = vst.msk [vmem:[%s25282_s19 + $0xf0] sm:$0xff] %vm363_vm0, %v20330_v7 }
 0xc0d PF: > { %s21_s30 = sadd.s32 1, %s21455_s30  }
 0xc0e   : > { %p18_p5 = scmp.ge.s32.totalorder %s21_s30, 4  }
 0xc10   :  { %20 = sbr.rel (!%p18_p5) target bundleno = 2 (0x2), region = 133 }
 0xc17   :  { %14905 = vsyncpa [#allocation5], 1 }
 0xc18   :  { %14907 = vsyncpa [#allocation5 + $0x1], 1 }
 0xc19   :  { %14908 = vsyncpa [#allocation7], 1 }

</bundles_post_ra>
